<compile_context>
chip_gen: v5e
topology: v5e:2x2
jax: 0.10.0
libtpu: 0.0.40
codegen_flags: <defaults>
</compile_context>

<pallas_src>
import math
from functools import partial

import numpy as np
import jax
import jax.numpy as jnp
from jax.experimental import pallas as pl
from jax.experimental.pallas import tpu as pltpu

# ----------------------------- configuration --------------------------------
DEFAULT_VARS = ("t2m", "u10", "v10", "z500")
VAR_MAP = {v: i for i, v in enumerate(DEFAULT_VARS)}
IMG_SIZE = (16, 16)
PATCH_SIZE = 2
EMBED_DIM = 64
NUM_HEADS = 4
DEPTH = 2            # backbone transformer blocks
DECODER_DEPTH = 2    # head: DECODER_DEPTH x (Linear+GELU) + final Linear
MLP_RATIO = 4
LS_INIT = 1.0        # dinov2 hub LayerScale init_values
LN_EPS = 1e-6        # dinov2 LayerNorm eps
ATTN_SCALE = 1.0 / math.sqrt(EMBED_DIM // NUM_HEADS)


# --------------------------- sincos embeddings -------------------------------
def get_1d_sincos_pos_embed_from_grid(embed_dim, pos):
    omega = np.arange(embed_dim // 2, dtype=np.float64)
    omega /= embed_dim / 2.0
    omega = 1.0 / 10000 ** omega
    pos = np.asarray(pos, dtype=np.float64).reshape(-1)
    out = np.einsum("m,d->md", pos, omega)
    return np.concatenate([np.sin(out), np.cos(out)], axis=1)


def get_2d_sincos_pos_embed(embed_dim, grid_size_h, grid_size_w):
    grid_h = np.arange(grid_size_h, dtype=np.float32)
    grid_w = np.arange(grid_size_w, dtype=np.float32)
    grid = np.meshgrid(grid_w, grid_h)          # w goes first (ClimaX convention)
    grid = np.stack(grid, axis=0).reshape([2, 1, grid_size_h, grid_size_w])
    emb_h = get_1d_sincos_pos_embed_from_grid(embed_dim // 2, grid[0])
    emb_w = get_1d_sincos_pos_embed_from_grid(embed_dim // 2, grid[1])
    return np.concatenate([emb_h, emb_w], axis=1)


# ----------------------------- kernel helpers --------------------------------
def _bf16(x):
    return x.astype(jnp.bfloat16)


def _dot_f32(a, b):
    # bf16 x bf16 -> f32 accumulation on the MXU.
    return jnp.dot(a, b, preferred_element_type=jnp.float32)


def _dot_t_f32(a, b):
    # a @ b.T (contract last dims of both operands), f32 accumulation.
    return jax.lax.dot_general(a, b, (((1,), (1,)), ((), ())),
                               preferred_element_type=jnp.float32)


def _erf(x):
    # Abramowitz & Stegun 7.1.26: |error| <= 1.5e-7 (f32 resolution), so this is
    # the exact-erf GELU at float32 precision while using only ops with
    # guaranteed Pallas/Mosaic lowerings (exp, mul, add, div, compare, select).
    a1, a2, a3, a4, a5 = (0.254829592, -0.284496736, 1.421413741,
                          -1.453152027, 1.061405429)
    p_ = 0.3275911
    s = jnp.where(x >= 0.0, 1.0, -1.0)
    z = jnp.abs(x)
    t = 1.0 / (1.0 + p_ * z)
    poly = t * (a1 + t * (a2 + t * (a3 + t * (a4 + t * a5))))
    return s * (1.0 - poly * jnp.exp(-z * z))


def _gelu(x):
    # exact (erf-based) GELU, matching torch.nn.GELU() default.
    return 0.5 * x * (1.0 + _erf(x * 0.7071067811865476))


def _layernorm(x, g, b, eps):
    mu = jnp.mean(x, axis=-1, keepdims=True)
    var = jnp.mean(jnp.square(x - mu), axis=-1, keepdims=True)
    return (x - mu) * jax.lax.rsqrt(var + eps) * g + b


def _full_spec(shape):
    nd = len(shape)
    return pl.BlockSpec(shape, lambda *_: (0,) * nd)


def _row_tile(m, cap=512):
    # Largest multiple-of-8 divisor of m that is <= cap and leaves >=2 grid steps
    # (so row-parallel kernels shard across v7x's two TensorCores).
    cands = [t for t in range(8, min(m // 2, cap) + 1, 8) if m % t == 0]
    return max(cands) if cands else m


# ---- kernel A: folded patch-embed + var-embed + var-aggregation + pos-embed --
def _embed_agg_kernel(xp_ref, ws_ref, bs_ref, wv_ref, bv_ref, ex_ref,
                      wo_ref, bo_ref, pos_ref, o_ref, *, nvar, nh, D):
    # One (row-tile, V*pp) slab of tokens per grid step.
    xp = _bf16(xp_ref[...])                                   # (tl, V*pp)
    # Patch-embed folded into block-diag score/value weights: two matmuls total.
    scores = _dot_f32(xp, ws_ref[...]) + bs_ref[...]          # (tl, V*nh) f32
    vals = _dot_f32(xp, wv_ref[...]) + bv_ref[...]            # (tl, V*D)  f32
    # softmax over variables, per head (f32)
    s_list = [scores[:, v * nh:(v + 1) * nh] for v in range(nvar)]
    m = s_list[0]
    for s in s_list[1:]:
        m = jnp.maximum(m, s)
    e_list = [jnp.exp(s - m) for s in s_list]
    den = e_list[0]
    for e in e_list[1:]:
        den = den + e
    inv = pl.reciprocal(den, approx=True)
    ex = ex_ref[...]                                          # (nh, D) bf16
    agg = jnp.zeros((scores.shape[0], D), jnp.float32)
    for v in range(nvar):
        w_exp = _dot_f32(_bf16(e_list[v] * inv), ex)          # per-head -> D lanes
        agg = agg + w_exp * vals[:, v * D:(v + 1) * D]
    # aggregation out-projection + positional embedding
    o_ref[...] = _dot_f32(_bf16(agg), wo_ref[...]) + bo_ref[...] + pos_ref[...]


def pallas_embed_aggregate(xp, ws_full, bs_full, wv_full, bv_full, expand,
                           wo, bo, pos, *, B, L, V, nh, D, pp):
    tl = _row_tile(L)
    nlt = L // tl
    Vpp = V * pp
    return pl.pallas_call(
        partial(_embed_agg_kernel, nvar=V, nh=nh, D=D),
        out_shape=jax.ShapeDtypeStruct((B * L, D), jnp.float32),
        grid=(B, nlt),
        in_specs=[
            pl.BlockSpec((tl, Vpp), lambda b, l: (b * nlt + l, 0)),
            _full_spec(ws_full.shape), _full_spec(bs_full.shape),
            _full_spec(wv_full.shape), _full_spec(bv_full.shape),
            _full_spec(expand.shape),
            _full_spec(wo.shape), _full_spec(bo.shape),
            pl.BlockSpec((tl, D), lambda b, l: (l, 0)),
        ],
        out_specs=pl.BlockSpec((tl, D), lambda b, l: (b * nlt + l, 0)),
        compiler_params=pltpu.CompilerParams(
            dimension_semantics=("parallel", "parallel")),
    )(xp, ws_full, bs_full, wv_full, bv_full, expand, wo, bo, pos)


# ---- kernel B: one fused transformer block (LN1+MHA+LS+res + LN2+MLP+LS+res) --
def _block_kernel(x_ref, g1_ref, b1_ref, wqkv_ref, bqkv_ref, wo_ref, bo_ref,
                  ls1_ref, g2_ref, b2_ref, w1_ref, bf1_ref, w2_ref, bf2_ref,
                  ls2_ref, o_ref, *, nh, dh, eps):
    D = nh * dh
    x = x_ref[...]                                            # (L, D) residual, f32
    # --- attention half ---
    h = _layernorm(x, g1_ref[...], b1_ref[...], eps)
    qkv = _dot_f32(_bf16(h), wqkv_ref[...]) + bqkv_ref[...]   # (L, 3D); scale folded
    qkv_b = _bf16(qkv)                                        # cast once, slice heads
    heads = []
    for hd in range(nh):
        q = qkv_b[:, hd * dh:(hd + 1) * dh]
        k = qkv_b[:, D + hd * dh:D + (hd + 1) * dh]
        v = qkv_b[:, 2 * D + hd * dh:2 * D + (hd + 1) * dh]
        s = _dot_t_f32(q, k)                                  # (L, L) f32
        s = s - jnp.max(s, axis=-1, keepdims=True)
        p = jnp.exp(s)
        p = p * pl.reciprocal(jnp.sum(p, axis=-1, keepdims=True), approx=True)
        heads.append(_dot_f32(_bf16(p), v))                   # (L, dh)
    a = jnp.concatenate(heads, axis=-1)                       # (L, D)
    attn = _dot_f32(_bf16(a), wo_ref[...]) + bo_ref[...]
    x = x + ls1_ref[...] * attn
    # --- MLP half ---
    h2 = _layernorm(x, g2_ref[...], b2_ref[...], eps)
    m = _dot_f32(_bf16(h2), w1_ref[...]) + bf1_ref[...]
    m = _gelu(m)
    m = _dot_f32(_bf16(m), w2_ref[...]) + bf2_ref[...]
    o_ref[...] = x + ls2_ref[...] * m


def pallas_block(x, blk, *, B, L, nh, dh, eps=LN_EPS):
    N, D = x.shape
    hid = blk["w_fc1"].shape[1]
    return pl.pallas_call(
        partial(_block_kernel, nh=nh, dh=dh, eps=eps),
        out_shape=jax.ShapeDtypeStruct((N, D), jnp.float32),
        grid=(B,),
        in_specs=[
            pl.BlockSpec((L, D), lambda b: (b, 0)),
            _full_spec((1, D)), _full_spec((1, D)),            # LN1
            _full_spec((D, 3 * D)), _full_spec((1, 3 * D)),    # fused QKV (bf16 w)
            _full_spec((D, D)), _full_spec((1, D)),            # out-proj
            _full_spec((1, D)),                                # LayerScale 1
            _full_spec((1, D)), _full_spec((1, D)),            # LN2
            _full_spec((D, hid)), _full_spec((1, hid)),        # fc1
            _full_spec((hid, D)), _full_spec((1, D)),          # fc2
            _full_spec((1, D)),                                # LayerScale 2
        ],
        out_specs=pl.BlockSpec((L, D), lambda b: (b, 0)),
        compiler_params=pltpu.CompilerParams(dimension_semantics=("parallel",)),
    )(x, blk["norm1_g"], blk["norm1_b"], blk["w_qkv"], blk["b_qkv"],
      blk["w_proj"], blk["b_proj"], blk["ls1"],
      blk["norm2_g"], blk["norm2_b"], blk["w_fc1"], blk["b_fc1"],
      blk["w_fc2"], blk["b_fc2"], blk["ls2"])


# -------------- kernel C: fused final LayerNorm + prediction head -------------
def _head_kernel(*refs, eps, n_layers):
    x_ref, g_ref, b_ref = refs[0], refs[1], refs[2]
    o_ref = refs[-1]
    wb = refs[3:-1]
    h = _layernorm(x_ref[...], g_ref[...], b_ref[...], eps)
    for li in range(n_layers):
        h = _dot_f32(_bf16(h), wb[2 * li][...]) + wb[2 * li + 1][...]
        if li < n_layers - 1:
            h = _gelu(h)
    o_ref[...] = h


def pallas_head(x, g, b, head_layers, *, eps=LN_EPS):
    N, D = x.shape
    out_dim = head_layers[-1][0].shape[1]
    tm = _row_tile(N)
    in_specs = [pl.BlockSpec((tm, D), lambda i: (i, 0)),
                _full_spec((1, D)), _full_spec((1, D))]
    args = [x, g, b]
    for (w, bb) in head_layers:
        in_specs += [_full_spec(w.shape), _full_spec(bb.shape)]
        args += [w, bb]
    return pl.pallas_call(
        partial(_head_kernel, eps=eps, n_layers=len(head_layers)),
        out_shape=jax.ShapeDtypeStruct((N, out_dim), jnp.float32),
        grid=(N // tm,),
        in_specs=in_specs,
        out_specs=pl.BlockSpec((tm, out_dim), lambda i: (i, 0)),
        compiler_params=pltpu.CompilerParams(dimension_semantics=("parallel",)),
    )(*args)


# ------------------------------ parameters -----------------------------------
def init_params(key):
    V, D, nh = len(DEFAULT_VARS), EMBED_DIM, NUM_HEADS
    pp = PATCH_SIZE ** 2
    hid = MLP_RATIO * D
    keys = iter(jax.random.split(key, 64))

    def nrm(shape, std=0.02):
        return jax.random.normal(next(keys), shape, jnp.float32) * std

    p = {
        # per-variable PatchEmbed conv (stride=patch) stored as (p*p, D) linear
        # (kept f32: folded with the aggregation projections in the forward wrapper)
        "patch_w": nrm((V, pp, D)),
        "patch_b": jnp.zeros((V, D), jnp.float32),
        # deterministic sincos embeddings (as in initialize_weights)
        "var_embed": jnp.asarray(
            get_1d_sincos_pos_embed_from_grid(D, np.arange(V)), jnp.float32),
        "pos_embed": jnp.asarray(
            get_2d_sincos_pos_embed(D, IMG_SIZE[0] // PATCH_SIZE,
                                    IMG_SIZE[1] // PATCH_SIZE), jnp.float32),
        "var_query": jnp.zeros((1, 1, D), jnp.float32),  # stays zero in the module
        # var_agg nn.MultiheadAttention (weights stored as (in, out), f32 for folding)
        "agg_wq": nrm((D, D)), "agg_bq": jnp.zeros((D,), jnp.float32),
        "agg_wk": nrm((D, D)), "agg_bk": jnp.zeros((D,), jnp.float32),
        "agg_wv": nrm((D, D)), "agg_bv": jnp.zeros((D,), jnp.float32),
        "agg_wo": nrm((D, D)), "agg_bo": jnp.zeros((D,), jnp.float32),
        "norm_g": jnp.ones((1, D), jnp.float32),
        "norm_b": jnp.zeros((1, D), jnp.float32),
    }

    blocks = []
    # fold the 1/sqrt(dh) attention scale into the q-columns of the fused QKV
    scale_vec = jnp.concatenate(
        [jnp.full((D,), ATTN_SCALE, jnp.float32), jnp.ones((2 * D,), jnp.float32)])
    for _ in range(DEPTH):
        w_qkv = nrm((D, 3 * D))
        b_qkv = jnp.zeros((3 * D,), jnp.float32)
        blocks.append(dict(
            norm1_g=jnp.ones((1, D), jnp.float32),
            norm1_b=jnp.zeros((1, D), jnp.float32),
            w_qkv=_bf16(w_qkv * scale_vec[None, :]),          # bf16 weights in HBM
            b_qkv=(b_qkv * scale_vec).reshape(1, 3 * D),
            w_proj=_bf16(nrm((D, D))),
            b_proj=jnp.zeros((1, D), jnp.float32),
            ls1=jnp.full((1, D), LS_INIT, jnp.float32),
            norm2_g=jnp.ones((1, D), jnp.float32),
            norm2_b=jnp.zeros((1, D), jnp.float32),
            w_fc1=_bf16(nrm((D, hid))), b_fc1=jnp.zeros((1, hid), jnp.float32),
            w_fc2=_bf16(nrm((hid, D))), b_fc2=jnp.zeros((1, D), jnp.float32),
            ls2=jnp.full((1, D), LS_INIT, jnp.float32),
        ))
    p["blocks"] = blocks

    head = []
    for _ in range(DECODER_DEPTH):
        head.append((_bf16(nrm((D, D))), jnp.zeros((1, D), jnp.float32)))
    head.append((_bf16(nrm((D, V * pp))), jnp.zeros((1, V * pp), jnp.float32)))
    p["head"] = head
    return p


# ------------------------------ forward pass ----------------------------------
def new_climax_forward(params, x, variables):
    B, Vn, H, W = x.shape
    p_, D, nh = PATCH_SIZE, EMBED_DIM, NUM_HEADS
    dh = D // nh
    hh, ww = H // p_, W // p_
    L = hh * ww
    N = B * L
    pp = p_ * p_
    var_ids = np.array([VAR_MAP[v] for v in variables])

    # ---- patchify once in JAX (pure layout): (B,V,H,W) -> (N, V*p*p) token-major,
    #      lane-width V*pp instead of pp ----
    xp = (x.reshape(B, Vn, hh, p_, ww, p_)
            .transpose(0, 2, 4, 1, 3, 5)
            .reshape(N, Vn * pp))

    # ---- host-side algebraic folding of the encoder front-end ----
    pw = params["patch_w"][var_ids]                                   # (V, pp, D)
    pvb = params["patch_b"][var_ids] + params["var_embed"][var_ids]   # (V, D)
    # aggregation query (length 1) per head, with 1/sqrt(dh) folded in
    q = params["var_query"].reshape(1, D) @ params["agg_wq"] + params["agg_bq"]
    qh = q.reshape(nh, dh) * ATTN_SCALE
    qmat = (qh[:, :, None] * jnp.eye(nh, dtype=jnp.float32)[:, None, :]).reshape(D, nh)
    # fold patch embed into the aggregation score / value projections
    ws = jnp.einsum("vpd,de->vpe", pw, params["agg_wk"]) @ qmat       # (V, pp, nh)
    bs = (pvb @ params["agg_wk"] + params["agg_bk"]) @ qmat           # (V, nh)
    wv = jnp.einsum("vpd,de->vpe", pw, params["agg_wv"])              # (V, pp, D)
    bv = pvb @ params["agg_wv"] + params["agg_bv"]                    # (V, D)
    ws_full = _bf16(jax.scipy.linalg.block_diag(*[ws[v] for v in range(Vn)]))
    wv_full = _bf16(jax.scipy.linalg.block_diag(*[wv[v] for v in range(Vn)]))
    bs_full = bs.reshape(1, Vn * nh)
    bv_full = bv.reshape(1, Vn * D)
    expand = _bf16(jnp.repeat(jnp.eye(nh, dtype=jnp.float32), dh, axis=1))  # (nh, D)
    wo_agg = _bf16(params["agg_wo"])
    bo_agg = params["agg_bo"].reshape(1, D)

    # ---- fused: folded patch-embed + var-embed + variable aggregation + pos ----
    x_tok = pallas_embed_aggregate(
        xp, ws_full, bs_full, wv_full, bv_full, expand, wo_agg, bo_agg,
        params["pos_embed"], B=B, L=L, V=Vn, nh=nh, D=D, pp=pp)       # (N, D)

    # ---- backbone blocks (dinov2-style pre-LN + LayerScale): 1 kernel each ----
    for blk in params["blocks"]:
        x_tok = pallas_block(x_tok, blk, B=B, L=L, nh=nh, dh=dh)

    # ---- fused final norm + prediction head ----
    pred = pallas_head(x_tok, params["norm_g"], params["norm_b"], params["head"])

    # ---- unpatchify: (B, L, V*p^2) -> (B, V, H, W)  (einsum 'nhwpqc->nchpwq') ----
    pred = pred.reshape(B, hh, ww, p_, p_, Vn)
    pred = pred.transpose(0, 5, 1, 3, 2, 4).reshape(B, Vn, H, W)

    # ---- select output variables ----
    pred = pred[:, var_ids]
    return pred


# ---------------------------------- main --------------------------------------
if __name__ == "__main__":
    key = jax.random.PRNGKey(0)
    pkey, xkey = jax.random.split(key)
    params = init_params(pkey)

    B = 2
    x = jax.random.normal(
        xkey, (B, len(DEFAULT_VARS), IMG_SIZE[0], IMG_SIZE[1]), jnp.float32)
    variables = tuple(DEFAULT_VARS)

    fwd = jax.jit(lambda prm, inp: new_climax_forward(prm, inp, variables))
    out = fwd(params, x)
    jax.block_until_ready(out)

    assert out.shape == (B, len(DEFAULT_VARS), IMG_SIZE[0], IMG_SIZE[1]), out.shape
    assert bool(jnp.all(jnp.isfinite(out)))
    print("KERNEL_OK")
</pallas_src>

<mosaic_0001>
module attributes {stable_mosaic.version = 11 : i64} {
  func.func @_head_kernel(%arg0: i32, %arg1: memref<64x64xf32, #tpu.memory_space<vmem>>, %arg2: memref<1x64xf32, #tpu.memory_space<vmem>>, %arg3: memref<1x64xf32, #tpu.memory_space<vmem>>, %arg4: memref<64x64xbf16, #tpu.memory_space<vmem>>, %arg5: memref<1x64xf32, #tpu.memory_space<vmem>>, %arg6: memref<64x64xbf16, #tpu.memory_space<vmem>>, %arg7: memref<1x64xf32, #tpu.memory_space<vmem>>, %arg8: memref<64x16xbf16, #tpu.memory_space<vmem>>, %arg9: memref<1x16xf32, #tpu.memory_space<vmem>>, %arg10: memref<64x16xf32, #tpu.memory_space<vmem>>) attributes {dimension_semantics = [#tpu.dimension_semantics<parallel>], iteration_bounds = array<i64: 2>, scalar_prefetch = 0 : i64, scratch_operands = 0 : i64, tpu.core_type = #tpu.core_type<tc>, window_params = [{transform_indices = @transform_0, window_bounds = array<i64: 64, 64>}, {pipeline_mode = #tpu.pipeline_mode<synchronous>, transform_indices = @transform_1, window_bounds = array<i64: 1, 64>}, {pipeline_mode = #tpu.pipeline_mode<synchronous>, transform_indices = @transform_2, window_bounds = array<i64: 1, 64>}, {pipeline_mode = #tpu.pipeline_mode<synchronous>, transform_indices = @transform_3, window_bounds = array<i64: 64, 64>}, {pipeline_mode = #tpu.pipeline_mode<synchronous>, transform_indices = @transform_4, window_bounds = array<i64: 1, 64>}, {pipeline_mode = #tpu.pipeline_mode<synchronous>, transform_indices = @transform_5, window_bounds = array<i64: 64, 64>}, {pipeline_mode = #tpu.pipeline_mode<synchronous>, transform_indices = @transform_6, window_bounds = array<i64: 1, 64>}, {pipeline_mode = #tpu.pipeline_mode<synchronous>, transform_indices = @transform_7, window_bounds = array<i64: 64, 16>}, {pipeline_mode = #tpu.pipeline_mode<synchronous>, transform_indices = @transform_8, window_bounds = array<i64: 1, 16>}, {transform_indices = @transform_9, window_bounds = array<i64: 64, 16>}]} {
    %c0 = arith.constant 0 : index
    %c0_0 = arith.constant 0 : index
    %0 = vector.load %arg1[%c0, %c0_0] : memref<64x64xf32, #tpu.memory_space<vmem>>, vector<64x64xf32>
    %c0_1 = arith.constant 0 : index
    %c0_2 = arith.constant 0 : index
    %1 = vector.load %arg2[%c0_1, %c0_2] : memref<1x64xf32, #tpu.memory_space<vmem>>, vector<1x64xf32>
    %c0_3 = arith.constant 0 : index
    %c0_4 = arith.constant 0 : index
    %2 = vector.load %arg3[%c0_3, %c0_4] : memref<1x64xf32, #tpu.memory_space<vmem>>, vector<1x64xf32>
    %cst = arith.constant dense<0.000000e+00> : vector<64xf32>
    %3 = vector.multi_reduction <add>, %0, %cst [1] : vector<64x64xf32> to vector<64xf32>
    %4 = vector.shape_cast %3 : vector<64xf32> to vector<64x1xf32>
    %cst_5 = arith.constant 6.400000e+01 : f32
    %5 = vector.broadcast %cst_5 : f32 to vector<64x1xf32>
    %6 = arith.divf %4, %5 : vector<64x1xf32>
    %7 = vector.broadcast %6 : vector<64x1xf32> to vector<64x64xf32>
    %8 = arith.subf %0, %7 : vector<64x64xf32>
    %9 = arith.mulf %8, %8 : vector<64x64xf32>
    %cst_6 = arith.constant dense<0.000000e+00> : vector<64xf32>
    %10 = vector.multi_reduction <add>, %9, %cst_6 [1] : vector<64x64xf32> to vector<64xf32>
    %11 = vector.shape_cast %10 : vector<64xf32> to vector<64x1xf32>
    %cst_7 = arith.constant 6.400000e+01 : f32
    %12 = vector.broadcast %cst_7 : f32 to vector<64x1xf32>
    %13 = arith.divf %11, %12 : vector<64x1xf32>
    %14 = vector.broadcast %6 : vector<64x1xf32> to vector<64x64xf32>
    %15 = arith.subf %0, %14 : vector<64x64xf32>
    %cst_8 = arith.constant 9.99999997E-7 : f32
    %16 = vector.broadcast %cst_8 : f32 to vector<64x1xf32>
    %17 = arith.addf %13, %16 : vector<64x1xf32>
    %18 = math.rsqrt %17 : vector<64x1xf32>
    %19 = vector.broadcast %18 : vector<64x1xf32> to vector<64x64xf32>
    %20 = arith.mulf %15, %19 : vector<64x64xf32>
    %21 = vector.broadcast %1 : vector<1x64xf32> to vector<64x64xf32>
    %22 = arith.mulf %20, %21 : vector<64x64xf32>
    %23 = vector.broadcast %2 : vector<1x64xf32> to vector<64x64xf32>
    %24 = arith.addf %22, %23 : vector<64x64xf32>
    %25 = arith.truncf %24 : vector<64x64xf32> to vector<64x64xbf16>
    %c0_9 = arith.constant 0 : index
    %c0_10 = arith.constant 0 : index
    %26 = vector.load %arg4[%c0_9, %c0_10] : memref<64x64xbf16, #tpu.memory_space<vmem>>, vector<64x64xbf16>
    %cst_11 = arith.constant dense<0.000000e+00> : vector<64x64xf32>
    %27 = tpu.matmul %25, %26, %cst_11 {dimension_numbers = #tpu.dot_dimension_numbers<[1], [0], [0], [1], [0, 0, 1, 1], [], []>} : vector<64x64xbf16>, vector<64x64xbf16>, vector<64x64xf32> -> vector<64x64xf32>
    %c0_12 = arith.constant 0 : index
    %c0_13 = arith.constant 0 : index
    %28 = vector.load %arg5[%c0_12, %c0_13] : memref<1x64xf32, #tpu.memory_space<vmem>>, vector<1x64xf32>
    %29 = vector.broadcast %28 : vector<1x64xf32> to vector<64x64xf32>
    %30 = arith.addf %27, %29 : vector<64x64xf32>
    %cst_14 = arith.constant 5.000000e-01 : f32
    %31 = vector.broadcast %cst_14 : f32 to vector<64x64xf32>
    %32 = arith.mulf %31, %30 : vector<64x64xf32>
    %cst_15 = arith.constant 0.707106769 : f32
    %33 = vector.broadcast %cst_15 : f32 to vector<64x64xf32>
    %34 = arith.mulf %30, %33 : vector<64x64xf32>
    %cst_16 = arith.constant 0.000000e+00 : f32
    %35 = vector.broadcast %cst_16 : f32 to vector<64x64xf32>
    %36 = arith.cmpf oge, %34, %35 : vector<64x64xf32>
    %cst_17 = arith.constant 1.000000e+00 : f32
    %cst_18 = arith.constant -1.000000e+00 : f32
    %37 = vector.broadcast %cst_17 : f32 to vector<64x64xf32>
    %38 = vector.broadcast %cst_18 : f32 to vector<64x64xf32>
    %39 = arith.select %36, %37, %38 : vector<64x64xi1>, vector<64x64xf32>
    %40 = math.absf %34 : vector<64x64xf32>
    %cst_19 = arith.constant 0.327591091 : f32
    %41 = vector.broadcast %cst_19 : f32 to vector<64x64xf32>
    %42 = arith.mulf %41, %40 : vector<64x64xf32>
    %cst_20 = arith.constant 1.000000e+00 : f32
    %43 = vector.broadcast %cst_20 : f32 to vector<64x64xf32>
    %44 = arith.addf %43, %42 : vector<64x64xf32>
    %cst_21 = arith.constant 1.000000e+00 : f32
    %45 = vector.broadcast %cst_21 : f32 to vector<64x64xf32>
    %46 = arith.divf %45, %44 : vector<64x64xf32>
    %cst_22 = arith.constant 1.06140542 : f32
    %47 = vector.broadcast %cst_22 : f32 to vector<64x64xf32>
    %48 = arith.mulf %46, %47 : vector<64x64xf32>
    %cst_23 = arith.constant -1.45315206 : f32
    %49 = vector.broadcast %cst_23 : f32 to vector<64x64xf32>
    %50 = arith.addf %49, %48 : vector<64x64xf32>
    %51 = arith.mulf %46, %50 : vector<64x64xf32>
    %cst_24 = arith.constant 1.42141378 : f32
    %52 = vector.broadcast %cst_24 : f32 to vector<64x64xf32>
    %53 = arith.addf %52, %51 : vector<64x64xf32>
    %54 = arith.mulf %46, %53 : vector<64x64xf32>
    %cst_25 = arith.constant -0.284496725 : f32
    %55 = vector.broadcast %cst_25 : f32 to vector<64x64xf32>
    %56 = arith.addf %55, %54 : vector<64x64xf32>
    %57 = arith.mulf %46, %56 : vector<64x64xf32>
    %cst_26 = arith.constant 0.254829586 : f32
    %58 = vector.broadcast %cst_26 : f32 to vector<64x64xf32>
    %59 = arith.addf %58, %57 : vector<64x64xf32>
    %60 = arith.mulf %46, %59 : vector<64x64xf32>
    %cst_27 = arith.constant 0.000000e+00 : f32
    %61 = vector.broadcast %cst_27 : f32 to vector<64x64xf32>
    %62 = arith.subf %61, %40 : vector<64x64xf32>
    %63 = arith.mulf %62, %40 : vector<64x64xf32>
    %64 = math.exp %63 : vector<64x64xf32>
    %65 = arith.mulf %60, %64 : vector<64x64xf32>
    %cst_28 = arith.constant 1.000000e+00 : f32
    %66 = vector.broadcast %cst_28 : f32 to vector<64x64xf32>
    %67 = arith.subf %66, %65 : vector<64x64xf32>
    %68 = arith.mulf %39, %67 : vector<64x64xf32>
    %cst_29 = arith.constant 1.000000e+00 : f32
    %69 = vector.broadcast %cst_29 : f32 to vector<64x64xf32>
    %70 = arith.addf %69, %68 : vector<64x64xf32>
    %71 = arith.mulf %32, %70 : vector<64x64xf32>
    %72 = arith.truncf %71 : vector<64x64xf32> to vector<64x64xbf16>
    %c0_30 = arith.constant 0 : index
    %c0_31 = arith.constant 0 : index
    %73 = vector.load %arg6[%c0_30, %c0_31] : memref<64x64xbf16, #tpu.memory_space<vmem>>, vector<64x64xbf16>
    %cst_32 = arith.constant dense<0.000000e+00> : vector<64x64xf32>
    %74 = tpu.matmul %72, %73, %cst_32 {dimension_numbers = #tpu.dot_dimension_numbers<[1], [0], [0], [1], [0, 0, 1, 1], [], []>} : vector<64x64xbf16>, vector<64x64xbf16>, vector<64x64xf32> -> vector<64x64xf32>
    %c0_33 = arith.constant 0 : index
    %c0_34 = arith.constant 0 : index
    %75 = vector.load %arg7[%c0_33, %c0_34] : memref<1x64xf32, #tpu.memory_space<vmem>>, vector<1x64xf32>
    %76 = vector.broadcast %75 : vector<1x64xf32> to vector<64x64xf32>
    %77 = arith.addf %74, %76 : vector<64x64xf32>
    %cst_35 = arith.constant 5.000000e-01 : f32
    %78 = vector.broadcast %cst_35 : f32 to vector<64x64xf32>
    %79 = arith.mulf %78, %77 : vector<64x64xf32>
    %cst_36 = arith.constant 0.707106769 : f32
    %80 = vector.broadcast %cst_36 : f32 to vector<64x64xf32>
    %81 = arith.mulf %77, %80 : vector<64x64xf32>
    %cst_37 = arith.constant 0.000000e+00 : f32
    %82 = vector.broadcast %cst_37 : f32 to vector<64x64xf32>
    %83 = arith.cmpf oge, %81, %82 : vector<64x64xf32>
    %cst_38 = arith.constant 1.000000e+00 : f32
    %cst_39 = arith.constant -1.000000e+00 : f32
    %84 = vector.broadcast %cst_38 : f32 to vector<64x64xf32>
    %85 = vector.broadcast %cst_39 : f32 to vector<64x64xf32>
    %86 = arith.select %83, %84, %85 : vector<64x64xi1>, vector<64x64xf32>
    %87 = math.absf %81 : vector<64x64xf32>
    %cst_40 = arith.constant 0.327591091 : f32
    %88 = vector.broadcast %cst_40 : f32 to vector<64x64xf32>
    %89 = arith.mulf %88, %87 : vector<64x64xf32>
    %cst_41 = arith.constant 1.000000e+00 : f32
    %90 = vector.broadcast %cst_41 : f32 to vector<64x64xf32>
    %91 = arith.addf %90, %89 : vector<64x64xf32>
    %cst_42 = arith.constant 1.000000e+00 : f32
    %92 = vector.broadcast %cst_42 : f32 to vector<64x64xf32>
    %93 = arith.divf %92, %91 : vector<64x64xf32>
    %cst_43 = arith.constant 1.06140542 : f32
    %94 = vector.broadcast %cst_43 : f32 to vector<64x64xf32>
    %95 = arith.mulf %93, %94 : vector<64x64xf32>
    %cst_44 = arith.constant -1.45315206 : f32
    %96 = vector.broadcast %cst_44 : f32 to vector<64x64xf32>
    %97 = arith.addf %96, %95 : vector<64x64xf32>
    %98 = arith.mulf %93, %97 : vector<64x64xf32>
    %cst_45 = arith.constant 1.42141378 : f32
    %99 = vector.broadcast %cst_45 : f32 to vector<64x64xf32>
    %100 = arith.addf %99, %98 : vector<64x64xf32>
    %101 = arith.mulf %93, %100 : vector<64x64xf32>
    %cst_46 = arith.constant -0.284496725 : f32
    %102 = vector.broadcast %cst_46 : f32 to vector<64x64xf32>
    %103 = arith.addf %102, %101 : vector<64x64xf32>
    %104 = arith.mulf %93, %103 : vector<64x64xf32>
    %cst_47 = arith.constant 0.254829586 : f32
    %105 = vector.broadcast %cst_47 : f32 to vector<64x64xf32>
    %106 = arith.addf %105, %104 : vector<64x64xf32>
    %107 = arith.mulf %93, %106 : vector<64x64xf32>
    %cst_48 = arith.constant 0.000000e+00 : f32
    %108 = vector.broadcast %cst_48 : f32 to vector<64x64xf32>
    %109 = arith.subf %108, %87 : vector<64x64xf32>
    %110 = arith.mulf %109, %87 : vector<64x64xf32>
    %111 = math.exp %110 : vector<64x64xf32>
    %112 = arith.mulf %107, %111 : vector<64x64xf32>
    %cst_49 = arith.constant 1.000000e+00 : f32
    %113 = vector.broadcast %cst_49 : f32 to vector<64x64xf32>
    %114 = arith.subf %113, %112 : vector<64x64xf32>
    %115 = arith.mulf %86, %114 : vector<64x64xf32>
    %cst_50 = arith.constant 1.000000e+00 : f32
    %116 = vector.broadcast %cst_50 : f32 to vector<64x64xf32>
    %117 = arith.addf %116, %115 : vector<64x64xf32>
    %118 = arith.mulf %79, %117 : vector<64x64xf32>
    %119 = arith.truncf %118 : vector<64x64xf32> to vector<64x64xbf16>
    %c0_51 = arith.constant 0 : index
    %c0_52 = arith.constant 0 : index
    %120 = vector.load %arg8[%c0_51, %c0_52] : memref<64x16xbf16, #tpu.memory_space<vmem>>, vector<64x16xbf16>
    %cst_53 = arith.constant dense<0.000000e+00> : vector<64x16xf32>
    %121 = tpu.matmul %119, %120, %cst_53 {dimension_numbers = #tpu.dot_dimension_numbers<[1], [0], [0], [1], [0, 0, 1, 1], [], []>} : vector<64x64xbf16>, vector<64x16xbf16>, vector<64x16xf32> -> vector<64x16xf32>
    %c0_54 = arith.constant 0 : index
    %c0_55 = arith.constant 0 : index
    %122 = vector.load %arg9[%c0_54, %c0_55] : memref<1x16xf32, #tpu.memory_space<vmem>>, vector<1x16xf32>
    %123 = vector.broadcast %122 : vector<1x16xf32> to vector<64x16xf32>
    %124 = arith.addf %121, %123 : vector<64x16xf32>
    %c0_56 = arith.constant 0 : index
    %c0_57 = arith.constant 0 : index
    %125 = vector.load %arg10[%c0_56, %c0_57] : memref<64x16xf32, #tpu.memory_space<vmem>>, vector<64x16xf32>
    tpu.vector_store %arg10[%c0_56, %c0_57], %124 {strides = array<i32>} : memref<64x16xf32, #tpu.memory_space<vmem>>, vector<64x16xf32>,
    return
  }
  func.func @transform_0(%arg0: i32) -> (i32, i32) {
    %c0_i32 = arith.constant 0 : i32
    %c0_i32_0 = arith.constant 0 : i32
    return %arg0, %c0_i32 : i32, i32
  }
  func.func @transform_1(%arg0: i32) -> (i32, i32) {
    %c0_i32 = arith.constant 0 : i32
    %c0_i32_0 = arith.constant 0 : i32
    %c0_i32_1 = arith.constant 0 : i32
    return %c0_i32, %c0_i32_0 : i32, i32
  }
  func.func @transform_2(%arg0: i32) -> (i32, i32) {
    %c0_i32 = arith.constant 0 : i32
    %c0_i32_0 = arith.constant 0 : i32
    %c0_i32_1 = arith.constant 0 : i32
    return %c0_i32, %c0_i32_0 : i32, i32
  }
  func.func @transform_3(%arg0: i32) -> (i32, i32) {
    %c0_i32 = arith.constant 0 : i32
    %c0_i32_0 = arith.constant 0 : i32
    %c0_i32_1 = arith.constant 0 : i32
    return %c0_i32, %c0_i32_0 : i32, i32
  }
  func.func @transform_4(%arg0: i32) -> (i32, i32) {
    %c0_i32 = arith.constant 0 : i32
    %c0_i32_0 = arith.constant 0 : i32
    %c0_i32_1 = arith.constant 0 : i32
    return %c0_i32, %c0_i32_0 : i32, i32
  }
  func.func @transform_5(%arg0: i32) -> (i32, i32) {
    %c0_i32 = arith.constant 0 : i32
    %c0_i32_0 = arith.constant 0 : i32
    %c0_i32_1 = arith.constant 0 : i32
    return %c0_i32, %c0_i32_0 : i32, i32
  }
  func.func @transform_6(%arg0: i32) -> (i32, i32) {
    %c0_i32 = arith.constant 0 : i32
    %c0_i32_0 = arith.constant 0 : i32
    %c0_i32_1 = arith.constant 0 : i32
    return %c0_i32, %c0_i32_0 : i32, i32
  }
  func.func @transform_7(%arg0: i32) -> (i32, i32) {
    %c0_i32 = arith.constant 0 : i32
    %c0_i32_0 = arith.constant 0 : i32
    %c0_i32_1 = arith.constant 0 : i32
    return %c0_i32, %c0_i32_0 : i32, i32
  }
  func.func @transform_8(%arg0: i32) -> (i32, i32) {
    %c0_i32 = arith.constant 0 : i32
    %c0_i32_0 = arith.constant 0 : i32
    %c0_i32_1 = arith.constant 0 : i32
    return %c0_i32, %c0_i32_0 : i32, i32
  }
  func.func @transform_9(%arg0: i32) -> (i32, i32) {
    %c0_i32 = arith.constant 0 : i32
    %c0_i32_0 = arith.constant 0 : i32
    return %arg0, %c0_i32 : i32, i32
  }
}

module attributes {stable_mosaic.version = 11 : i64} {
  func.func @_embed_agg_kernel(%arg0: i32, %arg1: i32, %arg2: memref<32x16xf32, #tpu.memory_space<vmem>>, %arg3: memref<16x16xbf16, #tpu.memory_space<vmem>>, %arg4: memref<1x16xf32, #tpu.memory_space<vmem>>, %arg5: memref<16x256xbf16, #tpu.memory_space<vmem>>, %arg6: memref<1x256xf32, #tpu.memory_space<vmem>>, %arg7: memref<4x64xbf16, #tpu.memory_space<vmem>>, %arg8: memref<64x64xbf16, #tpu.memory_space<vmem>>, %arg9: memref<1x64xf32, #tpu.memory_space<vmem>>, %arg10: memref<32x64xf32, #tpu.memory_space<vmem>>, %arg11: memref<32x64xf32, #tpu.memory_space<vmem>>) attributes {dimension_semantics = [#tpu.dimension_semantics<parallel>, #tpu.dimension_semantics<parallel>], iteration_bounds = array<i64: 2, 2>, scalar_prefetch = 0 : i64, scratch_operands = 0 : i64, tpu.core_type = #tpu.core_type<tc>, window_params = [{transform_indices = @transform_0, window_bounds = array<i64: 32, 16>}, {pipeline_mode = #tpu.pipeline_mode<synchronous>, transform_indices = @transform_1, window_bounds = array<i64: 16, 16>}, {pipeline_mode = #tpu.pipeline_mode<synchronous>, transform_indices = @transform_2, window_bounds = array<i64: 1, 16>}, {pipeline_mode = #tpu.pipeline_mode<synchronous>, transform_indices = @transform_3, window_bounds = array<i64: 16, 256>}, {pipeline_mode = #tpu.pipeline_mode<synchronous>, transform_indices = @transform_4, window_bounds = array<i64: 1, 256>}, {pipeline_mode = #tpu.pipeline_mode<synchronous>, transform_indices = @transform_5, window_bounds = array<i64: 4, 64>}, {pipeline_mode = #tpu.pipeline_mode<synchronous>, transform_indices = @transform_6, window_bounds = array<i64: 64, 64>}, {pipeline_mode = #tpu.pipeline_mode<synchronous>, transform_indices = @transform_7, window_bounds = array<i64: 1, 64>}, {transform_indices = @transform_8, window_bounds = array<i64: 32, 64>}, {transform_indices = @transform_9, window_bounds = array<i64: 32, 64>}]} {
    %c0 = arith.constant 0 : index
    %c0_0 = arith.constant 0 : index
    %0 = vector.load %arg2[%c0, %c0_0] : memref<32x16xf32, #tpu.memory_space<vmem>>, vector<32x16xf32>
    %1 = arith.truncf %0 : vector<32x16xf32> to vector<32x16xbf16>
    %c0_1 = arith.constant 0 : index
    %c0_2 = arith.constant 0 : index
    %2 = vector.load %arg3[%c0_1, %c0_2] : memref<16x16xbf16, #tpu.memory_space<vmem>>, vector<16x16xbf16>
    %cst = arith.constant dense<0.000000e+00> : vector<32x16xf32>
    %3 = tpu.matmul %1, %2, %cst {dimension_numbers = #tpu.dot_dimension_numbers<[1], [0], [0], [1], [0, 0, 1, 1], [], []>} : vector<32x16xbf16>, vector<16x16xbf16>, vector<32x16xf32> -> vector<32x16xf32>
    %c0_3 = arith.constant 0 : index
    %c0_4 = arith.constant 0 : index
    %4 = vector.load %arg4[%c0_3, %c0_4] : memref<1x16xf32, #tpu.memory_space<vmem>>, vector<1x16xf32>
    %5 = vector.broadcast %4 : vector<1x16xf32> to vector<32x16xf32>
    %6 = arith.addf %3, %5 : vector<32x16xf32>
    %c0_5 = arith.constant 0 : index
    %c0_6 = arith.constant 0 : index
    %7 = vector.load %arg5[%c0_5, %c0_6] : memref<16x256xbf16, #tpu.memory_space<vmem>>, vector<16x256xbf16>
    %cst_7 = arith.constant dense<0.000000e+00> : vector<32x256xf32>
    %8 = tpu.matmul %1, %7, %cst_7 {dimension_numbers = #tpu.dot_dimension_numbers<[1], [0], [0], [1], [0, 0, 1, 1], [], []>} : vector<32x16xbf16>, vector<16x256xbf16>, vector<32x256xf32> -> vector<32x256xf32>
    %c0_8 = arith.constant 0 : index
    %c0_9 = arith.constant 0 : index
    %9 = vector.load %arg6[%c0_8, %c0_9] : memref<1x256xf32, #tpu.memory_space<vmem>>, vector<1x256xf32>
    %10 = vector.broadcast %9 : vector<1x256xf32> to vector<32x256xf32>
    %11 = arith.addf %8, %10 : vector<32x256xf32>
    %12 = vector.extract_strided_slice %6 {offsets = [0, 0], sizes = [32, 4], strides = [1, 1]} : vector<32x16xf32> to vector<32x4xf32>
    %13 = vector.extract_strided_slice %6 {offsets = [0, 4], sizes = [32, 4], strides = [1, 1]} : vector<32x16xf32> to vector<32x4xf32>
    %14 = vector.extract_strided_slice %6 {offsets = [0, 8], sizes = [32, 4], strides = [1, 1]} : vector<32x16xf32> to vector<32x4xf32>
    %15 = vector.extract_strided_slice %6 {offsets = [0, 12], sizes = [32, 4], strides = [1, 1]} : vector<32x16xf32> to vector<32x4xf32>
    %16 = arith.maximumf %12, %13 : vector<32x4xf32>
    %17 = arith.maximumf %16, %14 : vector<32x4xf32>
    %18 = arith.maximumf %17, %15 : vector<32x4xf32>
    %19 = arith.subf %12, %18 : vector<32x4xf32>
    %20 = math.exp %19 : vector<32x4xf32>
    %21 = arith.subf %13, %18 : vector<32x4xf32>
    %22 = math.exp %21 : vector<32x4xf32>
    %23 = arith.subf %14, %18 : vector<32x4xf32>
    %24 = math.exp %23 : vector<32x4xf32>
    %25 = arith.subf %15, %18 : vector<32x4xf32>
    %26 = math.exp %25 : vector<32x4xf32>
    %27 = arith.addf %20, %22 : vector<32x4xf32>
    %28 = arith.addf %27, %24 : vector<32x4xf32>
    %29 = arith.addf %28, %26 : vector<32x4xf32>
    %30 = tpu.reciprocal %29 {approx = true} : vector<32x4xf32> -> vector<32x4xf32>
    %c0_10 = arith.constant 0 : index
    %c0_11 = arith.constant 0 : index
    %31 = vector.load %arg7[%c0_10, %c0_11] : memref<4x64xbf16, #tpu.memory_space<vmem>>, vector<4x64xbf16>
    %cst_12 = arith.constant 0.000000e+00 : f32
    %32 = vector.broadcast %cst_12 : f32 to vector<32x64xf32>
    %33 = arith.mulf %20, %30 : vector<32x4xf32>
    %34 = arith.truncf %33 : vector<32x4xf32> to vector<32x4xbf16>
    %cst_13 = arith.constant dense<0.000000e+00> : vector<32x64xf32>
    %35 = tpu.matmul %34, %31, %cst_13 {dimension_numbers = #tpu.dot_dimension_numbers<[1], [0], [0], [1], [0, 0, 1, 1], [], []>} : vector<32x4xbf16>, vector<4x64xbf16>, vector<32x64xf32> -> vector<32x64xf32>
    %36 = vector.extract_strided_slice %11 {offsets = [0, 0], sizes = [32, 64], strides = [1, 1]} : vector<32x256xf32> to vector<32x64xf32>
    %37 = arith.mulf %35, %36 : vector<32x64xf32>
    %38 = arith.addf %32, %37 : vector<32x64xf32>
    %39 = arith.mulf %22, %30 : vector<32x4xf32>
    %40 = arith.truncf %39 : vector<32x4xf32> to vector<32x4xbf16>
    %cst_14 = arith.constant dense<0.000000e+00> : vector<32x64xf32>
    %41 = tpu.matmul %40, %31, %cst_14 {dimension_numbers = #tpu.dot_dimension_numbers<[1], [0], [0], [1], [0, 0, 1, 1], [], []>} : vector<32x4xbf16>, vector<4x64xbf16>, vector<32x64xf32> -> vector<32x64xf32>
    %42 = vector.extract_strided_slice %11 {offsets = [0, 64], sizes = [32, 64], strides = [1, 1]} : vector<32x256xf32> to vector<32x64xf32>
    %43 = arith.mulf %41, %42 : vector<32x64xf32>
    %44 = arith.addf %38, %43 : vector<32x64xf32>
    %45 = arith.mulf %24, %30 : vector<32x4xf32>
    %46 = arith.truncf %45 : vector<32x4xf32> to vector<32x4xbf16>
    %cst_15 = arith.constant dense<0.000000e+00> : vector<32x64xf32>
    %47 = tpu.matmul %46, %31, %cst_15 {dimension_numbers = #tpu.dot_dimension_numbers<[1], [0], [0], [1], [0, 0, 1, 1], [], []>} : vector<32x4xbf16>, vector<4x64xbf16>, vector<32x64xf32> -> vector<32x64xf32>
    %48 = vector.extract_strided_slice %11 {offsets = [0, 128], sizes = [32, 64], strides = [1, 1]} : vector<32x256xf32> to vector<32x64xf32>
    %49 = arith.mulf %47, %48 : vector<32x64xf32>
    %50 = arith.addf %44, %49 : vector<32x64xf32>
    %51 = arith.mulf %26, %30 : vector<32x4xf32>
    %52 = arith.truncf %51 : vector<32x4xf32> to vector<32x4xbf16>
    %cst_16 = arith.constant dense<0.000000e+00> : vector<32x64xf32>
    %53 = tpu.matmul %52, %31, %cst_16 {dimension_numbers = #tpu.dot_dimension_numbers<[1], [0], [0], [1], [0, 0, 1, 1], [], []>} : vector<32x4xbf16>, vector<4x64xbf16>, vector<32x64xf32> -> vector<32x64xf32>
    %54 = vector.extract_strided_slice %11 {offsets = [0, 192], sizes = [32, 64], strides = [1, 1]} : vector<32x256xf32> to vector<32x64xf32>
    %55 = arith.mulf %53, %54 : vector<32x64xf32>
    %56 = arith.addf %50, %55 : vector<32x64xf32>
    %57 = arith.truncf %56 : vector<32x64xf32> to vector<32x64xbf16>
    %c0_17 = arith.constant 0 : index
    %c0_18 = arith.constant 0 : index
    %58 = vector.load %arg8[%c0_17, %c0_18] : memref<64x64xbf16, #tpu.memory_space<vmem>>, vector<64x64xbf16>
    %cst_19 = arith.constant dense<0.000000e+00> : vector<32x64xf32>
    %59 = tpu.matmul %57, %58, %cst_19 {dimension_numbers = #tpu.dot_dimension_numbers<[1], [0], [0], [1], [0, 0, 1, 1], [], []>} : vector<32x64xbf16>, vector<64x64xbf16>, vector<32x64xf32> -> vector<32x64xf32>
    %c0_20 = arith.constant 0 : index
    %c0_21 = arith.constant 0 : index
    %60 = vector.load %arg9[%c0_20, %c0_21] : memref<1x64xf32, #tpu.memory_space<vmem>>, vector<1x64xf32>
    %61 = vector.broadcast %60 : vector<1x64xf32> to vector<32x64xf32>
    %62 = arith.addf %59, %61 : vector<32x64xf32>
    %c0_22 = arith.constant 0 : index
    %c0_23 = arith.constant 0 : index
    %63 = vector.load %arg10[%c0_22, %c0_23] : memref<32x64xf32, #tpu.memory_space<vmem>>, vector<32x64xf32>
    %64 = arith.addf %62, %63 : vector<32x64xf32>
    %c0_24 = arith.constant 0 : index
    %c0_25 = arith.constant 0 : index
    %65 = vector.load %arg11[%c0_24, %c0_25] : memref<32x64xf32, #tpu.memory_space<vmem>>, vector<32x64xf32>
    tpu.vector_store %arg11[%c0_24, %c0_25], %64 {strides = array<i32>} : memref<32x64xf32, #tpu.memory_space<vmem>>, vector<32x64xf32>,
    return
  }
  func.func @transform_0(%arg0: i32, %arg1: i32) -> (i32, i32) {
    %c2_i32 = arith.constant 2 : i32
    %0 = arith.muli %arg0, %c2_i32 : i32
    %1 = arith.addi %0, %arg1 : i32
    %c0_i32 = arith.constant 0 : i32
    %c0_i32_0 = arith.constant 0 : i32
    return %1, %c0_i32 : i32, i32
  }
  func.func @transform_1(%arg0: i32, %arg1: i32) -> (i32, i32) {
    %c0_i32 = arith.constant 0 : i32
    %c0_i32_0 = arith.constant 0 : i32
    %c0_i32_1 = arith.constant 0 : i32
    return %c0_i32, %c0_i32_0 : i32, i32
  }
  func.func @transform_2(%arg0: i32, %arg1: i32) -> (i32, i32) {
    %c0_i32 = arith.constant 0 : i32
    %c0_i32_0 = arith.constant 0 : i32
    %c0_i32_1 = arith.constant 0 : i32
    return %c0_i32, %c0_i32_0 : i32, i32
  }
  func.func @transform_3(%arg0: i32, %arg1: i32) -> (i32, i32) {
    %c0_i32 = arith.constant 0 : i32
    %c0_i32_0 = arith.constant 0 : i32
    %c0_i32_1 = arith.constant 0 : i32
    return %c0_i32, %c0_i32_0 : i32, i32
  }
  func.func @transform_4(%arg0: i32, %arg1: i32) -> (i32, i32) {
    %c0_i32 = arith.constant 0 : i32
    %c0_i32_0 = arith.constant 0 : i32
    %c0_i32_1 = arith.constant 0 : i32
    return %c0_i32, %c0_i32_0 : i32, i32
  }
  func.func @transform_5(%arg0: i32, %arg1: i32) -> (i32, i32) {
    %c0_i32 = arith.constant 0 : i32
    %c0_i32_0 = arith.constant 0 : i32
    %c0_i32_1 = arith.constant 0 : i32
    return %c0_i32, %c0_i32_0 : i32, i32
  }
  func.func @transform_6(%arg0: i32, %arg1: i32) -> (i32, i32) {
    %c0_i32 = arith.constant 0 : i32
    %c0_i32_0 = arith.constant 0 : i32
    %c0_i32_1 = arith.constant 0 : i32
    return %c0_i32, %c0_i32_0 : i32, i32
  }
  func.func @transform_7(%arg0: i32, %arg1: i32) -> (i32, i32) {
    %c0_i32 = arith.constant 0 : i32
    %c0_i32_0 = arith.constant 0 : i32
    %c0_i32_1 = arith.constant 0 : i32
    return %c0_i32, %c0_i32_0 : i32, i32
  }
  func.func @transform_8(%arg0: i32, %arg1: i32) -> (i32, i32) {
    %c0_i32 = arith.constant 0 : i32
    %c0_i32_0 = arith.constant 0 : i32
    return %arg1, %c0_i32 : i32, i32
  }
  func.func @transform_9(%arg0: i32, %arg1: i32) -> (i32, i32) {
    %c2_i32 = arith.constant 2 : i32
    %0 = arith.muli %arg0, %c2_i32 : i32
    %1 = arith.addi %0, %arg1 : i32
    %c0_i32 = arith.constant 0 : i32
    %c0_i32_0 = arith.constant 0 : i32
    return %1, %c0_i32 : i32, i32
  }
}

module attributes {stable_mosaic.version = 11 : i64} {
  func.func @_block_kernel(%arg0: i32, %arg1: memref<64x64xf32, #tpu.memory_space<vmem>>, %arg2: memref<1x64xf32, #tpu.memory_space<vmem>>, %arg3: memref<1x64xf32, #tpu.memory_space<vmem>>, %arg4: memref<64x192xbf16, #tpu.memory_space<vmem>>, %arg5: memref<1x192xf32, #tpu.memory_space<vmem>>, %arg6: memref<64x64xbf16, #tpu.memory_space<vmem>>, %arg7: memref<1x64xf32, #tpu.memory_space<vmem>>, %arg8: memref<1x64xf32, #tpu.memory_space<vmem>>, %arg9: memref<1x64xf32, #tpu.memory_space<vmem>>, %arg10: memref<1x64xf32, #tpu.memory_space<vmem>>, %arg11: memref<64x256xbf16, #tpu.memory_space<vmem>>, %arg12: memref<1x256xf32, #tpu.memory_space<vmem>>, %arg13: memref<256x64xbf16, #tpu.memory_space<vmem>>, %arg14: memref<1x64xf32, #tpu.memory_space<vmem>>, %arg15: memref<1x64xf32, #tpu.memory_space<vmem>>, %arg16: memref<64x64xf32, #tpu.memory_space<vmem>>) attributes {dimension_semantics = [#tpu.dimension_semantics<parallel>], iteration_bounds = array<i64: 2>, scalar_prefetch = 0 : i64, scratch_operands = 0 : i64, tpu.core_type = #tpu.core_type<tc>, window_params = [{transform_indices = @transform_0, window_bounds = array<i64: 64, 64>}, {pipeline_mode = #tpu.pipeline_mode<synchronous>, transform_indices = @transform_1, window_bounds = array<i64: 1, 64>}, {pipeline_mode = #tpu.pipeline_mode<synchronous>, transform_indices = @transform_2, window_bounds = array<i64: 1, 64>}, {pipeline_mode = #tpu.pipeline_mode<synchronous>, transform_indices = @transform_3, window_bounds = array<i64: 64, 192>}, {pipeline_mode = #tpu.pipeline_mode<synchronous>, transform_indices = @transform_4, window_bounds = array<i64: 1, 192>}, {pipeline_mode = #tpu.pipeline_mode<synchronous>, transform_indices = @transform_5, window_bounds = array<i64: 64, 64>}, {pipeline_mode = #tpu.pipeline_mode<synchronous>, transform_indices = @transform_6, window_bounds = array<i64: 1, 64>}, {pipeline_mode = #tpu.pipeline_mode<synchronous>, transform_indices = @transform_7, window_bounds = array<i64: 1, 64>}, {pipeline_mode = #tpu.pipeline_mode<synchronous>, transform_indices = @transform_8, window_bounds = array<i64: 1, 64>}, {pipeline_mode = #tpu.pipeline_mode<synchronous>, transform_indices = @transform_9, window_bounds = array<i64: 1, 64>}, {pipeline_mode = #tpu.pipeline_mode<synchronous>, transform_indices = @transform_10, window_bounds = array<i64: 64, 256>}, {pipeline_mode = #tpu.pipeline_mode<synchronous>, transform_indices = @transform_11, window_bounds = array<i64: 1, 256>}, {pipeline_mode = #tpu.pipeline_mode<synchronous>, transform_indices = @transform_12, window_bounds = array<i64: 256, 64>}, {pipeline_mode = #tpu.pipeline_mode<synchronous>, transform_indices = @transform_13, window_bounds = array<i64: 1, 64>}, {pipeline_mode = #tpu.pipeline_mode<synchronous>, transform_indices = @transform_14, window_bounds = array<i64: 1, 64>}, {transform_indices = @transform_15, window_bounds = array<i64: 64, 64>}]} {
    %c0 = arith.constant 0 : index
    %c0_0 = arith.constant 0 : index
    %0 = vector.load %arg1[%c0, %c0_0] : memref<64x64xf32, #tpu.memory_space<vmem>>, vector<64x64xf32>
    %c0_1 = arith.constant 0 : index
    %c0_2 = arith.constant 0 : index
    %1 = vector.load %arg2[%c0_1, %c0_2] : memref<1x64xf32, #tpu.memory_space<vmem>>, vector<1x64xf32>
    %c0_3 = arith.constant 0 : index
    %c0_4 = arith.constant 0 : index
    %2 = vector.load %arg3[%c0_3, %c0_4] : memref<1x64xf32, #tpu.memory_space<vmem>>, vector<1x64xf32>
    %cst = arith.constant dense<0.000000e+00> : vector<64xf32>
    %3 = vector.multi_reduction <add>, %0, %cst [1] : vector<64x64xf32> to vector<64xf32>
    %4 = vector.shape_cast %3 : vector<64xf32> to vector<64x1xf32>
    %cst_5 = arith.constant 6.400000e+01 : f32
    %5 = vector.broadcast %cst_5 : f32 to vector<64x1xf32>
    %6 = arith.divf %4, %5 : vector<64x1xf32>
    %7 = vector.broadcast %6 : vector<64x1xf32> to vector<64x64xf32>
    %8 = arith.subf %0, %7 : vector<64x64xf32>
    %9 = arith.mulf %8, %8 : vector<64x64xf32>
    %cst_6 = arith.constant dense<0.000000e+00> : vector<64xf32>
    %10 = vector.multi_reduction <add>, %9, %cst_6 [1] : vector<64x64xf32> to vector<64xf32>
    %11 = vector.shape_cast %10 : vector<64xf32> to vector<64x1xf32>
    %cst_7 = arith.constant 6.400000e+01 : f32
    %12 = vector.broadcast %cst_7 : f32 to vector<64x1xf32>
    %13 = arith.divf %11, %12 : vector<64x1xf32>
    %14 = vector.broadcast %6 : vector<64x1xf32> to vector<64x64xf32>
    %15 = arith.subf %0, %14 : vector<64x64xf32>
    %cst_8 = arith.constant 9.99999997E-7 : f32
    %16 = vector.broadcast %cst_8 : f32 to vector<64x1xf32>
    %17 = arith.addf %13, %16 : vector<64x1xf32>
    %18 = math.rsqrt %17 : vector<64x1xf32>
    %19 = vector.broadcast %18 : vector<64x1xf32> to vector<64x64xf32>
    %20 = arith.mulf %15, %19 : vector<64x64xf32>
    %21 = vector.broadcast %1 : vector<1x64xf32> to vector<64x64xf32>
    %22 = arith.mulf %20, %21 : vector<64x64xf32>
    %23 = vector.broadcast %2 : vector<1x64xf32> to vector<64x64xf32>
    %24 = arith.addf %22, %23 : vector<64x64xf32>
    %25 = arith.truncf %24 : vector<64x64xf32> to vector<64x64xbf16>
    %c0_9 = arith.constant 0 : index
    %c0_10 = arith.constant 0 : index
    %26 = vector.load %arg4[%c0_9, %c0_10] : memref<64x192xbf16, #tpu.memory_space<vmem>>, vector<64x192xbf16>
    %cst_11 = arith.constant dense<0.000000e+00> : vector<64x192xf32>
    %27 = tpu.matmul %25, %26, %cst_11 {dimension_numbers = #tpu.dot_dimension_numbers<[1], [0], [0], [1], [0, 0, 1, 1], [], []>} : vector<64x64xbf16>, vector<64x192xbf16>, vector<64x192xf32> -> vector<64x192xf32>
    %c0_12 = arith.constant 0 : index
    %c0_13 = arith.constant 0 : index
    %28 = vector.load %arg5[%c0_12, %c0_13] : memref<1x192xf32, #tpu.memory_space<vmem>>, vector<1x192xf32>
    %29 = vector.broadcast %28 : vector<1x192xf32> to vector<64x192xf32>
    %30 = arith.addf %27, %29 : vector<64x192xf32>
    %31 = arith.truncf %30 : vector<64x192xf32> to vector<64x192xbf16>
    %32 = vector.extract_strided_slice %31 {offsets = [0, 0], sizes = [64, 16], strides = [1, 1]} : vector<64x192xbf16> to vector<64x16xbf16>
    %33 = vector.extract_strided_slice %31 {offsets = [0, 64], sizes = [64, 16], strides = [1, 1]} : vector<64x192xbf16> to vector<64x16xbf16>
    %34 = vector.extract_strided_slice %31 {offsets = [0, 128], sizes = [64, 16], strides = [1, 1]} : vector<64x192xbf16> to vector<64x16xbf16>
    %cst_14 = arith.constant dense<0.000000e+00> : vector<64x64xf32>
    %35 = tpu.matmul %32, %33, %cst_14 {dimension_numbers = #tpu.dot_dimension_numbers<[1], [1], [0], [0], [0, 0, 1, 0], [], []>} : vector<64x16xbf16>, vector<64x16xbf16>, vector<64x64xf32> -> vector<64x64xf32>
    %cst_15 = arith.constant dense<0xFF800000> : vector<64xf32>
    %36 = vector.multi_reduction <maximumf>, %35, %cst_15 [1] : vector<64x64xf32> to vector<64xf32>
    %37 = vector.shape_cast %36 : vector<64xf32> to vector<64x1xf32>
    %38 = vector.broadcast %37 : vector<64x1xf32> to vector<64x64xf32>
    %39 = arith.subf %35, %38 : vector<64x64xf32>
    %40 = math.exp %39 : vector<64x64xf32>
    %cst_16 = arith.constant dense<0.000000e+00> : vector<64xf32>
    %41 = vector.multi_reduction <add>, %40, %cst_16 [1] : vector<64x64xf32> to vector<64xf32>
    %42 = vector.shape_cast %41 : vector<64xf32> to vector<64x1xf32>
    %43 = tpu.reciprocal %42 {approx = true} : vector<64x1xf32> -> vector<64x1xf32>
    %44 = vector.broadcast %43 : vector<64x1xf32> to vector<64x64xf32>
    %45 = arith.mulf %40, %44 : vector<64x64xf32>
    %46 = arith.truncf %45 : vector<64x64xf32> to vector<64x64xbf16>
    %cst_17 = arith.constant dense<0.000000e+00> : vector<64x16xf32>
    %47 = tpu.matmul %46, %34, %cst_17 {dimension_numbers = #tpu.dot_dimension_numbers<[1], [0], [0], [1], [0, 0, 1, 1], [], []>} : vector<64x64xbf16>, vector<64x16xbf16>, vector<64x16xf32> -> vector<64x16xf32>
    %48 = vector.extract_strided_slice %31 {offsets = [0, 16], sizes = [64, 16], strides = [1, 1]} : vector<64x192xbf16> to vector<64x16xbf16>
    %49 = vector.extract_strided_slice %31 {offsets = [0, 80], sizes = [64, 16], strides = [1, 1]} : vector<64x192xbf16> to vector<64x16xbf16>
    %50 = vector.extract_strided_slice %31 {offsets = [0, 144], sizes = [64, 16], strides = [1, 1]} : vector<64x192xbf16> to vector<64x16xbf16>
    %cst_18 = arith.constant dense<0.000000e+00> : vector<64x64xf32>
    %51 = tpu.matmul %48, %49, %cst_18 {dimension_numbers = #tpu.dot_dimension_numbers<[1], [1], [0], [0], [0, 0, 1, 0], [], []>} : vector<64x16xbf16>, vector<64x16xbf16>, vector<64x64xf32> -> vector<64x64xf32>
    %cst_19 = arith.constant dense<0xFF800000> : vector<64xf32>
    %52 = vector.multi_reduction <maximumf>, %51, %cst_19 [1] : vector<64x64xf32> to vector<64xf32>
    %53 = vector.shape_cast %52 : vector<64xf32> to vector<64x1xf32>
    %54 = vector.broadcast %53 : vector<64x1xf32> to vector<64x64xf32>
    %55 = arith.subf %51, %54 : vector<64x64xf32>
    %56 = math.exp %55 : vector<64x64xf32>
    %cst_20 = arith.constant dense<0.000000e+00> : vector<64xf32>
    %57 = vector.multi_reduction <add>, %56, %cst_20 [1] : vector<64x64xf32> to vector<64xf32>
    %58 = vector.shape_cast %57 : vector<64xf32> to vector<64x1xf32>
    %59 = tpu.reciprocal %58 {approx = true} : vector<64x1xf32> -> vector<64x1xf32>
    %60 = vector.broadcast %59 : vector<64x1xf32> to vector<64x64xf32>
    %61 = arith.mulf %56, %60 : vector<64x64xf32>
    %62 = arith.truncf %61 : vector<64x64xf32> to vector<64x64xbf16>
    %cst_21 = arith.constant dense<0.000000e+00> : vector<64x16xf32>
    %63 = tpu.matmul %62, %50, %cst_21 {dimension_numbers = #tpu.dot_dimension_numbers<[1], [0], [0], [1], [0, 0, 1, 1], [], []>} : vector<64x64xbf16>, vector<64x16xbf16>, vector<64x16xf32> -> vector<64x16xf32>
    %64 = vector.extract_strided_slice %31 {offsets = [0, 32], sizes = [64, 16], strides = [1, 1]} : vector<64x192xbf16> to vector<64x16xbf16>
    %65 = vector.extract_strided_slice %31 {offsets = [0, 96], sizes = [64, 16], strides = [1, 1]} : vector<64x192xbf16> to vector<64x16xbf16>
    %66 = vector.extract_strided_slice %31 {offsets = [0, 160], sizes = [64, 16], strides = [1, 1]} : vector<64x192xbf16> to vector<64x16xbf16>
    %cst_22 = arith.constant dense<0.000000e+00> : vector<64x64xf32>
    %67 = tpu.matmul %64, %65, %cst_22 {dimension_numbers = #tpu.dot_dimension_numbers<[1], [1], [0], [0], [0, 0, 1, 0], [], []>} : vector<64x16xbf16>, vector<64x16xbf16>, vector<64x64xf32> -> vector<64x64xf32>
    %cst_23 = arith.constant dense<0xFF800000> : vector<64xf32>
    %68 = vector.multi_reduction <maximumf>, %67, %cst_23 [1] : vector<64x64xf32> to vector<64xf32>
    %69 = vector.shape_cast %68 : vector<64xf32> to vector<64x1xf32>
    %70 = vector.broadcast %69 : vector<64x1xf32> to vector<64x64xf32>
    %71 = arith.subf %67, %70 : vector<64x64xf32>
    %72 = math.exp %71 : vector<64x64xf32>
    %cst_24 = arith.constant dense<0.000000e+00> : vector<64xf32>
    %73 = vector.multi_reduction <add>, %72, %cst_24 [1] : vector<64x64xf32> to vector<64xf32>
    %74 = vector.shape_cast %73 : vector<64xf32> to vector<64x1xf32>
    %75 = tpu.reciprocal %74 {approx = true} : vector<64x1xf32> -> vector<64x1xf32>
    %76 = vector.broadcast %75 : vector<64x1xf32> to vector<64x64xf32>
    %77 = arith.mulf %72, %76 : vector<64x64xf32>
    %78 = arith.truncf %77 : vector<64x64xf32> to vector<64x64xbf16>
    %cst_25 = arith.constant dense<0.000000e+00> : vector<64x16xf32>
    %79 = tpu.matmul %78, %66, %cst_25 {dimension_numbers = #tpu.dot_dimension_numbers<[1], [0], [0], [1], [0, 0, 1, 1], [], []>} : vector<64x64xbf16>, vector<64x16xbf16>, vector<64x16xf32> -> vector<64x16xf32>
    %80 = vector.extract_strided_slice %31 {offsets = [0, 48], sizes = [64, 16], strides = [1, 1]} : vector<64x192xbf16> to vector<64x16xbf16>
    %81 = vector.extract_strided_slice %31 {offsets = [0, 112], sizes = [64, 16], strides = [1, 1]} : vector<64x192xbf16> to vector<64x16xbf16>
    %82 = vector.extract_strided_slice %31 {offsets = [0, 176], sizes = [64, 16], strides = [1, 1]} : vector<64x192xbf16> to vector<64x16xbf16>
    %cst_26 = arith.constant dense<0.000000e+00> : vector<64x64xf32>
    %83 = tpu.matmul %80, %81, %cst_26 {dimension_numbers = #tpu.dot_dimension_numbers<[1], [1], [0], [0], [0, 0, 1, 0], [], []>} : vector<64x16xbf16>, vector<64x16xbf16>, vector<64x64xf32> -> vector<64x64xf32>
    %cst_27 = arith.constant dense<0xFF800000> : vector<64xf32>
    %84 = vector.multi_reduction <maximumf>, %83, %cst_27 [1] : vector<64x64xf32> to vector<64xf32>
    %85 = vector.shape_cast %84 : vector<64xf32> to vector<64x1xf32>
    %86 = vector.broadcast %85 : vector<64x1xf32> to vector<64x64xf32>
    %87 = arith.subf %83, %86 : vector<64x64xf32>
    %88 = math.exp %87 : vector<64x64xf32>
    %cst_28 = arith.constant dense<0.000000e+00> : vector<64xf32>
    %89 = vector.multi_reduction <add>, %88, %cst_28 [1] : vector<64x64xf32> to vector<64xf32>
    %90 = vector.shape_cast %89 : vector<64xf32> to vector<64x1xf32>
    %91 = tpu.reciprocal %90 {approx = true} : vector<64x1xf32> -> vector<64x1xf32>
    %92 = vector.broadcast %91 : vector<64x1xf32> to vector<64x64xf32>
    %93 = arith.mulf %88, %92 : vector<64x64xf32>
    %94 = arith.truncf %93 : vector<64x64xf32> to vector<64x64xbf16>
    %cst_29 = arith.constant dense<0.000000e+00> : vector<64x16xf32>
    %95 = tpu.matmul %94, %82, %cst_29 {dimension_numbers = #tpu.dot_dimension_numbers<[1], [0], [0], [1], [0, 0, 1, 1], [], []>} : vector<64x64xbf16>, vector<64x16xbf16>, vector<64x16xf32> -> vector<64x16xf32>
    %96 = tpu.concatenate %47, %63, %79, %95 in 1 : vector<64x16xf32>, vector<64x16xf32>, vector<64x16xf32>, vector<64x16xf32> -> vector<64x64xf32>
    %97 = arith.truncf %96 : vector<64x64xf32> to vector<64x64xbf16>
    %c0_30 = arith.constant 0 : index
    %c0_31 = arith.constant 0 : index
    %98 = vector.load %arg6[%c0_30, %c0_31] : memref<64x64xbf16, #tpu.memory_space<vmem>>, vector<64x64xbf16>
    %cst_32 = arith.constant dense<0.000000e+00> : vector<64x64xf32>
    %99 = tpu.matmul %97, %98, %cst_32 {dimension_numbers = #tpu.dot_dimension_numbers<[1], [0], [0], [1], [0, 0, 1, 1], [], []>} : vector<64x64xbf16>, vector<64x64xbf16>, vector<64x64xf32> -> vector<64x64xf32>
    %c0_33 = arith.constant 0 : index
    %c0_34 = arith.constant 0 : index
    %100 = vector.load %arg7[%c0_33, %c0_34] : memref<1x64xf32, #tpu.memory_space<vmem>>, vector<1x64xf32>
    %101 = vector.broadcast %100 : vector<1x64xf32> to vector<64x64xf32>
    %102 = arith.addf %99, %101 : vector<64x64xf32>
    %c0_35 = arith.constant 0 : index
    %c0_36 = arith.constant 0 : index
    %103 = vector.load %arg8[%c0_35, %c0_36] : memref<1x64xf32, #tpu.memory_space<vmem>>, vector<1x64xf32>
    %104 = vector.broadcast %103 : vector<1x64xf32> to vector<64x64xf32>
    %105 = arith.mulf %104, %102 : vector<64x64xf32>
    %106 = arith.addf %0, %105 : vector<64x64xf32>
    %c0_37 = arith.constant 0 : index
    %c0_38 = arith.constant 0 : index
    %107 = vector.load %arg9[%c0_37, %c0_38] : memref<1x64xf32, #tpu.memory_space<vmem>>, vector<1x64xf32>
    %c0_39 = arith.constant 0 : index
    %c0_40 = arith.constant 0 : index
    %108 = vector.load %arg10[%c0_39, %c0_40] : memref<1x64xf32, #tpu.memory_space<vmem>>, vector<1x64xf32>
    %cst_41 = arith.constant dense<0.000000e+00> : vector<64xf32>
    %109 = vector.multi_reduction <add>, %106, %cst_41 [1] : vector<64x64xf32> to vector<64xf32>
    %110 = vector.shape_cast %109 : vector<64xf32> to vector<64x1xf32>
    %cst_42 = arith.constant 6.400000e+01 : f32
    %111 = vector.broadcast %cst_42 : f32 to vector<64x1xf32>
    %112 = arith.divf %110, %111 : vector<64x1xf32>
    %113 = vector.broadcast %112 : vector<64x1xf32> to vector<64x64xf32>
    %114 = arith.subf %106, %113 : vector<64x64xf32>
    %115 = arith.mulf %114, %114 : vector<64x64xf32>
    %cst_43 = arith.constant dense<0.000000e+00> : vector<64xf32>
    %116 = vector.multi_reduction <add>, %115, %cst_43 [1] : vector<64x64xf32> to vector<64xf32>
    %117 = vector.shape_cast %116 : vector<64xf32> to vector<64x1xf32>
    %cst_44 = arith.constant 6.400000e+01 : f32
    %118 = vector.broadcast %cst_44 : f32 to vector<64x1xf32>
    %119 = arith.divf %117, %118 : vector<64x1xf32>
    %120 = vector.broadcast %112 : vector<64x1xf32> to vector<64x64xf32>
    %121 = arith.subf %106, %120 : vector<64x64xf32>
    %cst_45 = arith.constant 9.99999997E-7 : f32
    %122 = vector.broadcast %cst_45 : f32 to vector<64x1xf32>
    %123 = arith.addf %119, %122 : vector<64x1xf32>
    %124 = math.rsqrt %123 : vector<64x1xf32>
    %125 = vector.broadcast %124 : vector<64x1xf32> to vector<64x64xf32>
    %126 = arith.mulf %121, %125 : vector<64x64xf32>
    %127 = vector.broadcast %107 : vector<1x64xf32> to vector<64x64xf32>
    %128 = arith.mulf %126, %127 : vector<64x64xf32>
    %129 = vector.broadcast %108 : vector<1x64xf32> to vector<64x64xf32>
    %130 = arith.addf %128, %129 : vector<64x64xf32>
    %131 = arith.truncf %130 : vector<64x64xf32> to vector<64x64xbf16>
    %c0_46 = arith.constant 0 : index
    %c0_47 = arith.constant 0 : index
    %132 = vector.load %arg11[%c0_46, %c0_47] : memref<64x256xbf16, #tpu.memory_space<vmem>>, vector<64x256xbf16>
    %cst_48 = arith.constant dense<0.000000e+00> : vector<64x256xf32>
    %133 = tpu.matmul %131, %132, %cst_48 {dimension_numbers = #tpu.dot_dimension_numbers<[1], [0], [0], [1], [0, 0, 1, 1], [], []>} : vector<64x64xbf16>, vector<64x256xbf16>, vector<64x256xf32> -> vector<64x256xf32>
    %c0_49 = arith.constant 0 : index
    %c0_50 = arith.constant 0 : index
    %134 = vector.load %arg12[%c0_49, %c0_50] : memref<1x256xf32, #tpu.memory_space<vmem>>, vector<1x256xf32>
    %135 = vector.broadcast %134 : vector<1x256xf32> to vector<64x256xf32>
    %136 = arith.addf %133, %135 : vector<64x256xf32>
    %cst_51 = arith.constant 5.000000e-01 : f32
    %137 = vector.broadcast %cst_51 : f32 to vector<64x256xf32>
    %138 = arith.mulf %137, %136 : vector<64x256xf32>
    %cst_52 = arith.constant 0.707106769 : f32
    %139 = vector.broadcast %cst_52 : f32 to vector<64x256xf32>
    %140 = arith.mulf %136, %139 : vector<64x256xf32>
    %cst_53 = arith.constant 0.000000e+00 : f32
    %141 = vector.broadcast %cst_53 : f32 to vector<64x256xf32>
    %142 = arith.cmpf oge, %140, %141 : vector<64x256xf32>
    %cst_54 = arith.constant 1.000000e+00 : f32
    %cst_55 = arith.constant -1.000000e+00 : f32
    %143 = vector.broadcast %cst_54 : f32 to vector<64x256xf32>
    %144 = vector.broadcast %cst_55 : f32 to vector<64x256xf32>
    %145 = arith.select %142, %143, %144 : vector<64x256xi1>, vector<64x256xf32>
    %146 = math.absf %140 : vector<64x256xf32>
    %cst_56 = arith.constant 0.327591091 : f32
    %147 = vector.broadcast %cst_56 : f32 to vector<64x256xf32>
    %148 = arith.mulf %147, %146 : vector<64x256xf32>
    %cst_57 = arith.constant 1.000000e+00 : f32
    %149 = vector.broadcast %cst_57 : f32 to vector<64x256xf32>
    %150 = arith.addf %149, %148 : vector<64x256xf32>
    %cst_58 = arith.constant 1.000000e+00 : f32
    %151 = vector.broadcast %cst_58 : f32 to vector<64x256xf32>
    %152 = arith.divf %151, %150 : vector<64x256xf32>
    %cst_59 = arith.constant 1.06140542 : f32
    %153 = vector.broadcast %cst_59 : f32 to vector<64x256xf32>
    %154 = arith.mulf %152, %153 : vector<64x256xf32>
    %cst_60 = arith.constant -1.45315206 : f32
    %155 = vector.broadcast %cst_60 : f32 to vector<64x256xf32>
    %156 = arith.addf %155, %154 : vector<64x256xf32>
    %157 = arith.mulf %152, %156 : vector<64x256xf32>
    %cst_61 = arith.constant 1.42141378 : f32
    %158 = vector.broadcast %cst_61 : f32 to vector<64x256xf32>
    %159 = arith.addf %158, %157 : vector<64x256xf32>
    %160 = arith.mulf %152, %159 : vector<64x256xf32>
    %cst_62 = arith.constant -0.284496725 : f32
    %161 = vector.broadcast %cst_62 : f32 to vector<64x256xf32>
    %162 = arith.addf %161, %160 : vector<64x256xf32>
    %163 = arith.mulf %152, %162 : vector<64x256xf32>
    %cst_63 = arith.constant 0.254829586 : f32
    %164 = vector.broadcast %cst_63 : f32 to vector<64x256xf32>
    %165 = arith.addf %164, %163 : vector<64x256xf32>
    %166 = arith.mulf %152, %165 : vector<64x256xf32>
    %cst_64 = arith.constant 0.000000e+00 : f32
    %167 = vector.broadcast %cst_64 : f32 to vector<64x256xf32>
    %168 = arith.subf %167, %146 : vector<64x256xf32>
    %169 = arith.mulf %168, %146 : vector<64x256xf32>
    %170 = math.exp %169 : vector<64x256xf32>
    %171 = arith.mulf %166, %170 : vector<64x256xf32>
    %cst_65 = arith.constant 1.000000e+00 : f32
    %172 = vector.broadcast %cst_65 : f32 to vector<64x256xf32>
    %173 = arith.subf %172, %171 : vector<64x256xf32>
    %174 = arith.mulf %145, %173 : vector<64x256xf32>
    %cst_66 = arith.constant 1.000000e+00 : f32
    %175 = vector.broadcast %cst_66 : f32 to vector<64x256xf32>
    %176 = arith.addf %175, %174 : vector<64x256xf32>
    %177 = arith.mulf %138, %176 : vector<64x256xf32>
    %178 = arith.truncf %177 : vector<64x256xf32> to vector<64x256xbf16>
    %c0_67 = arith.constant 0 : index
    %c0_68 = arith.constant 0 : index
    %179 = vector.load %arg13[%c0_67, %c0_68] : memref<256x64xbf16, #tpu.memory_space<vmem>>, vector<256x64xbf16>
    %cst_69 = arith.constant dense<0.000000e+00> : vector<64x64xf32>
    %180 = tpu.matmul %178, %179, %cst_69 {dimension_numbers = #tpu.dot_dimension_numbers<[1], [0], [0], [1], [0, 0, 1, 1], [], []>} : vector<64x256xbf16>, vector<256x64xbf16>, vector<64x64xf32> -> vector<64x64xf32>
    %c0_70 = arith.constant 0 : index
    %c0_71 = arith.constant 0 : index
    %181 = vector.load %arg14[%c0_70, %c0_71] : memref<1x64xf32, #tpu.memory_space<vmem>>, vector<1x64xf32>
    %182 = vector.broadcast %181 : vector<1x64xf32> to vector<64x64xf32>
    %183 = arith.addf %180, %182 : vector<64x64xf32>
    %c0_72 = arith.constant 0 : index
    %c0_73 = arith.constant 0 : index
    %184 = vector.load %arg15[%c0_72, %c0_73] : memref<1x64xf32, #tpu.memory_space<vmem>>, vector<1x64xf32>
    %185 = vector.broadcast %184 : vector<1x64xf32> to vector<64x64xf32>
    %186 = arith.mulf %185, %183 : vector<64x64xf32>
    %187 = arith.addf %106, %186 : vector<64x64xf32>
    %c0_74 = arith.constant 0 : index
    %c0_75 = arith.constant 0 : index
    %188 = vector.load %arg16[%c0_74, %c0_75] : memref<64x64xf32, #tpu.memory_space<vmem>>, vector<64x64xf32>
    tpu.vector_store %arg16[%c0_74, %c0_75], %187 {strides = array<i32>} : memref<64x64xf32, #tpu.memory_space<vmem>>, vector<64x64xf32>,
    return
  }
  func.func @transform_0(%arg0: i32) -> (i32, i32) {
    %c0_i32 = arith.constant 0 : i32
    %c0_i32_0 = arith.constant 0 : i32
    return %arg0, %c0_i32 : i32, i32
  }
  func.func @transform_1(%arg0: i32) -> (i32, i32) {
    %c0_i32 = arith.constant 0 : i32
    %c0_i32_0 = arith.constant 0 : i32
    %c0_i32_1 = arith.constant 0 : i32
    return %c0_i32, %c0_i32_0 : i32, i32
  }
  func.func @transform_2(%arg0: i32) -> (i32, i32) {
    %c0_i32 = arith.constant 0 : i32
    %c0_i32_0 = arith.constant 0 : i32
    %c0_i32_1 = arith.constant 0 : i32
    return %c0_i32, %c0_i32_0 : i32, i32
  }
  func.func @transform_3(%arg0: i32) -> (i32, i32) {
    %c0_i32 = arith.constant 0 : i32
    %c0_i32_0 = arith.constant 0 : i32
    %c0_i32_1 = arith.constant 0 : i32
    return %c0_i32, %c0_i32_0 : i32, i32
  }
  func.func @transform_4(%arg0: i32) -> (i32, i32) {
    %c0_i32 = arith.constant 0 : i32
    %c0_i32_0 = arith.constant 0 : i32
    %c0_i32_1 = arith.constant 0 : i32
    return %c0_i32, %c0_i32_0 : i32, i32
  }
  func.func @transform_5(%arg0: i32) -> (i32, i32) {
    %c0_i32 = arith.constant 0 : i32
    %c0_i32_0 = arith.constant 0 : i32
    %c0_i32_1 = arith.constant 0 : i32
    return %c0_i32, %c0_i32_0 : i32, i32
  }
  func.func @transform_6(%arg0: i32) -> (i32, i32) {
    %c0_i32 = arith.constant 0 : i32
    %c0_i32_0 = arith.constant 0 : i32
    %c0_i32_1 = arith.constant 0 : i32
    return %c0_i32, %c0_i32_0 : i32, i32
  }
  func.func @transform_7(%arg0: i32) -> (i32, i32) {
    %c0_i32 = arith.constant 0 : i32
    %c0_i32_0 = arith.constant 0 : i32
    %c0_i32_1 = arith.constant 0 : i32
    return %c0_i32, %c0_i32_0 : i32, i32
  }
  func.func @transform_8(%arg0: i32) -> (i32, i32) {
    %c0_i32 = arith.constant 0 : i32
    %c0_i32_0 = arith.constant 0 : i32
    %c0_i32_1 = arith.constant 0 : i32
    return %c0_i32, %c0_i32_0 : i32, i32
  }
  func.func @transform_9(%arg0: i32) -> (i32, i32) {
    %c0_i32 = arith.constant 0 : i32
    %c0_i32_0 = arith.constant 0 : i32
    %c0_i32_1 = arith.constant 0 : i32
    return %c0_i32, %c0_i32_0 : i32, i32
  }
  func.func @transform_10(%arg0: i32) -> (i32, i32) {
    %c0_i32 = arith.constant 0 : i32
    %c0_i32_0 = arith.constant 0 : i32
    %c0_i32_1 = arith.constant 0 : i32
    return %c0_i32, %c0_i32_0 : i32, i32
  }
  func.func @transform_11(%arg0: i32) -> (i32, i32) {
    %c0_i32 = arith.constant 0 : i32
    %c0_i32_0 = arith.constant 0 : i32
    %c0_i32_1 = arith.constant 0 : i32
    return %c0_i32, %c0_i32_0 : i32, i32
  }
  func.func @transform_12(%arg0: i32) -> (i32, i32) {
    %c0_i32 = arith.constant 0 : i32
    %c0_i32_0 = arith.constant 0 : i32
    %c0_i32_1 = arith.constant 0 : i32
    return %c0_i32, %c0_i32_0 : i32, i32
  }
  func.func @transform_13(%arg0: i32) -> (i32, i32) {
    %c0_i32 = arith.constant 0 : i32
    %c0_i32_0 = arith.constant 0 : i32
    %c0_i32_1 = arith.constant 0 : i32
    return %c0_i32, %c0_i32_0 : i32, i32
  }
  func.func @transform_14(%arg0: i32) -> (i32, i32) {
    %c0_i32 = arith.constant 0 : i32
    %c0_i32_0 = arith.constant 0 : i32
    %c0_i32_1 = arith.constant 0 : i32
    return %c0_i32, %c0_i32_0 : i32, i32
  }
  func.func @transform_15(%arg0: i32) -> (i32, i32) {
    %c0_i32 = arith.constant 0 : i32
    %c0_i32_0 = arith.constant 0 : i32
    return %arg0, %c0_i32 : i32, i32
  }
}

</mosaic_0001>

<bundles_post_ra>
// kernel: _lambda_.7
= control target key start
LH: loop header
LB: loop body
LE: loop exit
PB: predicated region body
PF: predicated region fallthrough
CT: control target
= control target key end

     0   :  { %14 = vsyncpa [#allocation3], 0  ;;  %s1828_s30 = smov 0   ;;  %s2506_s0 = inlined_call_operand.vmem [shape: f32[128,64], index: 0, kind: input, shape index: {}]   ;;  %s2507_s1 = inlined_call_operand.vmem [shape: f32[1,64], index: 1, kind: input, shape index: {}]   ;;  %s2508_s2 = inlined_call_operand.vmem [shape: f32[1,64], index: 2, kind: input, shape index: {}]   ;;  %s2509_s3 = inlined_call_operand.vmem [shape: bf16[64,64], index: 3, kind: input, shape index: {}]   ;;  %s2510_s4 = inlined_call_operand.vmem [shape: f32[1,64], index: 4, kind: input, shape index: {}]   ;;  %s2511_s5 = inlined_call_operand.vmem [shape: bf16[64,64], index: 5, kind: input, shape index: {}]   ;;  %s2512_s6 = inlined_call_operand.vmem [shape: f32[1,64], index: 6, kind: input, shape index: {}]   ;;  %s2513_s7 = inlined_call_operand.vmem [shape: bf16[64,16], index: 7, kind: input, shape index: {}]   ;;  %s2514_s8 = inlined_call_operand.hbm [shape: f32[1,16], index: 8, kind: input, shape index: {}]   ;;  %s2515_s9 = inlined_call_operand.vmem [shape: f32[128,16], index: 9, kind: output, shape index: {}]  }
   0x1 LB: > { %s1528_s10 = sadd.s32 4294967295, %s1773_s30   ;;  %p1530_p0 = scmp.ge.s32.totalorder %s1773_s30, 1  ;;  %s1773_s30 = sphi %s1828_s30, %s20_s30  }
   0x2   : > { %p245_p1 = scmp.lt.s32.totalorder %s1773_s30, 3  ;;  %s278_s13 = sshll.u32 %s2514_s8, 4  ;;  %s279_s13 = int_to_ptr.hbm [resolvable:$true] %s278_s13 }
   0x3   : > { %p1633_p3 = scmp.eq.s32.totalorder %s1528_s10, 0  ;;  %s1775_s14 = smov [#allocation2]  }
   0x4   : > { %p246_p2 = pnand %p1530_p0, %p245_p1  ;;  %s280_s15 = sshll.u32 %s1775_s14, 4  ;;  %s281_s15 = int_to_ptr.vmem [resolvable:$true] %s280_s15 }
   0x6   : > { %p1629_p4 = pneg %p246_p2  ;;  %302 = sbr.rel (%p246_p2) target bundleno = 881 (0x371), region = 56 }
   0x8   : > { %p1630_p5 = pnand %p1633_p3, %p1629_p4 }
   0xa   : > { %1632 = dma.hbm_to_vmem [thread:$0]  (!%p1630_p5), %s279_s13, 16, %s281_s15, [#allocation3]  }
   0xb   : > { %1768 = dma.done.wait (%p1633_p3), [#allocation3], 16  }
   0xc   : > { %1770 = vsyncadd (%p1633_p3), [#allocation3], 4294967280  ;;  %s1535_s16 = sshll.u32 %s1528_s10, 3  ;;  %vm362_vm0 = vcmask 523264   ;;  %v1776_v16 = vmov 64.0   ;;  %v1604_v63 = vld [vmem:[%s2509_s3 + $0x18] sm:$0xff] }
   0xd   : > { %p340_p6 = scmp.lt.s32.totalorder %s1535_s16, 15  ;;  %1651 = vrcp.f32 %v1776_v16  ;;  %1613 = vmatpush.bf16.msra.mxu3 %v1604_v63  ;;  %624 = vmatpush.bf16.msra.mxu0 %v1604_v63 }
   0xf   : > { %s2525_s16 = smov (!%p340_p6, %s1535_s16), 15 }
  0x10   : > { %s1536_s17 = sshll.u32 %s2525_s16, 3 }
  0x11   : > { %s343_s20 = scalar_lea.vmem %s2506_s0, %s1536_s17  ;;  %s349_s19 = scalar_lea.vmem %s2515_s9, %s1536_s17 }
  0x12   : > { %v358_v0 = vld [vmem:[%s343_s20 + $0x30] sm:$0xff]  ;;  %v356_v1 = vld [vmem:[%s343_s20 + $0x20] sm:$0xff]  ;;  %v359_v6 = vld [vmem:[%s343_s20 + $0x38] sm:$0xff] }
  0x13   : > { %v354_v2 = vld [vmem:[%s343_s20 + $0x10] sm:$0xff]  ;;  %v381_v3 = vsel %vm362_vm0, %v358_v0, 0.0  ;;  %v375_v4 = vsel %vm362_vm0, %v356_v1, 0.0  ;;  %v357_v7 = vld [vmem:[%s343_s20 + $0x28] sm:$0xff]  ;;  %v355_v8 = vld [vmem:[%s343_s20 + $0x18] sm:$0xff]  ;;  %v384_v9 = vsel %vm362_vm0, %v359_v6, 0.0  ;;  %v1652_v17 = vpop.eup %1651 }
  0x14   : > { %v369_v5 = vsel %vm362_vm0, %v354_v2, 0.0  ;;  %382 = vadd.xlane.f32.xlu2 %v381_v3  ;;  %376 = vadd.xlane.f32.xlu1 %v375_v4  ;;  %v378_v10 = vsel %vm362_vm0, %v357_v7, 0.0  ;;  %v372_v11 = vsel %vm362_vm0, %v355_v8, 0.0  ;;  %v353_v12 = vld [vmem:[%s343_s20 + $0x8] sm:$0xff]  ;;  %v352_v13 = vld [vmem:[%s343_s20] sm:$0xff]  ;;  %v388_v18 = vmul.f32 64.0, %v1652_v17 }
  0x15   : > { %370 = vadd.xlane.f32.xlu0 %v369_v5  ;;  %v366_v14 = vsel %vm362_vm0, %v353_v12, 0.0  ;;  %v363_v15 = vsel %vm362_vm0, %v352_v13, 0.0  ;;  %vm392_vm1 = vweird.f32 %v1652_v17  ;;  %v1602_v4 = vld [vmem:[%s2509_s3 + $0x8] sm:$0xff] }
  0x16   : > { %v389_v19 = vsub.f32 1.0, %v388_v18 }
  0x18   : > { %v390_v20 = vmul.f32 %v1652_v17, %v389_v19 }
  0x1a   : > { %v391_v21 = vadd.f32 %v1652_v17, %v390_v20 }
  0x1c   : > { %385 = vadd.xlane.f32.xlu2 %v384_v9  ;;  %379 = vadd.xlane.f32.xlu1 %v378_v10  ;;  %v1855_v22 = vsel %vm392_vm1, %v1652_v17, %v391_v21 }
  0x1d   : > { %373 = vadd.xlane.f32.xlu0 %v372_v11 }
  0x24   : > { %367 = vadd.xlane.f32.xlu1 %v366_v14 }
  0x25   : > { %364 = vadd.xlane.f32.xlu0 %v363_v15 }
  0x87   : > { %v383_v23 = vpop.xlane.xlu2 %382  ;;  %v377_v24 = vpop.xlane.xlu1 %376 }
  0x88   : > { %v398_v25 = vmul.f32 %v1855_v22, %v377_v24  ;;  %v371_v26 = vpop.xlane.xlu0 %370  ;;  %v400_v39 = vmul.f32 %v1855_v22, %v383_v23 }
  0x89   : > { %v396_v27 = vmul.f32 %v1855_v22, %v371_v26 }
  0x8a   : > { %v1859_v28 = vsub.f32 %v356_v1, %v398_v25  ;;  %v1883_v46 = vsub.f32 %v358_v0, %v400_v39  ;;  %v1603_v0 = vld [vmem:[%s2509_s3 + $0x10] sm:$0xff] }
  0x8b   : > { %v1861_v29 = vsub.f32 %v354_v2, %v396_v27  ;;  %1614 = vmatpush.bf16.msra.mxu3 %v1603_v0  ;;  %625 = vmatpush.bf16.msra.mxu0 %v1603_v0 }
  0x8c   : > { %v414_v30 = vmul.f32 %v1859_v28, %v1859_v28  ;;  %v416_v55 = vmul.f32 %v1883_v46, %v1883_v46 }
  0x8d   : > { %v412_v31 = vmul.f32 %v1861_v29, %v1861_v29 }
  0x8e   : > { %v430_v32 = vsel %vm362_vm0, %v414_v30, 0.0  ;;  %v436_v58 = vsel %vm362_vm0, %v416_v55, 0.0 }
  0x8f   : > { %v386_v33 = vpop.xlane.xlu2 %385  ;;  %v380_v34 = vpop.xlane.xlu1 %379  ;;  %v424_v35 = vsel %vm362_vm0, %v412_v31, 0.0  ;;  %431 = vadd.xlane.f32.xlu1 %v430_v32  ;;  %1615 = vmatpush.bf16.msra.mxu3 %v1602_v4 }
  0x90   : > { %v401_v36 = vmul.f32 %v1855_v22, %v386_v33  ;;  %v399_v37 = vmul.f32 %v1855_v22, %v380_v34  ;;  %425 = vadd.xlane.f32.xlu2 %v424_v35  ;;  %v374_v38 = vpop.xlane.xlu0 %373  ;;  %626 = vmatpush.bf16.msra.mxu0 %v1602_v4 }
  0x91   : > { %v397_v40 = vmul.f32 %v1855_v22, %v374_v38 }
  0x92   : > { %v1873_v41 = vsub.f32 %v359_v6, %v401_v36  ;;  %v1875_v42 = vsub.f32 %v357_v7, %v399_v37  ;;  %v1601_v7 = vld [vmem:[%s2509_s3] sm:$0xff] }
  0x93   : > { %v1877_v43 = vsub.f32 %v355_v8, %v397_v40  ;;  %1616 = vmatpush.bf16.msra.mxu3 %v1601_v7 }
  0x94   : > { %v415_v44 = vmul.f32 %v1875_v42, %v1875_v42  ;;  %v417_v45 = vmul.f32 %v1873_v41, %v1873_v41  ;;  %627 = vmatpush.bf16.msra.mxu0 %v1601_v7 }
  0x95   : > { %v413_v47 = vmul.f32 %v1877_v43, %v1877_v43 }
  0x96   : > { %v433_v48 = vsel %vm362_vm0, %v415_v44, 0.0  ;;  %v439_v49 = vsel %vm362_vm0, %v417_v45, 0.0 }
  0x97   : > { %440 = vadd.xlane.f32.xlu1 %v439_v49  ;;  %v427_v50 = vsel %vm362_vm0, %v413_v47, 0.0  ;;  %v368_v51 = vpop.xlane.xlu1 %367 }
  0x98   : > { %434 = vadd.xlane.f32.xlu2 %v433_v48  ;;  %428 = vadd.xlane.f32.xlu0 %v427_v50  ;;  %v365_v52 = vpop.xlane.xlu0 %364  ;;  %v395_v54 = vmul.f32 %v1855_v22, %v368_v51 }
  0x99   : > { %v394_v53 = vmul.f32 %v1855_v22, %v365_v52 }
  0x9a   : > { %v1896_v57 = vsub.f32 %v353_v12, %v395_v54 }
  0x9b   : > { %v1894_v56 = vsub.f32 %v352_v13, %v394_v53 }
  0x9c   : > { %v411_v61 = vmul.f32 %v1896_v57, %v1896_v57 }
  0x9d   : > { %v410_v59 = vmul.f32 %v1894_v56, %v1894_v56 }
  0x9e   : > { %v421_v62 = vsel %vm362_vm0, %v411_v61, 0.0 }
  0x9f   : > { %v418_v60 = vsel %vm362_vm0, %v410_v59, 0.0 }
  0xa0   : > { %437 = vadd.xlane.f32.xlu0 %v436_v58  ;;  %419 = vadd.xlane.f32.xlu2 %v418_v60  ;;  %v1954_v58 = vld [vmem:[%s2507_s1] ss:$0 sm:$0xff] }
  0xa8   : > { %422 = vadd.xlane.f32.xlu0 %v421_v62 }
 0x102   : > { %v432_v2 = vpop.xlane.xlu1 %431 }
 0x103   : > { %v426_v1 = vpop.xlane.xlu2 %425  ;;  %v446_v6 = vmul.f32 %v432_v2, %v1855_v22 }
 0x104   : > { %v444_v3 = vmul.f32 %v426_v1, %v1855_v22 }
 0x105   : > { %v1919_v8 = vadd.f32 1e-06, %v446_v6 }
 0x106   : > { %v452_v5 = vadd.f32 1e-06, %v444_v3  ;;  %v1966_v3 = vld [vmem:[%s2508_s2] ss:$0 sm:$0xff] }
 0x107   : > { %vm504_vm10 = vweird.f32 %v1919_v8 }
 0x108   : > { %1653 = vrsqrt.f32 %v452_v5  ;;  %vm484_vm3 = vweird.f32 %v452_v5 }
 0x109   : > { %1655 = vrsqrt.f32 %v1919_v8 }
 0x10a   : > { %v441_v18 = vpop.xlane.xlu1 %440 }
 0x10b   : > { %v435_v9 = vpop.xlane.xlu2 %434  ;;  %v429_v10 = vpop.xlane.xlu0 %428  ;;  %v449_v24 = vmul.f32 %v441_v18, %v1855_v22 }
 0x10c   : > { %v447_v11 = vmul.f32 %v435_v9, %v1855_v22  ;;  %v445_v12 = vmul.f32 %v429_v10, %v1855_v22 }
 0x10d   : > { %v1940_v36 = vadd.f32 1e-06, %v449_v24 }
 0x10e   : > { %v1654_v13 = vpop.eup %1653  ;;  %v1924_v14 = vadd.f32 1e-06, %v447_v11  ;;  %v453_v15 = vadd.f32 1e-06, %v445_v12 }
 0x10f   : > { %v479_v16 = vmul.f32 %v1654_v13, %v452_v5  ;;  %v1927_v23 = vpop.eup %1655  ;;  %vm485_vm2 = vweird.f32 %v1654_v13 }
 0x110   : > { %1657 = vrsqrt.f32 %v1924_v14  ;;  %v499_v33 = vmul.f32 %v1927_v23, %v1919_v8  ;;  %vm486_vm4 = vmor %vm484_vm3, %vm485_vm2  ;;  %vm494_vm6 = vweird.f32 %v453_v15  ;;  %vm514_vm8 = vweird.f32 %v1924_v14 }
 0x111   : > { %v480_v17 = vmul.f32 %v1654_v13, %v479_v16  ;;  %1659 = vrsqrt.f32 %v453_v15  ;;  %vm505_vm11 = vweird.f32 %v1927_v23 }
 0x112   : > { %v500_v44 = vmul.f32 %v1927_v23, %v499_v33  ;;  %vm1986_vm15 = vmor %vm504_vm10, %vm505_vm11 }
 0x113   : > { %v481_v19 = vmul.f32 0.5, %v480_v17  ;;  %v420_v20 = vpop.xlane.xlu2 %419  ;;  %v438_v21 = vpop.xlane.xlu0 %437 }
 0x114   : > { %v442_v25 = vmul.f32 %v420_v20, %v1855_v22  ;;  %v448_v27 = vmul.f32 %v438_v21, %v1855_v22  ;;  %v501_v55 = vmul.f32 0.5, %v500_v44 }
 0x115   : > { %v482_v26 = vsub.f32 1.5, %v481_v19 }
 0x116   : > { %v1932_v30 = vpop.eup %1657  ;;  %v1934_v31 = vadd.f32 1e-06, %v442_v25  ;;  %v1943_v38 = vadd.f32 1e-06, %v448_v27 }
 0x117   : > { %v1660_v32 = vpop.eup %1659  ;;  %v509_v34 = vmul.f32 %v1932_v30, %v1924_v14  ;;  %v483_v35 = vmul.f32 %v1654_v13, %v482_v26  ;;  %vm515_vm9 = vweird.f32 %v1932_v30 }
 0x118   : > { %v489_v37 = vmul.f32 %v1660_v32, %v453_v15  ;;  %1661 = vrsqrt.f32 %v1934_v31  ;;  %vm495_vm5 = vweird.f32 %v1660_v32  ;;  %vm464_vm12 = vweird.f32 %v1934_v31  ;;  %vm1978_vm14 = vmor %vm514_vm8, %vm515_vm9 }
 0x119   : > { %v510_v39 = vmul.f32 %v1932_v30, %v509_v34  ;;  %v487_v47 = vsel %vm486_vm4, %v1654_v13, %v483_v35  ;;  %1663 = vrsqrt.f32 %v1940_v36  ;;  %vm496_vm7 = vmor %vm494_vm6, %vm495_vm5  ;;  %vm524_vm5 = vweird.f32 %v1943_v38 }
 0x11a   : > { %v490_v40 = vmul.f32 %v1660_v32, %v489_v37  ;;  %1665 = vrsqrt.f32 %v1943_v38  ;;  %v540_v54 = vmul.f32 %v487_v47, %v1861_v29  ;;  %v502_v29 = vsub.f32 1.5, %v501_v55 }
 0x11b   : > { %v423_v45 = vpop.xlane.xlu0 %422  ;;  %v511_v50 = vmul.f32 0.5, %v510_v39 }
 0x11c   : > { %v491_v48 = vmul.f32 0.5, %v490_v40  ;;  %v443_v49 = vmul.f32 %v423_v45, %v1855_v22  ;;  %v551_v2 = vmul.f32 %v1954_v58, %v540_v54  ;;  %v503_v10 = vmul.f32 %v1927_v23, %v502_v29 }
 0x11d   : > { %v512_v61 = vsub.f32 1.5, %v511_v50 }
 0x11e   : > { %v492_v51 = vsub.f32 1.5, %v491_v48  ;;  %v451_v52 = vadd.f32 1e-06, %v443_v49  ;;  %v1662_v53 = vpop.eup %1661  ;;  %v562_v12 = vadd.f32 %v1966_v3, %v551_v2  ;;  %v507_v24 = vsel %vm1986_vm15, %v1927_v23, %v503_v10 }
 0x11f   : > { %v459_v60 = vmul.f32 %v1662_v53, %v1934_v31  ;;  %v1957_v22 = vpop.eup %1663  ;;  %v513_v5 = vmul.f32 %v1932_v30, %v512_v61  ;;  %vm465_vm13 = vweird.f32 %v1662_v53  ;;  %v542_v33 = vmul.f32 %v507_v24, %v1859_v28 }
 0x120   : > { %v493_v59 = vmul.f32 %v1660_v32, %v492_v51  ;;  %1667 = vrsqrt.f32 %v451_v52  ;;  %v1959_v0 = vpop.eup %1665  ;;  %v529_v8 = vmul.f32 %v1957_v22, %v1940_v36  ;;  %vm1992_vm1 = vmor %vm464_vm12, %vm465_vm13  ;;  %vm474_vm2 = vweird.f32 %v451_v52 }
 0x121   : > { %v460_v63 = vmul.f32 %v1662_v53, %v459_v60  ;;  %v519_v7 = vmul.f32 %v1959_v0, %v1943_v38  ;;  %v517_v19 = vsel %vm1978_vm14, %v1932_v30, %v513_v5  ;;  %v553_v47 = vmul.f32 %v1954_v58, %v542_v33 }
 0x122   : > { %v497_v62 = vsel %vm496_vm7, %v1660_v32, %v493_v59  ;;  %v530_v25 = vmul.f32 %v1957_v22, %v529_v8  ;;  %v543_v31 = vmul.f32 %v517_v19, %v1875_v42  ;;  %vm525_vm6 = vweird.f32 %v1959_v0 }
 0x123   : > { %v541_v1 = vmul.f32 %v497_v62, %v1877_v43  ;;  %v461_v4 = vmul.f32 0.5, %v460_v63  ;;  %v520_v20 = vmul.f32 %v1959_v0, %v519_v7  ;;  %vm534_vm7 = vweird.f32 %v1940_v36  ;;  %vm526_vm9 = vmor %vm524_vm5, %vm525_vm6 }
 0x124   : > { %v531_v23 = vmul.f32 0.5, %v530_v25  ;;  %v554_v37 = vmul.f32 %v1954_v58, %v543_v31  ;;  %vm535_vm8 = vweird.f32 %v1957_v22  ;;  %v564_v50 = vadd.f32 %v1966_v3, %v553_v47 }
 0x125   : > { %v552_v43 = vmul.f32 %v1954_v58, %v541_v1  ;;  %v462_v6 = vsub.f32 1.5, %v461_v4  ;;  %v521_v30 = vmul.f32 0.5, %v520_v20  ;;  %vm536_vm10 = vmor %vm534_vm7, %vm535_vm8 }
 0x126   : > { %v1668_v9 = vpop.eup %1667  ;;  %v532_v42 = vsub.f32 1.5, %v531_v23 }
 0x127   : > { %v563_v13 = vadd.f32 %v1966_v3, %v552_v43  ;;  %v463_v15 = vmul.f32 %v1662_v53, %v462_v6  ;;  %v469_v16 = vmul.f32 %v1668_v9, %v451_v52  ;;  %vm475_vm3 = vweird.f32 %v1668_v9 }
 0x128   : > { %vm476_vm4 = vmor %vm474_vm2, %vm475_vm3  ;;  %v522_v39 = vsub.f32 1.5, %v521_v30  ;;  %v533_v38 = vmul.f32 %v1957_v22, %v532_v42 }
 0x129   : > { %v569_v18 = vpack.c.bf16 %v563_v13, %v562_v12  ;;  %v470_v21 = vmul.f32 %v1668_v9, %v469_v16  ;;  %v467_v26 = vsel %vm1992_vm1, %v1662_v53, %v463_v15 }
 0x12a   : > { %v538_v34 = vmul.f32 %v467_v26, %v1894_v56  ;;  %v565_v56 = vadd.f32 %v1966_v3, %v554_v37  ;;  %v523_v48 = vmul.f32 %v1959_v0, %v522_v39  ;;  %v537_v36 = vsel %vm536_vm10, %v1957_v22, %v533_v38 }
 0x12b   : > { %1556 = vmatmul.msk.bf16.vlgmr.msra.gmra.mxu3 %vm362_vm0, %v569_v18  ;;  %v471_v27 = vmul.f32 0.5, %v470_v21  ;;  %v545_v55 = vmul.f32 %v537_v36, %v1873_v41 }
 0x12c   : > { %v549_v45 = vmul.f32 %v1954_v58, %v538_v34  ;;  %v570_v52 = vpack.c.bf16 %v565_v56, %v564_v50  ;;  %v527_v53 = vsel %vm526_vm9, %v1959_v0, %v523_v48  ;;  %v2039_v0 = vld [vmem:[%s2510_s4] ss:$0 sm:$0xff] }
 0x12d   : > { %v472_v32 = vsub.f32 1.5, %v471_v27  ;;  %v544_v54 = vmul.f32 %v527_v53, %v1883_v46  ;;  %v556_v60 = vmul.f32 %v1954_v58, %v545_v55 }
 0x12f   : > { %v473_v35 = vmul.f32 %v1668_v9, %v472_v32  ;;  %v555_v59 = vmul.f32 %v1954_v58, %v544_v54  ;;  %v567_v62 = vadd.f32 %v1966_v3, %v556_v60 }
 0x131   : > { %v477_v40 = vsel %vm476_vm4, %v1668_v9, %v473_v35  ;;  %v566_v61 = vadd.f32 %v1966_v3, %v555_v59 }
 0x132   : > { %v539_v44 = vmul.f32 %v477_v40, %v1896_v57  ;;  %v560_v57 = vadd.f32 %v1966_v3, %v549_v45 }
 0x133   : > { %v571_v63 = vpack.c.bf16 %v567_v62, %v566_v61 }
 0x134   : > { %v550_v28 = vmul.f32 %v1954_v58, %v539_v44 }
 0x136   : > { %v561_v49 = vadd.f32 %v1966_v3, %v550_v28 }
 0x138   : > { %v568_v51 = vpack.c.bf16 %v561_v49, %v560_v57 }
 0x13a   : > { %1555 = vmatmul.msk.bf16.vlgmr.msra.gmra.mxu0 %vm362_vm0, %v568_v51 }
 0x13b   : > { %1557 = vmatmul.msk.bf16.gmra.mxu3 %vm362_vm0, %v570_v52 }
 0x14b   : > { %1558 = vmatmul.msk.bf16.gmra.mxu3 %vm362_vm0, %v571_v63 }
 0x1ae   : > { %v634_v22 = vpop.f32.mrf.mxu3 }
 0x1af   : > { %v2042_v46 = vadd.f32 %v2039_v0, %v634_v22 }
 0x1b1   : > { %v2045_v41 = vmul.f32 0.70710677, %v2042_v46 }
 0x1b3   : > { %v683_v58 = vand.u32 2147483647, %v2045_v41  ;;  %vm667_vm9 = vcmp.ge.f32.partialorder %v2045_v41, 0.0 }
 0x1b5   : > { %v691_v29 = vmul.f32 0.3275911, %v683_v58  ;;  %v899_v25 = vsub.f32 0.0, %v683_v58 }
 0x1b6   : > { %v636_v1 = vpop.f32.mrf.mxu3 }
 0x1b7   : > { %v699_v2 = vadd.f32 1.0, %v691_v29  ;;  %v2049_v3 = vadd.f32 %v2039_v0, %v636_v1  ;;  %v629_v4 = vpop.f32.mrf.mxu0  ;;  %v907_v39 = vmul.f32 %v899_v25, %v683_v58  ;;  %v2118_v25 = vmul.f32 0.5, %v2042_v46  ;;  %v1608_v46 = vld [vmem:[%s2511_s5 + $0x18] sm:$0xff] }
 0x1b8   : > { %v2055_v5 = vadd.f32 %v2039_v0, %v629_v4  ;;  %1617 = vmatpush.bf16.msra.mxu1 %v1608_v46  ;;  %1025 = vmatpush.bf16.msrb.mxu0 %v1608_v46 }
 0x1b9   : > { %1669 = vrcp.f32 %v699_v2  ;;  %v2052_v43 = vmul.f32 0.70710677, %v2049_v3  ;;  %v746_v17 = vand.u32 2147483648, %v699_v2  ;;  %v744_v21 = vand.u32 2147483647, %v699_v2 }
 0x1ba   : > { %v2059_v7 = vmul.f32 0.70710677, %v2055_v5  ;;  %vm740_vm12 = vweird.f32 %v699_v2  ;;  %v917_v51 = vmul.f32 1.442695, %v907_v39 }
 0x1bb   : > { %v684_v6 = vand.u32 2147483647, %v2052_v43  ;;  %v747_v31 = vor.u32 1.1754944e-38, %v746_v17  ;;  %vm745_vm14 = vcmp.eq.f32.partialorder %v744_v21, 8.507059e+37 }
 0x1bc   : > { %v2062_v8 = vand.u32 2147483647, %v2059_v7 }
 0x1bd   : > { %v692_v9 = vmul.f32 0.3275911, %v684_v6  ;;  %v900_v40 = vsub.f32 0.0, %v684_v6 }
 0x1be   : > { %v639_v10 = vpop.f32.mrf.mxu3  ;;  %v689_v15 = vmul.f32 0.3275911, %v2062_v8 }
 0x1bf   : > { %v1670_v11 = vpop.eup %1669  ;;  %v700_v13 = vadd.f32 1.0, %v692_v9  ;;  %v2065_v14 = vadd.f32 %v2039_v0, %v639_v10  ;;  %v631_v19 = vpop.f32.mrf.mxu0  ;;  %v908_v52 = vmul.f32 %v900_v40, %v684_v6  ;;  %v897_v10 = vsub.f32 0.0, %v2062_v8 }
 0x1c0   : > { %v736_v12 = vmul.f32 %v1670_v11, %v699_v2  ;;  %v2068_v18 = vadd.f32 1.0, %v689_v15  ;;  %vm741_vm11 = vweird.f32 %v1670_v11  ;;  %v2075_v27 = vadd.f32 %v2039_v0, %v631_v19 }
 0x1c1   : > { %1671 = vrcp.f32 %v700_v13  ;;  %v2071_v24 = vmul.f32 0.70710677, %v2065_v14  ;;  %vm742_vm13 = vmor %vm740_vm12, %vm741_vm11  ;;  %v759_v47 = vand.u32 2147483647, %v700_v13  ;;  %v761_v48 = vand.u32 2147483648, %v700_v13 }
 0x1c2   : > { %v737_v16 = vsub.f32 1.0, %v736_v12  ;;  %1673 = vrcp.f32 %v2068_v18  ;;  %v2085_v44 = vmul.f32 0.70710677, %v2075_v27  ;;  %vm755_vm1 = vweird.f32 %v700_v13 }
 0x1c3   : > { %v2078_v30 = vand.u32 2147483647, %v2071_v24  ;;  %vm760_vm2 = vcmp.eq.f32.partialorder %v759_v47, 8.507059e+37  ;;  %v762_v59 = vor.u32 1.1754944e-38, %v761_v48  ;;  %v716_v60 = vand.u32 2147483648, %v2068_v18 }
 0x1c4   : > { %v738_v20 = vmul.f32 %v1670_v11, %v737_v16  ;;  %v2090_v57 = vand.u32 2147483647, %v2085_v44  ;;  %v714_v22 = vand.u32 2147483647, %v2068_v18  ;;  %vm710_vm5 = vweird.f32 %v2068_v18 }
 0x1c5   : > { %v693_v35 = vmul.f32 0.3275911, %v2078_v30  ;;  %v717_v12 = vor.u32 1.1754944e-38, %v716_v60  ;;  %v919_v16 = vmul.f32 1.442695, %v908_v52  ;;  %v905_v40 = vmul.f32 %v897_v10, %v2062_v8 }
 0x1c6   : > { %v739_v26 = vadd.f32 %v1670_v11, %v738_v20  ;;  %v641_v54 = vpop.f32.mrf.mxu3  ;;  %v690_v61 = vmul.f32 0.3275911, %v2090_v57  ;;  %vm715_vm7 = vcmp.eq.f32.partialorder %v714_v22, 8.507059e+37  ;;  %vm668_vm11 = vcmp.ge.f32.partialorder %v2052_v43, 0.0 }
 0x1c7   : > { %v1672_v32 = vpop.eup %1671  ;;  %v2087_v42 = vadd.f32 1.0, %v693_v35  ;;  %v2104_v2 = vadd.f32 %v2039_v0, %v641_v54  ;;  %v1607_v54 = vld [vmem:[%s2511_s5 + $0x10] sm:$0xff] }
 0x1c8   : > { %v743_v33 = vsel %vm742_vm13, %v1670_v11, %v739_v26  ;;  %v751_v23 = vmul.f32 %v1672_v32, %v700_v13  ;;  %v1674_v28 = vpop.eup %1673  ;;  %vm756_vm15 = vweird.f32 %v1672_v32  ;;  %v2101_v1 = vadd.f32 1.0, %v690_v61  ;;  %1618 = vmatpush.bf16.msra.mxu1 %v1607_v54  ;;  %1026 = vmatpush.bf16.msrb.mxu0 %v1607_v54 }
 0x1c9   : > { %v2080_v34 = vsel %vm745_vm14, %v747_v31, %v743_v33  ;;  %v706_v50 = vmul.f32 %v1674_v28, %v2068_v18  ;;  %1675 = vrcp.f32 %v2087_v42  ;;  %vm757_vm3 = vmor %vm755_vm1, %vm756_vm15  ;;  %vm711_vm4 = vweird.f32 %v1674_v28 }
 0x1ca   : > { %v827_v37 = vmul.f32 1.0614054, %v2080_v34  ;;  %v752_v45 = vsub.f32 1.0, %v751_v23  ;;  %vm712_vm6 = vmor %vm710_vm5, %vm711_vm4  ;;  %1677 = vrcp.f32 %v2101_v1  ;;  %v2115_v18 = vmul.f32 0.70710677, %v2104_v2 }
 0x1cb   : > { %v707_v36 = vsub.f32 1.0, %v706_v50  ;;  %v774_v35 = vand.u32 2147483647, %v2087_v42  ;;  %1679 = vpow2.f32 %v917_v51  ;;  %vm770_vm10 = vweird.f32 %v2087_v42 }
 0x1cc   : > { %v835_v56 = vadd.f32 -1.4531521, %v827_v37  ;;  %v753_v49 = vmul.f32 %v1672_v32, %v752_v45  ;;  %1681 = vpow2.f32 %v919_v16  ;;  %v731_v60 = vand.u32 2147483648, %v2101_v1 }
 0x1cd   : > { %v708_v63 = vmul.f32 %v1674_v28, %v707_v36  ;;  %vm775_vm13 = vcmp.eq.f32.partialorder %v774_v35, 8.507059e+37  ;;  %vm725_vm15 = vweird.f32 %v2101_v1  ;;  %v901_v16 = vsub.f32 0.0, %v2078_v30 }
 0x1ce   : > { %v843_v38 = vmul.f32 %v835_v56, %v2080_v34  ;;  %v754_v53 = vadd.f32 %v1672_v32, %v753_v49  ;;  %v898_v35 = vsub.f32 0.0, %v2090_v57 }
 0x1cf   : > { %v1676_v4 = vpop.eup %1675  ;;  %v709_v9 = vadd.f32 %v1674_v28, %v708_v63 }
 0x1d0   : > { %v851_v55 = vadd.f32 1.4214138, %v843_v38  ;;  %v758_v62 = vsel %vm757_vm3, %v1672_v32, %v754_v53  ;;  %v766_v13 = vmul.f32 %v1676_v4, %v2087_v42  ;;  %v776_v32 = vand.u32 2147483648, %v2087_v42  ;;  %v1678_v45 = vpop.eup %1677 }
 0x1d1   : > { %v2099_v29 = vsel %vm760_vm2, %v762_v59, %v758_v62  ;;  %v713_v17 = vsel %vm712_vm6, %v1674_v28, %v709_v9  ;;  %vm771_vm8 = vweird.f32 %v1676_v4  ;;  %v2131_v28 = vand.u32 2147483647, %v2115_v18  ;;  %v1680_v61 = vpop.eup %1679 }
 0x1d2   : > { %v859_v58 = vmul.f32 %v851_v55, %v2080_v34  ;;  %v828_v6 = vmul.f32 1.0614054, %v2099_v29  ;;  %v2112_v20 = vsel %vm715_vm7, %v717_v12, %v713_v17  ;;  %v767_v21 = vsub.f32 1.0, %v766_v13  ;;  %vm772_vm12 = vmor %vm770_vm10, %vm771_vm8 }
 0x1d3   : > { %v825_v31 = vmul.f32 1.0614054, %v2112_v20  ;;  %v777_v48 = vor.u32 1.1754944e-38, %v776_v32  ;;  %v721_v49 = vmul.f32 %v1678_v45, %v2101_v1  ;;  %v694_v42 = vmul.f32 0.3275911, %v2131_v28 }
 0x1d4   : > { %v867_v11 = vadd.f32 -0.28449672, %v859_v58  ;;  %v836_v15 = vadd.f32 -1.4531521, %v828_v6  ;;  %v768_v23 = vmul.f32 %v1676_v4, %v767_v21  ;;  %v729_v59 = vand.u32 2147483647, %v2101_v1  ;;  %v644_v58 = vpop.f32.mrf.mxu3 }
 0x1d5   : > { %v833_v39 = vadd.f32 -1.4531521, %v825_v31  ;;  %v722_v36 = vsub.f32 1.0, %v721_v49  ;;  %vm726_vm14 = vweird.f32 %v1678_v45  ;;  %v913_v9 = vmul.f32 1.442695, %v905_v40  ;;  %v1606_v21 = vld [vmem:[%s2511_s5 + $0x8] sm:$0xff] }
 0x1d6   : > { %v875_v19 = vmul.f32 %v867_v11, %v2080_v34  ;;  %v844_v26 = vmul.f32 %v836_v15, %v2099_v29  ;;  %v769_v47 = vadd.f32 %v1676_v4, %v768_v23  ;;  %vm727_vm1 = vmor %vm725_vm15, %vm726_vm14  ;;  %v732_v17 = vor.u32 1.1754944e-38, %v731_v60  ;;  %1619 = vmatpush.bf16.msra.mxu1 %v1606_v21  ;;  %1027 = vmatpush.bf16.msrb.mxu0 %v1606_v21 }
 0x1d7   : > { %v841_v8 = vmul.f32 %v833_v39, %v2112_v20  ;;  %v723_v22 = vmul.f32 %v1678_v45, %v722_v36  ;;  %vm730_vm2 = vcmp.eq.f32.partialorder %v729_v59, 8.507059e+37  ;;  %v652_v40 = vmul.f32 0.5, %v2049_v3 }
 0x1d8   : > { %v883_v33 = vadd.f32 0.2548296, %v875_v19  ;;  %v852_v37 = vadd.f32 1.4214138, %v844_v26  ;;  %v773_v38 = vsel %vm772_vm12, %v1676_v4, %v769_v47  ;;  %v1682_v4 = vpop.eup %1681  ;;  %v2158_v19 = vadd.f32 %v2039_v0, %v644_v58 }
 0x1d9   : > { %v849_v52 = vadd.f32 1.4214138, %v841_v8  ;;  %v2140_v53 = vsel %vm775_vm13, %v777_v48, %v773_v38  ;;  %v724_v13 = vadd.f32 %v1678_v45, %v723_v22  ;;  %vm665_vm7 = vcmp.ge.f32.partialorder %v2059_v7, 0.0 }
 0x1da   : > { %v860_v56 = vmul.f32 %v852_v37, %v2099_v29  ;;  %v891_v50 = vmul.f32 %v883_v33, %v2080_v34  ;;  %v829_v55 = vmul.f32 1.0614054, %v2140_v53  ;;  %v2148_v34 = vadd.f32 1.0, %v694_v42 }
 0x1db   : > { %v857_v63 = vmul.f32 %v849_v52, %v2112_v20  ;;  %v728_v32 = vsel %vm727_vm1, %v1678_v45, %v724_v13  ;;  %v1777_v37 = vmov -1.0   ;;  %v1605_v45 = vld [vmem:[%s2511_s5] sm:$0xff]  ;;  %v2181_v41 = vmul.f32 0.70710677, %v2158_v19 }
 0x1dc   : > { %v868_v51 = vadd.f32 -0.28449672, %v860_v56  ;;  %v931_v6 = vmul.f32 %v1680_v61, %v891_v50  ;;  %v837_v10 = vadd.f32 -1.4531521, %v829_v55  ;;  %1683 = vrcp.f32 %v2148_v34  ;;  %1620 = vmatpush.bf16.msra.mxu1 %v1605_v45  ;;  %1028 = vmatpush.bf16.msrb.mxu0 %v1605_v45  ;;  %v646_v22 = vpop.f32.mrf.mxu3 }
 0x1dd   : > { %v865_v12 = vadd.f32 -0.28449672, %v857_v63  ;;  %v2165_v23 = vsel %vm730_vm2, %v732_v17, %v728_v32  ;;  %v675_v39 = vsel %vm667_vm9, 1.0, %v1777_v37  ;;  %v676_v56 = vsel %vm668_vm11, 1.0, %v1777_v37 }
 0x1de   : > { %v876_v62 = vmul.f32 %v868_v51, %v2099_v29  ;;  %v845_v15 = vmul.f32 %v837_v10, %v2140_v53  ;;  %v939_v1 = vsub.f32 1.0, %v931_v6  ;;  %v826_v46 = vmul.f32 1.0614054, %v2165_v23 }
 0x1df   : > { %v873_v31 = vmul.f32 %v865_v12, %v2112_v20  ;;  %1685 = vpow2.f32 %v913_v9  ;;  %v909_v42 = vmul.f32 %v901_v16, %v2078_v30  ;;  %v906_v51 = vmul.f32 %v898_v35, %v2090_v57 }
 0x1e0   : > { %v884_v11 = vadd.f32 0.2548296, %v876_v62  ;;  %v853_v33 = vadd.f32 1.4214138, %v845_v15  ;;  %v834_v3 = vadd.f32 -1.4531521, %v826_v46  ;;  %v947_v38 = vmul.f32 %v939_v1, %v675_v39 }
 0x1e1   : > { %v881_v8 = vadd.f32 0.2548296, %v873_v31  ;;  %v2187_v52 = vand.u32 2147483647, %v2181_v41  ;;  %v791_v55 = vand.u32 2147483648, %v2148_v34  ;;  %vm785_vm4 = vweird.f32 %v2148_v34 }
 0x1e2   : > { %v892_v26 = vmul.f32 %v884_v11, %v2099_v29  ;;  %v1684_v47 = vpop.eup %1683  ;;  %v861_v48 = vmul.f32 %v853_v33, %v2140_v53  ;;  %v842_v36 = vmul.f32 %v834_v3, %v2165_v23  ;;  %v789_v61 = vand.u32 2147483647, %v2148_v34 }
 0x1e3   : > { %v781_v50 = vmul.f32 %v1684_v47, %v2148_v34  ;;  %v889_v59 = vmul.f32 %v881_v8, %v2112_v20  ;;  %v695_v30 = vmul.f32 0.3275911, %v2187_v52  ;;  %vm786_vm3 = vweird.f32 %v1684_v47 }
 0x1e4   : > { %v932_v29 = vmul.f32 %v1682_v4, %v892_v26  ;;  %v869_v60 = vadd.f32 -0.28449672, %v861_v48  ;;  %v850_v57 = vadd.f32 1.4214138, %v842_v36  ;;  %v955_v58 = vadd.f32 1.0, %v947_v38  ;;  %vm787_vm5 = vmor %vm785_vm4, %vm786_vm3 }
 0x1e5   : > { %v782_v54 = vsub.f32 1.0, %v781_v50  ;;  %v921_v4 = vmul.f32 1.442695, %v909_v42  ;;  %v915_v6 = vmul.f32 1.442695, %v906_v51  ;;  %v2194_v9 = vadd.f32 1.0, %v695_v30  ;;  %v1686_v10 = vpop.eup %1685 }
 0x1e6   : > { %v940_v49 = vsub.f32 1.0, %v932_v29  ;;  %v858_v11 = vmul.f32 %v850_v57, %v2165_v23  ;;  %v792_v20 = vor.u32 1.1754944e-38, %v791_v55  ;;  %v877_v15 = vmul.f32 %v869_v60, %v2140_v53 }
 0x1e7   : > { %v783_v63 = vmul.f32 %v1684_v47, %v782_v54  ;;  %1687 = vrcp.f32 %v2194_v9  ;;  %v2201_v16 = vadd.f32 %v2039_v0, %v646_v22  ;;  %v929_v17 = vmul.f32 %v1686_v10, %v889_v59 }
 0x1e8   : > { %v948_v43 = vmul.f32 %v940_v49, %v676_v56  ;;  %v866_v21 = vadd.f32 -0.28449672, %v858_v11  ;;  %vm790_vm6 = vcmp.eq.f32.partialorder %v789_v61, 8.507059e+37  ;;  %v963_v31 = vmul.f32 %v955_v58, %v2118_v25 }
 0x1e9   : > { %v784_v12 = vadd.f32 %v1684_v47, %v783_v63  ;;  %1689 = vpow2.f32 %v915_v6  ;;  %v902_v34 = vsub.f32 0.0, %v2131_v28  ;;  %v885_v35 = vadd.f32 0.2548296, %v877_v15 }
 0x1ea   : > { %v956_v62 = vadd.f32 1.0, %v948_v43  ;;  %v874_v1 = vmul.f32 %v866_v21, %v2165_v23  ;;  %v2211_v0 = vmul.f32 0.70710677, %v2201_v16  ;;  %1691 = vpow2.f32 %v921_v4 }
 0x1eb   : > { %v788_v26 = vsel %vm787_vm5, %v1684_v47, %v784_v12  ;;  %v910_v45 = vmul.f32 %v902_v34, %v2131_v28  ;;  %v649_v56 = vmul.f32 0.5, %v2055_v5  ;;  %v673_v50 = vsel %vm665_vm7, 1.0, %v1777_v37 }
 0x1ec   : > { %v964_v13 = vmul.f32 %v956_v62, %v652_v40  ;;  %v2204_v32 = vsel %vm790_vm6, %v792_v20, %v788_v26  ;;  %v937_v40 = vsub.f32 1.0, %v929_v17  ;;  %v882_v29 = vadd.f32 0.2548296, %v874_v1 }
 0x1ed   : > { %v830_v33 = vmul.f32 1.0614054, %v2204_v32  ;;  %v1688_v46 = vpop.eup %1687  ;;  %v2215_v47 = vand.u32 2147483647, %v2211_v0  ;;  %v893_v28 = vmul.f32 %v885_v35, %v2140_v53  ;;  %vm666_vm8 = vcmp.ge.f32.partialorder %v2085_v44, 0.0 }
 0x1ee   : > { %v970_v39 = vpack.c.bf16 %v964_v13, %v963_v31  ;;  %v890_v8 = vmul.f32 %v882_v29, %v2165_v23  ;;  %v796_v49 = vmul.f32 %v1688_v46, %v2194_v9  ;;  %v945_v42 = vmul.f32 %v937_v40, %v673_v50 }
 0x1ef   : > { %v838_v25 = vadd.f32 -1.4531521, %v830_v33  ;;  %v1690_v3 = vpop.eup %1689  ;;  %v696_v38 = vmul.f32 0.3275911, %v2215_v47  ;;  %v923_v23 = vmul.f32 1.442695, %v910_v45  ;;  %vm801_vm9 = vweird.f32 %v1688_v46 }
 0x1f0   : > { %1576 = vmatmul.msk.bf16.vlgmr.msra.gmra.mxu1 %vm362_vm0, %v970_v39  ;;  %v930_v51 = vmul.f32 %v1690_v3, %v890_v8  ;;  %v797_v43 = vsub.f32 1.0, %v796_v49  ;;  %v804_v36 = vand.u32 2147483647, %v2194_v9  ;;  %v806_v54 = vand.u32 2147483648, %v2194_v9  ;;  %v1692_v59 = vpop.eup %1691 }
 0x1f1   : > { %v846_v48 = vmul.f32 %v838_v25, %v2204_v32  ;;  %v2230_v55 = vadd.f32 1.0, %v696_v38  ;;  %v933_v61 = vmul.f32 %v1692_v59, %v893_v28  ;;  %v674_v30 = vsel %vm666_vm8, 1.0, %v1777_v37 }
 0x1f2   : > { %v938_v7 = vsub.f32 1.0, %v930_v51  ;;  %v798_v53 = vmul.f32 %v1688_v46, %v797_v43  ;;  %vm800_vm10 = vweird.f32 %v2194_v9  ;;  %v953_v62 = vadd.f32 1.0, %v945_v42 }
 0x1f3   : > { %v854_v5 = vadd.f32 1.4214138, %v846_v48  ;;  %1693 = vrcp.f32 %v2230_v55  ;;  %vm669_vm11 = vcmp.ge.f32.partialorder %v2071_v24, 0.0  ;;  %v650_v58 = vmul.f32 0.5, %v2075_v27  ;;  %vm802_vm12 = vmor %vm800_vm10, %vm801_vm9 }
 0x1f4   : > { %v946_v57 = vmul.f32 %v938_v7, %v674_v30  ;;  %v799_v22 = vadd.f32 %v1688_v46, %v798_v53  ;;  %1695 = vpow2.f32 %v923_v23  ;;  %v807_v4 = vor.u32 1.1754944e-38, %v806_v54 }
 0x1f5   : > { %v862_v60 = vmul.f32 %v854_v5, %v2204_v32  ;;  %vm805_vm13 = vcmp.eq.f32.partialorder %v804_v36, 8.507059e+37  ;;  %v941_v11 = vsub.f32 1.0, %v933_v61  ;;  %v961_v12 = vmul.f32 %v953_v62, %v649_v56 }
 0x1f6   : > { %v954_v6 = vadd.f32 1.0, %v946_v57  ;;  %v803_v44 = vsel %vm802_vm12, %v1688_v46, %v799_v22  ;;  %v677_v21 = vsel %vm669_vm11, 1.0, %v1777_v37  ;;  %v903_v35 = vsub.f32 0.0, %v2187_v52 }
 0x1f7   : > { %v870_v63 = vadd.f32 -0.28449672, %v862_v60  ;;  %v808_v9 = vsel %vm805_vm13, %v807_v4, %v803_v44  ;;  %v949_v33 = vmul.f32 %v941_v11, %v677_v21  ;;  %vm670_vm14 = vcmp.ge.f32.partialorder %v2115_v18, 0.0 }
 0x1f8   : > { %v962_v20 = vmul.f32 %v954_v6, %v650_v58  ;;  %v831_v15 = vmul.f32 1.0614054, %v808_v9  ;;  %v819_v24 = vand.u32 2147483647, %v2230_v55  ;;  %v821_v25 = vand.u32 2147483648, %v2230_v55 }
 0x1f9   : > { %v878_v10 = vmul.f32 %v870_v63, %v2204_v32  ;;  %v1694_v17 = vpop.eup %1693  ;;  %v957_v56 = vadd.f32 1.0, %v949_v33  ;;  %v678_v8 = vsel %vm670_vm14, 1.0, %v1777_v37  ;;  %v911_v48 = vmul.f32 %v903_v35, %v2187_v52 }
 0x1fa   : > { %v969_v27 = vpack.c.bf16 %v962_v20, %v961_v12  ;;  %v839_v31 = vadd.f32 -1.4531521, %v831_v15  ;;  %v811_v34 = vmul.f32 %v1694_v17, %v2230_v55  ;;  %v1696_v1 = vpop.eup %1695  ;;  %vm816_vm15 = vweird.f32 %v1694_v17 }
 0x1fb   : > { %v886_v13 = vadd.f32 0.2548296, %v878_v10  ;;  %vm815_vm1 = vweird.f32 %v2230_v55  ;;  %v653_v50 = vmul.f32 0.5, %v2065_v14  ;;  %v654_v28 = vmul.f32 0.5, %v2104_v2 }
 0x1fc   : > { %v847_v40 = vmul.f32 %v839_v31, %v808_v9  ;;  %v812_v29 = vsub.f32 1.0, %v811_v34  ;;  %1575 = vmatmul.msk.bf16.vlgmr.msrb.gmra.mxu0 %vm362_vm0, %v969_v27  ;;  %vm817_vm2 = vmor %vm815_vm1, %vm816_vm15  ;;  %v822_v38 = vor.u32 1.1754944e-38, %v821_v25  ;;  %vm820_vm3 = vcmp.eq.f32.partialorder %v819_v24, 8.507059e+37 }
 0x1fd   : > { %v894_v26 = vmul.f32 %v886_v13, %v2204_v32  ;;  %v925_v43 = vmul.f32 1.442695, %v911_v48  ;;  %v904_v36 = vsub.f32 0.0, %v2215_v47  ;;  %v965_v52 = vmul.f32 %v957_v56, %v653_v50 }
 0x1fe   : > { %v855_v32 = vadd.f32 1.4214138, %v847_v40  ;;  %v813_v45 = vmul.f32 %v1694_v17, %v812_v29  ;;  %vm671_vm4 = vcmp.ge.f32.partialorder %v2181_v41, 0.0  ;;  %vm672_vm5 = vcmp.ge.f32.partialorder %v2211_v0, 0.0  ;;  %v2269_v0 = vld [vmem:[%s2512_s6] ss:$0 sm:$0xff] }
 0x1ff   : > { %v934_v39 = vmul.f32 %v1696_v1, %v894_v26  ;;  %1697 = vpow2.f32 %v925_v43  ;;  %v912_v14 = vmul.f32 %v904_v36, %v2215_v47  ;;  %v679_v47 = vsel %vm671_vm4, 1.0, %v1777_v37 }
 0x200   : > { %v863_v18 = vmul.f32 %v855_v32, %v808_v9  ;;  %v814_v3 = vadd.f32 %v1694_v17, %v813_v45  ;;  %v680_v13 = vsel %vm672_vm5, 1.0, %v1777_v37  ;;  %v655_v21 = vmul.f32 0.5, %v2158_v19 }
 0x201   : > { %v942_v46 = vsub.f32 1.0, %v934_v39  ;;  %v927_v62 = vmul.f32 1.442695, %v912_v14  ;;  %v656_v27 = vmul.f32 0.5, %v2201_v16 }
 0x202   : > { %v871_v51 = vadd.f32 -0.28449672, %v863_v18  ;;  %v818_v5 = vsel %vm817_vm2, %v1694_v17, %v814_v3 }
 0x203   : > { %v950_v49 = vmul.f32 %v942_v46, %v678_v8  ;;  %v823_v23 = vsel %vm820_vm3, %v822_v38, %v818_v5  ;;  %1699 = vpow2.f32 %v927_v62 }
 0x204   : > { %v879_v59 = vmul.f32 %v871_v51, %v808_v9  ;;  %v832_v7 = vmul.f32 1.0614054, %v823_v23 }
 0x205   : > { %v958_v42 = vadd.f32 1.0, %v950_v49  ;;  %v1698_v63 = vpop.eup %1697 }
 0x206   : > { %v887_v60 = vadd.f32 0.2548296, %v879_v59  ;;  %v840_v55 = vadd.f32 -1.4531521, %v832_v7 }
 0x207   : > { %v966_v54 = vmul.f32 %v958_v42, %v654_v28 }
 0x208   : > { %v848_v2 = vmul.f32 %v840_v55, %v823_v23  ;;  %v895_v61 = vmul.f32 %v887_v60, %v808_v9 }
 0x209   : > { %v971_v53 = vpack.c.bf16 %v966_v54, %v965_v52  ;;  %v1700_v11 = vpop.eup %1699 }
 0x20a   : > { %v856_v30 = vadd.f32 1.4214138, %v848_v2  ;;  %v935_v22 = vmul.f32 %v1698_v63, %v895_v61 }
 0x20b   : > { %1577 = vmatmul.msk.bf16.gmra.mxu1 %vm362_vm0, %v971_v53 }
 0x20c   : > { %v864_v57 = vmul.f32 %v856_v30, %v823_v23  ;;  %v943_v6 = vsub.f32 1.0, %v935_v22 }
 0x20e   : > { %v872_v58 = vadd.f32 -0.28449672, %v864_v57  ;;  %v951_v12 = vmul.f32 %v943_v6, %v679_v47 }
 0x210   : > { %v880_v4 = vmul.f32 %v872_v58, %v823_v23  ;;  %v959_v15 = vadd.f32 1.0, %v951_v12 }
 0x212   : > { %v888_v10 = vadd.f32 0.2548296, %v880_v4  ;;  %v967_v26 = vmul.f32 %v959_v15, %v655_v21 }
 0x214   : > { %v896_v44 = vmul.f32 %v888_v10, %v823_v23 }
 0x216   : > { %v936_v9 = vmul.f32 %v1700_v11, %v896_v44 }
 0x218   : > { %v944_v20 = vsub.f32 1.0, %v936_v9 }
 0x21a   : > { %v952_v17 = vmul.f32 %v944_v20, %v680_v13 }
 0x21c   : > { %v960_v41 = vadd.f32 1.0, %v952_v17 }
 0x21e   : > { %v968_v31 = vmul.f32 %v960_v41, %v656_v27 }
 0x220   : > { %v972_v34 = vpack.c.bf16 %v968_v31, %v967_v26 }
 0x222   : > { %1578 = vmatmul.msk.bf16.gmra.mxu1 %vm362_vm0, %v972_v34 }
 0x26d   : > { %v1035_v1 = vpop.f32.mrf.mxu1 }
 0x26e   : > { %v2272_v33 = vadd.f32 %v2269_v0, %v1035_v1 }
 0x270   : > { %v2275_v35 = vmul.f32 0.70710677, %v2272_v33 }
 0x272   : > { %v1084_v19 = vand.u32 2147483647, %v2275_v35  ;;  %vm1068_vm3 = vcmp.ge.f32.partialorder %v2275_v35, 0.0 }
 0x274   : > { %v1092_v16 = vmul.f32 0.3275911, %v1084_v19  ;;  %v1300_v14 = vsub.f32 0.0, %v1084_v19 }
 0x275   : > { %v1037_v39 = vpop.f32.mrf.mxu1 }
 0x276   : > { %v1100_v40 = vadd.f32 1.0, %v1092_v16  ;;  %v2279_v29 = vadd.f32 %v2269_v0, %v1037_v39  ;;  %v1308_v44 = vmul.f32 %v1300_v14, %v1084_v19 }
 0x278   : > { %1701 = vrcp.f32 %v1100_v40  ;;  %v2282_v24 = vmul.f32 0.70710677, %v2279_v29  ;;  %v1147_v3 = vand.u32 2147483648, %v1100_v40  ;;  %v1145_v38 = vand.u32 2147483647, %v1100_v40 }
 0x279   : > { %v1030_v46 = vpop.f32.mrf.mxu0  ;;  %vm1141_vm7 = vweird.f32 %v1100_v40 }
 0x27a   : > { %v1085_v25 = vand.u32 2147483647, %v2282_v24  ;;  %v2286_v45 = vadd.f32 %v2269_v0, %v1030_v46  ;;  %v1148_v23 = vor.u32 1.1754944e-38, %v1147_v3  ;;  %vm1146_vm9 = vcmp.eq.f32.partialorder %v1145_v38, 8.507059e+37 }
 0x27b   : > { %vm1069_vm5 = vcmp.ge.f32.partialorder %v2282_v24, 0.0 }
 0x27c   : > { %v1093_v32 = vmul.f32 0.3275911, %v1085_v25  ;;  %v2289_v49 = vmul.f32 0.70710677, %v2286_v45  ;;  %v1301_v57 = vsub.f32 0.0, %v1085_v25 }
 0x27e   : > { %v1702_v56 = vpop.eup %1701  ;;  %v1101_v48 = vadd.f32 1.0, %v1093_v32  ;;  %v2292_v50 = vand.u32 2147483647, %v2289_v49  ;;  %v1309_v20 = vmul.f32 %v1301_v57, %v1085_v25  ;;  %v1318_v32 = vmul.f32 1.442695, %v1308_v44 }
 0x27f   : > { %v1137_v8 = vmul.f32 %v1702_v56, %v1100_v40  ;;  %vm1142_vm6 = vweird.f32 %v1702_v56 }
 0x280   : > { %1703 = vrcp.f32 %v1101_v48  ;;  %v1090_v42 = vmul.f32 0.3275911, %v2292_v50  ;;  %vm1143_vm8 = vmor %vm1141_vm7, %vm1142_vm6  ;;  %v1162_v62 = vand.u32 2147483648, %v1101_v48  ;;  %v1160_v22 = vand.u32 2147483647, %v1101_v48 }
 0x281   : > { %v1138_v18 = vsub.f32 1.0, %v1137_v8  ;;  %v1032_v51 = vpop.f32.mrf.mxu0  ;;  %vm1156_vm11 = vweird.f32 %v1101_v48  ;;  %v1298_v1 = vsub.f32 0.0, %v2292_v50  ;;  %v1320_v8 = vmul.f32 1.442695, %v1309_v20 }
 0x282   : > { %v2296_v43 = vadd.f32 %v2269_v0, %v1032_v51  ;;  %v2298_v36 = vadd.f32 1.0, %v1090_v42  ;;  %v1163_v9 = vor.u32 1.1754944e-38, %v1162_v62  ;;  %vm1161_vm13 = vcmp.eq.f32.partialorder %v1160_v22, 8.507059e+37 }
 0x283   : > { %v1139_v28 = vmul.f32 %v1702_v56, %v1138_v18  ;;  %v1306_v51 = vmul.f32 %v1298_v1, %v2292_v50  ;;  %v1612_v50 = vld [vmem:[%s2513_s7 + $0x18] sm:$0xff] }
 0x284   : > { %1705 = vrcp.f32 %v2298_v36  ;;  %v2305_v53 = vmul.f32 0.70710677, %v2296_v43  ;;  %v1117_v31 = vand.u32 2147483648, %v2298_v36  ;;  %v1115_v25 = vand.u32 2147483647, %v2298_v36  ;;  %1621 = vmatpush.bf16.msra.mxu2 %v1612_v50  ;;  %1426 = vmatpush.bf16.msra.mxu0 %v1612_v50  ;;  %v1609_v50 = vld [vmem:[%s2513_s7] sm:$0xff] }
 0x285   : > { %v1140_v5 = vadd.f32 %v1702_v56, %v1139_v28  ;;  %vm1111_vm15 = vweird.f32 %v2298_v36  ;;  %v2352_v62 = vmul.f32 1.442695, %v1306_v51 }
 0x286   : > { %v1704_v52 = vpop.eup %1703  ;;  %v2315_v6 = vand.u32 2147483647, %v2305_v53  ;;  %v1118_v18 = vor.u32 1.1754944e-38, %v1117_v31  ;;  %vm1116_vm2 = vcmp.eq.f32.partialorder %v1115_v25, 8.507059e+37 }
 0x287   : > { %v1144_v54 = vsel %vm1143_vm8, %v1702_v56, %v1140_v5  ;;  %v1152_v7 = vmul.f32 %v1704_v52, %v1101_v48  ;;  %vm1157_vm10 = vweird.f32 %v1704_v52 }
 0x288   : > { %v2300_v59 = vsel %vm1146_vm9, %v1148_v23, %v1144_v54  ;;  %v1040_v60 = vpop.f32.mrf.mxu1  ;;  %vm1158_vm12 = vmor %vm1156_vm11, %vm1157_vm10  ;;  %v1091_v21 = vmul.f32 0.3275911, %v2315_v6 }
 0x289   : > { %v1228_v55 = vmul.f32 1.0614054, %v2300_v59  ;;  %v1153_v2 = vsub.f32 1.0, %v1152_v7  ;;  %v2308_v61 = vadd.f32 %v2269_v0, %v1040_v60 }
 0x28a   : > { %v1706_v10 = vpop.eup %1705  ;;  %v2328_v16 = vadd.f32 1.0, %v1091_v21 }
 0x28b   : > { %v1236_v30 = vadd.f32 -1.4531521, %v1228_v55  ;;  %v1154_v63 = vmul.f32 %v1704_v52, %v1153_v2  ;;  %v2311_v58 = vmul.f32 0.70710677, %v2308_v61  ;;  %v1107_v13 = vmul.f32 %v1706_v10, %v2298_v36 }
 0x28c   : > { %vm1112_vm14 = vweird.f32 %v1706_v10  ;;  %v1299_v36 = vsub.f32 0.0, %v2315_v6  ;;  %vm1126_vm10 = vweird.f32 %v2328_v16 }
 0x28d   : > { %v1244_v4 = vmul.f32 %v1236_v30, %v2300_v59  ;;  %v1155_v11 = vadd.f32 %v1704_v52, %v1154_v63  ;;  %v1086_v47 = vand.u32 2147483647, %v2311_v58  ;;  %v1108_v26 = vsub.f32 1.0, %v1107_v13  ;;  %vm1113_vm1 = vmor %vm1111_vm15, %vm1112_vm14 }
 0x28f   : > { %v1252_v12 = vadd.f32 1.4214138, %v1244_v4  ;;  %v1159_v15 = vsel %vm1158_vm12, %v1704_v52, %v1155_v11  ;;  %v1094_v17 = vmul.f32 0.3275911, %v1086_v47  ;;  %v1109_v40 = vmul.f32 %v1706_v10, %v1108_v26 }
 0x290   : > { %v2321_v41 = vsel %vm1161_vm13, %v1163_v9, %v1159_v15  ;;  %v1042_v46 = vpop.f32.mrf.mxu1  ;;  %v1302_v5 = vsub.f32 0.0, %v1086_v47 }
 0x291   : > { %v1260_v27 = vmul.f32 %v1252_v12, %v2300_v59  ;;  %v1229_v34 = vmul.f32 1.0614054, %v2321_v41  ;;  %v2326_v19 = vadd.f32 1.0, %v1094_v17  ;;  %v1110_v48 = vadd.f32 %v1706_v10, %v1109_v40  ;;  %v1611_v17 = vld [vmem:[%s2513_s7 + $0x10] sm:$0xff] }
 0x292   : > { %v2337_v38 = vadd.f32 %v2269_v0, %v1042_v46  ;;  %v2355_v63 = vmul.f32 %v1302_v5, %v1086_v47  ;;  %1622 = vmatpush.bf16.msra.mxu2 %v1611_v17  ;;  %1427 = vmatpush.bf16.msra.mxu0 %v1611_v17 }
 0x293   : > { %v1268_v39 = vadd.f32 -0.28449672, %v1260_v27  ;;  %v1237_v56 = vadd.f32 -1.4531521, %v1229_v34  ;;  %1707 = vrcp.f32 %v2326_v19  ;;  %v1114_v42 = vsel %vm1113_vm1, %v1706_v10, %v1110_v48 }
 0x294   : > { %1709 = vrcp.f32 %v2328_v16  ;;  %v2340_v52 = vsel %vm1116_vm2, %v1118_v18, %v1114_v42  ;;  %v1175_v7 = vand.u32 2147483647, %v2326_v19  ;;  %v2347_v2 = vmul.f32 0.70710677, %v2337_v38 }
 0x295   : > { %v1276_v3 = vmul.f32 %v1268_v39, %v2300_v59  ;;  %v1245_v28 = vmul.f32 %v1237_v56, %v2321_v41  ;;  %1711 = vpow2.f32 %v1318_v32  ;;  %v1226_v54 = vmul.f32 1.0614054, %v2340_v52 }
 0x296   : > { %1713 = vpow2.f32 %v1320_v8  ;;  %vm1171_vm4 = vweird.f32 %v2326_v19  ;;  %v1307_v10 = vmul.f32 %v1299_v36, %v2315_v6  ;;  %v2361_v44 = vand.u32 2147483647, %v2347_v2 }
 0x297   : > { %v1253_v23 = vadd.f32 1.4214138, %v1245_v28  ;;  %v1284_v55 = vadd.f32 0.2548296, %v1276_v3  ;;  %v1234_v30 = vadd.f32 -1.4531521, %v1226_v54 }
 0x298   : > { %v1177_v47 = vand.u32 2147483648, %v2326_v19  ;;  %vm2369_vm6 = vcmp.eq.f32.partialorder %v1175_v7, 8.507059e+37  ;;  %v1095_v15 = vmul.f32 0.3275911, %v2361_v44  ;;  %v1132_v39 = vand.u32 2147483648, %v2328_v16  ;;  %v1610_v3 = vld [vmem:[%s2513_s7 + $0x8] sm:$0xff] }
 0x299   : > { %v1708_v60 = vpop.eup %1707  ;;  %v1261_v14 = vmul.f32 %v1253_v23, %v2321_v41  ;;  %v1242_v11 = vmul.f32 %v1234_v30, %v2340_v52  ;;  %v1292_v20 = vmul.f32 %v1284_v55, %v2300_v59  ;;  %v1130_v59 = vand.u32 2147483647, %v2328_v16  ;;  %1623 = vmatpush.bf16.msra.mxu2 %v1610_v3  ;;  %1428 = vmatpush.bf16.msra.mxu0 %v1610_v3 }
 0x29a   : > { %v1167_v57 = vmul.f32 %v1708_v60, %v2326_v19  ;;  %v1710_v22 = vpop.eup %1709  ;;  %vm1172_vm7 = vweird.f32 %v1708_v60  ;;  %v2379_v40 = vadd.f32 1.0, %v1095_v15  ;;  %v1178_v48 = vor.u32 1.1754944e-38, %v1177_v47 }
 0x29b   : > { %v1269_v4 = vadd.f32 -0.28449672, %v1261_v14  ;;  %v1122_v9 = vmul.f32 %v1710_v22, %v2328_v16  ;;  %v1712_v21 = vpop.eup %1711  ;;  %v1250_v27 = vadd.f32 1.4214138, %v1242_v11  ;;  %vm1127_vm8 = vweird.f32 %v1710_v22  ;;  %vm1173_vm9 = vmor %vm1171_vm4, %vm1172_vm7 }
 0x29c   : > { %v1168_v12 = vsub.f32 1.0, %v1167_v57  ;;  %v1714_v34 = vpop.eup %1713  ;;  %v1332_v56 = vmul.f32 %v1712_v21, %v1292_v20  ;;  %1715 = vrcp.f32 %v2379_v40  ;;  %vm1128_vm11 = vmor %vm1126_vm10, %vm1127_vm8  ;;  %v1133_v19 = vor.u32 1.1754944e-38, %v1132_v39 }
 0x29d   : > { %v1277_v13 = vmul.f32 %v1269_v4, %v2321_v41  ;;  %v1123_v31 = vsub.f32 1.0, %v1122_v9  ;;  %v1258_v25 = vmul.f32 %v1250_v27, %v2340_v52  ;;  %v1316_v23 = vmul.f32 1.442695, %v1307_v10  ;;  %1624 = vmatpush.bf16.msra.mxu2 %v1609_v50  ;;  %1429 = vmatpush.bf16.msra.mxu0 %v1609_v50 }
 0x29e   : > { %v1169_v26 = vmul.f32 %v1708_v60, %v1168_v12  ;;  %vm1131_vm12 = vcmp.eq.f32.partialorder %v1130_v59, 8.507059e+37  ;;  %v1052_v30 = vmul.f32 0.5, %v2272_v33  ;;  %v1076_v57 = vsel %vm1068_vm3, 1.0, %v1777_v37 }
 0x29f   : > { %v1285_v1 = vadd.f32 0.2548296, %v1277_v13  ;;  %v1124_v32 = vmul.f32 %v1710_v22, %v1123_v31  ;;  %v1045_v18 = vpop.f32.mrf.mxu1  ;;  %v1266_v28 = vadd.f32 -0.28449672, %v1258_v25  ;;  %v1053_v11 = vmul.f32 0.5, %v2279_v29 }
 0x2a0   : > { %v1170_v46 = vadd.f32 %v1708_v60, %v1169_v26  ;;  %v2400_v16 = vadd.f32 %v2269_v0, %v1045_v18  ;;  %v1077_v12 = vsel %vm1069_vm5, 1.0, %v1777_v37  ;;  %1717 = vpow2.f32 %v2352_v62 }
 0x2a1   : > { %v1293_v8 = vmul.f32 %v1285_v1, %v2321_v41  ;;  %v1125_v51 = vadd.f32 %v1710_v22, %v1124_v32  ;;  %v1274_v36 = vmul.f32 %v1266_v28, %v2340_v52  ;;  %v1322_v29 = vmul.f32 1.442695, %v2355_v63 }
 0x2a2   : > { %v1174_v42 = vsel %vm1173_vm9, %v1708_v60, %v1170_v46  ;;  %v1340_v60 = vsub.f32 1.0, %v1332_v56  ;;  %v1716_v10 = vpop.eup %1715  ;;  %v2415_v9 = vmul.f32 0.70710677, %v2400_v16  ;;  %1719 = vpow2.f32 %v1316_v23 }
 0x2a3   : > { %v1333_v5 = vmul.f32 %v1714_v34, %v1293_v8  ;;  %v2393_v41 = vsel %vm2369_vm6, %v1178_v48, %v1174_v42  ;;  %v1129_v7 = vsel %vm1128_vm11, %v1710_v22, %v1125_v51  ;;  %v1282_v47 = vadd.f32 0.2548296, %v1274_v36 }
 0x2a4   : > { %v1230_v54 = vmul.f32 1.0614054, %v2393_v41  ;;  %v2397_v14 = vsel %vm1131_vm12, %v1133_v19, %v1129_v7  ;;  %v1182_v20 = vmul.f32 %v1716_v10, %v2379_v40  ;;  %v1348_v13 = vmul.f32 %v1340_v60, %v1076_v57 }
 0x2a5   : > { %v1341_v55 = vsub.f32 1.0, %v1333_v5  ;;  %v1227_v22 = vmul.f32 1.0614054, %v2397_v14  ;;  %v1190_v27 = vand.u32 2147483647, %v2379_v40  ;;  %v1290_v26 = vmul.f32 %v1282_v47, %v2340_v52 }
 0x2a6   : > { %v1238_v4 = vadd.f32 -1.4531521, %v1230_v54  ;;  %v1183_v21 = vsub.f32 1.0, %v1182_v20  ;;  %v1192_v62 = vand.u32 2147483648, %v2379_v40  ;;  %v2426_v31 = vand.u32 2147483647, %v2415_v9  ;;  %v1718_v52 = vpop.eup %1717 }
 0x2a7   : > { %v1235_v35 = vadd.f32 -1.4531521, %v1227_v22  ;;  %v1349_v6 = vmul.f32 %v1341_v55, %v1077_v12  ;;  %v1047_v24 = vpop.f32.mrf.mxu1  ;;  %vm1187_vm13 = vweird.f32 %v1716_v10  ;;  %v1356_v39 = vadd.f32 1.0, %v1348_v13 }
 0x2a8   : > { %v1246_v33 = vmul.f32 %v1238_v4, %v2393_v41  ;;  %v2429_v34 = vadd.f32 %v2269_v0, %v1047_v24  ;;  %v1184_v59 = vmul.f32 %v1716_v10, %v1183_v21  ;;  %v1096_v46 = vmul.f32 0.3275911, %v2426_v31  ;;  %v1720_v0 = vpop.eup %1719 }
 0x2a9   : > { %v1243_v17 = vmul.f32 %v1235_v35, %v2397_v14  ;;  %v1357_v25 = vadd.f32 1.0, %v1349_v6  ;;  %vm1186_vm14 = vweird.f32 %v2379_v40  ;;  %v1330_v18 = vmul.f32 %v1718_v52, %v1290_v26 }
 0x2aa   : > { %v1254_v15 = vadd.f32 1.4214138, %v1246_v33  ;;  %v2434_v32 = vmul.f32 0.70710677, %v2429_v34  ;;  %v1185_v48 = vadd.f32 %v1716_v10, %v1184_v59  ;;  %vm1188_vm15 = vmor %vm1186_vm14, %vm1187_vm13  ;;  %vm1191_vm1 = vcmp.eq.f32.partialorder %v1190_v27, 8.507059e+37 }
 0x2ab   : > { %v1251_v1 = vadd.f32 1.4214138, %v1243_v17  ;;  %v1193_v3 = vor.u32 1.1754944e-38, %v1192_v62  ;;  %v1104_v28 = vadd.f32 1.0, %v1096_v46  ;;  %v1365_v23 = vmul.f32 %v1357_v25, %v1053_v11 }
 0x2ac   : > { %v1262_v63 = vmul.f32 %v1254_v15, %v2393_v41  ;;  %v1189_v5 = vsel %vm1188_vm15, %v1716_v10, %v1185_v48  ;;  %v2440_v19 = vand.u32 2147483647, %v2434_v32  ;;  %v1303_v54 = vsub.f32 0.0, %v2361_v44 }
 0x2ad   : > { %v1259_v8 = vmul.f32 %v1251_v1, %v2397_v14  ;;  %v2442_v36 = vsel %vm1191_vm1, %v1193_v3, %v1189_v5  ;;  %1721 = vrcp.f32 %v1104_v28  ;;  %v1364_v60 = vmul.f32 %v1356_v39, %v1052_v30 }
 0x2ae   : > { %v1270_v56 = vadd.f32 -0.28449672, %v1262_v63  ;;  %v1231_v7 = vmul.f32 1.0614054, %v2442_v36  ;;  %vm1066_vm2 = vcmp.ge.f32.partialorder %v2289_v49, 0.0  ;;  %v1338_v55 = vsub.f32 1.0, %v1330_v18 }
 0x2af   : > { %v1267_v51 = vadd.f32 -0.28449672, %v1259_v8  ;;  %1723 = vpow2.f32 %v1322_v29  ;;  %v1097_v22 = vmul.f32 0.3275911, %v2440_v19  ;;  %v1311_v10 = vmul.f32 %v1303_v54, %v2361_v44 }
 0x2b0   : > { %v1278_v42 = vmul.f32 %v1270_v56, %v2393_v41  ;;  %v1239_v4 = vadd.f32 -1.4531521, %v1231_v7  ;;  %v1371_v11 = vpack.c.bf16 %v1365_v23, %v1364_v60  ;;  %v1074_v12 = vsel %vm1066_vm2, 1.0, %v1777_v37 }
 0x2b1   : > { %v1275_v40 = vmul.f32 %v1267_v51, %v2397_v14  ;;  %v2453_v35 = vadd.f32 1.0, %v1097_v22  ;;  %v1346_v49 = vmul.f32 %v1338_v55, %v1074_v12  ;;  %vm1067_vm3 = vcmp.ge.f32.partialorder %v2305_v53, 0.0 }
 0x2b2   : > { %v1286_v50 = vadd.f32 0.2548296, %v1278_v42  ;;  %v1247_v33 = vmul.f32 %v1239_v4, %v2442_v36  ;;  %1596 = vmatmul.msk.bf16.vlgmr.msra.gmra.mxu2 %vm362_vm0, %v1371_v11  ;;  %v1324_v29 = vmul.f32 1.442695, %v1311_v10  ;;  %v1207_v62 = vand.u32 2147483648, %v1104_v28 }
 0x2b3   : > { %v1283_v57 = vadd.f32 0.2548296, %v1275_v40  ;;  %v1722_v30 = vpop.eup %1721  ;;  %1725 = vrcp.f32 %v2453_v35  ;;  %v1354_v27 = vadd.f32 1.0, %v1346_v49  ;;  %v1050_v59 = vmul.f32 0.5, %v2286_v45 }
 0x2b4   : > { %v1294_v20 = vmul.f32 %v1286_v50, %v2393_v41  ;;  %v1255_v6 = vadd.f32 1.4214138, %v1247_v33  ;;  %v1197_v44 = vmul.f32 %v1722_v30, %v1104_v28  ;;  %v1205_v41 = vand.u32 2147483647, %v1104_v28 }
 0x2b5   : > { %v1291_v47 = vmul.f32 %v1283_v57, %v2397_v14  ;;  %v1724_v24 = vpop.eup %1723  ;;  %v1075_v14 = vsel %vm1067_vm3, 1.0, %v1777_v37  ;;  %vm1202_vm4 = vweird.f32 %v1722_v30  ;;  %vm1070_vm5 = vcmp.ge.f32.partialorder %v2311_v58, 0.0 }
 0x2b6   : > { %v1263_v17 = vmul.f32 %v1255_v6, %v2442_v36  ;;  %v1198_v21 = vsub.f32 1.0, %v1197_v44  ;;  %v1334_v26 = vmul.f32 %v1724_v24, %v1294_v20  ;;  %v1051_v39 = vmul.f32 0.5, %v2296_v43 }
 0x2b7   : > { %v1331_v13 = vmul.f32 %v1720_v0, %v1291_v47  ;;  %1727 = vpow2.f32 %v1324_v29  ;;  %vm1201_vm6 = vweird.f32 %v1104_v28  ;;  %v1362_v8 = vmul.f32 %v1354_v27, %v1050_v59 }
 0x2b8   : > { %v1271_v63 = vadd.f32 -0.28449672, %v1263_v17  ;;  %v1199_v1 = vmul.f32 %v1722_v30, %v1198_v21  ;;  %v1342_v48 = vsub.f32 1.0, %v1334_v26  ;;  %vm1203_vm7 = vmor %vm1201_vm6, %vm1202_vm4  ;;  %vm1206_vm8 = vcmp.eq.f32.partialorder %v1205_v41, 8.507059e+37 }
 0x2b9   : > { %v1339_v15 = vsub.f32 1.0, %v1331_v13  ;;  %v1726_v56 = vpop.eup %1725  ;;  %v1208_v0 = vor.u32 1.1754944e-38, %v1207_v62  ;;  %v1078_v43 = vsel %vm1070_vm5, 1.0, %v1777_v37  ;;  %v1304_v5 = vsub.f32 0.0, %v2426_v31 }
 0x2ba   : > { %v1279_v46 = vmul.f32 %v1271_v63, %v2442_v36  ;;  %v1200_v52 = vadd.f32 %v1722_v30, %v1199_v1  ;;  %v1212_v45 = vmul.f32 %v1726_v56, %v2453_v35  ;;  %v1350_v60 = vmul.f32 %v1342_v48, %v1078_v43 }
 0x2bb   : > { %v1347_v53 = vmul.f32 %v1339_v15, %v1075_v14  ;;  %vm1071_vm9 = vcmp.ge.f32.partialorder %v2347_v2, 0.0  ;;  %v1220_v55 = vand.u32 2147483647, %v2453_v35  ;;  %v1222_v50 = vand.u32 2147483648, %v2453_v35 }
 0x2bc   : > { %v1287_v3 = vadd.f32 0.2548296, %v1279_v46  ;;  %v1204_v42 = vsel %vm1203_vm7, %v1722_v30, %v1200_v52  ;;  %v1213_v40 = vsub.f32 1.0, %v1212_v45  ;;  %vm1217_vm10 = vweird.f32 %v1726_v56 }
 0x2bd   : > { %v1355_v25 = vadd.f32 1.0, %v1347_v53  ;;  %v1209_v51 = vsel %vm1206_vm8, %v1208_v0, %v1204_v42  ;;  %v1728_v7 = vpop.eup %1727  ;;  %v1312_v22 = vmul.f32 %v1304_v5, %v2426_v31  ;;  %vm1216_vm11 = vweird.f32 %v2453_v35 }
 0x2be   : > { %v1295_v28 = vmul.f32 %v1287_v3, %v2442_v36  ;;  %v1232_v54 = vmul.f32 1.0614054, %v1209_v51  ;;  %v1214_v58 = vmul.f32 %v1726_v56, %v1213_v40  ;;  %v1079_v12 = vsel %vm1071_vm9, 1.0, %v1777_v37  ;;  %vm1218_vm12 = vmor %vm1216_vm11, %vm1217_vm10  ;;  %v1650_v40 = vld [vmem:[#allocation2] ss:$0 sm:$0xff] }
 0x2bf   : > { %v1363_v18 = vmul.f32 %v1355_v25, %v1051_v39  ;;  %vm1221_vm13 = vcmp.eq.f32.partialorder %v1220_v55, 8.507059e+37  ;;  %v1223_v2 = vor.u32 1.1754944e-38, %v1222_v50  ;;  %v1358_v47 = vadd.f32 1.0, %v1350_v60 }
 0x2c0   : > { %v1335_v57 = vmul.f32 %v1728_v7, %v1295_v28  ;;  %v1240_v4 = vadd.f32 -1.4531521, %v1232_v54  ;;  %v1215_v11 = vadd.f32 %v1726_v56, %v1214_v58  ;;  %v1054_v20 = vmul.f32 0.5, %v2308_v61 }
 0x2c1   : > { %v1370_v23 = vpack.c.bf16 %v1363_v18, %v1362_v8  ;;  %v1326_v13 = vmul.f32 1.442695, %v1312_v22  ;;  %v1305_v31 = vsub.f32 0.0, %v2440_v19  ;;  %v1055_v44 = vmul.f32 0.5, %v2337_v38 }
 0x2c2   : > { %v1343_v10 = vsub.f32 1.0, %v1335_v57  ;;  %v1248_v36 = vmul.f32 %v1240_v4, %v1209_v51  ;;  %v1219_v49 = vsel %vm1218_vm12, %v1726_v56, %v1215_v11  ;;  %v1366_v14 = vmul.f32 %v1358_v47, %v1054_v20 }
 0x2c3   : > { %1595 = vmatmul.msk.bf16.vlgmr.msra.gmra.mxu0 %vm362_vm0, %v1370_v23  ;;  %v1224_v6 = vsel %vm1221_vm13, %v1223_v2, %v1219_v49  ;;  %1729 = vpow2.f32 %v1326_v13  ;;  %v1313_v27 = vmul.f32 %v1305_v31, %v2440_v19  ;;  %vm1072_vm14 = vcmp.ge.f32.partialorder %v2415_v9, 0.0 }
 0x2c4   : > { %v1351_v33 = vmul.f32 %v1343_v10, %v1079_v12  ;;  %v1256_v30 = vadd.f32 1.4214138, %v1248_v36  ;;  %v1233_v35 = vmul.f32 1.0614054, %v1224_v6  ;;  %v1080_v48 = vsel %vm1072_vm14, 1.0, %v1777_v37 }
 0x2c5   : > { %v1328_v63 = vmul.f32 1.442695, %v1313_v27  ;;  %vm1073_vm15 = vcmp.ge.f32.partialorder %v2434_v32, 0.0  ;;  %v1057_v9 = vmul.f32 0.5, %v2429_v34  ;;  %vm1451_vm1 = vcmask 130048  }
 0x2c6   : > { %v1359_v29 = vadd.f32 1.0, %v1351_v33  ;;  %v1264_v24 = vmul.f32 %v1256_v30, %v1209_v51  ;;  %v1241_v21 = vadd.f32 -1.4531521, %v1233_v35  ;;  %v1081_v42 = vsel %vm1073_vm15, 1.0, %v1777_v37 }
 0x2c7   : > { %1731 = vpow2.f32 %v1328_v63 }
 0x2c8   : > { %v1367_v15 = vmul.f32 %v1359_v29, %v1055_v44  ;;  %v1272_v17 = vadd.f32 -0.28449672, %v1264_v24  ;;  %v1249_v41 = vmul.f32 %v1241_v21, %v1224_v6 }
 0x2c9   : > { %v1730_v59 = vpop.eup %1729 }
 0x2ca   : > { %v1280_v26 = vmul.f32 %v1272_v17, %v1209_v51  ;;  %v1372_v62 = vpack.c.bf16 %v1367_v15, %v1366_v14  ;;  %v1257_v53 = vadd.f32 1.4214138, %v1249_v41 }
 0x2cc   : > { %v1288_v61 = vadd.f32 0.2548296, %v1280_v26  ;;  %1597 = vmatmul.msk.bf16.gmra.mxu2 %vm362_vm0, %v1372_v62  ;;  %v1265_v38 = vmul.f32 %v1257_v53, %v1224_v6 }
 0x2cd   : > { %v1732_v8 = vpop.eup %1731 }
 0x2ce   : > { %v1296_v1 = vmul.f32 %v1288_v61, %v1209_v51  ;;  %v1273_v25 = vadd.f32 -0.28449672, %v1265_v38  ;;  %v1056_v51 = vmul.f32 0.5, %v2400_v16 }
 0x2d0   : > { %v1336_v39 = vmul.f32 %v1730_v59, %v1296_v1  ;;  %v1281_v46 = vmul.f32 %v1273_v25, %v1224_v6 }
 0x2d2   : > { %v1344_v52 = vsub.f32 1.0, %v1336_v39  ;;  %v1289_v56 = vadd.f32 0.2548296, %v1281_v46 }
 0x2d4   : > { %v1297_v19 = vmul.f32 %v1289_v56, %v1224_v6  ;;  %v1352_v0 = vmul.f32 %v1344_v52, %v1080_v48 }
 0x2d6   : > { %v1337_v18 = vmul.f32 %v1732_v8, %v1297_v19  ;;  %v1360_v45 = vadd.f32 1.0, %v1352_v0 }
 0x2d8   : > { %v1345_v3 = vsub.f32 1.0, %v1337_v18  ;;  %v1368_v23 = vmul.f32 %v1360_v45, %v1056_v51 }
 0x2da   : > { %v1353_v43 = vmul.f32 %v1345_v3, %v1081_v42 }
 0x2dc   : > { %v1361_v5 = vadd.f32 1.0, %v1353_v43 }
 0x2de   : > { %v1369_v28 = vmul.f32 %v1361_v5, %v1057_v9 }
 0x2e0   : > { %v1373_v54 = vpack.c.bf16 %v1369_v28, %v1368_v23 }
 0x2e2   : > { %1598 = vmatmul.msk.bf16.gmra.mxu2 %vm362_vm0, %v1373_v54 }
 0x335   : > { %v1436_v32 = vpop.f32.mrf.mxu2 }
 0x336   : > { %v1437_v37 = vadd.f32 %v1650_v40, %v1436_v32 }
 0x338   : > { %1454 = vst.msk [vmem:[%s349_s19 + $0x10] sm:$0xff] %vm1451_vm1, %v1437_v37 }
 0x33d   : > { %v1438_v34 = vpop.f32.mrf.mxu2 }
 0x33e   : > { %v1439_v60 = vadd.f32 %v1650_v40, %v1438_v34 }
 0x340   : > { %v1431_v16 = vpop.f32.mrf.mxu0  ;;  %1455 = vst.msk [vmem:[%s349_s19 + $0x18] sm:$0xff] %vm1451_vm1, %v1439_v60 }
 0x341   : > { %v1432_v7 = vadd.f32 %v1650_v40, %v1431_v16 }
 0x343   : > { %1452 = vst.msk [vmem:[%s349_s19] sm:$0xff] %vm1451_vm1, %v1432_v7 }
 0x348   : > { %v1433_v55 = vpop.f32.mrf.mxu0 }
 0x349   : > { %v1434_v50 = vadd.f32 %v1650_v40, %v1433_v55 }
 0x34b   : > { %1453 = vst.msk [vmem:[%s349_s19 + $0x8] sm:$0xff] %vm1451_vm1, %v1434_v50 }
 0x34f   : > { %v1441_v57 = vpop.f32.mrf.mxu2 }
 0x350   : > { %v1442_v4 = vadd.f32 %v1650_v40, %v1441_v57 }
 0x352   : > { %1456 = vst.msk [vmem:[%s349_s19 + $0x20] sm:$0xff] %vm1451_vm1, %v1442_v4 }
 0x357   : > { %v1443_v58 = vpop.f32.mrf.mxu2 }
 0x358   : > { %v1444_v22 = vadd.f32 %v1650_v40, %v1443_v58 }
 0x35a   : > { %1457 = vst.msk [vmem:[%s349_s19 + $0x28] sm:$0xff] %vm1451_vm1, %v1444_v22 }
 0x365   : > { %v1446_v10 = vpop.f32.mrf.mxu2 }
 0x366   : > { %v1447_v36 = vadd.f32 %v1650_v40, %v1446_v10 }
 0x368   : > { %1458 = vst.msk [vmem:[%s349_s19 + $0x30] sm:$0xff] %vm1451_vm1, %v1447_v36 }
 0x36d   : > { %v1448_v11 = vpop.f32.mrf.mxu2 }
 0x36e   : > { %v1449_v12 = vadd.f32 %v1650_v40, %v1448_v11 }
 0x370   : > { %1459 = vst.msk [vmem:[%s349_s19 + $0x38] sm:$0xff] %vm1451_vm1, %v1449_v12 }
 0x371 PF: > { %s20_s30 = sadd.s32 1, %s1773_s30  }
 0x372   : > { %p17_p7 = scmp.ge.s32.totalorder %s20_s30, 4  }
 0x374   :  { %19 = sbr.rel (!%p17_p7) target bundleno = 1 (0x1), region = 91 }
 0x379   :  { %1482 = vsyncpa [#allocation3], 1 }
 0x37a   :  { %1484 = vsyncpa [#allocation3 + $0x1], 1 }

// kernel: _lambda_.4
= control target key start
LH: loop header
LB: loop body
LE: loop exit
PB: predicated region body
PF: predicated region fallthrough
CT: control target
= control target key end

     0   :  { %s1369_s30 = smov 0   ;;  %s1371_s10 = smov 0   ;;  %s1687_s0 = inlined_call_operand.vmem [shape: f32[128,16], index: 0, kind: input, shape index: {}]   ;;  %s1688_s1 = inlined_call_operand.vmem [shape: bf16[16,16], index: 1, kind: input, shape index: {}]   ;;  %s1689_s2 = inlined_call_operand.vmem [shape: f32[1,16], index: 2, kind: input, shape index: {}]   ;;  %s1690_s3 = inlined_call_operand.vmem [shape: bf16[16,256], index: 3, kind: input, shape index: {}]   ;;  %s1691_s4 = inlined_call_operand.vmem [shape: f32[1,256], index: 4, kind: input, shape index: {}]   ;;  %s1692_s5 = inlined_call_operand.vmem [shape: bf16[4,64], index: 5, kind: input, shape index: {}]   ;;  %s1693_s6 = inlined_call_operand.vmem [shape: bf16[64,64], index: 6, kind: input, shape index: {}]   ;;  %s1694_s7 = inlined_call_operand.vmem [shape: f32[1,64], index: 7, kind: input, shape index: {}]   ;;  %s1695_s8 = inlined_call_operand.vmem [shape: f32[64,64], index: 8, kind: input, shape index: {}]   ;;  %s1696_s9 = inlined_call_operand.vmem [shape: f32[128,64], index: 9, kind: output, shape index: {}]  }
   0x1   :  { %s1373_s11 = smov 0   ;;  %s1375_s12 = smov 0  }
   0x2   :  { %s1377_s13 = smov 0  }
   0x3 LB: > { %s28_s14 = sadd.s32 1, %s1302_s11  ;;  %s31_s15 = sadd.s32 1, %s1306_s12  ;;  %s1310_s13 = sphi %s1377_s13, %s19_s13   ;;  %s1306_s12 = sphi %s1375_s12, %s1700_s12   ;;  %s1302_s11 = sphi %s1373_s11, %s1699_s11   ;;  %s1298_s10 = sphi %s1371_s10, %s1698_s10   ;;  %s1294_s30 = sphi %s1369_s30, %s1697_s30  }
   0x4   : > { %p29_p0 = scmp.ge.s32.totalorder %s28_s14, 2  ;;  %p1121_p1 = scmp.ge.s32.totalorder %s1310_s13, 1 }
   0x5   : > { %p323_p2 = scmp.lt.s32.totalorder %s1310_s13, 5 }
   0x6   : > { %s1702_s14 = smov (%p29_p0, %s28_s14), 0  ;;  %s1704_s15 = smov (!%p29_p0, %s31_s15), %s1306_s12 }
   0x7   : > { %p324_p3 = pnand %p1121_p1, %p323_p2  ;;  %p33_p4 = scmp.ge.s32.totalorder %s1704_s15, 2 }
   0x8   : > { %s1122_s18 = sshll.u32 (!%p324_p3), %s1298_s10, 1  ;;  %s1312_s27 = smov (!%p324_p3), 116  }
   0x9   : > { %s1706_s15 = smov (%p33_p4, %s1704_s15), 0  ;;  %327 = sbr.rel (%p324_p3) target bundleno = 1084 (0x43c), region = 56 }
   0xa   : > { %s369_s19 = sadd.s32 (!%p324_p3), %s1294_s30, %s1122_s18  ;;  %s1313_s28 = smov (!%p324_p3), 120  }
   0xb   : > { %s1123_s20 = sshll.u32 (!%p324_p3), %s369_s19, 2  ;;  %s1314_s29 = smov (!%p324_p3), 124  }
   0xc   : > { %p371_p5 = scmp.lt.s32.totalorder (!%p324_p3), %s1123_s20, 15  ;;  %s1315_s10 = smov (!%p324_p3), 8  }
   0xd   : > { %s1316_s16 = smov (!%p324_p3), 4   ;;  %s1317_s17 = smov (!%p324_p3), 12  }
   0xe   : > { %v1176_v0 = vld [vmem:[%s1688_s1] sm:$0xff]  ;;  %s1708_s20 = smov (!%p371_p5, %s1123_s20), 15  ;;  %vm413_vm0 = vcmask 130048   ;;  %vm713_vm1 = vcmask 1041408   ;;  %vm706_vm2 = vcmask 31744   ;;  %vm989_vm3 = vcmask 523264  }
   0xf   : > { %427 = vmatpush.bf16.msra.mxu0 %v1176_v0  ;;  %s1124_s21 = sshll.u32 %s1708_s20, 3  ;;  %v1230_v7 = vld [vmem:[%s1689_s2] ss:$0 sm:$0xff]  ;;  %s1125_s19 = sshll.u32 %s1294_s30, 2 }
  0x10   : > { %s374_s24 = scalar_lea.vmem %s1687_s0, %s1124_s21  ;;  %p379_p6 = scmp.lt.s32.totalorder %s1125_s19, 7 }
  0x11   : > { %v395_v1 = vld [vmem:[%s374_s24] sm:$0xff]  ;;  %v396_v2 = vld [vmem:[%s374_s24 + $0x8] sm:$0xff]  ;;  %v397_v4 = vld [vmem:[%s374_s24 + $0x10] sm:$0xff] }
  0x12   : > { %v1413_v3 = vpack.c.bf16 %v396_v2, %v395_v1  ;;  %v398_v5 = vld [vmem:[%s374_s24 + $0x18] sm:$0xff]  ;;  %s1710_s19 = smov (!%p379_p6, %s1125_s19), 7  ;;  %s390_s24 = scalar_lea.vmem %s1696_s9, %s1124_s21 }
  0x13   : > { %v1417_v6 = vpack.c.bf16 %v398_v5, %v397_v4  ;;  %s1126_s22 = sshll.u32 %s1710_s19, 3 }
  0x14   : > { %1134 = vmatmul.msk.bf16.vlgmr.msra.gmra.mxu0 %vm413_vm0, %v1413_v3 }
  0x24   : > { %1135 = vmatmul.msk.bf16.gmra.mxu0 %vm413_vm0, %v1417_v6 }
  0x91   : > { %v429_v8 = vpop.f32.mrf.mxu0 }
  0x92   : > { %v1424_v9 = vadd.f32 %v1230_v7, %v429_v8 }
  0x94   : > { %531 = vrot.lane.b32.xlu2 %v1424_v9, %s1312_s27  ;;  %515 = vrot.lane.b32.xlu1 %v1424_v9, %s1313_s28 }
  0x95   : > { %499 = vrot.lane.b32.xlu0 %v1424_v9, %s1314_s29 }
  0x99   : > { %v431_v10 = vpop.f32.mrf.mxu0 }
  0x9a   : > { %v1432_v11 = vadd.f32 %v1230_v7, %v431_v10 }
  0x9c   : > { %533 = vrot.lane.b32.xlu2 %v1432_v11, %s1312_s27  ;;  %517 = vrot.lane.b32.xlu1 %v1432_v11, %s1313_s28 }
  0x9d   : > { %501 = vrot.lane.b32.xlu0 %v1432_v11, %s1314_s29 }
  0xa1   : > { %v434_v12 = vpop.f32.mrf.mxu0 }
  0xa2   : > { %v1440_v13 = vadd.f32 %v1230_v7, %v434_v12 }
  0xa4   : > { %519 = vrot.lane.b32.xlu2 %v1440_v13, %s1313_s28 }
  0xa5   : > { %503 = vrot.lane.b32.xlu0 %v1440_v13, %s1314_s29 }
  0xa9   : > { %v436_v14 = vpop.f32.mrf.mxu0 }
  0xaa   : > { %v1446_v15 = vadd.f32 %v1230_v7, %v436_v14 }
  0xac   : > { %537 = vrot.lane.b32.xlu2 %v1446_v15, %s1312_s27  ;;  %505 = vrot.lane.b32.xlu1 %v1446_v15, %s1314_s29 }
  0xad   : > { %521 = vrot.lane.b32.xlu0 %v1446_v15, %s1313_s28 }
  0xb4   : > { %535 = vrot.lane.b32.xlu1 %v1440_v13, %s1312_s27 }
  0xee   : > { %v532_v16 = vpop.permute.xlu2 %531 }
  0xf6   : > { %v534_v22 = vpop.permute.xlu2 %533 }
  0xfe   : > { %v520_v29 = vpop.permute.xlu2 %519 }
 0x106   : > { %v516_v17 = vpop.permute.xlu1 %515  ;;  %v538_v35 = vpop.permute.xlu2 %537 }
 0x107   : > { %v500_v18 = vpop.permute.xlu0 %499 }
 0x108   : > { %v511_v19 = vmax.f32 %v1424_v9, %v500_v18 }
 0x10a   : > { %v527_v20 = vmax.f32 %v511_v19, %v516_v17 }
 0x10c   : > { %v1457_v21 = vmax.f32 %v527_v20, %v532_v16 }
 0x10e   : > { %587 = vrot.lane.b32.xlu2 %v1457_v21, %s1315_s10  ;;  %563 = vrot.lane.b32.xlu0 %v1457_v21, %s1316_s16  ;;  %v518_v25 = vpop.permute.xlu1 %517 }
 0x10f   : > { %v502_v23 = vpop.permute.xlu0 %501 }
 0x110   : > { %v512_v24 = vmax.f32 %v1432_v11, %v502_v23 }
 0x112   : > { %v528_v26 = vmax.f32 %v512_v24, %v518_v25 }
 0x114   : > { %v1464_v27 = vmax.f32 %v528_v26, %v534_v22 }
 0x116   : > { %613 = vrot.lane.b32.xlu2 %v1464_v27, %s1317_s17  ;;  %589 = vrot.lane.b32.xlu0 %v1464_v27, %s1315_s10 }
 0x117   : > { %565 = vrot.lane.b32.xlu1 %v1464_v27, %s1316_s16  ;;  %v504_v28 = vpop.permute.xlu0 %503 }
 0x118   : > { %v513_v33 = vmax.f32 %v1440_v13, %v504_v28 }
 0x11a   : > { %v529_v37 = vmax.f32 %v513_v33, %v520_v29  ;;  %v548_v33 = vsub.f32 %v1432_v11, %v1464_v27 }
 0x11e   : > { %v506_v30 = vpop.permute.xlu1 %505 }
 0x11f   : > { %611 = vrot.lane.b32.xlu1 %v1457_v21, %s1317_s17  ;;  %v514_v31 = vmax.f32 %v1446_v15, %v506_v30  ;;  %v522_v32 = vpop.permute.xlu0 %521 }
 0x121   : > { %v530_v34 = vmax.f32 %v514_v31, %v522_v32  ;;  %v699_v32 = vld [vmem:[%s1692_s5] sm:$0x3] }
 0x123   : > { %v1476_v36 = vmax.f32 %v530_v34, %v538_v35  ;;  %v1557_v34 = vsel %vm713_vm1, %v699_v32, 0  ;;  %v547_v35 = vsub.f32 %v1424_v9, %v1457_v21 }
 0x124   : > { %724 = vmatpush.bf16.msra.mxu3 %v1557_v34  ;;  %785 = vmatpush.bf16.msrb.mxu0 %v1557_v34 }
 0x126   : > { %v536_v38 = vpop.permute.xlu1 %535 }
 0x127   : > { %569 = vrot.lane.b32.xlu1 %v1476_v36, %s1316_s16  ;;  %v1480_v39 = vmax.f32 %v529_v37, %v536_v38  ;;  %v1138_v37 = vld [vmem:[%s1690_s3] sm:$0xf]  ;;  %v1178_v38 = vld [vmem:[%s1690_s3 + $0x4] sm:$0xf0] }
 0x129   : > { %591 = vrot.lane.b32.xlu2 %v1480_v39, %s1315_s10  ;;  %567 = vrot.lane.b32.xlu0 %v1480_v39, %s1316_s16 }
 0x12f   : > { %615 = vrot.lane.b32.xlu1 %v1480_v39, %s1317_s17 }
 0x131   : > { %617 = vrot.lane.b32.xlu2 %v1476_v36, %s1317_s17  ;;  %593 = vrot.lane.b32.xlu0 %v1476_v36, %s1315_s10 }
 0x168   : > { %v588_v40 = vpop.permute.xlu2 %587 }
 0x169   : > { %v599_v41 = vsub.f32 %v1424_v9, %v588_v40  ;;  %v1139_v40 = vor.u32 %v1178_v38, %v1138_v37 }
 0x16b   : > { %v603_v42 = vmul.f32 1.442695, %v599_v41  ;;  %v553_v41 = vmul.f32 1.442695, %v548_v33  ;;  %464 = vmatpush.bf16.msra.mxu1 %v1139_v40  ;;  %v1177_v33 = vld [vmem:[%s1690_s3 + $0x4] sm:$0xf] }
 0x16d   : > { %1232 = vpow2.f32 %v603_v42 }
 0x16e   : > { %1144 = vmatmul.msk.bf16.vlgmr.msra.gmra.mxu1 %vm413_vm0, %v1413_v3 }
 0x16f   : > { %858 = vmatpush.bf16.msrb.mxu1 %v1557_v34 }
 0x170   : > { %v614_v43 = vpop.permute.xlu2 %613 }
 0x171   : > { %v624_v44 = vsub.f32 %v1432_v11, %v614_v43 }
 0x173   : > { %v1494_v45 = vpop.eup %1232  ;;  %v629_v46 = vmul.f32 1.442695, %v624_v44 }
 0x174   : > { %659 = vrot.lane.b32.xlu2 %v1494_v45, %s1313_s28 }
 0x175   : > { %1234 = vpow2.f32 %v629_v46 }
 0x17b   : > { %v1498_v47 = vpop.eup %1234 }
 0x17c   : > { %681 = vrot.lane.b32.xlu2 %v1498_v47, %s1312_s27 }
 0x17e   : > { %1145 = vmatmul.msk.bf16.gmra.mxu1 %vm413_vm0, %v1417_v6 }
 0x180   : > { %v564_v48 = vpop.permute.xlu0 %563 }
 0x181   : > { %v575_v49 = vsub.f32 %v1424_v9, %v564_v48 }
 0x183   : > { %v579_v50 = vmul.f32 1.442695, %v575_v49  ;;  %v592_v51 = vpop.permute.xlu2 %591 }
 0x184   : > { %v601_v52 = vsub.f32 %v1440_v13, %v592_v51  ;;  %v549_v51 = vsub.f32 %v1440_v13, %v1480_v39 }
 0x185   : > { %1236 = vpow2.f32 %v579_v50 }
 0x186   : > { %v607_v53 = vmul.f32 1.442695, %v601_v52 }
 0x188   : > { %1238 = vpow2.f32 %v607_v53  ;;  %v590_v54 = vpop.permute.xlu0 %589 }
 0x189   : > { %v566_v55 = vpop.permute.xlu1 %565  ;;  %v600_v56 = vsub.f32 %v1432_v11, %v590_v54 }
 0x18a   : > { %v576_v57 = vsub.f32 %v1432_v11, %v566_v55  ;;  %v551_v11 = vmul.f32 1.442695, %v547_v35  ;;  %v555_v55 = vmul.f32 1.442695, %v549_v51  ;;  %v1140_v35 = vld [vmem:[%s1690_s3 + $0x8] sm:$0xf0] }
 0x18b   : > { %v1506_v58 = vpop.eup %1236  ;;  %v605_v59 = vmul.f32 1.442695, %v600_v56  ;;  %v618_v60 = vpop.permute.xlu2 %617  ;;  %v1143_v37 = vor.u32 %v1177_v33, %v1140_v35 }
 0x18c   : > { %v581_v61 = vmul.f32 1.442695, %v576_v57  ;;  %v626_v62 = vsub.f32 %v1446_v15, %v618_v60  ;;  %639 = vrot.lane.b32.xlu0 %v1506_v58, %s1314_s29  ;;  %v550_v57 = vsub.f32 %v1446_v15, %v1476_v36 }
 0x18d   : > { %1240 = vpow2.f32 %v605_v59  ;;  %483 = vmatpush.bf16.msra.mxu2 %v1143_v37 }
 0x18e   : > { %v1511_v63 = vpop.eup %1238  ;;  %1242 = vpow2.f32 %v581_v61  ;;  %v633_v0 = vmul.f32 1.442695, %v626_v62  ;;  %v557_v60 = vmul.f32 1.442695, %v550_v57 }
 0x18f   : > { %663 = vrot.lane.b32.xlu2 %v1511_v63, %s1313_s28 }
 0x190   : > { %1244 = vpow2.f32 %v633_v0  ;;  %1146 = vmatmul.msk.bf16.vlgmr.msra.gmra.mxu2 %vm413_vm0, %v1413_v3 }
 0x191   : > { %v612_v1 = vpop.permute.xlu1 %611  ;;  %915 = vmatpush.bf16.msrb.mxu2 %v1557_v34 }
 0x192   : > { %v623_v2 = vsub.f32 %v1424_v9, %v612_v1 }
 0x193   : > { %v1516_v4 = vpop.eup %1240 }
 0x194   : > { %v1518_v5 = vpop.eup %1242  ;;  %v627_v7 = vmul.f32 1.442695, %v623_v2  ;;  %661 = vrot.lane.b32.xlu0 %v1516_v4, %s1313_s28 }
 0x195   : > { %641 = vrot.lane.b32.xlu1 %v1518_v5, %s1314_s29 }
 0x196   : > { %v1524_v8 = vpop.eup %1244  ;;  %1246 = vpow2.f32 %v627_v7 }
 0x197   : > { %685 = vrot.lane.b32.xlu2 %v1524_v8, %s1312_s27 }
 0x199   : > { %v570_v10 = vpop.permute.xlu1 %569 }
 0x19a   : > { %v578_v12 = vsub.f32 %v1446_v15, %v570_v10 }
 0x19b   : > { %v568_v14 = vpop.permute.xlu0 %567 }
 0x19c   : > { %v1529_v16 = vpop.eup %1246  ;;  %v585_v17 = vmul.f32 1.442695, %v578_v12  ;;  %v577_v18 = vsub.f32 %v1440_v13, %v568_v14 }
 0x19d   : > { %679 = vrot.lane.b32.xlu1 %v1529_v16, %s1312_s27 }
 0x19e   : > { %1248 = vpow2.f32 %v585_v17  ;;  %v583_v19 = vmul.f32 1.442695, %v577_v18 }
 0x1a0   : > { %1250 = vpow2.f32 %v583_v19  ;;  %1147 = vmatmul.msk.bf16.gmra.mxu2 %vm413_vm0, %v1417_v6 }
 0x1a1   : > { %v616_v20 = vpop.permute.xlu1 %615 }
 0x1a2   : > { %v625_v22 = vsub.f32 %v1440_v13, %v616_v20 }
 0x1a3   : > { %v594_v23 = vpop.permute.xlu0 %593 }
 0x1a4   : > { %v1535_v24 = vpop.eup %1248  ;;  %v631_v25 = vmul.f32 1.442695, %v625_v22  ;;  %v602_v26 = vsub.f32 %v1446_v15, %v594_v23 }
 0x1a5   : > { %645 = vrot.lane.b32.xlu1 %v1535_v24, %s1314_s29 }
 0x1a6   : > { %v1540_v28 = vpop.eup %1250  ;;  %1252 = vpow2.f32 %v631_v25  ;;  %v609_v29 = vmul.f32 1.442695, %v602_v26 }
 0x1a7   : > { %643 = vrot.lane.b32.xlu0 %v1540_v28, %s1314_s29 }
 0x1a8   : > { %1254 = vpow2.f32 %v609_v29 }
 0x1a9   : > { %1256 = vpow2.f32 %v553_v41 }
 0x1aa   : > { %1258 = vpow2.f32 %v551_v11 }
 0x1ac   : > { %v1544_v30 = vpop.eup %1252 }
 0x1ad   : > { %683 = vrot.lane.b32.xlu1 %v1544_v30, %s1312_s27 }
 0x1ae   : > { %v1548_v31 = vpop.eup %1254 }
 0x1af   : > { %665 = vrot.lane.b32.xlu0 %v1548_v31, %s1313_s28  ;;  %v1257_v9 = vpop.eup %1256 }
 0x1b0   : > { %v1259_v44 = vpop.eup %1258 }
 0x1ce   : > { %v660_v42 = vpop.permute.xlu2 %659 }
 0x1d6   : > { %v682_v50 = vpop.permute.xlu2 %681 }
 0x1e9   : > { %v664_v62 = vpop.permute.xlu2 %663 }
 0x1f1   : > { %v686_v20 = vpop.permute.xlu2 %685 }
 0x1fe   : > { %v640_v27 = vpop.permute.xlu0 %639 }
 0x1ff   : > { %v651_v48 = vadd.f32 %v1259_v44, %v640_v27 }
 0x201   : > { %v671_v53 = vadd.f32 %v660_v42, %v651_v48 }
 0x206   : > { %v662_v46 = vpop.permute.xlu0 %661 }
 0x207   : > { %v642_v21 = vpop.permute.xlu1 %641 }
 0x208   : > { %v652_v43 = vadd.f32 %v1257_v9, %v642_v21 }
 0x20a   : > { %v672_v49 = vadd.f32 %v662_v46, %v652_v43 }
 0x20c   : > { %v692_v52 = vadd.f32 %v682_v50, %v672_v49  ;;  %v466_v50 = vpop.f32.mrf.mxu1 }
 0x20e   : > { %1260 = vrcp.f32 %v692_v52 }
 0x20f   : > { %v680_v54 = vpop.permute.xlu1 %679 }
 0x210   : > { %v691_v56 = vadd.f32 %v680_v54, %v671_v53 }
 0x212   : > { %1262 = vrcp.f32 %v691_v56 }
 0x213   : > { %1264 = vpow2.f32 %v555_v55 }
 0x214   : > { %v1261_v59 = vpop.eup %1260  ;;  %1266 = vpow2.f32 %v557_v60 }
 0x215   : > { %880 = vrot.lane.b32.xlu1 %v1261_v59, %s1317_s17  ;;  %v701_v36 = vmul.f32 %v1261_v59, %v1257_v9 }
 0x217   : > { %v646_v61 = vpop.permute.xlu1 %645 }
 0x218   : > { %v1263_v13 = vpop.eup %1262 }
 0x219   : > { %v1265_v39 = vpop.eup %1264  ;;  %748 = vrot.lane.b32.xlu2 %v1263_v13, %s1316_s16  ;;  %878 = vrot.lane.b32.xlu0 %v1263_v13, %s1317_s17  ;;  %v644_v0 = vpop.permute.xlu0 %643  ;;  %v700_v15 = vmul.f32 %v1263_v13, %v1259_v44 }
 0x21a   : > { %v653_v1 = vadd.f32 %v1265_v39, %v644_v0  ;;  %v1267_v10 = vpop.eup %1266 }
 0x21b   : > { %v704_v2 = vpack.c.bf16 %v701_v36, %v700_v15  ;;  %v654_v14 = vadd.f32 %v1267_v10, %v646_v61  ;;  %v468_v61 = vpop.f32.mrf.mxu1 }
 0x21c   : > { %v673_v7 = vadd.f32 %v664_v62, %v653_v1  ;;  %v485_v62 = vpop.f32.mrf.mxu2 }
 0x21d   : > { %821 = vrot.lane.b32.xlu1 %v1263_v13, %s1315_s10  ;;  %1148 = vmatmul.msk.bf16.vlgmr.msra.gmra.mxu3 %vm706_vm2, %v704_v2 }
 0x21f   : > { %v684_v12 = vpop.permute.xlu1 %683 }
 0x220   : > { %v693_v17 = vadd.f32 %v684_v12, %v673_v7 }
 0x221   : > { %823 = vrot.lane.b32.xlu2 %v1261_v59, %s1315_s10  ;;  %750 = vrot.lane.b32.xlu0 %v1261_v59, %s1316_s16  ;;  %v666_v18 = vpop.permute.xlu0 %665 }
 0x222   : > { %1268 = vrcp.f32 %v693_v17  ;;  %v674_v19 = vadd.f32 %v666_v18, %v654_v14 }
 0x224   : > { %v694_v22 = vadd.f32 %v686_v20, %v674_v19  ;;  %v487_v15 = vpop.f32.mrf.mxu2 }
 0x226   : > { %1270 = vrcp.f32 %v694_v22  ;;  %v1182_v22 = vld [vmem:[%s1693_s6 + $0x18] sm:$0xff] }
 0x227   : > { %1000 = vmatpush.bf16.msrb.mxu3 %v1182_v22 }
 0x228   : > { %v1269_v23 = vpop.eup %1268 }
 0x229   : > { %752 = vrot.lane.b32.xlu2 %v1269_v23, %s1316_s16  ;;  %882 = vrot.lane.b32.xlu0 %v1269_v23, %s1317_s17  ;;  %v702_v26 = vmul.f32 %v1269_v23, %v1265_v39 }
 0x22c   : > { %v1271_v25 = vpop.eup %1270  ;;  %v490_v2 = vpop.f32.mrf.mxu2 }
 0x22d   : > { %884 = vrot.lane.b32.xlu1 %v1271_v25, %s1317_s17  ;;  %v703_v29 = vmul.f32 %v1271_v25, %v1267_v10  ;;  %s1318_s17 = smov 64  }
 0x22f   : > { %v705_v32 = vpack.c.bf16 %v703_v29, %v702_v26  ;;  %v1179_v26 = vld [vmem:[%s1693_s6] sm:$0xff] }
 0x231   : > { %827 = vrot.lane.b32.xlu2 %v1271_v25, %s1315_s10  ;;  %754 = vrot.lane.b32.xlu0 %v1271_v25, %s1316_s16  ;;  %v1180_v25 = vld [vmem:[%s1693_s6 + $0x8] sm:$0xff] }
 0x232   : > { %1149 = vmatmul.msk.bf16.gmra.mxu3 %vm706_vm2, %v705_v32 }
 0x234   : > { %v492_v14 = vpop.f32.mrf.mxu2 }
 0x235   : > { %825 = vrot.lane.b32.xlu1 %v1269_v23, %s1315_s10  ;;  %v1181_v23 = vld [vmem:[%s1693_s6 + $0x10] sm:$0xff] }
 0x236   : > { %1001 = vmatpush.bf16.msrb.mxu3 %v1181_v23 }
 0x23a   : > { %1002 = vmatpush.bf16.msrb.mxu3 %v1180_v25 }
 0x23e   : > { %1003 = vmatpush.bf16.msrb.mxu3 %v1179_v26 }
 0x273   : > { %v749_v38 = vpop.permute.xlu2 %748 }
 0x274   : > { %v760_v6 = vmul.f32 %v1506_v58, %v749_v38  ;;  %v441_v58 = vld [vmem:[%s1691_s4] sm:$0x3] }
 0x275   : > { %v443_v55 = vperm.slane %v441_v58, 0  ;;  %v444_v39 = vperm.slane %v441_v58, 1 }
 0x277   : > { %v467_v59 = vadd.f32 %v466_v50, %v443_v55  ;;  %v488_v1 = vadd.f32 %v487_v15, %v444_v39  ;;  %v1631_v7 = vadd.f32 %v490_v2, %v444_v39  ;;  %v493_v17 = vadd.f32 %v492_v14, %v444_v39 }
 0x27b   : > { %v824_v42 = vpop.permute.xlu2 %823 }
 0x27c   : > { %v834_v43 = vmul.f32 %v1516_v4, %v824_v42 }
 0x287   : > { %v881_v40 = vpop.permute.xlu1 %880 }
 0x288   : > { %v891_v11 = vmul.f32 %v1498_v47, %v881_v40 }
 0x28b   : > { %v879_v41 = vpop.permute.xlu0 %878 }
 0x28c   : > { %v890_v27 = vmul.f32 %v1529_v16, %v879_v41  ;;  %v753_v16 = vpop.permute.xlu2 %752 }
 0x28e   : > { %v894_v9 = vpack.c.bf16 %v891_v11, %v890_v27 }
 0x28f   : > { %v822_v21 = vpop.permute.xlu1 %821 }
 0x290   : > { %v833_v34 = vmul.f32 %v1494_v45, %v822_v21  ;;  %898 = vrot.lane.b32.xlu0 %v894_v9, %s1312_s27 }
 0x292   : > { %v837_v3 = vpack.c.bf16 %v834_v43, %v833_v34 }
 0x293   : > { %v751_v44 = vpop.permute.xlu0 %750 }
 0x294   : > { %v761_v46 = vmul.f32 %v1518_v5, %v751_v44  ;;  %841 = vrot.lane.b32.xlu2 %v837_v3, %s1313_s28  ;;  %v762_v5 = vmul.f32 %v1540_v28, %v753_v16  ;;  %v828_v54 = vpop.permute.xlu2 %827  ;;  %v471_v28 = vpop.f32.mrf.mxu1 }
 0x295   : > { %v1624_v13 = vadd.f32 %v471_v28, %v443_v55 }
 0x296   : > { %v764_v47 = vpack.c.bf16 %v761_v46, %v760_v6 }
 0x298   : > { %768 = vrot.lane.b32.xlu1 %v764_v47, %s1314_s29 }
 0x29b   : > { %v883_v48 = vpop.permute.xlu0 %882 }
 0x29c   : > { %v892_v4 = vmul.f32 %v1544_v30, %v883_v48  ;;  %v836_v30 = vmul.f32 %v1548_v31, %v828_v54  ;;  %v473_v0 = vpop.f32.mrf.mxu1 }
 0x29d   : > { %v1628_v36 = vadd.f32 %v473_v0, %v443_v55 }
 0x29f   : > { %v885_v49 = vpop.permute.xlu1 %884 }
 0x2a0   : > { %v893_v45 = vmul.f32 %v1524_v8, %v885_v49  ;;  %v726_v29 = vpop.f32.mrf.mxu3 }
 0x2a1   : > { %v736_v41 = vmul.f32 %v726_v29, %v467_v59 }
 0x2a2   : > { %v895_v51 = vpack.c.bf16 %v893_v45, %v892_v4 }
 0x2a3   : > { %v755_v52 = vpop.permute.xlu0 %754 }
 0x2a4   : > { %v763_v53 = vmul.f32 %v1535_v24, %v755_v52  ;;  %900 = vrot.lane.b32.xlu0 %v895_v51, %s1312_s27  ;;  %v469_v24 = vadd.f32 %v468_v61, %v443_v55 }
 0x2a6   : > { %v765_v56 = vpack.c.bf16 %v763_v53, %v762_v5 }
 0x2a7   : > { %v826_v57 = vpop.permute.xlu1 %825 }
 0x2a8   : > { %770 = vrot.lane.b32.xlu1 %v765_v56, %s1314_s29  ;;  %v835_v8 = vmul.f32 %v1511_v63, %v826_v57  ;;  %v486_v63 = vadd.f32 %v485_v62, %v444_v39  ;;  %v728_v38 = vpop.f32.mrf.mxu3 }
 0x2a9   : > { %v737_v21 = vmul.f32 %v728_v38, %v469_v24 }
 0x2aa   : > { %v838_v60 = vpack.c.bf16 %v836_v30, %v835_v8 }
 0x2ac   : > { %843 = vrot.lane.b32.xlu2 %v838_v60, %s1313_s28  ;;  %801 = vrot.lane.b32.xlu0 %v467_v59, %s1318_s17 }
 0x2b0   : > { %803 = vrot.lane.b32.xlu1 %v469_v24, %s1318_s17 }
 0x2b4   : > { %931 = vrot.lane.b32.xlu2 %v486_v63, %s1318_s17  ;;  %933 = vrot.lane.b32.xlu0 %v488_v1, %s1318_s17 }
 0x2b5   : > { %v731_v44 = vpop.f32.mrf.mxu3 }
 0x2b6   : > { %v738_v56 = vmul.f32 %v731_v44, %v1624_v13 }
 0x2b8   : > { %805 = vrot.lane.b32.xlu1 %v1624_v13, %s1318_s17 }
 0x2bc   : > { %807 = vrot.lane.b32.xlu2 %v1628_v36, %s1318_s17  ;;  %935 = vrot.lane.b32.xlu0 %v1631_v7, %s1318_s17 }
 0x2bd   : > { %v733_v57 = vpop.f32.mrf.mxu3 }
 0x2be   : > { %v739_v24 = vmul.f32 %v733_v57, %v1628_v36  ;;  %v1231_v36 = vld [vmem:[%s1694_s7] ss:$0 sm:$0xff] }
 0x2c0   : > { %937 = vrot.lane.b32.xlu1 %v493_v17, %s1318_s17  ;;  %s382_s17 = scalar_lea.vmem %s1695_s8, %s1126_s22 }
 0x2c1   : > { %v1016_v22 = vld [vmem:[%s382_s17 + $0x8] sm:$0xff]  ;;  %v1017_v29 = vld [vmem:[%s382_s17 + $0x10] sm:$0xff] }
 0x2ee   : > { %v842_v31 = vpop.permute.xlu2 %841 }
 0x2ef   : > { %1152 = vmatmul.msk.bf16.vlgmr.msrb.gmra.mxu1 %vm706_vm2, %v842_v31 }
 0x302   : > { %v899_v10 = vpop.permute.xlu0 %898 }
 0x303   : > { %1154 = vmatmul.msk.bf16.vlgmr.msrb.gmra.mxu2 %vm706_vm2, %v899_v10 }
 0x306   : > { %v844_v12 = vpop.permute.xlu2 %843 }
 0x307   : > { %1153 = vmatmul.msk.bf16.gmra.mxu1 %vm706_vm2, %v844_v12 }
 0x30a   : > { %v769_v18 = vpop.permute.xlu1 %768 }
 0x30b   : > { %1150 = vmatmul.msk.bf16.vlgmr.msrb.gmra.mxu0 %vm706_vm2, %v769_v18 }
 0x30e   : > { %v932_v16 = vpop.permute.xlu2 %931 }
 0x316   : > { %v901_v19 = vpop.permute.xlu0 %900  ;;  %v808_v30 = vpop.permute.xlu2 %807 }
 0x317   : > { %1155 = vmatmul.msk.bf16.gmra.mxu2 %vm706_vm2, %v901_v19 }
 0x31a   : > { %v771_v20 = vpop.permute.xlu1 %770 }
 0x31b   : > { %1151 = vmatmul.msk.bf16.gmra.mxu0 %vm706_vm2, %v771_v20 }
 0x31e   : > { %v802_v37 = vpop.permute.xlu0 %801 }
 0x322   : > { %v804_v42 = vpop.permute.xlu1 %803 }
 0x326   : > { %v934_v48 = vpop.permute.xlu0 %933 }
 0x32a   : > { %v806_v52 = vpop.permute.xlu1 %805 }
 0x32e   : > { %v936_v60 = vpop.permute.xlu0 %935 }
 0x332   : > { %v938_v62 = vpop.permute.xlu1 %937 }
 0x36c   : > { %v860_v32 = vpop.f32.mrf.mxu1 }
 0x36d   : > { %v870_v43 = vmul.f32 %v860_v32, %v486_v63 }
 0x374   : > { %v862_v11 = vpop.f32.mrf.mxu1 }
 0x375   : > { %v871_v6 = vmul.f32 %v862_v11, %v488_v1 }
 0x384   : > { %v865_v49 = vpop.f32.mrf.mxu1 }
 0x385   : > { %v872_v28 = vmul.f32 %v865_v49, %v1631_v7 }
 0x386   : > { %v917_v33 = vpop.f32.mrf.mxu2 }
 0x387   : > { %v943_v4 = vmul.f32 %v932_v16, %v917_v33 }
 0x388   : > { %v787_v35 = vpop.f32.mrf.mxu0 }
 0x389   : > { %v813_v40 = vmul.f32 %v802_v37, %v787_v35  ;;  %v1018_v37 = vld [vmem:[%s382_s17 + $0x18] sm:$0xff] }
 0x38b   : > { %v817_v27 = vadd.f32 %v813_v40, %v736_v41 }
 0x38c   : > { %v867_v8 = vpop.f32.mrf.mxu1 }
 0x38d   : > { %v874_v46 = vadd.f32 %v870_v43, %v817_v27  ;;  %v873_v31 = vmul.f32 %v867_v8, %v493_v17  ;;  %v1015_v17 = vld [vmem:[%s382_s17] sm:$0xff] }
 0x38e   : > { %v919_v3 = vpop.f32.mrf.mxu2 }
 0x38f   : > { %v944_v45 = vmul.f32 %v934_v48, %v919_v3  ;;  %v947_v51 = vadd.f32 %v943_v4, %v874_v46 }
 0x390   : > { %v789_v9 = vpop.f32.mrf.mxu0 }
 0x391   : > { %v814_v34 = vmul.f32 %v804_v42, %v789_v9 }
 0x393   : > { %v818_v47 = vadd.f32 %v814_v34, %v737_v21 }
 0x395   : > { %v875_v50 = vadd.f32 %v871_v6, %v818_v47 }
 0x397   : > { %v948_v58 = vadd.f32 %v944_v45, %v875_v50 }
 0x398   : > { %v792_v5 = vpop.f32.mrf.mxu0 }
 0x399   : > { %v951_v53 = vpack.c.bf16 %v948_v58, %v947_v51  ;;  %v815_v55 = vmul.f32 %v806_v52, %v792_v5 }
 0x39a   : > { %v922_v54 = vpop.f32.mrf.mxu2 }
 0x39b   : > { %1172 = vmatmul.msk.bf16.vlgmr.msrb.gmra.mxu3 %vm989_vm3, %v951_v53  ;;  %v819_v59 = vadd.f32 %v815_v55, %v738_v56  ;;  %v945_v15 = vmul.f32 %v936_v60, %v922_v54 }
 0x39d   : > { %v876_v0 = vadd.f32 %v872_v28, %v819_v59 }
 0x39f   : > { %v949_v10 = vadd.f32 %v945_v15, %v876_v0 }
 0x3a0   : > { %v794_v61 = vpop.f32.mrf.mxu0 }
 0x3a1   : > { %v816_v39 = vmul.f32 %v808_v30, %v794_v61 }
 0x3a2   : > { %v924_v63 = vpop.f32.mrf.mxu2 }
 0x3a3   : > { %v820_v1 = vadd.f32 %v816_v39, %v739_v24  ;;  %v946_v13 = vmul.f32 %v938_v62, %v924_v63 }
 0x3a5   : > { %v877_v2 = vadd.f32 %v873_v31, %v820_v1 }
 0x3a7   : > { %v950_v12 = vadd.f32 %v946_v13, %v877_v2 }
 0x3a9   : > { %v952_v14 = vpack.c.bf16 %v950_v12, %v949_v10 }
 0x3ab   : > { %1173 = vmatmul.msk.bf16.gmra.mxu3 %vm989_vm3, %v952_v14 }
 0x41e   : > { %v1005_v7 = vpop.f32.mrf.mxu3 }
 0x41f   : > { %v1006_v18 = vadd.f32 %v1231_v36, %v1005_v7 }
 0x421   : > { %v1019_v19 = vadd.f32 %v1015_v17, %v1006_v18 }
 0x423   : > { %1023 = vst.msk [vmem:[%s390_s24] sm:$0xff] %vm989_vm3, %v1019_v19 }
 0x426   : > { %v1007_v20 = vpop.f32.mrf.mxu3 }
 0x427   : > { %v1008_v23 = vadd.f32 %v1231_v36, %v1007_v20 }
 0x429   : > { %v1020_v25 = vadd.f32 %v1016_v22, %v1008_v23 }
 0x42b   : > { %1024 = vst.msk [vmem:[%s390_s24 + $0x8] sm:$0xff] %vm989_vm3, %v1020_v25 }
 0x42e   : > { %v1010_v26 = vpop.f32.mrf.mxu3 }
 0x42f   : > { %v1011_v32 = vadd.f32 %v1231_v36, %v1010_v26 }
 0x431   : > { %v1021_v33 = vadd.f32 %v1017_v29, %v1011_v32 }
 0x433   : > { %1025 = vst.msk [vmem:[%s390_s24 + $0x10] sm:$0xff] %vm989_vm3, %v1021_v33 }
 0x436   : > { %v1012_v35 = vpop.f32.mrf.mxu3 }
 0x437   : > { %v1013_v38 = vadd.f32 %v1231_v36, %v1012_v35 }
 0x439   : > { %v1022_v40 = vadd.f32 %v1018_v37, %v1013_v38 }
 0x43b   : > { %1026 = vst.msk [vmem:[%s390_s24 + $0x18] sm:$0xff] %vm989_vm3, %v1022_v40 }
 0x43c PF: > { %s19_s13 = sadd.s32 1, %s1310_s13   ;;  %s1697_s30 = smov %s1302_s11 }
 0x43d   : > { %p16_p7 = scmp.ge.s32.totalorder %s19_s13, 6   ;;  %s1698_s10 = smov %s1306_s12 }
 0x43e   : > { %s1699_s11 = smov %s1702_s14  ;;  %s1700_s12 = smov %s1706_s15 }
 0x43f   :  { %18 = sbr.rel (!%p16_p7) target bundleno = 3 (0x3), region = 89 }

// kernel: _lambda_.5
= control target key start
LH: loop header
LB: loop body
LE: loop exit
PB: predicated region body
PF: predicated region fallthrough
CT: control target
= control target key end

     0   :  { %s3868_s18 = smov 0   ;;  %s5419_s0 = inlined_call_operand.vmem [shape: f32[128,64], index: 0, kind: input, shape index: {}]   ;;  %s5420_s1 = inlined_call_operand.vmem [shape: f32[1,64], index: 1, kind: input, shape index: {}]   ;;  %s5421_s2 = inlined_call_operand.vmem [shape: f32[1,64], index: 2, kind: input, shape index: {}]   ;;  %s5422_s3 = inlined_call_operand.vmem [shape: bf16[64,192], index: 3, kind: input, shape index: {}]   ;;  %s5423_s4 = inlined_call_operand.vmem [shape: f32[1,192], index: 4, kind: input, shape index: {}]   ;;  %s5424_s5 = inlined_call_operand.vmem [shape: bf16[64,64], index: 5, kind: input, shape index: {}]   ;;  %s5425_s6 = inlined_call_operand.vmem [shape: f32[1,64], index: 6, kind: input, shape index: {}]   ;;  %s5426_s7 = inlined_call_operand.vmem [shape: f32[1,64], index: 7, kind: input, shape index: {}]   ;;  %s5427_s8 = inlined_call_operand.vmem [shape: f32[1,64], index: 8, kind: input, shape index: {}]   ;;  %s5428_s9 = inlined_call_operand.vmem [shape: f32[1,64], index: 9, kind: input, shape index: {}]   ;;  %s5429_s10 = inlined_call_operand.vmem [shape: bf16[64,256], index: 10, kind: input, shape index: {}]   ;;  %s5430_s11 = inlined_call_operand.vmem [shape: f32[1,256], index: 11, kind: input, shape index: {}]   ;;  %s5431_s12 = inlined_call_operand.vmem [shape: bf16[256,64], index: 12, kind: input, shape index: {}]   ;;  %s5432_s13 = inlined_call_operand.vmem [shape: f32[1,64], index: 13, kind: input, shape index: {}]   ;;  %s5433_s14 = inlined_call_operand.vmem [shape: f32[1,64], index: 14, kind: input, shape index: {}]   ;;  %s5434_s15 = inlined_call_operand.vmem [shape: f32[128,64], index: 15, kind: output, shape index: {}]  }
   0x1 LB: > { %s3197_s19 = sadd.s32 4294967295, %s3777_s18   ;;  %p3201_p0 = scmp.ge.s32.totalorder %s3777_s18, 1  ;;  %s3777_s18 = sphi %s3868_s18, %s25_s18  }
   0x2   : > { %p438_p1 = scmp.lt.s32.totalorder %s3777_s18, 3 }
   0x4   : > { %p439_p2 = pnand %p3201_p0, %p438_p1 }
   0x5   : > { %s3202_s20 = sshll.u32 (!%p439_p2), %s3197_s19, 3  ;;  %s3780_s30 = smov (!%p439_p2), 64  }
   0x6   : > { %442 = sbr.rel (%p439_p2) target bundleno = 2722 (0xaa2), region = 80  ;;  %p487_p3 = scmp.lt.s32.totalorder (!%p439_p2), %s3202_s20, 15 }
   0x7   : > { %s3781_s16 = smov (!%p439_p2), 112   ;;  %s3782_s17 = smov (!%p439_p2), 80  }
   0x8   : > { %s3783_s19 = smov (!%p439_p2), 48   ;;  %s3784_s22 = smov (!%p439_p2), 32  }
   0x9   : > { %s3785_s23 = smov (!%p439_p2), 16   ;;  %s3786_s25 = smov (!%p439_p2), 96  }
   0xb   : > { %s5442_s20 = smov (!%p487_p3, %s3202_s20), 15  ;;  %vm509_vm0 = vcmask 523264   ;;  %v3779_v16 = vmov 64.0   ;;  %v3232_v63 = vld [vmem:[%s5422_s3 + $0x30] sm:$0xf] }
   0xc   : > { %s3203_s21 = sshll.u32 %s5442_s20, 3  ;;  %3537 = vrcp.f32 %v3779_v16 }
   0xd   : > { %s3884_s24 = scalar_lea.vmem %s5419_s0, %s3203_s21 }
   0xe   : > { %v503_v0 = vld [vmem:[%s3884_s24 + $0x20] sm:$0xff]  ;;  %v501_v1 = vld [vmem:[%s3884_s24 + $0x10] sm:$0xff]  ;;  %v504_v6 = vld [vmem:[%s3884_s24 + $0x28] sm:$0xff] }
   0xf   : > { %v499_v2 = vld [vmem:[%s3884_s24] sm:$0xff]  ;;  %v522_v3 = vsel %vm509_vm0, %v503_v0, 0.0  ;;  %v516_v4 = vsel %vm509_vm0, %v501_v1, 0.0  ;;  %v502_v7 = vld [vmem:[%s3884_s24 + $0x18] sm:$0xff]  ;;  %v500_v8 = vld [vmem:[%s3884_s24 + $0x8] sm:$0xff]  ;;  %v525_v9 = vsel %vm509_vm0, %v504_v6, 0.0 }
  0x10   : > { %v510_v5 = vsel %vm509_vm0, %v499_v2, 0.0  ;;  %523 = vadd.xlane.f32.xlu2 %v522_v3  ;;  %517 = vadd.xlane.f32.xlu1 %v516_v4  ;;  %v519_v10 = vsel %vm509_vm0, %v502_v7, 0.0  ;;  %v513_v11 = vsel %vm509_vm0, %v500_v8, 0.0  ;;  %v506_v12 = vld [vmem:[%s3884_s24 + $0x38] sm:$0xff]  ;;  %v505_v13 = vld [vmem:[%s3884_s24 + $0x30] sm:$0xff] }
  0x11   : > { %511 = vadd.xlane.f32.xlu0 %v510_v5  ;;  %v531_v14 = vsel %vm509_vm0, %v506_v12, 0.0  ;;  %v528_v15 = vsel %vm509_vm0, %v505_v13, 0.0  ;;  %v3234_v3 = vld [vmem:[%s5422_s3 + $0x38] sm:$0xf0]  ;;  %v3224_v5 = vld [vmem:[%s5422_s3 + $0x20] sm:$0xf] }
  0x12   : > { %v3538_v17 = vpop.eup %3537 }
  0x13   : > { %v535_v18 = vmul.f32 64.0, %v3538_v17  ;;  %vm539_vm1 = vweird.f32 %v3538_v17 }
  0x15   : > { %v536_v19 = vsub.f32 1.0, %v535_v18 }
  0x17   : > { %v537_v20 = vmul.f32 %v3538_v17, %v536_v19 }
  0x18   : > { %526 = vadd.xlane.f32.xlu2 %v525_v9  ;;  %520 = vadd.xlane.f32.xlu1 %v519_v10  ;;  %v3226_v9 = vld [vmem:[%s5422_s3 + $0x28] sm:$0xf0] }
  0x19   : > { %514 = vadd.xlane.f32.xlu0 %v513_v11  ;;  %v538_v21 = vadd.f32 %v3538_v17, %v537_v20 }
  0x1b   : > { %v3902_v22 = vsel %vm539_vm1, %v3538_v17, %v538_v21  ;;  %v3218_v17 = vld [vmem:[%s5422_s3 + $0x18] sm:$0xf0] }
  0x20   : > { %532 = vadd.xlane.f32.xlu1 %v531_v14  ;;  %v3406_v14 = vld [vmem:[%s5422_s3 + $0x14] sm:$0xf] }
  0x21   : > { %529 = vadd.xlane.f32.xlu0 %v528_v15  ;;  %v3221_v19 = vor.u32 %v3406_v14, %v3218_v17 }
  0x83   : > { %v524_v23 = vpop.xlane.xlu2 %523  ;;  %v518_v24 = vpop.xlane.xlu1 %517 }
  0x84   : > { %v543_v25 = vmul.f32 %v3902_v22, %v518_v24  ;;  %v512_v26 = vpop.xlane.xlu0 %511  ;;  %v545_v39 = vmul.f32 %v3902_v22, %v524_v23  ;;  %v3208_v23 = vld [vmem:[%s5422_s3] sm:$0xf]  ;;  %v3405_v24 = vld [vmem:[%s5422_s3 + $0x4] sm:$0xf0] }
  0x85   : > { %v541_v27 = vmul.f32 %v3902_v22, %v512_v26  ;;  %v3404_v26 = vld [vmem:[%s5422_s3 + $0x4] sm:$0xf] }
  0x86   : > { %v3906_v28 = vsub.f32 %v501_v1, %v543_v25  ;;  %v3930_v46 = vsub.f32 %v503_v0, %v545_v39  ;;  %v3411_v0 = vld [vmem:[%s5422_s3 + $0x34] sm:$0xf0]  ;;  %v3410_v1 = vld [vmem:[%s5422_s3 + $0x34] sm:$0xf]  ;;  %v3209_v25 = vor.u32 %v3405_v24, %v3208_v23 }
  0x87   : > { %v3908_v29 = vsub.f32 %v499_v2, %v541_v27  ;;  %v3233_v2 = vor.u32 %v3411_v0, %v3232_v63  ;;  %v3237_v4 = vor.u32 %v3410_v1, %v3234_v3  ;;  %v3210_v27 = vld [vmem:[%s5422_s3 + $0x8] sm:$0xf0] }
  0x88   : > { %v559_v30 = vmul.f32 %v3906_v28, %v3906_v28  ;;  %v561_v55 = vmul.f32 %v3930_v46, %v3930_v46 }
  0x89   : > { %v557_v31 = vmul.f32 %v3908_v29, %v3908_v29  ;;  %789 = vmatpush.bf16.msra.mxu0 %v3233_v2  ;;  %3440 = vmatpush.bf16.msra.mxu2 %v3233_v2 }
  0x8a   : > { %v571_v32 = vsel %vm509_vm0, %v559_v30, 0.0  ;;  %v577_v58 = vsel %vm509_vm0, %v561_v55, 0.0  ;;  %818 = vmatpush.bf16.msra.mxu1 %v3237_v4  ;;  %v3213_v30 = vor.u32 %v3404_v26, %v3210_v27 }
  0x8b   : > { %v527_v33 = vpop.xlane.xlu2 %526  ;;  %572 = vadd.xlane.f32.xlu1 %v571_v32  ;;  %v521_v34 = vpop.xlane.xlu1 %520  ;;  %v565_v35 = vsel %vm509_vm0, %v557_v31, 0.0 }
  0x8c   : > { %v546_v36 = vmul.f32 %v3902_v22, %v527_v33  ;;  %v544_v37 = vmul.f32 %v3902_v22, %v521_v34  ;;  %566 = vadd.xlane.f32.xlu2 %v565_v35  ;;  %v515_v38 = vpop.xlane.xlu0 %514 }
  0x8d   : > { %v542_v40 = vmul.f32 %v3902_v22, %v515_v38 }
  0x8e   : > { %v3920_v41 = vsub.f32 %v504_v6, %v546_v36  ;;  %v3922_v42 = vsub.f32 %v502_v7, %v544_v37  ;;  %v3409_v6 = vld [vmem:[%s5422_s3 + $0x24] sm:$0xf0]  ;;  %v3408_v7 = vld [vmem:[%s5422_s3 + $0x24] sm:$0xf] }
  0x8f   : > { %v3924_v43 = vsub.f32 %v500_v8, %v542_v40  ;;  %v3225_v8 = vor.u32 %v3409_v6, %v3224_v5  ;;  %v3229_v10 = vor.u32 %v3408_v7, %v3226_v9 }
  0x90   : > { %v562_v44 = vmul.f32 %v3920_v41, %v3920_v41  ;;  %v560_v45 = vmul.f32 %v3922_v42, %v3922_v42 }
  0x91   : > { %v558_v47 = vmul.f32 %v3924_v43, %v3924_v43  ;;  %790 = vmatpush.bf16.msra.mxu0 %v3225_v8  ;;  %3441 = vmatpush.bf16.msra.mxu2 %v3225_v8 }
  0x92   : > { %v580_v48 = vsel %vm509_vm0, %v562_v44, 0.0  ;;  %v574_v49 = vsel %vm509_vm0, %v560_v45, 0.0  ;;  %819 = vmatpush.bf16.msra.mxu1 %v3229_v10 }
  0x93   : > { %581 = vadd.xlane.f32.xlu1 %v580_v48  ;;  %v568_v50 = vsel %vm509_vm0, %v558_v47, 0.0  ;;  %v533_v51 = vpop.xlane.xlu1 %532 }
  0x94   : > { %575 = vadd.xlane.f32.xlu2 %v574_v49  ;;  %569 = vadd.xlane.f32.xlu0 %v568_v50  ;;  %v530_v52 = vpop.xlane.xlu0 %529  ;;  %v548_v54 = vmul.f32 %v3902_v22, %v533_v51 }
  0x95   : > { %v547_v53 = vmul.f32 %v3902_v22, %v530_v52 }
  0x96   : > { %v3943_v57 = vsub.f32 %v506_v12, %v548_v54  ;;  %v3216_v12 = vld [vmem:[%s5422_s3 + $0x10] sm:$0xf]  ;;  %820 = vmatpush.bf16.msra.mxu1 %v3221_v19 }
  0x97   : > { %v3941_v56 = vsub.f32 %v505_v13, %v547_v53  ;;  %v3407_v13 = vld [vmem:[%s5422_s3 + $0x14] sm:$0xf0] }
  0x98   : > { %v564_v61 = vmul.f32 %v3943_v57, %v3943_v57  ;;  %v3217_v16 = vor.u32 %v3407_v13, %v3216_v12 }
  0x99   : > { %v563_v59 = vmul.f32 %v3941_v56, %v3941_v56 }
  0x9a   : > { %v586_v62 = vsel %vm509_vm0, %v564_v61, 0.0  ;;  %791 = vmatpush.bf16.msra.mxu0 %v3217_v16  ;;  %3442 = vmatpush.bf16.msra.mxu2 %v3217_v16 }
  0x9b   : > { %v583_v60 = vsel %vm509_vm0, %v563_v59, 0.0  ;;  %821 = vmatpush.bf16.msra.mxu1 %v3213_v30 }
  0x9c   : > { %578 = vadd.xlane.f32.xlu0 %v577_v58  ;;  %584 = vadd.xlane.f32.xlu2 %v583_v60 }
  0x9e   : > { %792 = vmatpush.bf16.msra.mxu0 %v3209_v25  ;;  %3443 = vmatpush.bf16.msra.mxu2 %v3209_v25 }
  0xa4   : > { %587 = vadd.xlane.f32.xlu0 %v586_v62 }
  0xfe   : > { %v573_v11 = vpop.xlane.xlu1 %572 }
  0xff   : > { %v567_v15 = vpop.xlane.xlu2 %566  ;;  %v591_v20 = vmul.f32 %v573_v11, %v3902_v22 }
 0x100   : > { %v589_v18 = vmul.f32 %v567_v15, %v3902_v22 }
 0x101   : > { %v4002_v31 = vadd.f32 1e-06, %v591_v20 }
 0x102   : > { %v597_v21 = vadd.f32 1e-06, %v589_v18  ;;  %v4043_v18 = vld [vmem:[%s5420_s1] ss:$0 sm:$0xff] }
 0x103   : > { %vm631_vm14 = vweird.f32 %v4002_v31 }
 0x104   : > { %3539 = vrsqrt.f32 %v597_v21  ;;  %vm611_vm3 = vweird.f32 %v597_v21 }
 0x105   : > { %3541 = vrsqrt.f32 %v4002_v31 }
 0x106   : > { %v582_v32 = vpop.xlane.xlu1 %581 }
 0x107   : > { %v594_v33 = vmul.f32 %v582_v32, %v3902_v22  ;;  %v576_v34 = vpop.xlane.xlu2 %575  ;;  %v570_v35 = vpop.xlane.xlu0 %569 }
 0x108   : > { %v592_v36 = vmul.f32 %v576_v34, %v3902_v22  ;;  %v590_v37 = vmul.f32 %v570_v35, %v3902_v22  ;;  %v4061_v34 = vld [vmem:[%s5421_s2] ss:$0 sm:$0xff] }
 0x109   : > { %v602_v38 = vadd.f32 1e-06, %v594_v33 }
 0x10a   : > { %v3540_v39 = vpop.eup %3539  ;;  %v4008_v40 = vadd.f32 1e-06, %v592_v36  ;;  %v598_v44 = vadd.f32 1e-06, %v590_v37 }
 0x10b   : > { %v606_v45 = vmul.f32 %v3540_v39, %v597_v21  ;;  %3543 = vrsqrt.f32 %v602_v38  ;;  %v4011_v51 = vpop.eup %3541  ;;  %vm612_vm2 = vweird.f32 %v3540_v39  ;;  %vm661_vm6 = vweird.f32 %v602_v38 }
 0x10c   : > { %3545 = vrsqrt.f32 %v4008_v40  ;;  %v626_v62 = vmul.f32 %v4011_v51, %v4002_v31  ;;  %vm613_vm4 = vmor %vm611_vm3, %vm612_vm2  ;;  %vm621_vm8 = vweird.f32 %v598_v44  ;;  %vm641_vm11 = vweird.f32 %v4008_v40 }
 0x10d   : > { %v607_v47 = vmul.f32 %v3540_v39, %v606_v45  ;;  %3547 = vrsqrt.f32 %v598_v44  ;;  %vm632_vm15 = vweird.f32 %v4011_v51 }
 0x10e   : > { %v627_v7 = vmul.f32 %v4011_v51, %v626_v62  ;;  %vm4083_vm3 = vmor %vm631_vm14, %vm632_vm15 }
 0x10f   : > { %v608_v48 = vmul.f32 0.5, %v607_v47  ;;  %v585_v49 = vpop.xlane.xlu2 %584  ;;  %v579_v50 = vpop.xlane.xlu0 %578 }
 0x110   : > { %v595_v52 = vmul.f32 %v585_v49, %v3902_v22  ;;  %v593_v53 = vmul.f32 %v579_v50, %v3902_v22  ;;  %v628_v20 = vmul.f32 0.5, %v627_v7 }
 0x111   : > { %v4015_v54 = vpop.eup %3543  ;;  %v609_v55 = vsub.f32 1.5, %v608_v48 }
 0x112   : > { %v4017_v58 = vpop.eup %3545  ;;  %v656_v59 = vmul.f32 %v4015_v54, %v602_v38  ;;  %v4020_v60 = vadd.f32 1e-06, %v595_v52  ;;  %v4026_v0 = vadd.f32 1e-06, %v593_v53  ;;  %vm662_vm7 = vweird.f32 %v4015_v54 }
 0x113   : > { %v3548_v61 = vpop.eup %3547  ;;  %v636_v63 = vmul.f32 %v4017_v58, %v4008_v40  ;;  %v610_v1 = vmul.f32 %v3540_v39, %v609_v55  ;;  %vm4049_vm10 = vmor %vm661_vm6, %vm662_vm7  ;;  %vm642_vm12 = vweird.f32 %v4017_v58  ;;  %v629_v35 = vsub.f32 1.5, %v628_v20 }
 0x114   : > { %v657_v2 = vmul.f32 %v4015_v54, %v656_v59  ;;  %v616_v3 = vmul.f32 %v3548_v61, %v598_v44  ;;  %3549 = vrsqrt.f32 %v4020_v60  ;;  %vm622_vm5 = vweird.f32 %v3548_v61  ;;  %vm4067_vm13 = vmor %vm641_vm11, %vm642_vm12 }
 0x115   : > { %v637_v4 = vmul.f32 %v4017_v58, %v636_v63  ;;  %3551 = vrsqrt.f32 %v4026_v0  ;;  %v614_v9 = vsel %vm613_vm4, %v3540_v39, %v610_v1  ;;  %vm623_vm9 = vmor %vm621_vm8, %vm622_vm5  ;;  %vm651_vm1 = vweird.f32 %v4026_v0 }
 0x116   : > { %v658_v5 = vmul.f32 0.5, %v657_v2  ;;  %v617_v6 = vmul.f32 %v3548_v61, %v616_v3  ;;  %v685_v17 = vmul.f32 %v614_v9, %v3908_v29  ;;  %v630_v49 = vmul.f32 %v4011_v51, %v629_v35 }
 0x117   : > { %v588_v8 = vpop.xlane.xlu0 %587  ;;  %v638_v10 = vmul.f32 0.5, %v637_v4  ;;  %vm671_vm7 = vweird.f32 %v4020_v60  ;;  %vm879_vm11 = vcmask 130048   ;;  %vm1828_vm12 = vcmask 261120  }
 0x118   : > { %v618_v11 = vmul.f32 0.5, %v617_v6  ;;  %v596_v12 = vmul.f32 %v588_v8, %v3902_v22  ;;  %v659_v13 = vsub.f32 1.5, %v658_v5  ;;  %v696_v33 = vmul.f32 %v4043_v18, %v685_v17 }
 0x119   : > { %v639_v21 = vsub.f32 1.5, %v638_v10 }
 0x11a   : > { %v619_v14 = vsub.f32 1.5, %v618_v11  ;;  %v4034_v15 = vadd.f32 1e-06, %v596_v12  ;;  %v4036_v16 = vpop.eup %3549  ;;  %v660_v24 = vmul.f32 %v4015_v54, %v659_v13  ;;  %v707_v45 = vadd.f32 %v4061_v34, %v696_v33 }
 0x11b   : > { %v3552_v19 = vpop.eup %3551  ;;  %v666_v25 = vmul.f32 %v4036_v16, %v4020_v60  ;;  %v640_v36 = vmul.f32 %v4017_v58, %v639_v21  ;;  %vm672_vm8 = vweird.f32 %v4036_v16 }
 0x11c   : > { %v620_v23 = vmul.f32 %v3548_v61, %v619_v14  ;;  %v646_v29 = vmul.f32 %v3552_v19, %v4026_v0  ;;  %3553 = vrsqrt.f32 %v4034_v15  ;;  %v664_v37 = vsel %vm4049_vm10, %v4015_v54, %v660_v24  ;;  %vm673_vm10 = vmor %vm671_vm7, %vm672_vm8  ;;  %v727_v24 = vld [vmem:[%s5423_s4] sm:$0x3] }
 0x11d   : > { %vm652_vm2 = vweird.f32 %v3552_v19  ;;  %v690_v50 = vmul.f32 %v664_v37, %v3920_v41  ;;  %v644_v52 = vsel %vm4067_vm13, %v4017_v58, %v640_v36  ;;  %v634_v41 = vsel %vm4083_vm3, %v4011_v51, %v630_v49 }
 0x11e   : > { %v624_v27 = vsel %vm623_vm9, %v3548_v61, %v620_v23  ;;  %v647_v32 = vmul.f32 %v3552_v19, %v646_v29  ;;  %vm653_vm4 = vmor %vm651_vm1, %vm652_vm2  ;;  %v688_v58 = vmul.f32 %v644_v52, %v3922_v42  ;;  %vm681_vm5 = vweird.f32 %v4034_v15 }
 0x11f   : > { %v686_v30 = vmul.f32 %v624_v27, %v3924_v43  ;;  %v667_v43 = vmul.f32 %v4036_v16, %v666_v25  ;;  %v701_v0 = vmul.f32 %v4043_v18, %v690_v50  ;;  %v687_v51 = vmul.f32 %v634_v41, %v3906_v28 }
 0x120   : > { %v648_v39 = vmul.f32 0.5, %v647_v32  ;;  %v699_v7 = vmul.f32 %v4043_v18, %v688_v58  ;;  %v729_v29 = vperm.slane %v727_v24, 0  ;;  %v730_v26 = vperm.slane %v727_v24, 1 }
 0x121   : > { %v697_v40 = vmul.f32 %v4043_v18, %v686_v30  ;;  %v668_v53 = vmul.f32 0.5, %v667_v43  ;;  %v698_v60 = vmul.f32 %v4043_v18, %v687_v51  ;;  %vm1837_vm13 = vcmask 392192  }
 0x122   : > { %v649_v44 = vsub.f32 1.5, %v648_v39  ;;  %v3554_v48 = vpop.eup %3553  ;;  %v710_v28 = vadd.f32 %v4061_v34, %v699_v7 }
 0x123   : > { %v708_v47 = vadd.f32 %v4061_v34, %v697_v40  ;;  %v676_v55 = vmul.f32 %v3554_v48, %v4034_v15  ;;  %v669_v1 = vsub.f32 1.5, %v668_v53  ;;  %vm682_vm6 = vweird.f32 %v3554_v48 }
 0x124   : > { %v650_v54 = vmul.f32 %v3552_v19, %v649_v44  ;;  %vm683_vm9 = vmor %vm681_vm5, %vm682_vm6  ;;  %v709_v12 = vadd.f32 %v4061_v34, %v698_v60 }
 0x125   : > { %v715_v59 = vpack.c.bf16 %v708_v47, %v707_v45  ;;  %v677_v62 = vmul.f32 %v3554_v48, %v676_v55  ;;  %v670_v5 = vmul.f32 %v4036_v16, %v669_v1 }
 0x126   : > { %v654_v61 = vsel %vm653_vm4, %v3552_v19, %v650_v54  ;;  %v716_v14 = vpack.c.bf16 %v710_v28, %v709_v12 }
 0x127   : > { %3238 = vmatmul.msk.bf16.vlgmr.msra.gmra.mxu0 %vm509_vm0, %v715_v59  ;;  %3242 = vmatmul.msk.bf16.vlgmr.msra.gmra.mxu1 %vm509_vm0, %v715_v59  ;;  %v689_v63 = vmul.f32 %v654_v61, %v3930_v46  ;;  %v678_v2 = vmul.f32 0.5, %v677_v62  ;;  %v712_v46 = vadd.f32 %v4061_v34, %v701_v0  ;;  %v674_v10 = vsel %vm673_vm10, %v4036_v16, %v670_v5 }
 0x128   : > { %v691_v13 = vmul.f32 %v674_v10, %v3941_v56 }
 0x129   : > { %v700_v3 = vmul.f32 %v4043_v18, %v689_v63  ;;  %v679_v4 = vsub.f32 1.5, %v678_v2 }
 0x12a   : > { %v702_v17 = vmul.f32 %v4043_v18, %v691_v13 }
 0x12b   : > { %v711_v42 = vadd.f32 %v4061_v34, %v700_v3  ;;  %v680_v6 = vmul.f32 %v3554_v48, %v679_v4 }
 0x12c   : > { %v713_v16 = vadd.f32 %v4061_v34, %v702_v17 }
 0x12d   : > { %v717_v8 = vpack.c.bf16 %v712_v46, %v711_v42  ;;  %v684_v9 = vsel %vm683_vm9, %v3554_v48, %v680_v6 }
 0x12e   : > { %v692_v11 = vmul.f32 %v684_v9, %v3943_v57 }
 0x12f   : > { %3240 = vmatmul.msk.bf16.vlgmr.msra.gmra.mxu2 %vm509_vm0, %v717_v8 }
 0x130   : > { %v703_v15 = vmul.f32 %v4043_v18, %v692_v11 }
 0x132   : > { %v714_v19 = vadd.f32 %v4061_v34, %v703_v15 }
 0x134   : > { %v718_v20 = vpack.c.bf16 %v714_v19, %v713_v16 }
 0x137   : > { %3239 = vmatmul.msk.bf16.gmra.mxu0 %vm509_vm0, %v716_v14  ;;  %3243 = vmatmul.msk.bf16.gmra.mxu1 %vm509_vm0, %v716_v14 }
 0x13f   : > { %3241 = vmatmul.msk.bf16.gmra.mxu2 %vm509_vm0, %v718_v20 }
 0x147   : > { %3244 = vmatmul.msk.bf16.gmra.mxu1 %vm509_vm0, %v717_v8 }
 0x157   : > { %3245 = vmatmul.msk.bf16.gmra.mxu1 %vm509_vm0, %v718_v20 }
 0x1a4   : > { %v794_v56 = vpop.f32.mrf.mxu0  ;;  %v823_v57 = vpop.f32.mrf.mxu1 }
 0x1a5   : > { %v795_v61 = vadd.f32 %v794_v56, %v729_v29  ;;  %v824_v62 = vadd.f32 %v823_v57, %v730_v26 }
 0x1a7   : > { %v843_v2 = vpack.c.bf16 %v824_v62, %v795_v61 }
 0x1a9   : > { %v859_v4 = vunpack.c.l.b16 %v843_v2 }
 0x1ac   : > { %v796_v21 = vpop.f32.mrf.mxu0  ;;  %v825_v23 = vpop.f32.mrf.mxu1 }
 0x1ad   : > { %v797_v53 = vadd.f32 %v796_v21, %v729_v29  ;;  %v826_v54 = vadd.f32 %v825_v23, %v730_v26  ;;  %v1025_v21 = vunpack.c.h.b16 %v843_v2 }
 0x1af   : > { %v844_v63 = vpack.c.bf16 %v826_v54, %v797_v53 }
 0x1b1   : > { %v860_v3 = vunpack.c.l.b16 %v844_v63  ;;  %v1026_v56 = vunpack.c.h.b16 %v844_v63 }
 0x1b2   : > { %v804_v32 = vpop.f32.mrf.mxu2 }
 0x1b3   : > { %v805_v48 = vadd.f32 %v804_v32, %v729_v29  ;;  %v4139_v46 = vpack.c.b16 %v860_v3, %v859_v4  ;;  %v4167_v23 = vpack.c.b16 %v1026_v56, %v1025_v21 }
 0x1b4   : > { %v799_v18 = vpop.f32.mrf.mxu0  ;;  %v828_v25 = vpop.f32.mrf.mxu1 }
 0x1b5   : > { %v800_v27 = vadd.f32 %v799_v18, %v729_v29  ;;  %v829_v30 = vadd.f32 %v828_v25, %v730_v26 }
 0x1b7   : > { %v4124_v35 = vpack.c.bf16 %v829_v30, %v800_v27 }
 0x1b9   : > { %v861_v43 = vunpack.c.l.b16 %v4124_v35  ;;  %v1027_v20 = vunpack.c.h.b16 %v4124_v35 }
 0x1ba   : > { %v806_v45 = vpop.f32.mrf.mxu2 }
 0x1bb   : > { %v807_v50 = vadd.f32 %v806_v45, %v729_v29 }
 0x1bc   : > { %v801_v33 = vpop.f32.mrf.mxu0  ;;  %v830_v34 = vpop.f32.mrf.mxu1 }
 0x1bd   : > { %v802_v36 = vadd.f32 %v801_v33, %v729_v29  ;;  %v831_v37 = vadd.f32 %v830_v34, %v730_v26 }
 0x1bf   : > { %v846_v38 = vpack.c.bf16 %v831_v37, %v802_v36 }
 0x1c1   : > { %v862_v39 = vunpack.c.l.b16 %v846_v38  ;;  %v1028_v19 = vunpack.c.h.b16 %v846_v38 }
 0x1c2   : > { %v809_v59 = vpop.f32.mrf.mxu2 }
 0x1c3   : > { %v4127_v40 = vpack.c.b16 %v862_v39, %v861_v43  ;;  %v810_v5 = vadd.f32 %v809_v59, %v729_v29  ;;  %v4158_v57 = vpack.c.b16 %v1028_v19, %v1027_v20 }
 0x1c4   : > { %v833_v44 = vpop.f32.mrf.mxu1 }
 0x1c5   : > { %873 = vrot.lane.b32.xlu0 %v4127_v40, %s3780_s30  ;;  %v834_v47 = vadd.f32 %v833_v44, %v730_v26 }
 0x1c7   : > { %v847_v52 = vpack.c.bf16 %v834_v47, %v805_v48 }
 0x1c9   : > { %v863_v41 = vunpack.c.l.b16 %v847_v52  ;;  %v1029_v17 = vunpack.c.h.b16 %v847_v52 }
 0x1ca   : > { %v811_v42 = vpop.f32.mrf.mxu2 }
 0x1cb   : > { %v812_v7 = vadd.f32 %v811_v42, %v729_v29 }
 0x1cc   : > { %v835_v49 = vpop.f32.mrf.mxu1 }
 0x1cd   : > { %v836_v31 = vadd.f32 %v835_v49, %v730_v26  ;;  %1084 = vrot.lane.b32.xlu0 %v4127_v40, %s3781_s16 }
 0x1cf   : > { %v848_v55 = vpack.c.bf16 %v836_v31, %v807_v50 }
 0x1d1   : > { %v864_v58 = vunpack.c.l.b16 %v848_v55  ;;  %v1030_v13 = vunpack.c.h.b16 %v848_v55 }
 0x1d3   : > { %v4133_v0 = vpack.c.b16 %v864_v58, %v863_v41  ;;  %v4154_v16 = vpack.c.b16 %v1030_v13, %v1029_v17 }
 0x1d4   : > { %v838_v1 = vpop.f32.mrf.mxu1 }
 0x1d5   : > { %1512 = vrot.lane.b32.xlu0 %v4127_v40, %s3782_s17  ;;  %875 = vrot.lane.b32.xlu2 %v4133_v0, %s3780_s30  ;;  %v839_v51 = vadd.f32 %v838_v1, %v730_v26 }
 0x1d7   : > { %v849_v8 = vpack.c.bf16 %v839_v51, %v810_v5 }
 0x1d9   : > { %v865_v10 = vunpack.c.l.b16 %v849_v8  ;;  %v1031_v28 = vunpack.c.h.b16 %v849_v8 }
 0x1dc   : > { %v840_v6 = vpop.f32.mrf.mxu1 }
 0x1dd   : > { %v841_v9 = vadd.f32 %v840_v6, %v730_v26  ;;  %871 = vrot.lane.b32.xlu2 %v4139_v46, %s3780_s30 }
 0x1df   : > { %v850_v60 = vpack.c.bf16 %v841_v9, %v812_v7 }
 0x1e1   : > { %v866_v11 = vunpack.c.l.b16 %v850_v60  ;;  %v1032_v12 = vunpack.c.h.b16 %v850_v60 }
 0x1e3   : > { %v4143_v14 = vpack.c.b16 %v866_v11, %v865_v10  ;;  %v4145_v15 = vpack.c.b16 %v1032_v12, %v1031_v28 }
 0x1e5   : > { %1094 = vrot.lane.b32.xlu2 %v4133_v0, %s3783_s19  ;;  %3444 = vmatpush.bf16.msra.mxu3 %v4145_v15 }
 0x1e6   : > { %1096 = vrot.lane.b32.xlu0 %v4143_v14, %s3783_s19  ;;  %877 = vrot.lane.b32.xlu1 %v4143_v14, %s3780_s30  ;;  %s5373_s30 = scalar_lea.vmem %s5434_s15, %s3203_s21 }
 0x1e9   : > { %3445 = vmatpush.bf16.msra.mxu3 %v4154_v16 }
 0x1ed   : > { %1308 = vrot.lane.b32.xlu2 %v4133_v0, %s3784_s22  ;;  %3446 = vmatpush.bf16.msra.mxu3 %v4158_v57 }
 0x1ee   : > { %1088 = vrot.lane.b32.xlu0 %v4143_v14, %s3781_s16  ;;  %1092 = vrot.lane.b32.xlu1 %v4127_v40, %s3783_s19 }
 0x1f1   : > { %3447 = vmatpush.bf16.msra.mxu3 %v4167_v23 }
 0x1f5   : > { %1306 = vrot.lane.b32.xlu2 %v4127_v40, %s3784_s22 }
 0x1f6   : > { %1090 = vrot.lane.b32.xlu1 %v4139_v46, %s3783_s19 }
 0x1fd   : > { %1522 = vrot.lane.b32.xlu2 %v4133_v0, %s3785_s23 }
 0x1fe   : > { %1082 = vrot.lane.b32.xlu1 %v4139_v46, %s3781_s16 }
 0x205   : > { %1520 = vrot.lane.b32.xlu2 %v4127_v40, %s3785_s23 }
 0x206   : > { %1086 = vrot.lane.b32.xlu1 %v4133_v0, %s3781_s16 }
 0x20d   : > { %1518 = vrot.lane.b32.xlu2 %v4139_v46, %s3785_s23 }
 0x20e   : > { %1304 = vrot.lane.b32.xlu1 %v4139_v46, %s3784_s22 }
 0x215   : > { %1298 = vrot.lane.b32.xlu2 %v4127_v40, %s3786_s25 }
 0x216   : > { %1296 = vrot.lane.b32.xlu1 %v4139_v46, %s3786_s25 }
 0x21d   : > { %1310 = vrot.lane.b32.xlu2 %v4143_v14, %s3784_s22 }
 0x21e   : > { %1510 = vrot.lane.b32.xlu1 %v4139_v46, %s3782_s17 }
 0x225   : > { %1524 = vrot.lane.b32.xlu2 %v4143_v14, %s3785_s23 }
 0x226   : > { %1300 = vrot.lane.b32.xlu1 %v4133_v0, %s3786_s25 }
 0x22f   : > { %v876_v24 = vpop.permute.xlu2 %875 }
 0x230   : > { %v899_v43 = vsel %vm879_vm11, %v876_v24, 0 }
 0x237   : > { %v872_v18 = vpop.permute.xlu2 %871  ;;  %v874_v25 = vpop.permute.xlu0 %873 }
 0x238   : > { %v896_v47 = vsel %vm879_vm11, %v874_v25, 0  ;;  %v893_v52 = vsel %vm879_vm11, %v872_v18, 0 }
 0x23f   : > { %v1095_v29 = vpop.permute.xlu2 %1094  ;;  %v1085_v26 = vpop.permute.xlu0 %1084 }
 0x240   : > { %v1117_v39 = vsel %vm879_vm11, %v1095_v29, 0 }
 0x247   : > { %v1309_v27 = vpop.permute.xlu2 %1308  ;;  %v4198_v32 = vpop.permute.xlu0 %1512 }
 0x248   : > { %v1331_v62 = vsel %vm879_vm11, %v1309_v27, 0 }
 0x24f   : > { %v1307_v30 = vpop.permute.xlu2 %1306 }
 0x250   : > { %v1328_v63 = vsel %vm879_vm11, %v1307_v30, 0 }
 0x257   : > { %v1523_v33 = vpop.permute.xlu2 %1522 }
 0x258   : > { %v878_v34 = vpop.permute.xlu1 %877  ;;  %v1097_v35 = vpop.permute.xlu0 %1096  ;;  %v1545_v58 = vsel %vm879_vm11, %v1523_v33, 0 }
 0x259   : > { %v902_v36 = vsel %vm879_vm11, %v878_v34, 0  ;;  %v1120_v37 = vsel %vm879_vm11, %v1097_v35, 0 }
 0x25a   : > { %908 = vmatpush.bf16.xpose.msrb.mxu2 %v902_v36  ;;  %1126 = vmatpush.bf16.xpose.msrb.mxu0 %v1120_v37 }
 0x25f   : > { %v1521_v38 = vpop.permute.xlu2 %1520 }
 0x260   : > { %v1093_v44 = vpop.permute.xlu1 %1092  ;;  %v1542_v2 = vsel %vm879_vm11, %v1521_v38, 0 }
 0x261   : > { %v1114_v48 = vsel %vm879_vm11, %v1093_v44, 0 }
 0x262   : > { %909 = vmatpush.bf16.xpose.msrb.mxu2 %v899_v43  ;;  %1127 = vmatpush.bf16.xpose.msrb.mxu0 %v1117_v39 }
 0x267   : > { %v1519_v45 = vpop.permute.xlu2 %1518 }
 0x268   : > { %v1091_v49 = vpop.permute.xlu1 %1090  ;;  %v1539_v4 = vsel %vm879_vm11, %v1519_v45, 0 }
 0x269   : > { %v1111_v31 = vsel %vm879_vm11, %v1091_v49, 0 }
 0x26a   : > { %910 = vmatpush.bf16.xpose.msrb.mxu2 %v896_v47  ;;  %1128 = vmatpush.bf16.xpose.msrb.mxu0 %v1114_v48 }
 0x26f   : > { %v4206_v50 = vpop.permute.xlu2 %1298 }
 0x270   : > { %v1083_v54 = vpop.permute.xlu1 %1082 }
 0x272   : > { %911 = vmatpush.bf16.xpose.msrb.mxu2 %v893_v52  ;;  %1129 = vmatpush.bf16.xpose.msrb.mxu0 %v1111_v31 }
 0x277   : > { %v1311_v53 = vpop.permute.xlu2 %1310 }
 0x278   : > { %v1334_v55 = vsel %vm879_vm11, %v1311_v53, 0  ;;  %v1087_v41 = vpop.permute.xlu1 %1086 }
 0x279   : > { %3246 = vmatmul.msk.bf16.vlgmr.msrb.gmra.mxu2 %vm879_vm11, %v4139_v46  ;;  %3254 = vmatmul.msk.bf16.vlgmr.msrb.gmra.mxu0 %vm879_vm11, %v1083_v54 }
 0x27a   : > { %1057 = vmatpush.bf16.msra.mxu2 %v4145_v15  ;;  %1340 = vmatpush.bf16.xpose.msrb.mxu3 %v1334_v55 }
 0x27e   : > { %1058 = vmatpush.bf16.msra.mxu2 %v4154_v16 }
 0x27f   : > { %v1525_v59 = vpop.permute.xlu2 %1524 }
 0x280   : > { %v1548_v61 = vsel %vm879_vm11, %v1525_v59, 0  ;;  %v1305_v1 = vpop.permute.xlu1 %1304 }
 0x281   : > { %1554 = vmatpush.bf16.xpose.msra.mxu0 %v1548_v61  ;;  %v1325_v3 = vsel %vm879_vm11, %v1305_v1, 0 }
 0x282   : > { %1059 = vmatpush.bf16.msra.mxu2 %v4158_v57  ;;  %1341 = vmatpush.bf16.xpose.msrb.mxu3 %v1331_v62 }
 0x286   : > { %1060 = vmatpush.bf16.msra.mxu2 %v4167_v23 }
 0x288   : > { %v4234_v51 = vpop.permute.xlu1 %1296 }
 0x289   : > { %3247 = vmatmul.msk.bf16.gmra.mxu2 %vm879_vm11, %v4127_v40  ;;  %3255 = vmatmul.msk.bf16.gmra.mxu0 %vm879_vm11, %v1085_v26  ;;  %v1089_v40 = vpop.permute.xlu0 %1088 }
 0x28a   : > { %1342 = vmatpush.bf16.xpose.msrb.mxu3 %v1328_v63  ;;  %1555 = vmatpush.bf16.xpose.msra.mxu0 %v1545_v58 }
 0x290   : > { %v1511_v42 = vpop.permute.xlu1 %1510 }
 0x292   : > { %1343 = vmatpush.bf16.xpose.msrb.mxu3 %v1325_v3  ;;  %1556 = vmatpush.bf16.xpose.msra.mxu0 %v1542_v2 }
 0x298   : > { %v4252_v20 = vpop.permute.xlu1 %1300 }
 0x299   : > { %3248 = vmatmul.msk.bf16.gmra.mxu2 %vm879_vm11, %v4133_v0  ;;  %3256 = vmatmul.msk.bf16.gmra.mxu0 %vm879_vm11, %v1087_v41 }
 0x29a   : > { %1557 = vmatpush.bf16.xpose.msra.mxu0 %v1539_v4 }
 0x2a9   : > { %3249 = vmatmul.msk.bf16.gmra.mxu2 %vm879_vm11, %v4143_v14  ;;  %3257 = vmatmul.msk.bf16.gmra.mxu0 %vm879_vm11, %v1089_v40 }
 0x2b9   : > { %3270 = vmatmul.msk.bf16.vlgmr.msra.gmra.mxu0 %vm879_vm11, %v1511_v42 }
 0x2c9   : > { %3271 = vmatmul.msk.bf16.gmra.mxu0 %vm879_vm11, %v4198_v32 }
 0x2f6   : > { %v4262_v38 = vpop.f32.mrf.mxu0 }
 0x2fc   : > { %v4239_v46 = vpop.f32.mrf.mxu2 }
 0x2fe   : > { %v4270_v47 = vpop.f32.mrf.mxu0 }
 0x304   : > { %v4241_v5 = vpop.f32.mrf.mxu2 }
 0x305   : > { %v936_v4 = vsel %vm509_vm0, %v4241_v5, -inf }
 0x306   : > { %v4276_v49 = vpop.f32.mrf.mxu0 }
 0x30c   : > { %v918_v6 = vpop.f32.mrf.mxu2 }
 0x30d   : > { %v939_v7 = vsel %vm509_vm0, %v918_v6, -inf }
 0x30e   : > { %940 = vmax.xlane.f32.xlu1 %v939_v7  ;;  %v4280_v52 = vpop.f32.mrf.mxu0 }
 0x30f   : > { %v1160_v62 = vsel %vm509_vm0, %v4280_v52, -inf }
 0x314   : > { %v920_v8 = vpop.f32.mrf.mxu2 }
 0x315   : > { %v942_v9 = vsel %vm509_vm0, %v920_v8, -inf }
 0x316   : > { %943 = vmax.xlane.f32.xlu0 %v942_v9  ;;  %v4284_v31 = vpop.f32.mrf.mxu0  ;;  %v933_v9 = vsel %vm509_vm0, %v4239_v46, -inf }
 0x317   : > { %v1163_v2 = vsel %vm509_vm0, %v4284_v31, -inf }
 0x31c   : > { %v923_v60 = vpop.f32.mrf.mxu2 }
 0x31d   : > { %v945_v10 = vsel %vm509_vm0, %v923_v60, -inf }
 0x31e   : > { %946 = vmax.xlane.f32.xlu2 %v945_v10  ;;  %v4286_v53 = vpop.f32.mrf.mxu0 }
 0x324   : > { %v925_v28 = vpop.f32.mrf.mxu2 }
 0x325   : > { %v948_v11 = vsel %vm509_vm0, %v925_v28, -inf }
 0x326   : > { %949 = vmax.xlane.f32.xlu1 %v948_v11  ;;  %v4290_v61 = vpop.f32.mrf.mxu0 }
 0x327   : > { %v1169_v11 = vsel %vm509_vm0, %v4290_v61, -inf }
 0x32c   : > { %v928_v12 = vpop.f32.mrf.mxu2 }
 0x32d   : > { %v951_v13 = vsel %vm509_vm0, %v928_v12, -inf }
 0x32e   : > { %952 = vmax.xlane.f32.xlu2 %v951_v13  ;;  %v4298_v58 = vpop.f32.mrf.mxu0 }
 0x334   : > { %v4248_v17 = vpop.f32.mrf.mxu2 }
 0x335   : > { %v954_v19 = vsel %vm509_vm0, %v4248_v17, -inf }
 0x336   : > { %955 = vmax.xlane.f32.xlu1 %v954_v19  ;;  %v4307_v40 = vpop.f32.mrf.mxu0 }
 0x337   : > { %v1579_v7 = vsel %vm509_vm0, %v4307_v40, -inf }
 0x33e   : > { %v4325_v13 = vpop.f32.mrf.mxu0 }
 0x33f   : > { %v1582_v19 = vsel %vm509_vm0, %v4325_v13, -inf }
 0x381   : > { %v941_v56 = vpop.xlane.xlu1 %940 }
 0x382   : > { %v959_v21 = vsub.f32 %v918_v6, %v941_v56  ;;  %v1154_v6 = vsel %vm509_vm0, %v4270_v47, -inf }
 0x384   : > { %v969_v24 = vmul.f32 1.442695, %v959_v21 }
 0x386   : > { %3555 = vpow2.f32 %v969_v24 }
 0x389   : > { %v944_v18 = vpop.xlane.xlu0 %943 }
 0x38a   : > { %v960_v25 = vsub.f32 %v920_v8, %v944_v18  ;;  %v1172_v8 = vsel %vm509_vm0, %v4298_v58, -inf }
 0x38c   : > { %v4254_v29 = vpop.eup %3555  ;;  %v971_v26 = vmul.f32 1.442695, %v960_v25 }
 0x38d   : > { %v987_v27 = vsel %vm509_vm0, %v4254_v29, 0.0 }
 0x38e   : > { %3557 = vpow2.f32 %v971_v26  ;;  %988 = vadd.xlane.f32.xlu0 %v987_v27 }
 0x391   : > { %v947_v30 = vpop.xlane.xlu2 %946 }
 0x392   : > { %v961_v32 = vsub.f32 %v923_v60, %v947_v30 }
 0x394   : > { %v4258_v33 = vpop.eup %3557  ;;  %v973_v34 = vmul.f32 1.442695, %v961_v32 }
 0x395   : > { %v990_v35 = vsel %vm509_vm0, %v4258_v33, 0.0 }
 0x396   : > { %3559 = vpow2.f32 %v973_v34  ;;  %991 = vadd.xlane.f32.xlu2 %v990_v35 }
 0x399   : > { %v950_v36 = vpop.xlane.xlu1 %949 }
 0x39a   : > { %v962_v37 = vsub.f32 %v925_v28, %v950_v36  ;;  %v1166_v28 = vsel %vm509_vm0, %v4286_v53, -inf }
 0x39c   : > { %v4264_v43 = vpop.eup %3559  ;;  %v975_v39 = vmul.f32 1.442695, %v962_v37  ;;  %v4339_v37 = vpop.f32.mrf.mxu0 }
 0x39d   : > { %v993_v44 = vsel %vm509_vm0, %v4264_v43, 0.0 }
 0x39e   : > { %3561 = vpow2.f32 %v975_v39  ;;  %994 = vadd.xlane.f32.xlu1 %v993_v44 }
 0x3a1   : > { %v953_v54 = vpop.xlane.xlu2 %952 }
 0x3a2   : > { %v963_v55 = vsub.f32 %v928_v12, %v953_v54 }
 0x3a4   : > { %v4268_v45 = vpop.eup %3561  ;;  %v977_v59 = vmul.f32 1.442695, %v963_v55  ;;  %v4341_v39 = vpop.f32.mrf.mxu0 }
 0x3a5   : > { %v996_v48 = vsel %vm509_vm0, %v4268_v45, 0.0  ;;  %v1588_v44 = vsel %vm509_vm0, %v4341_v39, -inf }
 0x3a6   : > { %997 = vadd.xlane.f32.xlu0 %v996_v48  ;;  %3563 = vpow2.f32 %v977_v59 }
 0x3a9   : > { %v956_v1 = vpop.xlane.xlu1 %955 }
 0x3aa   : > { %v964_v3 = vsub.f32 %v4248_v17, %v956_v1 }
 0x3ac   : > { %v4294_v41 = vpop.eup %3563  ;;  %v979_v42 = vmul.f32 1.442695, %v964_v3 }
 0x3ad   : > { %v999_v63 = vsel %vm509_vm0, %v4294_v41, 0.0 }
 0x3ae   : > { %1514 = vrot.lane.b32.xlu2 %v4133_v0, %s3782_s17  ;;  %v1151_v0 = vsel %vm509_vm0, %v4262_v38, -inf  ;;  %3565 = vpow2.f32 %v979_v42 }
 0x3b4   : > { %v4317_v60 = vpop.eup %3565 }
 0x3b5   : > { %v1002_v10 = vsel %vm509_vm0, %v4317_v60, 0.0 }
 0x3b7   : > { %1516 = vrot.lane.b32.xlu1 %v4143_v14, %s3782_s17 }
 0x3ba   : > { %1302 = vrot.lane.b32.xlu0 %v4143_v14, %s3786_s25  ;;  %v1157_v14 = vsel %vm509_vm0, %v4276_v49, -inf }
 0x3d7   : > { %1152 = vmax.xlane.f32.xlu2 %v1151_v0 }
 0x3df   : > { %1161 = vmax.xlane.f32.xlu2 %v1160_v62 }
 0x3e1   : > { %1158 = vmax.xlane.f32.xlu1 %v1157_v14 }
 0x3e4   : > { %1000 = vadd.xlane.f32.xlu0 %v999_v63 }
 0x3e7   : > { %1164 = vmax.xlane.f32.xlu2 %v1163_v2 }
 0x3e9   : > { %937 = vmax.xlane.f32.xlu1 %v936_v4 }
 0x3ec   : > { %1155 = vmax.xlane.f32.xlu0 %v1154_v6 }
 0x3ef   : > { %1580 = vmax.xlane.f32.xlu2 %v1579_v7 }
 0x3f1   : > { %1173 = vmax.xlane.f32.xlu1 %v1172_v8 }
 0x3f4   : > { %934 = vmax.xlane.f32.xlu0 %v933_v9 }
 0x3f9   : > { %1003 = vadd.xlane.f32.xlu1 %v1002_v10 }
 0x3fc   : > { %1167 = vmax.xlane.f32.xlu0 %v1166_v28 }
 0x401   : > { %v989_v12 = vpop.xlane.xlu0 %988 }
 0x402   : > { %3567 = vrcp.f32 %v989_v12 }
 0x404   : > { %1170 = vmax.xlane.f32.xlu0 %v1169_v11 }
 0x408   : > { %v3568_v56 = vpop.eup %3567 }
 0x409   : > { %v992_v17 = vpop.xlane.xlu2 %991  ;;  %v1015_v18 = vmul.f32 %v3568_v56, %v4254_v29 }
 0x40a   : > { %3569 = vrcp.f32 %v992_v17 }
 0x40c   : > { %1583 = vmax.xlane.f32.xlu0 %v1582_v19 }
 0x410   : > { %v3570_v21 = vpop.eup %3569 }
 0x411   : > { %v1515_v24 = vpop.permute.xlu2 %1514  ;;  %v1016_v25 = vmul.f32 %v3570_v21, %v4258_v33  ;;  %v995_v27 = vpop.xlane.xlu1 %994 }
 0x412   : > { %1249 = vrot.lane.b32.xlu1 %v4145_v15, %s3781_s16  ;;  %3272 = vmatmul.msk.bf16.gmra.mxu0 %vm879_vm11, %v1515_v24  ;;  %3571 = vrcp.f32 %v995_v27 }
 0x413   : > { %v1022_v26 = vpack.c.bf16 %v1016_v25, %v1015_v18 }
 0x415   : > { %3251 = vmatmul.msk.bf16.vlgmr.msra.gmra.mxu3 %vm509_vm0, %v1022_v26 }
 0x418   : > { %v3572_v32 = vpop.eup %3571 }
 0x419   : > { %v998_v30 = vpop.xlane.xlu0 %997  ;;  %v1017_v35 = vmul.f32 %v3572_v32, %v4264_v43 }
 0x41a   : > { %3573 = vrcp.f32 %v998_v30 }
 0x420   : > { %v3574_v34 = vpop.eup %3573 }
 0x421   : > { %v1018_v29 = vmul.f32 %v3574_v34, %v4268_v45 }
 0x423   : > { %v1023_v36 = vpack.c.bf16 %v1018_v29, %v1017_v35 }
 0x425   : > { %3252 = vmatmul.msk.bf16.gmra.mxu3 %vm509_vm0, %v1023_v36 }
 0x429   : > { %v1517_v33 = vpop.permute.xlu1 %1516 }
 0x42a   : > { %3273 = vmatmul.msk.bf16.gmra.mxu0 %vm879_vm11, %v1517_v33 }
 0x42c   : > { %v4346_v55 = vpop.permute.xlu0 %1302 }
 0x43c   : > { %1589 = vmax.xlane.f32.xlu1 %v1588_v44 }
 0x44a   : > { %v1153_v48 = vpop.xlane.xlu2 %1152 }
 0x44b   : > { %v1175_v54 = vsub.f32 %v4262_v38, %v1153_v48 }
 0x44d   : > { %v1183_v43 = vmul.f32 1.442695, %v1175_v54 }
 0x44f   : > { %3575 = vpow2.f32 %v1183_v43 }
 0x452   : > { %v1162_v45 = vpop.xlane.xlu2 %1161 }
 0x453   : > { %v1178_v27 = vsub.f32 %v4280_v52, %v1162_v45 }
 0x454   : > { %v1159_v59 = vpop.xlane.xlu1 %1158 }
 0x455   : > { %v4348_v0 = vpop.eup %3575  ;;  %v1177_v62 = vsub.f32 %v4276_v49, %v1159_v59 }
 0x456   : > { %v1199_v14 = vsel %vm509_vm0, %v4348_v0, 0.0 }
 0x457   : > { %v1187_v63 = vmul.f32 1.442695, %v1177_v62  ;;  %1200 = vadd.xlane.f32.xlu2 %v1199_v14  ;;  %v1001_v1 = vpop.xlane.xlu0 %1000 }
 0x459   : > { %3577 = vpow2.f32 %v1187_v63 }
 0x45a   : > { %v1165_v2 = vpop.xlane.xlu2 %1164 }
 0x45b   : > { %v1179_v42 = vsub.f32 %v4284_v31, %v1165_v2 }
 0x45c   : > { %v938_v3 = vpop.xlane.xlu1 %937 }
 0x45d   : > { %v958_v38 = vsub.f32 %v4241_v5, %v938_v3  ;;  %v1191_v10 = vmul.f32 1.442695, %v1179_v42 }
 0x45f   : > { %v4354_v4 = vpop.eup %3577  ;;  %v967_v6 = vmul.f32 1.442695, %v958_v38  ;;  %v1156_v7 = vpop.xlane.xlu0 %1155 }
 0x460   : > { %v1176_v8 = vsub.f32 %v4270_v47, %v1156_v7  ;;  %v1205_v49 = vsel %vm509_vm0, %v4354_v4, 0.0 }
 0x461   : > { %3579 = vpow2.f32 %v967_v6  ;;  %1206 = vadd.xlane.f32.xlu1 %v1205_v49 }
 0x462   : > { %v1185_v9 = vmul.f32 1.442695, %v1176_v8  ;;  %v1581_v3 = vpop.xlane.xlu2 %1580 }
 0x464   : > { %3581 = vpow2.f32 %v1185_v9  ;;  %v4360_v28 = vpop.xlane.xlu1 %1173 }
 0x465   : > { %3583 = vpow2.f32 %v1191_v10  ;;  %v1182_v6 = vsub.f32 %v4298_v58, %v4360_v28 }
 0x466   : > { %3585 = vrcp.f32 %v1001_v1 }
 0x467   : > { %v4362_v11 = vpop.eup %3579  ;;  %v935_v30 = vpop.xlane.xlu0 %934  ;;  %v1197_v8 = vmul.f32 1.442695, %v1182_v6 }
 0x468   : > { %v984_v5 = vsel %vm509_vm0, %v4362_v11, 0.0 }
 0x469   : > { %985 = vadd.xlane.f32.xlu1 %v984_v5 }
 0x46a   : > { %v4366_v31 = vpop.eup %3581 }
 0x46b   : > { %v1202_v47 = vsel %vm509_vm0, %v4366_v31, 0.0  ;;  %v4370_v17 = vpop.eup %3583 }
 0x46c   : > { %v1004_v12 = vpop.xlane.xlu1 %1003  ;;  %1203 = vadd.xlane.f32.xlu0 %v1202_v47  ;;  %v1211_v19 = vsel %vm509_vm0, %v4370_v17, 0.0  ;;  %v3586_v56 = vpop.eup %3585 }
 0x46d   : > { %3587 = vrcp.f32 %v1004_v12  ;;  %v1019_v24 = vmul.f32 %v3586_v56, %v4294_v41  ;;  %v1189_v41 = vmul.f32 1.442695, %v1178_v27 }
 0x46f   : > { %1247 = vrot.lane.b32.xlu2 %v4154_v16, %s3781_s16  ;;  %3589 = vpow2.f32 %v1189_v41 }
 0x471   : > { %1212 = vadd.xlane.f32.xlu1 %v1211_v19  ;;  %v1603_v19 = vsub.f32 %v4307_v40, %v1581_v3 }
 0x473   : > { %v3588_v21 = vpop.eup %3587 }
 0x474   : > { %v1020_v18 = vmul.f32 %v3588_v21, %v4317_v60  ;;  %v1168_v60 = vpop.xlane.xlu0 %1167 }
 0x475   : > { %v4386_v32 = vpop.eup %3589  ;;  %v1180_v35 = vsub.f32 %v4286_v53, %v1168_v60 }
 0x476   : > { %v1024_v25 = vpack.c.bf16 %v1020_v18, %v1019_v24  ;;  %v1208_v29 = vsel %vm509_vm0, %v4386_v32, 0.0  ;;  %v1611_v24 = vmul.f32 1.442695, %v1603_v19 }
 0x478   : > { %3253 = vmatmul.msk.bf16.gmra.mxu3 %vm509_vm0, %v1024_v25 }
 0x47c   : > { %v1171_v44 = vpop.xlane.xlu0 %1170 }
 0x47d   : > { %v1181_v53 = vsub.f32 %v4290_v61, %v1171_v44 }
 0x47f   : > { %v1195_v45 = vmul.f32 1.442695, %v1181_v53 }
 0x480   : > { %1245 = vrot.lane.b32.xlu0 %v4158_v57, %s3781_s16 }
 0x484   : > { %v1250_v26 = vpop.permute.xlu1 %1249 }
 0x485   : > { %1271 = vmatpush.bf16.msrb.mxu1 %v1250_v26 }
 0x488   : > { %3262 = vmatmul.msk.bf16.vlgmr.msrb.gmra.mxu3 %vm879_vm11, %v4234_v51  ;;  %1243 = vrot.lane.b32.xlu0 %v4167_v23, %s3781_s16  ;;  %v1193_v51 = vmul.f32 1.442695, %v1180_v35 }
 0x48a   : > { %3591 = vpow2.f32 %v1193_v51 }
 0x48b   : > { %3593 = vpow2.f32 %v1195_v45 }
 0x48f   : > { %v4388_v34 = vpop.f32.mrf.mxu0 }
 0x490   : > { %v1591_v36 = vsel %vm509_vm0, %v4388_v34, -inf  ;;  %v4399_v33 = vpop.eup %3591 }
 0x491   : > { %v1214_v54 = vsel %vm509_vm0, %v4399_v33, 0.0 }
 0x497   : > { %v4395_v52 = vpop.f32.mrf.mxu0 }
 0x498   : > { %1209 = vadd.xlane.f32.xlu2 %v1208_v29  ;;  %3263 = vmatmul.msk.bf16.gmra.mxu3 %vm879_vm11, %v4206_v50  ;;  %v957_v50 = vsub.f32 %v4239_v46, %v935_v30  ;;  %v1585_v46 = vsel %vm509_vm0, %v4339_v37, -inf  ;;  %v1594_v2 = vsel %vm509_vm0, %v4395_v52, -inf  ;;  %v4435_v42 = vpop.f32.mrf.mxu3 }
 0x49a   : > { %v965_v59 = vmul.f32 1.442695, %v957_v50 }
 0x49c   : > { %3595 = vpow2.f32 %v965_v59 }
 0x49d   : > { %3597 = vpow2.f32 %v1197_v8 }
 0x4a0   : > { %1592 = vmax.xlane.f32.xlu2 %v1591_v36  ;;  %v4443_v7 = vpop.f32.mrf.mxu3 }
 0x4a7   : > { %v4402_v48 = vpop.f32.mrf.mxu0 }
 0x4a8   : > { %3264 = vmatmul.msk.bf16.gmra.mxu3 %vm879_vm11, %v4252_v20  ;;  %1215 = vadd.xlane.f32.xlu2 %v1214_v54  ;;  %v1597_v43 = vsel %vm509_vm0, %v4402_v48, -inf  ;;  %v4417_v20 = vpop.eup %3593  ;;  %v4445_v49 = vpop.f32.mrf.mxu3 }
 0x4a9   : > { %1598 = vmax.xlane.f32.xlu1 %v1597_v43  ;;  %v4419_v14 = vpop.eup %3595  ;;  %v1217_v63 = vsel %vm509_vm0, %v4417_v20, 0.0 }
 0x4aa   : > { %v981_v1 = vsel %vm509_vm0, %v4419_v14, 0.0  ;;  %v4448_v5 = vpop.eup %3597 }
 0x4af   : > { %v4411_v62 = vpop.f32.mrf.mxu0  ;;  %v4459_v26 = vpop.xlane.xlu1 %1589 }
 0x4b0   : > { %v1600_v61 = vsel %vm509_vm0, %v4411_v62, -inf  ;;  %v4452_v28 = vpop.f32.mrf.mxu3 }
 0x4b1   : > { %1601 = vmax.xlane.f32.xlu1 %v1600_v61 }
 0x4b2   : > { %1586 = vmax.xlane.f32.xlu0 %v1585_v46 }
 0x4b8   : > { %3265 = vmatmul.msk.bf16.gmra.mxu3 %vm879_vm11, %v4346_v55 }
 0x4b9   : > { %1218 = vadd.xlane.f32.xlu1 %v1217_v63 }
 0x4ba   : > { %982 = vadd.xlane.f32.xlu0 %v981_v1 }
 0x4c0   : > { %1463 = vrot.lane.b32.xlu2 %v4145_v15, %s3786_s25 }
 0x4c2   : > { %1595 = vmax.xlane.f32.xlu0 %v1594_v2 }
 0x4c8   : > { %1677 = vrot.lane.b32.xlu2 %v4145_v15, %s3782_s17  ;;  %v1584_v15 = vpop.xlane.xlu0 %1583 }
 0x4c9   : > { %v1604_v9 = vsub.f32 %v4325_v13, %v1584_v15 }
 0x4ca   : > { %v1201_v55 = vpop.xlane.xlu2 %1200 }
 0x4cb   : > { %v1613_v47 = vmul.f32 1.442695, %v1604_v9 }
 0x4d2   : > { %v1248_v38 = vpop.permute.xlu2 %1247  ;;  %1675 = vrot.lane.b32.xlu1 %v4154_v16, %s3782_s17 }
 0x4d3   : > { %1272 = vmatpush.bf16.msrb.mxu1 %v1248_v38 }
 0x4d4   : > { %v1207_v40 = vpop.xlane.xlu1 %1206 }
 0x4d6   : > { %1461 = vrot.lane.b32.xlu0 %v4154_v16, %s3786_s25  ;;  %v1220_v16 = vsel %vm509_vm0, %v4448_v5, 0.0 }
 0x4dc   : > { %v986_v36 = vpop.xlane.xlu1 %985 }
 0x4de   : > { %1459 = vrot.lane.b32.xlu0 %v4158_v57, %s3786_s25 }
 0x4df   : > { %v1204_v10 = vpop.xlane.xlu0 %1203 }
 0x4e0   : > { %3599 = vrcp.f32 %v1204_v10 }
 0x4e1   : > { %3601 = vrcp.f32 %v1201_v55 }
 0x4e2   : > { %3603 = vpow2.f32 %v1613_v47 }
 0x4e3   : > { %3605 = vpow2.f32 %v1611_v24 }
 0x4e4   : > { %3607 = vrcp.f32 %v1207_v40  ;;  %v1213_v46 = vpop.xlane.xlu1 %1212 }
 0x4e6   : > { %v3600_v12 = vpop.eup %3599 }
 0x4e7   : > { %v3602_v56 = vpop.eup %3601  ;;  %v1232_v21 = vmul.f32 %v3600_v12, %v4366_v31 }
 0x4e8   : > { %v4455_v13 = vpop.eup %3603  ;;  %v1231_v18 = vmul.f32 %v3602_v56, %v4348_v0 }
 0x4e9   : > { %v1630_v30 = vsel %vm509_vm0, %v4455_v13, 0.0  ;;  %v4468_v31 = vpop.eup %3605 }
 0x4ea   : > { %v1239_v41 = vpack.c.bf16 %v1232_v21, %v1231_v18  ;;  %v1627_v0 = vsel %vm509_vm0, %v4468_v31, 0.0  ;;  %v3608_v44 = vpop.eup %3607 }
 0x4eb   : > { %v1233_v43 = vmul.f32 %v3608_v44, %v4354_v4 }
 0x4f1   : > { %1221 = vadd.xlane.f32.xlu2 %v1220_v16 }
 0x4f2   : > { %v1246_v58 = vpop.permute.xlu0 %1245 }
 0x4f3   : > { %1273 = vmatpush.bf16.msrb.mxu1 %v1246_v58 }
 0x4fa   : > { %v1244_v25 = vpop.permute.xlu0 %1243 }
 0x4fb   : > { %v4461_v27 = vpop.f32.mrf.mxu3  ;;  %1274 = vmatpush.bf16.msrb.mxu1 %v1244_v25 }
 0x4fc   : > { %1631 = vadd.xlane.f32.xlu1 %v1630_v30 }
 0x4fe   : > { %3258 = vmatmul.msk.bf16.vlgmr.msrb.gmra.mxu1 %vm509_vm0, %v1239_v41 }
 0x503   : > { %v4466_v60 = vpop.f32.mrf.mxu3 }
 0x508   : > { %1628 = vadd.xlane.f32.xlu0 %v1627_v0 }
 0x50b   : > { %v1210_v35 = vpop.xlane.xlu2 %1209  ;;  %v4472_v29 = vpop.f32.mrf.mxu3 }
 0x50c   : > { %3609 = vrcp.f32 %v1210_v35  ;;  %v1365_v51 = vsel %vm509_vm0, %v4472_v29, -inf }
 0x50d   : > { %1366 = vmax.xlane.f32.xlu1 %v1365_v51  ;;  %3611 = vrcp.f32 %v1213_v46 }
 0x512   : > { %v3610_v53 = vpop.eup %3609 }
 0x513   : > { %v4476_v54 = vpop.xlane.xlu2 %1592  ;;  %v4478_v50 = vpop.f32.mrf.mxu3  ;;  %v1234_v45 = vmul.f32 %v3610_v53, %v4386_v32 }
 0x514   : > { %v1368_v59 = vsel %vm509_vm0, %v4478_v50, -inf  ;;  %v3612_v4 = vpop.eup %3611 }
 0x515   : > { %1369 = vmax.xlane.f32.xlu2 %v1368_v59  ;;  %v1240_v61 = vpack.c.bf16 %v1234_v45, %v1233_v43  ;;  %v1235_v38 = vmul.f32 %v3612_v4, %v4370_v17 }
 0x517   : > { %3259 = vmatmul.msk.bf16.gmra.mxu1 %vm509_vm0, %v1240_v61  ;;  %v1607_v61 = vsub.f32 %v4388_v34, %v4476_v54 }
 0x51b   : > { %v4485_v63 = vpop.f32.mrf.mxu3  ;;  %v1216_v1 = vpop.xlane.xlu2 %1215 }
 0x51c   : > { %3613 = vrcp.f32 %v1216_v1  ;;  %v1371_v2 = vsel %vm509_vm0, %v4485_v63, -inf  ;;  %v4496_v10 = vpop.xlane.xlu1 %1598 }
 0x51d   : > { %1372 = vmax.xlane.f32.xlu1 %v1371_v2  ;;  %3615 = vrcp.f32 %v986_v36 }
 0x522   : > { %v3614_v3 = vpop.eup %3613 }
 0x523   : > { %v4489_v32 = vpop.f32.mrf.mxu3  ;;  %v1464_v55 = vpop.permute.xlu2 %1463  ;;  %v1236_v6 = vmul.f32 %v3614_v3, %v4399_v33 }
 0x524   : > { %1485 = vmatpush.bf16.msrb.mxu2 %v1464_v55  ;;  %v1374_v15 = vsel %vm509_vm0, %v4489_v32, -inf  ;;  %v3616_v58 = vpop.eup %3615  ;;  %v4502_v12 = vpop.xlane.xlu1 %1601 }
 0x525   : > { %1375 = vmax.xlane.f32.xlu2 %v1374_v15  ;;  %v1587_v8 = vpop.xlane.xlu0 %1586  ;;  %v1241_v9 = vpack.c.bf16 %v1236_v6, %v1235_v38  ;;  %v1014_v24 = vmul.f32 %v3616_v58, %v4362_v11 }
 0x526   : > { %v1605_v44 = vsub.f32 %v4339_v37, %v1587_v8 }
 0x527   : > { %3260 = vmatmul.msk.bf16.gmra.mxu1 %vm509_vm0, %v1241_v9 }
 0x528   : > { %v1615_v43 = vmul.f32 1.442695, %v1605_v44 }
 0x52b   : > { %v4498_v47 = vpop.f32.mrf.mxu3  ;;  %v1678_v16 = vpop.permute.xlu2 %1677 }
 0x52c   : > { %1699 = vmatpush.bf16.msrb.mxu0 %v1678_v16  ;;  %3448 = vmatpush.bf16.msra.mxu1 %v1678_v16  ;;  %v1377_v17 = vsel %vm509_vm0, %v4498_v47, -inf  ;;  %v1219_v41 = vpop.xlane.xlu1 %1218 }
 0x52d   : > { %1378 = vmax.xlane.f32.xlu1 %v1377_v17  ;;  %v983_v33 = vpop.xlane.xlu0 %982 }
 0x52e   : > { %3617 = vrcp.f32 %v983_v33 }
 0x52f   : > { %3619 = vrcp.f32 %v1219_v41  ;;  %v1610_v41 = vsub.f32 %v4411_v62, %v4502_v12 }
 0x533   : > { %v4504_v19 = vpop.f32.mrf.mxu3 }
 0x534   : > { %v3618_v56 = vpop.eup %3617  ;;  %v1380_v21 = vsel %vm509_vm0, %v4504_v19, -inf }
 0x535   : > { %v1013_v18 = vmul.f32 %v3618_v56, %v4419_v14  ;;  %1381 = vmax.xlane.f32.xlu2 %v1380_v21  ;;  %v4515_v0 = vpop.xlane.xlu0 %1595  ;;  %v3620_v45 = vpop.eup %3619 }
 0x536   : > { %v1237_v46 = vmul.f32 %v3620_v45, %v4417_v20  ;;  %v1609_v45 = vsub.f32 %v4402_v48, %v4496_v10 }
 0x537   : > { %v1021_v25 = vpack.c.bf16 %v1014_v24, %v1013_v18 }
 0x539   : > { %3250 = vmatmul.msk.bf16.vlgmr.msra.gmra.mxu2 %vm509_vm0, %v1021_v25 }
 0x53b   : > { %v4511_v30 = vpop.f32.mrf.mxu3 }
 0x53c   : > { %v1383_v40 = vsel %vm509_vm0, %v4511_v30, -inf }
 0x53d   : > { %1384 = vmax.xlane.f32.xlu0 %v1383_v40 }
 0x543   : > { %v4517_v35 = vpop.f32.mrf.mxu3 }
 0x544   : > { %v1676_v51 = vpop.permute.xlu1 %1675  ;;  %v1386_v11 = vsel %vm509_vm0, %v4517_v35, -inf }
 0x545   : > { %1700 = vmatpush.bf16.msrb.mxu0 %v1676_v51  ;;  %1387 = vmax.xlane.f32.xlu1 %v1386_v11  ;;  %v1625_v11 = vmul.f32 1.442695, %v1610_v41 }
 0x546   : > { %3449 = vmatpush.bf16.msra.mxu1 %v1676_v51 }
 0x548   : > { %v1462_v14 = vpop.permute.xlu0 %1461 }
 0x549   : > { %1486 = vmatpush.bf16.msrb.mxu2 %v1462_v14 }
 0x54d   : > { %1673 = vrot.lane.b32.xlu2 %v4158_v57, %s3782_s17  ;;  %v1619_v57 = vmul.f32 1.442695, %v1607_v61 }
 0x550   : > { %v1460_v36 = vpop.permute.xlu0 %1459 }
 0x551   : > { %1487 = vmatpush.bf16.msrb.mxu2 %v1460_v36 }
 0x564   : > { %v1222_v53 = vpop.xlane.xlu2 %1221 }
 0x565   : > { %3621 = vrcp.f32 %v1222_v53  ;;  %v1606_v53 = vsub.f32 %v4341_v39, %v4459_v26  ;;  %v1623_v39 = vmul.f32 1.442695, %v1609_v45 }
 0x566   : > { %3623 = vpow2.f32 %v1615_v43 }
 0x567   : > { %3625 = vpow2.f32 %v1619_v57  ;;  %v1617_v12 = vmul.f32 1.442695, %v1606_v53 }
 0x56b   : > { %v3622_v59 = vpop.eup %3621 }
 0x56c   : > { %v1238_v1 = vmul.f32 %v3622_v59, %v4448_v5  ;;  %v4529_v4 = vpop.eup %3623 }
 0x56d   : > { %v1633_v37 = vsel %vm509_vm0, %v4529_v4, 0.0  ;;  %v4533_v55 = vpop.eup %3625 }
 0x56e   : > { %v1242_v2 = vpack.c.bf16 %v1238_v1, %v1237_v46  ;;  %v1639_v20 = vsel %vm509_vm0, %v4533_v55, 0.0 }
 0x56f   : > { %v1632_v3 = vpop.xlane.xlu1 %1631 }
 0x570   : > { %3261 = vmatmul.msk.bf16.gmra.mxu1 %vm509_vm0, %v1242_v2  ;;  %3627 = vrcp.f32 %v1632_v3 }
 0x576   : > { %1634 = vadd.xlane.f32.xlu2 %v1633_v37  ;;  %v3628_v5 = vpop.eup %3627 }
 0x577   : > { %v4539_v15 = vmul.f32 %v3628_v5, %v4455_v13 }
 0x57b   : > { %v1629_v34 = vpop.xlane.xlu0 %1628 }
 0x57c   : > { %3629 = vrcp.f32 %v1629_v34 }
 0x57e   : > { %1640 = vadd.xlane.f32.xlu2 %v1639_v20  ;;  %v1608_v20 = vsub.f32 %v4395_v52, %v4515_v0 }
 0x580   : > { %v1367_v54 = vpop.xlane.xlu1 %1366  ;;  %v1621_v5 = vmul.f32 1.442695, %v1608_v20 }
 0x581   : > { %v1389_v38 = vsub.f32 %v4472_v29, %v1367_v54 }
 0x582   : > { %v3630_v6 = vpop.eup %3629 }
 0x583   : > { %v4542_v8 = vmul.f32 %v3630_v6, %v4468_v31  ;;  %v1397_v9 = vmul.f32 1.442695, %v1389_v38 }
 0x585   : > { %v1667_v16 = vpack.c.bf16 %v4539_v15, %v4542_v8  ;;  %3631 = vpow2.f32 %v1397_v9 }
 0x588   : > { %v1370_v17 = vpop.xlane.xlu2 %1369 }
 0x589   : > { %v1390_v33 = vsub.f32 %v4478_v50, %v1370_v17 }
 0x58b   : > { %v4547_v58 = vpop.eup %3631  ;;  %v1399_v56 = vmul.f32 1.442695, %v1390_v33 }
 0x58c   : > { %v1413_v29 = vsel %vm509_vm0, %v4547_v58, 0.0 }
 0x58d   : > { %3633 = vpow2.f32 %v1399_v56  ;;  %1414 = vadd.xlane.f32.xlu0 %v1413_v29  ;;  %v1276_v29 = vpop.f32.mrf.mxu1 }
 0x590   : > { %v1373_v51 = vpop.xlane.xlu1 %1372 }
 0x591   : > { %v1391_v14 = vsub.f32 %v4485_v63, %v1373_v51 }
 0x593   : > { %v4551_v13 = vpop.eup %3633  ;;  %v1401_v44 = vmul.f32 1.442695, %v1391_v14 }
 0x594   : > { %v1416_v31 = vsel %vm509_vm0, %v4551_v13, 0.0 }
 0x595   : > { %1417 = vadd.xlane.f32.xlu1 %v1416_v31  ;;  %v1278_v31 = vpop.f32.mrf.mxu1 }
 0x598   : > { %v1376_v21 = vpop.xlane.xlu2 %1375 }
 0x599   : > { %v1392_v63 = vsub.f32 %v4489_v32, %v1376_v21  ;;  %v3469_v21 = vpack.i.bf16 %v1278_v31, %v1276_v29 }
 0x59b   : > { %v1403_v59 = vmul.f32 1.442695, %v1392_v63 }
 0x5a0   : > { %v1379_v46 = vpop.xlane.xlu1 %1378 }
 0x5a1   : > { %1671 = vrot.lane.b32.xlu0 %v4167_v23, %s3782_s17  ;;  %v1393_v26 = vsub.f32 %v4498_v47, %v1379_v46 }
 0x5a3   : > { %v1405_v32 = vmul.f32 1.442695, %v1393_v26 }
 0x5a8   : > { %v1382_v24 = vpop.xlane.xlu2 %1381 }
 0x5a9   : > { %v1394_v48 = vsub.f32 %v4504_v19, %v1382_v24 }
 0x5ab   : > { %v1407_v47 = vmul.f32 1.442695, %v1394_v48 }
 0x5ae   : > { %1457 = vrot.lane.b32.xlu1 %v4167_v23, %s3786_s25 }
 0x5b0   : > { %v1674_v50 = vpop.permute.xlu2 %1673  ;;  %v1385_v18 = vpop.xlane.xlu0 %1384 }
 0x5b1   : > { %v1395_v25 = vsub.f32 %v4511_v30, %v1385_v18  ;;  %1701 = vmatpush.bf16.msrb.mxu0 %v1674_v50  ;;  %3450 = vmatpush.bf16.msra.mxu1 %v1674_v50 }
 0x5b3   : > { %v1409_v40 = vmul.f32 1.442695, %v1395_v25 }
 0x5b5   : > { %3635 = vpow2.f32 %v1409_v40 }
 0x5b6   : > { %3637 = vpow2.f32 %v1625_v11 }
 0x5b7   : > { %3639 = vpow2.f32 %v1401_v44 }
 0x5b8   : > { %3641 = vpow2.f32 %v1617_v12  ;;  %v1388_v54 = vpop.xlane.xlu1 %1387 }
 0x5b9   : > { %3643 = vpow2.f32 %v1403_v59  ;;  %v1396_v6 = vsub.f32 %v4517_v35, %v1388_v54 }
 0x5ba   : > { %3645 = vpow2.f32 %v1623_v39 }
 0x5bb   : > { %v4563_v36 = vpop.eup %3635  ;;  %3647 = vpow2.f32 %v1405_v32  ;;  %v1411_v17 = vmul.f32 1.442695, %v1396_v6 }
 0x5bc   : > { %v1431_v23 = vsel %vm509_vm0, %v4563_v36, 0.0  ;;  %v4567_v30 = vpop.eup %3637  ;;  %3649 = vpow2.f32 %v1407_v47 }
 0x5bd   : > { %1432 = vadd.xlane.f32.xlu2 %v1431_v23  ;;  %v1648_v62 = vsel %vm509_vm0, %v4567_v30, 0.0  ;;  %v4574_v43 = vpop.eup %3639  ;;  %3651 = vpow2.f32 %v1621_v5 }
 0x5be   : > { %v1419_v61 = vsel %vm509_vm0, %v4574_v43, 0.0  ;;  %v4581_v1 = vpop.eup %3641  ;;  %3653 = vpow2.f32 %v1411_v17 }
 0x5bf   : > { %v1636_v2 = vsel %vm509_vm0, %v4581_v1, 0.0  ;;  %v4585_v57 = vpop.eup %3643 }
 0x5c0   : > { %v4588_v10 = vpop.eup %3645  ;;  %v1422_v37 = vsel %vm509_vm0, %v4585_v57, 0.0 }
 0x5c1   : > { %v1645_v3 = vsel %vm509_vm0, %v4588_v10, 0.0  ;;  %v4594_v34 = vpop.eup %3647 }
 0x5c2   : > { %v1425_v19 = vsel %vm509_vm0, %v4594_v34, 0.0  ;;  %v4600_v38 = vpop.eup %3649 }
 0x5c3   : > { %v1428_v9 = vsel %vm509_vm0, %v4600_v38, 0.0  ;;  %v4605_v33 = vpop.eup %3651 }
 0x5c4   : > { %v1642_v52 = vsel %vm509_vm0, %v4605_v33, 0.0  ;;  %v4609_v0 = vpop.eup %3653 }
 0x5c5   : > { %1649 = vadd.xlane.f32.xlu2 %v1648_v62  ;;  %v1434_v56 = vsel %vm509_vm0, %v4609_v0, 0.0 }
 0x5cb   : > { %1420 = vadd.xlane.f32.xlu0 %v1419_v61 }
 0x5d3   : > { %1637 = vadd.xlane.f32.xlu0 %v1636_v2 }
 0x5d8   : > { %1423 = vadd.xlane.f32.xlu1 %v1422_v37 }
 0x5db   : > { %1646 = vadd.xlane.f32.xlu0 %v1645_v3 }
 0x5e0   : > { %1426 = vadd.xlane.f32.xlu1 %v1425_v19 }
 0x5e8   : > { %1429 = vadd.xlane.f32.xlu1 %v1428_v9 }
 0x5e9   : > { %v1635_v23 = vpop.xlane.xlu2 %1634 }
 0x5f0   : > { %1643 = vadd.xlane.f32.xlu1 %v1642_v52 }
 0x5f1   : > { %v1641_v39 = vpop.xlane.xlu2 %1640 }
 0x5f8   : > { %1435 = vadd.xlane.f32.xlu1 %v1434_v56  ;;  %v1281_v56 = vpop.f32.mrf.mxu1 }
 0x600   : > { %v1415_v35 = vpop.xlane.xlu0 %1414  ;;  %v1283_v31 = vpop.f32.mrf.mxu1 }
 0x608   : > { %v1418_v24 = vpop.xlane.xlu1 %1417 }
 0x609   : > { %3655 = vrcp.f32 %v1418_v24 }
 0x60a   : > { %3657 = vrcp.f32 %v1415_v35 }
 0x60b   : > { %3659 = vrcp.f32 %v1635_v23  ;;  %v3484_v23 = vpack.i.bf16 %v1283_v31, %v1281_v56 }
 0x60f   : > { %v3656_v18 = vpop.eup %3655 }
 0x610   : > { %v3658_v25 = vpop.eup %3657  ;;  %v1446_v41 = vmul.f32 %v3656_v18, %v4551_v13 }
 0x611   : > { %3470 = vrot.lane.b32.xlu1 %v3469_v21, %s3785_s23  ;;  %v1445_v40 = vmul.f32 %v3658_v25, %v4547_v58  ;;  %v3660_v15 = vpop.eup %3659  ;;  %v1286_v21 = vpop.f32.mrf.mxu1 }
 0x612   : > { %v1661_v53 = vmul.f32 %v3660_v15, %v4529_v4 }
 0x613   : > { %v1672_v50 = vpop.permute.xlu0 %1671  ;;  %v1453_v11 = vpack.c.bf16 %v1446_v41, %v1445_v40 }
 0x614   : > { %1702 = vmatpush.bf16.msrb.mxu0 %v1672_v50  ;;  %3451 = vmatpush.bf16.msra.mxu1 %v1672_v50  ;;  %v1062_v50 = vpop.f32.mrf.mxu2 }
 0x617   : > { %3274 = vmatmul.msk.bf16.vlgmr.msrb.gmra.mxu0 %vm509_vm0, %v1667_v16 }
 0x61c   : > { %v1064_v25 = vpop.f32.mrf.mxu2 }
 0x620   : > { %v1458_v51 = vpop.permute.xlu1 %1457 }
 0x621   : > { %1488 = vmatpush.bf16.msrb.mxu2 %v1458_v51 }
 0x624   : > { %3266 = vmatmul.msk.bf16.vlgmr.msrb.gmra.mxu2 %vm509_vm0, %v1453_v11 }
 0x630   : > { %v1433_v48 = vpop.xlane.xlu2 %1432 }
 0x638   : > { %v1650_v54 = vpop.xlane.xlu2 %1649 }
 0x63e   : > { %v1421_v14 = vpop.xlane.xlu0 %1420 }
 0x646   : > { %v1638_v44 = vpop.xlane.xlu0 %1637 }
 0x647   : > { %3661 = vrcp.f32 %v1638_v44  ;;  %v3415_v44 = vld [vmem:[%s5424_s5 + $0x18] sm:$0xff] }
 0x648   : > { %3663 = vrcp.f32 %v1421_v14  ;;  %1902 = vmatpush.bf16.msra.mxu3 %v3415_v44 }
 0x64b   : > { %v1424_v8 = vpop.xlane.xlu1 %1423 }
 0x64c   : > { %3665 = vrcp.f32 %v1424_v8 }
 0x64d   : > { %v3662_v16 = vpop.eup %3661 }
 0x64e   : > { %v1662_v13 = vmul.f32 %v3662_v16, %v4581_v1  ;;  %v3664_v58 = vpop.eup %3663  ;;  %v1647_v19 = vpop.xlane.xlu0 %1646 }
 0x64f   : > { %v1447_v45 = vmul.f32 %v3664_v58, %v4574_v43 }
 0x650   : > { %v1668_v62 = vpack.c.bf16 %v1662_v13, %v1661_v53  ;;  %v3414_v13 = vld [vmem:[%s5424_s5 + $0x10] sm:$0xff] }
 0x651   : > { %1903 = vmatpush.bf16.msra.mxu3 %v3414_v13 }
 0x652   : > { %v3666_v12 = vpop.eup %3665  ;;  %3275 = vmatmul.msk.bf16.vlgmr.msra.gmra.mxu1 %vm509_vm0, %v1668_v62 }
 0x653   : > { %v1427_v63 = vpop.xlane.xlu1 %1426  ;;  %v1448_v59 = vmul.f32 %v3666_v12, %v4585_v57 }
 0x654   : > { %3667 = vrcp.f32 %v1427_v63 }
 0x655   : > { %v1454_v61 = vpack.c.bf16 %v1448_v59, %v1447_v45  ;;  %v3413_v45 = vld [vmem:[%s5424_s5 + $0x8] sm:$0xff]  ;;  %v3412_v59 = vld [vmem:[%s5424_s5] sm:$0xff] }
 0x656   : > { %1904 = vmatpush.bf16.msra.mxu3 %v3413_v45 }
 0x657   : > { %3267 = vmatmul.msk.bf16.gmra.mxu2 %vm509_vm0, %v1454_v61 }
 0x65a   : > { %v3668_v4 = vpop.eup %3667  ;;  %1905 = vmatpush.bf16.msra.mxu3 %v3412_v59 }
 0x65b   : > { %v1430_v46 = vpop.xlane.xlu1 %1429  ;;  %v1449_v32 = vmul.f32 %v3668_v4, %v4594_v34 }
 0x65c   : > { %3669 = vrcp.f32 %v1430_v46 }
 0x65d   : > { %3671 = vrcp.f32 %v1641_v39 }
 0x662   : > { %v3670_v26 = vpop.eup %3669 }
 0x663   : > { %v1644_v1 = vpop.xlane.xlu1 %1643  ;;  %v1450_v2 = vmul.f32 %v3670_v26, %v4600_v38  ;;  %v3672_v57 = vpop.eup %3671 }
 0x664   : > { %3673 = vrcp.f32 %v1644_v1  ;;  %v1663_v3 = vmul.f32 %v3672_v57, %v4533_v55 }
 0x665   : > { %v1455_v43 = vpack.c.bf16 %v1450_v2, %v1449_v32  ;;  %3675 = vrcp.f32 %v1433_v48 }
 0x667   : > { %3268 = vmatmul.msk.bf16.gmra.mxu2 %vm509_vm0, %v1455_v43 }
 0x66a   : > { %v3674_v37 = vpop.eup %3673 }
 0x66b   : > { %v1436_v47 = vpop.xlane.xlu1 %1435  ;;  %v1664_v20 = vmul.f32 %v3674_v37, %v4605_v33  ;;  %v3676_v34 = vpop.eup %3675 }
 0x66c   : > { %3677 = vrcp.f32 %v1436_v47  ;;  %v1451_v6 = vmul.f32 %v3676_v34, %v4563_v36  ;;  %v1288_v36 = vpop.f32.mrf.mxu1 }
 0x66d   : > { %v1669_v5 = vpack.c.bf16 %v1664_v20, %v1663_v3  ;;  %3679 = vrcp.f32 %v1647_v19  ;;  %v3499_v40 = vpack.i.bf16 %v1288_v36, %v1286_v21 }
 0x66e   : > { %3681 = vrcp.f32 %v1650_v54 }
 0x66f   : > { %3276 = vmatmul.msk.bf16.gmra.mxu1 %vm509_vm0, %v1669_v5 }
 0x672   : > { %v3678_v38 = vpop.eup %3677 }
 0x673   : > { %v1452_v9 = vmul.f32 %v3678_v38, %v4609_v0  ;;  %v3680_v52 = vpop.eup %3679 }
 0x674   : > { %v3682_v55 = vpop.eup %3681  ;;  %v1665_v33 = vmul.f32 %v3680_v52, %v4588_v10  ;;  %v1291_v41 = vpop.f32.mrf.mxu1 }
 0x675   : > { %v1456_v17 = vpack.c.bf16 %v1452_v9, %v1451_v6  ;;  %v1666_v29 = vmul.f32 %v3682_v55, %v4567_v30 }
 0x677   : > { %3269 = vmatmul.msk.bf16.gmra.mxu2 %vm509_vm0, %v1456_v17  ;;  %v1670_v35 = vpack.c.bf16 %v1666_v29, %v1665_v33 }
 0x67c   : > { %v1293_v10 = vpop.f32.mrf.mxu1 }
 0x67d   : > { %v3514_v30 = vpack.i.bf16 %v1293_v10, %v1291_v41 }
 0x67f   : > { %3277 = vmatmul.msk.bf16.gmra.mxu1 %vm509_vm0, %v1670_v35 }
 0x683   : > { %v3471_v57 = vpop.permute.xlu1 %3470 }
 0x684   : > { %v3473_v37 = vunpack.i.h.bf16 %v3471_v57  ;;  %v3472_v47 = vunpack.i.l.bf16 %v3471_v57 }
 0x686   : > { %v1821_v54 = vsel %vm879_vm11, %v1064_v25, %v3473_v37  ;;  %v1820_v34 = vsel %vm879_vm11, %v1062_v50, %v3472_v47 }
 0x694   : > { %v1704_v24 = vpop.f32.mrf.mxu0 }
 0x69c   : > { %v1706_v18 = vpop.f32.mrf.mxu0 }
 0x69d   : > { %v3479_v0 = vpack.i.bf16 %v1706_v18, %v1704_v24 }
 0x69f   : > { %3480 = vrot.lane.b32.xlu2 %v3479_v0, %s3783_s19 }
 0x6a7   : > { %v1490_v51 = vpop.f32.mrf.mxu2  ;;  %3500 = vrot.lane.b32.xlu2 %v3499_v40, %s3785_s23 }
 0x6af   : > { %v1492_v11 = vpop.f32.mrf.mxu2  ;;  %3515 = vrot.lane.b32.xlu2 %v3514_v30, %s3785_s23 }
 0x6b0   : > { %v3474_v14 = vpack.i.bf16 %v1492_v11, %v1490_v51 }
 0x6b2   : > { %3475 = vrot.lane.b32.xlu0 %v3474_v14, %s3784_s22 }
 0x6ba   : > { %3485 = vrot.lane.b32.xlu0 %v3484_v23, %s3785_s23 }
 0x6cf   : > { %v1709_v15 = vpop.f32.mrf.mxu1 }
 0x6d7   : > { %v1711_v8 = vpop.f32.mrf.mxu1 }
 0x6d8   : > { %v3494_v16 = vpack.i.bf16 %v1711_v8, %v1709_v15 }
 0x6da   : > { %v1495_v53 = vpop.f32.mrf.mxu2  ;;  %3495 = vrot.lane.b32.xlu0 %v3494_v16, %s3783_s19 }
 0x6e2   : > { %v1497_v58 = vpop.f32.mrf.mxu2 }
 0x6e3   : > { %v3489_v62 = vpack.i.bf16 %v1497_v58, %v1495_v53 }
 0x6e5   : > { %3490 = vrot.lane.b32.xlu1 %v3489_v62, %s3784_s22 }
 0x6ea   : > { %v1500_v12 = vpop.f32.mrf.mxu2 }
 0x6ec   : > { %v1714_v63 = vpop.f32.mrf.mxu1 }
 0x6f2   : > { %v1502_v61 = vpop.f32.mrf.mxu2 }
 0x6f3   : > { %v3504_v46 = vpack.i.bf16 %v1502_v61, %v1500_v12 }
 0x6f4   : > { %v1716_v39 = vpop.f32.mrf.mxu1 }
 0x6f5   : > { %v3509_v4 = vpack.i.bf16 %v1716_v39, %v1714_v63  ;;  %3505 = vrot.lane.b32.xlu1 %v3504_v46, %s3784_s22 }
 0x6f7   : > { %3510 = vrot.lane.b32.xlu0 %v3509_v4, %s3783_s19 }
 0x6f9   : > { %v3481_v3 = vpop.permute.xlu2 %3480 }
 0x6fa   : > { %v1505_v26 = vpop.f32.mrf.mxu2  ;;  %v3483_v38 = vunpack.i.h.bf16 %v3481_v3  ;;  %v3482_v6 = vunpack.i.l.bf16 %v3481_v3 }
 0x6fc   : > { %v1719_v1 = vpop.f32.mrf.mxu1 }
 0x701   : > { %v3501_v11 = vpop.permute.xlu2 %3500 }
 0x702   : > { %v1507_v32 = vpop.f32.mrf.mxu2  ;;  %v3503_v14 = vunpack.i.h.bf16 %v3501_v11  ;;  %v3502_v23 = vunpack.i.l.bf16 %v3501_v11 }
 0x703   : > { %v3519_v2 = vpack.i.bf16 %v1507_v32, %v1505_v26 }
 0x704   : > { %v1721_v48 = vpop.f32.mrf.mxu1  ;;  %v1824_v8 = vsel %vm879_vm11, %v4445_v49, %v3502_v23 }
 0x705   : > { %v3524_v43 = vpack.i.bf16 %v1721_v48, %v1719_v1  ;;  %3520 = vrot.lane.b32.xlu1 %v3519_v2, %s3784_s22 }
 0x707   : > { %3525 = vrot.lane.b32.xlu0 %v3524_v43, %s3783_s19 }
 0x709   : > { %v3516_v59 = vpop.permute.xlu2 %3515 }
 0x70a   : > { %v3518_v61 = vunpack.i.h.bf16 %v3516_v59 }
 0x70c   : > { %v1827_v4 = vsel %vm879_vm11, %v4466_v60, %v3518_v61  ;;  %v3531_v60 = vld [vmem:[%s5425_s6] ss:$0 sm:$0xff] }
 0x724   : > { %v3476_v20 = vpop.permute.xlu0 %3475 }
 0x725   : > { %v3478_v19 = vunpack.i.h.bf16 %v3476_v20  ;;  %v3477_v5 = vunpack.i.l.bf16 %v3476_v20 }
 0x727   : > { %v1830_v9 = vsel %vm1828_vm12, %v1821_v54, %v3478_v19  ;;  %v1829_v17 = vsel %vm1828_vm12, %v1820_v34, %v3477_v5  ;;  %v3763_v5 = vld [vmem:[%s3884_s24] sm:$0xff] }
 0x728   : > { %v1839_v52 = vsel %vm1837_vm13, %v1830_v9, %v3483_v38  ;;  %v1838_v55 = vsel %vm1837_vm13, %v1829_v17, %v3482_v6  ;;  %v3764_v17 = vld [vmem:[%s3884_s24 + $0x8] sm:$0xff] }
 0x729   : > { %v1846_v33 = vpack.c.bf16 %v1839_v52, %v1838_v55 }
 0x72b   : > { %3294 = vmatmul.msk.bf16.vlgmr.msra.gmra.mxu3 %vm509_vm0, %v1846_v33 }
 0x72c   : > { %v3486_v56 = vpop.permute.xlu0 %3485 }
 0x72d   : > { %v3488_v29 = vunpack.i.h.bf16 %v3486_v56  ;;  %v3487_v35 = vunpack.i.l.bf16 %v3486_v56 }
 0x72f   : > { %v1823_v36 = vsel %vm879_vm11, %v4443_v7, %v3488_v29  ;;  %v1822_v18 = vsel %vm879_vm11, %v4435_v42, %v3487_v35  ;;  %v1825_v42 = vsel %vm879_vm11, %v4452_v28, %v3503_v14  ;;  %v3517_v28 = vunpack.i.l.bf16 %v3516_v59  ;;  %v3765_v35 = vld [vmem:[%s3884_s24 + $0x10] sm:$0xff] }
 0x731   : > { %v1826_v26 = vsel %vm879_vm11, %v4461_v27, %v3517_v28  ;;  %v3532_v27 = vld [vmem:[%s5426_s7] ss:$0 sm:$0xff] }
 0x74c   : > { %v3496_v31 = vpop.permute.xlu0 %3495 }
 0x74d   : > { %v3498_v0 = vunpack.i.h.bf16 %v3496_v31  ;;  %v3497_v25 = vunpack.i.l.bf16 %v3496_v31 }
 0x757   : > { %v3491_v21 = vpop.permute.xlu1 %3490 }
 0x758   : > { %v3493_v24 = vunpack.i.h.bf16 %v3491_v21  ;;  %v3492_v50 = vunpack.i.l.bf16 %v3491_v21 }
 0x75a   : > { %v1831_v41 = vsel %vm1828_vm12, %v1822_v18, %v3492_v50  ;;  %v1832_v40 = vsel %vm1828_vm12, %v1823_v36, %v3493_v24  ;;  %v3766_v18 = vld [vmem:[%s3884_s24 + $0x18] sm:$0xff] }
 0x75b   : > { %v1840_v51 = vsel %vm1837_vm13, %v1831_v41, %v3497_v25  ;;  %v1841_v10 = vsel %vm1837_vm13, %v1832_v40, %v3498_v0 }
 0x75c   : > { %v1847_v30 = vpack.c.bf16 %v1841_v10, %v1840_v51  ;;  %v3767_v10 = vld [vmem:[%s3884_s24 + $0x20] sm:$0xff] }
 0x75e   : > { %3295 = vmatmul.msk.bf16.gmra.mxu3 %vm509_vm0, %v1847_v30 }
 0x767   : > { %v3506_v7 = vpop.permute.xlu1 %3505 }
 0x768   : > { %v3508_v44 = vunpack.i.h.bf16 %v3506_v7  ;;  %v3507_v15 = vunpack.i.l.bf16 %v3506_v7 }
 0x769   : > { %v3511_v16 = vpop.permute.xlu0 %3510 }
 0x76a   : > { %v1834_v53 = vsel %vm1828_vm12, %v1825_v42, %v3508_v44  ;;  %v1833_v13 = vsel %vm1828_vm12, %v1824_v8, %v3507_v15  ;;  %v3513_v58 = vunpack.i.h.bf16 %v3511_v16  ;;  %v3512_v62 = vunpack.i.l.bf16 %v3511_v16  ;;  %v3768_v44 = vld [vmem:[%s3884_s24 + $0x28] sm:$0xff] }
 0x76c   : > { %v1842_v12 = vsel %vm1837_vm13, %v1833_v13, %v3512_v62  ;;  %v1843_v63 = vsel %vm1837_vm13, %v1834_v53, %v3513_v58  ;;  %v3769_v13 = vld [vmem:[%s3884_s24 + $0x30] sm:$0xff] }
 0x76d   : > { %v1848_v45 = vpack.c.bf16 %v1843_v63, %v1842_v12 }
 0x76f   : > { %3296 = vmatmul.msk.bf16.gmra.mxu3 %vm509_vm0, %v1848_v45 }
 0x777   : > { %v3521_v46 = vpop.permute.xlu1 %3520 }
 0x778   : > { %v3523_v39 = vunpack.i.h.bf16 %v3521_v46  ;;  %v3522_v49 = vunpack.i.l.bf16 %v3521_v46 }
 0x779   : > { %v3526_v1 = vpop.permute.xlu0 %3525 }
 0x77a   : > { %v1836_v32 = vsel %vm1828_vm12, %v1827_v4, %v3523_v39  ;;  %v1835_v2 = vsel %vm1828_vm12, %v1826_v26, %v3522_v49  ;;  %v3528_v48 = vunpack.i.h.bf16 %v3526_v1  ;;  %v3527_v43 = vunpack.i.l.bf16 %v3526_v1  ;;  %v3770_v26 = vld [vmem:[%s3884_s24 + $0x38] sm:$0xff] }
 0x77c   : > { %v1844_v57 = vsel %vm1837_vm13, %v1835_v2, %v3527_v43  ;;  %v1845_v37 = vsel %vm1837_vm13, %v1836_v32, %v3528_v48 }
 0x77d   : > { %v1849_v47 = vpack.c.bf16 %v1845_v37, %v1844_v57 }
 0x77f   : > { %3297 = vmatmul.msk.bf16.gmra.mxu3 %vm509_vm0, %v1849_v47 }
 0x7ae   : > { %v1907_v3 = vpop.f32.mrf.mxu3 }
 0x7af   : > { %v1908_v20 = vadd.f32 %v3531_v60, %v1907_v3 }
 0x7b1   : > { %v1931_v19 = vmul.f32 %v3532_v27, %v1908_v20 }
 0x7b3   : > { %v4703_v54 = vadd.f32 %v3763_v5, %v1931_v19 }
 0x7b5   : > { %v1949_v34 = vsel %vm509_vm0, %v4703_v54, 0.0 }
 0x7b6   : > { %v1909_v38 = vpop.f32.mrf.mxu3  ;;  %1950 = vadd.xlane.f32.xlu2 %v1949_v34 }
 0x7b7   : > { %v1910_v6 = vadd.f32 %v3531_v60, %v1909_v38 }
 0x7b9   : > { %v1932_v9 = vmul.f32 %v3532_v27, %v1910_v6 }
 0x7bb   : > { %v4708_v52 = vadd.f32 %v3764_v17, %v1932_v9 }
 0x7bd   : > { %v1952_v55 = vsel %vm509_vm0, %v4708_v52, 0.0 }
 0x7be   : > { %1953 = vadd.xlane.f32.xlu1 %v1952_v55 }
 0x7e1   : > { %v1912_v33 = vpop.f32.mrf.mxu3 }
 0x7e2   : > { %v1913_v56 = vadd.f32 %v3531_v60, %v1912_v33 }
 0x7e4   : > { %v1933_v29 = vmul.f32 %v3532_v27, %v1913_v56 }
 0x7e6   : > { %v4713_v31 = vadd.f32 %v3765_v35, %v1933_v29 }
 0x7e8   : > { %v1955_v21 = vsel %vm509_vm0, %v4713_v31, 0.0 }
 0x7e9   : > { %v1914_v24 = vpop.f32.mrf.mxu3  ;;  %1956 = vadd.xlane.f32.xlu0 %v1955_v21 }
 0x7ea   : > { %v1915_v50 = vadd.f32 %v3531_v60, %v1914_v24 }
 0x7ec   : > { %v1934_v36 = vmul.f32 %v3532_v27, %v1915_v50 }
 0x7ee   : > { %v4718_v0 = vadd.f32 %v3766_v18, %v1934_v36 }
 0x7f0   : > { %v1958_v25 = vsel %vm509_vm0, %v4718_v0, 0.0 }
 0x7f1   : > { %1959 = vadd.xlane.f32.xlu2 %v1958_v25 }
 0x7f2   : > { %v1917_v41 = vpop.f32.mrf.mxu3 }
 0x7f3   : > { %v1918_v40 = vadd.f32 %v3531_v60, %v1917_v41  ;;  %v3324_v41 = vld [vmem:[%s5429_s10 + $0x30] sm:$0xf] }
 0x7f5   : > { %v1935_v51 = vmul.f32 %v3532_v27, %v1918_v40  ;;  %v3423_v40 = vld [vmem:[%s5429_s10 + $0x34] sm:$0xf0] }
 0x7f7   : > { %v4723_v30 = vadd.f32 %v3767_v10, %v1935_v51  ;;  %v3422_v51 = vld [vmem:[%s5429_s10 + $0x34] sm:$0xf]  ;;  %v3325_v10 = vor.u32 %v3423_v40, %v3324_v41 }
 0x7f9   : > { %v1961_v11 = vsel %vm509_vm0, %v4723_v30, 0.0  ;;  %2221 = vmatpush.bf16.msra.mxu2 %v3325_v10  ;;  %v4857_v10 = vld [vmem:[%s5428_s9] ss:$0 sm:$0xff] }
 0x7fa   : > { %v1919_v14 = vpop.f32.mrf.mxu3  ;;  %1962 = vadd.xlane.f32.xlu1 %v1961_v11  ;;  %v3326_v11 = vld [vmem:[%s5429_s10 + $0x38] sm:$0xf0] }
 0x7fb   : > { %v1920_v23 = vadd.f32 %v3531_v60, %v1919_v14  ;;  %v3329_v14 = vor.u32 %v3422_v51, %v3326_v11 }
 0x7fd   : > { %v1936_v7 = vmul.f32 %v3532_v27, %v1920_v23  ;;  %2250 = vmatpush.bf16.msra.mxu0 %v3329_v14  ;;  %v3316_v23 = vld [vmem:[%s5429_s10 + $0x20] sm:$0xf] }
 0x7ff   : > { %v4728_v15 = vadd.f32 %v3768_v44, %v1936_v7  ;;  %v3421_v7 = vld [vmem:[%s5429_s10 + $0x24] sm:$0xf0]  ;;  %v3420_v44 = vld [vmem:[%s5429_s10 + $0x24] sm:$0xf] }
 0x801   : > { %v1964_v42 = vsel %vm509_vm0, %v4728_v15, 0.0 }
 0x802   : > { %v1922_v8 = vpop.f32.mrf.mxu3  ;;  %1965 = vadd.xlane.f32.xlu2 %v1964_v42  ;;  %v3317_v42 = vor.u32 %v3421_v7, %v3316_v23 }
 0x803   : > { %v1923_v16 = vadd.f32 %v3531_v60, %v1922_v8  ;;  %v3318_v8 = vld [vmem:[%s5429_s10 + $0x28] sm:$0xf0] }
 0x804   : > { %2222 = vmatpush.bf16.msra.mxu2 %v3317_v42 }
 0x805   : > { %v1937_v53 = vmul.f32 %v3532_v27, %v1923_v16  ;;  %v3321_v16 = vor.u32 %v3420_v44, %v3318_v8 }
 0x807   : > { %v4733_v58 = vadd.f32 %v3769_v13, %v1937_v53  ;;  %2251 = vmatpush.bf16.msra.mxu0 %v3321_v16  ;;  %v3308_v53 = vld [vmem:[%s5429_s10 + $0x10] sm:$0xf]  ;;  %v3419_v13 = vld [vmem:[%s5429_s10 + $0x14] sm:$0xf0] }
 0x809   : > { %v1967_v62 = vsel %vm509_vm0, %v4733_v58, 0.0 }
 0x80a   : > { %1968 = vadd.xlane.f32.xlu2 %v1967_v62  ;;  %v1924_v12 = vpop.f32.mrf.mxu3  ;;  %v3418_v62 = vld [vmem:[%s5429_s10 + $0x14] sm:$0xf] }
 0x80b   : > { %v1925_v59 = vadd.f32 %v3531_v60, %v1924_v12  ;;  %v3309_v12 = vor.u32 %v3419_v13, %v3308_v53 }
 0x80d   : > { %v1938_v46 = vmul.f32 %v3532_v27, %v1925_v59  ;;  %2223 = vmatpush.bf16.msra.mxu2 %v3309_v12 }
 0x80f   : > { %v4746_v1 = vadd.f32 %v3770_v26, %v1938_v46  ;;  %v3300_v46 = vld [vmem:[%s5429_s10] sm:$0xf] }
 0x811   : > { %v1970_v43 = vsel %vm509_vm0, %v4746_v1, 0.0 }
 0x829   : > { %v1951_v63 = vpop.xlane.xlu2 %1950 }
 0x82a   : > { %v1973_v45 = vmul.f32 %v1951_v63, %v3902_v22  ;;  %v3310_v63 = vld [vmem:[%s5429_s10 + $0x18] sm:$0xf0] }
 0x82b   : > { %v3313_v59 = vor.u32 %v3418_v62, %v3310_v63 }
 0x82c   : > { %v4739_v61 = vsub.f32 %v4703_v54, %v1973_v45 }
 0x82d   : > { %2252 = vmatpush.bf16.msra.mxu0 %v3313_v59 }
 0x82e   : > { %v1989_v28 = vmul.f32 %v4739_v61, %v4739_v61 }
 0x830   : > { %v1997_v39 = vsel %vm509_vm0, %v1989_v28, 0.0 }
 0x831   : > { %v1954_v49 = vpop.xlane.xlu1 %1953  ;;  %1998 = vadd.xlane.f32.xlu0 %v1997_v39  ;;  %v3417_v39 = vld [vmem:[%s5429_s10 + $0x4] sm:$0xf0] }
 0x832   : > { %v1974_v4 = vmul.f32 %v1954_v49, %v3902_v22  ;;  %v3416_v49 = vld [vmem:[%s5429_s10 + $0x4] sm:$0xf]  ;;  %v3301_v26 = vor.u32 %v3417_v39, %v3300_v46 }
 0x834   : > { %v4749_v32 = vsub.f32 %v4708_v52, %v1974_v4  ;;  %2224 = vmatpush.bf16.msra.mxu2 %v3301_v26 }
 0x836   : > { %v1990_v2 = vmul.f32 %v4749_v32, %v4749_v32 }
 0x838   : > { %v2000_v48 = vsel %vm509_vm0, %v1990_v2, 0.0  ;;  %v3302_v2 = vld [vmem:[%s5429_s10 + $0x8] sm:$0xf0] }
 0x839   : > { %2001 = vadd.xlane.f32.xlu1 %v2000_v48  ;;  %1971 = vadd.xlane.f32.xlu0 %v1970_v43  ;;  %v3305_v48 = vor.u32 %v3416_v49, %v3302_v2 }
 0x83b   : > { %2253 = vmatpush.bf16.msra.mxu0 %v3305_v48 }
 0x85c   : > { %v1957_v57 = vpop.xlane.xlu0 %1956 }
 0x85d   : > { %v1975_v37 = vmul.f32 %v1957_v57, %v3902_v22 }
 0x85f   : > { %v4758_v47 = vsub.f32 %v4713_v31, %v1975_v37 }
 0x861   : > { %v1991_v60 = vmul.f32 %v4758_v47, %v4758_v47 }
 0x863   : > { %v2003_v27 = vsel %vm509_vm0, %v1991_v60, 0.0 }
 0x864   : > { %2004 = vadd.xlane.f32.xlu1 %v2003_v27  ;;  %v1960_v3 = vpop.xlane.xlu2 %1959 }
 0x865   : > { %v1976_v20 = vmul.f32 %v1960_v3, %v3902_v22 }
 0x867   : > { %v4765_v19 = vsub.f32 %v4718_v0, %v1976_v20 }
 0x869   : > { %v1992_v5 = vmul.f32 %v4765_v19, %v4765_v19 }
 0x86b   : > { %v2006_v34 = vsel %vm509_vm0, %v1992_v5, 0.0 }
 0x86c   : > { %2007 = vadd.xlane.f32.xlu2 %v2006_v34 }
 0x86d   : > { %v1963_v38 = vpop.xlane.xlu1 %1962 }
 0x86e   : > { %v1977_v6 = vmul.f32 %v1963_v38, %v3902_v22 }
 0x870   : > { %v4772_v9 = vsub.f32 %v4723_v30, %v1977_v6 }
 0x872   : > { %v1993_v17 = vmul.f32 %v4772_v9, %v4772_v9 }
 0x874   : > { %v2009_v55 = vsel %vm509_vm0, %v1993_v17, 0.0 }
 0x875   : > { %2010 = vadd.xlane.f32.xlu0 %v2009_v55  ;;  %v1966_v33 = vpop.xlane.xlu2 %1965 }
 0x876   : > { %v1978_v56 = vmul.f32 %v1966_v33, %v3902_v22 }
 0x878   : > { %v4779_v29 = vsub.f32 %v4728_v15, %v1978_v56 }
 0x87a   : > { %v1994_v35 = vmul.f32 %v4779_v29, %v4779_v29 }
 0x87c   : > { %v2012_v21 = vsel %vm509_vm0, %v1994_v35, 0.0 }
 0x87d   : > { %2013 = vadd.xlane.f32.xlu1 %v2012_v21  ;;  %v1969_v24 = vpop.xlane.xlu2 %1968 }
 0x87e   : > { %v1979_v50 = vmul.f32 %v1969_v24, %v3902_v22 }
 0x880   : > { %v4786_v36 = vsub.f32 %v4733_v58, %v1979_v50 }
 0x882   : > { %v1995_v18 = vmul.f32 %v4786_v36, %v4786_v36 }
 0x884   : > { %v2015_v25 = vsel %vm509_vm0, %v1995_v18, 0.0 }
 0x885   : > { %2016 = vadd.xlane.f32.xlu2 %v2015_v25  ;;  %v4851_v25 = vld [vmem:[%s5427_s8] ss:$0 sm:$0xff] }
 0x8a4   : > { %v1999_v45 = vpop.xlane.xlu0 %1998 }
 0x8a5   : > { %v2021_v28 = vmul.f32 %v1999_v45, %v3902_v22 }
 0x8a7   : > { %v2029_v4 = vadd.f32 1e-06, %v2021_v28 }
 0x8a9   : > { %3683 = vrsqrt.f32 %v2029_v4  ;;  %vm2043_vm15 = vweird.f32 %v2029_v4 }
 0x8ac   : > { %v2002_v43 = vpop.xlane.xlu1 %2001  ;;  %v1972_v57 = vpop.xlane.xlu0 %1971 }
 0x8ad   : > { %v2022_v37 = vmul.f32 %v2002_v43, %v3902_v22  ;;  %v1980_v60 = vmul.f32 %v1972_v57, %v3902_v22 }
 0x8af   : > { %v3684_v27 = vpop.eup %3683  ;;  %v2030_v3 = vadd.f32 1e-06, %v2022_v37  ;;  %v4843_v20 = vsub.f32 %v4746_v1, %v1980_v60 }
 0x8b0   : > { %v2038_v5 = vmul.f32 %v3684_v27, %v2029_v4  ;;  %vm2044_vm14 = vweird.f32 %v3684_v27 }
 0x8b1   : > { %3685 = vrsqrt.f32 %v2030_v3  ;;  %v1996_v34 = vmul.f32 %v4843_v20, %v4843_v20  ;;  %vm2045_vm1 = vmor %vm2043_vm15, %vm2044_vm14  ;;  %vm2053_vm3 = vweird.f32 %v2030_v3 }
 0x8b2   : > { %v2039_v38 = vmul.f32 %v3684_v27, %v2038_v5 }
 0x8b3   : > { %v2018_v6 = vsel %vm509_vm0, %v1996_v34, 0.0 }
 0x8b4   : > { %v2040_v17 = vmul.f32 0.5, %v2039_v38  ;;  %2019 = vadd.xlane.f32.xlu0 %v2018_v6 }
 0x8b6   : > { %v2041_v55 = vsub.f32 1.5, %v2040_v17 }
 0x8b7   : > { %v3686_v33 = vpop.eup %3685 }
 0x8b8   : > { %v2042_v56 = vmul.f32 %v3684_v27, %v2041_v55  ;;  %v2048_v35 = vmul.f32 %v3686_v33, %v2030_v3  ;;  %vm2054_vm2 = vweird.f32 %v3686_v33 }
 0x8b9   : > { %vm2055_vm4 = vmor %vm2053_vm3, %vm2054_vm2 }
 0x8ba   : > { %v2049_v21 = vmul.f32 %v3686_v33, %v2048_v35  ;;  %v2046_v24 = vsel %vm2045_vm1, %v3684_v27, %v2042_v56 }
 0x8bb   : > { %v2117_v41 = vmul.f32 %v2046_v24, %v4739_v61 }
 0x8bc   : > { %v2050_v50 = vmul.f32 0.5, %v2049_v21 }
 0x8bd   : > { %v2128_v11 = vmul.f32 %v4851_v25, %v2117_v41 }
 0x8be   : > { %v2051_v18 = vsub.f32 1.5, %v2050_v50 }
 0x8bf   : > { %v2139_v7 = vadd.f32 %v4857_v10, %v2128_v11 }
 0x8c0   : > { %v2052_v40 = vmul.f32 %v3686_v33, %v2051_v18 }
 0x8c2   : > { %v2056_v51 = vsel %vm2055_vm4, %v3686_v33, %v2052_v40 }
 0x8c3   : > { %v2118_v14 = vmul.f32 %v2056_v51, %v4749_v32 }
 0x8c5   : > { %v2129_v23 = vmul.f32 %v4851_v25, %v2118_v14 }
 0x8c7   : > { %v2140_v44 = vadd.f32 %v4857_v10, %v2129_v23 }
 0x8c9   : > { %v2147_v61 = vpack.c.bf16 %v2140_v44, %v2139_v7 }
 0x8cb   : > { %3330 = vmatmul.msk.bf16.vlgmr.msra.gmra.mxu2 %vm509_vm0, %v2147_v61  ;;  %3334 = vmatmul.msk.bf16.vlgmr.msra.gmra.mxu0 %vm509_vm0, %v2147_v61 }
 0x8d7   : > { %v2005_v42 = vpop.xlane.xlu1 %2004 }
 0x8d8   : > { %v2023_v8 = vmul.f32 %v2005_v42, %v3902_v22 }
 0x8da   : > { %v2031_v16 = vadd.f32 1e-06, %v2023_v8 }
 0x8dc   : > { %3687 = vrsqrt.f32 %v2031_v16  ;;  %vm2063_vm6 = vweird.f32 %v2031_v16 }
 0x8df   : > { %v2008_v53 = vpop.xlane.xlu2 %2007 }
 0x8e0   : > { %v2024_v13 = vmul.f32 %v2008_v53, %v3902_v22 }
 0x8e2   : > { %v3688_v32 = vpop.eup %3687  ;;  %v2032_v62 = vadd.f32 1e-06, %v2024_v13 }
 0x8e3   : > { %v2058_v12 = vmul.f32 %v3688_v32, %v2031_v16  ;;  %vm2064_vm5 = vweird.f32 %v3688_v32 }
 0x8e4   : > { %3689 = vrsqrt.f32 %v2032_v62  ;;  %vm2065_vm7 = vmor %vm2063_vm6, %vm2064_vm5  ;;  %vm2073_vm9 = vweird.f32 %v2032_v62 }
 0x8e5   : > { %v2059_v63 = vmul.f32 %v3688_v32, %v2058_v12 }
 0x8e7   : > { %v2060_v45 = vmul.f32 0.5, %v2059_v63 }
 0x8e8   : > { %v2011_v59 = vpop.xlane.xlu0 %2010 }
 0x8e9   : > { %v2061_v28 = vsub.f32 1.5, %v2060_v45  ;;  %v2025_v46 = vmul.f32 %v2011_v59, %v3902_v22 }
 0x8ea   : > { %v3690_v39 = vpop.eup %3689 }
 0x8eb   : > { %v2062_v49 = vmul.f32 %v3688_v32, %v2061_v28  ;;  %v2068_v4 = vmul.f32 %v3690_v39, %v2032_v62  ;;  %v2033_v26 = vadd.f32 1e-06, %v2025_v46  ;;  %vm2074_vm8 = vweird.f32 %v3690_v39 }
 0x8ec   : > { %vm2075_vm10 = vmor %vm2073_vm9, %vm2074_vm8 }
 0x8ed   : > { %v2069_v2 = vmul.f32 %v3690_v39, %v2068_v4  ;;  %3691 = vrsqrt.f32 %v2033_v26  ;;  %v2066_v48 = vsel %vm2065_vm7, %v3688_v32, %v2062_v49  ;;  %vm2083_vm12 = vweird.f32 %v2033_v26 }
 0x8ee   : > { %v2119_v27 = vmul.f32 %v2066_v48, %v4758_v47 }
 0x8ef   : > { %v2070_v43 = vmul.f32 0.5, %v2069_v2 }
 0x8f0   : > { %v2014_v57 = vpop.xlane.xlu1 %2013  ;;  %v2130_v33 = vmul.f32 %v4851_v25, %v2119_v27 }
 0x8f1   : > { %v2071_v37 = vsub.f32 1.5, %v2070_v43  ;;  %v2026_v60 = vmul.f32 %v2014_v57, %v3902_v22 }
 0x8f2   : > { %v2141_v24 = vadd.f32 %v4857_v10, %v2130_v33 }
 0x8f3   : > { %v3692_v3 = vpop.eup %3691  ;;  %v2072_v5 = vmul.f32 %v3690_v39, %v2071_v37  ;;  %v2034_v34 = vadd.f32 1e-06, %v2026_v60 }
 0x8f4   : > { %v2078_v38 = vmul.f32 %v3692_v3, %v2033_v26  ;;  %vm2084_vm11 = vweird.f32 %v3692_v3 }
 0x8f5   : > { %v2076_v6 = vsel %vm2075_vm10, %v3690_v39, %v2072_v5  ;;  %3693 = vrsqrt.f32 %v2034_v34  ;;  %vm2085_vm13 = vmor %vm2083_vm12, %vm2084_vm11  ;;  %vm2093_vm15 = vweird.f32 %v2034_v34 }
 0x8f6   : > { %v2120_v17 = vmul.f32 %v2076_v6, %v4765_v19  ;;  %v2079_v55 = vmul.f32 %v3692_v3, %v2078_v38  ;;  %v2159_v6 = vld [vmem:[%s5430_s11] sm:$0x3] }
 0x8f7   : > { %v4907_v33 = vperm.slane %v2159_v6, 0 }
 0x8f8   : > { %v2080_v56 = vmul.f32 0.5, %v2079_v55  ;;  %v2131_v35 = vmul.f32 %v4851_v25, %v2120_v17  ;;  %v2017_v32 = vpop.xlane.xlu2 %2016 }
 0x8fa   : > { %v2081_v21 = vsub.f32 1.5, %v2080_v56  ;;  %v2142_v47 = vadd.f32 %v4857_v10, %v2131_v35  ;;  %v3439_v56 = vld [vmem:[%s5431_s12 + $0x78] sm:$0xff] }
 0x8fb   : > { %v3694_v50 = vpop.eup %3693  ;;  %3084 = vmatpush.bf16.msrb.mxu3 %v3439_v56 }
 0x8fc   : > { %v2082_v18 = vmul.f32 %v3692_v3, %v2081_v21  ;;  %v2088_v41 = vmul.f32 %v3694_v50, %v2034_v34  ;;  %v2148_v40 = vpack.c.bf16 %v2142_v47, %v2141_v24  ;;  %vm2094_vm14 = vweird.f32 %v3694_v50 }
 0x8fd   : > { %vm2095_vm1 = vmor %vm2093_vm15, %vm2094_vm14 }
 0x8fe   : > { %v2089_v51 = vmul.f32 %v3694_v50, %v2088_v41  ;;  %3331 = vmatmul.msk.bf16.gmra.mxu2 %vm509_vm0, %v2148_v40  ;;  %3335 = vmatmul.msk.bf16.gmra.mxu0 %vm509_vm0, %v2148_v40  ;;  %v2086_v19 = vsel %vm2085_vm13, %v3692_v3, %v2082_v18  ;;  %v3438_v41 = vld [vmem:[%s5431_s12 + $0x70] sm:$0xff] }
 0x8ff   : > { %v2121_v23 = vmul.f32 %v2086_v19, %v4772_v9  ;;  %v2027_v9 = vmul.f32 %v2017_v32, %v3902_v22  ;;  %3085 = vmatpush.bf16.msrb.mxu3 %v3438_v41  ;;  %v3433_v41 = vld [vmem:[%s5431_s12 + $0x48] sm:$0xff] }
 0x900   : > { %v2090_v11 = vmul.f32 0.5, %v2089_v51  ;;  %v3431_v51 = vld [vmem:[%s5431_s12 + $0x38] sm:$0xff] }
 0x901   : > { %v2132_v42 = vmul.f32 %v4851_v25, %v2121_v23  ;;  %v2035_v62 = vadd.f32 1e-06, %v2027_v9  ;;  %3055 = vmatpush.bf16.msrb.mxu1 %v3431_v51  ;;  %v3436_v9 = vld [vmem:[%s5431_s12 + $0x60] sm:$0xff] }
 0x902   : > { %v2091_v14 = vsub.f32 1.5, %v2090_v11 }
 0x903   : > { %v2143_v16 = vadd.f32 %v4857_v10, %v2132_v42  ;;  %3695 = vrsqrt.f32 %v2035_v62  ;;  %vm2103_vm3 = vweird.f32 %v2035_v62  ;;  %v3430_v42 = vld [vmem:[%s5431_s12 + $0x30] sm:$0xff] }
 0x904   : > { %v2092_v7 = vmul.f32 %v3694_v50, %v2091_v14  ;;  %v3437_v14 = vld [vmem:[%s5431_s12 + $0x68] sm:$0xff] }
 0x905   : > { %3086 = vmatpush.bf16.msrb.mxu3 %v3437_v14  ;;  %3056 = vmatpush.bf16.msrb.mxu1 %v3430_v42 }
 0x906   : > { %v2096_v44 = vsel %vm2095_vm1, %v3694_v50, %v2092_v7 }
 0x907   : > { %v2122_v61 = vmul.f32 %v2096_v44, %v4779_v29 }
 0x909   : > { %v2133_v8 = vmul.f32 %v4851_v25, %v2122_v61  ;;  %v3696_v12 = vpop.eup %3695  ;;  %3087 = vmatpush.bf16.msrb.mxu3 %v3436_v9 }
 0x90a   : > { %v2098_v29 = vmul.f32 %v3696_v12, %v2035_v62  ;;  %vm2104_vm2 = vweird.f32 %v3696_v12 }
 0x90b   : > { %v2144_v53 = vadd.f32 %v4857_v10, %v2133_v8  ;;  %vm2105_vm4 = vmor %vm2103_vm3, %vm2104_vm2 }
 0x90c   : > { %v2099_v63 = vmul.f32 %v3696_v12, %v2098_v29 }
 0x90d   : > { %v2149_v13 = vpack.c.bf16 %v2144_v53, %v2143_v16 }
 0x90e   : > { %v2100_v46 = vmul.f32 0.5, %v2099_v63  ;;  %v3429_v63 = vld [vmem:[%s5431_s12 + $0x28] sm:$0xff] }
 0x90f   : > { %3332 = vmatmul.msk.bf16.gmra.mxu2 %vm509_vm0, %v2149_v13  ;;  %3336 = vmatmul.msk.bf16.gmra.mxu0 %vm509_vm0, %v2149_v13 }
 0x910   : > { %v2101_v39 = vsub.f32 1.5, %v2100_v46  ;;  %3057 = vmatpush.bf16.msrb.mxu1 %v3429_v63 }
 0x912   : > { %v2102_v4 = vmul.f32 %v3696_v12, %v2101_v39 }
 0x914   : > { %v2106_v48 = vsel %vm2105_vm4, %v3696_v12, %v2102_v4 }
 0x915   : > { %v2123_v37 = vmul.f32 %v2106_v48, %v4786_v36  ;;  %v4897_v36 = vperm.slane %v2159_v6, 1 }
 0x917   : > { %v2134_v3 = vmul.f32 %v4851_v25, %v2123_v37  ;;  %v3434_v37 = vld [vmem:[%s5431_s12 + $0x50] sm:$0xff] }
 0x919   : > { %v2145_v34 = vadd.f32 %v4857_v10, %v2134_v3 }
 0x927   : > { %v2020_v45 = vpop.xlane.xlu0 %2019 }
 0x928   : > { %v2028_v59 = vmul.f32 %v2020_v45, %v3902_v22 }
 0x92a   : > { %v2036_v28 = vadd.f32 1e-06, %v2028_v59  ;;  %v3435_v59 = vld [vmem:[%s5431_s12 + $0x58] sm:$0xff] }
 0x92b   : > { %3088 = vmatpush.bf16.msrb.mxu3 %v3435_v59 }
 0x92c   : > { %3697 = vrsqrt.f32 %v2036_v28  ;;  %vm2113_vm6 = vweird.f32 %v2036_v28 }
 0x92f   : > { %3089 = vmatpush.bf16.msrb.mxu3 %v3434_v37 }
 0x932   : > { %v3698_v49 = vpop.eup %3697 }
 0x933   : > { %v2108_v26 = vmul.f32 %v3698_v49, %v2036_v28  ;;  %vm2114_vm5 = vweird.f32 %v3698_v49  ;;  %3090 = vmatpush.bf16.msrb.mxu3 %v3433_v41 }
 0x934   : > { %vm2115_vm7 = vmor %vm2113_vm6, %vm2114_vm5 }
 0x935   : > { %v2109_v2 = vmul.f32 %v3698_v49, %v2108_v26 }
 0x937   : > { %v2110_v43 = vmul.f32 0.5, %v2109_v2  ;;  %v3428_v2 = vld [vmem:[%s5431_s12 + $0x20] sm:$0xff] }
 0x938   : > { %3058 = vmatpush.bf16.msrb.mxu1 %v3428_v2 }
 0x939   : > { %v2111_v57 = vsub.f32 1.5, %v2110_v43 }
 0x93b   : > { %v2112_v60 = vmul.f32 %v3698_v49, %v2111_v57 }
 0x93d   : > { %v2116_v22 = vsel %vm2115_vm7, %v3698_v49, %v2112_v60 }
 0x93e   : > { %v2124_v27 = vmul.f32 %v2116_v22, %v4843_v20 }
 0x940   : > { %v2135_v5 = vmul.f32 %v4851_v25, %v2124_v27 }
 0x942   : > { %v2146_v38 = vadd.f32 %v4857_v10, %v2135_v5  ;;  %v3427_v5 = vld [vmem:[%s5431_s12 + $0x18] sm:$0xff] }
 0x943   : > { %3059 = vmatpush.bf16.msrb.mxu1 %v3427_v5 }
 0x944   : > { %v2150_v17 = vpack.c.bf16 %v2146_v38, %v2145_v34 }
 0x946   : > { %3333 = vmatmul.msk.bf16.gmra.mxu2 %vm509_vm0, %v2150_v17  ;;  %3337 = vmatmul.msk.bf16.gmra.mxu0 %vm509_vm0, %v2150_v17 }
 0x948   : > { %v2255_v20 = vpop.f32.mrf.mxu0 }
 0x949   : > { %v4902_v55 = vadd.f32 %v2255_v20, %v4897_v36 }
 0x94b   : > { %v4905_v25 = vmul.f32 0.70710677, %v4902_v55 }
 0x94d   : > { %v2340_v10 = vand.u32 2147483647, %v4905_v25 }
 0x94e   : > { %v2226_v35 = vpop.f32.mrf.mxu2 }
 0x94f   : > { %v2356_v21 = vmul.f32 0.3275911, %v2340_v10  ;;  %v4914_v24 = vadd.f32 %v2226_v35, %v4907_v33  ;;  %v2772_v39 = vsub.f32 0.0, %v2340_v10 }
 0x950   : > { %v2257_v47 = vpop.f32.mrf.mxu0 }
 0x951   : > { %v2372_v50 = vadd.f32 1.0, %v2356_v21  ;;  %v4917_v18 = vmul.f32 0.70710677, %v4914_v24  ;;  %v4923_v40 = vadd.f32 %v2257_v47, %v4897_v36  ;;  %v2788_v27 = vmul.f32 %v2772_v39, %v2340_v10 }
 0x953   : > { %3699 = vrcp.f32 %v2372_v50  ;;  %v4929_v19 = vand.u32 2147483647, %v4917_v18  ;;  %v4932_v11 = vmul.f32 0.70710677, %v4923_v40  ;;  %v2413_v45 = vand.u32 2147483648, %v2372_v50 }
 0x954   : > { %v2411_v46 = vand.u32 2147483647, %v2372_v50  ;;  %vm2407_vm9 = vweird.f32 %v2372_v50  ;;  %v2805_v21 = vmul.f32 1.442695, %v2788_v27 }
 0x955   : > { %v2355_v23 = vmul.f32 0.3275911, %v4929_v19  ;;  %v4939_v44 = vand.u32 2147483647, %v4932_v11  ;;  %v2414_v48 = vor.u32 1.1754944e-38, %v2413_v45  ;;  %v2771_v35 = vsub.f32 0.0, %v4929_v19 }
 0x956   : > { %v2228_v7 = vpop.f32.mrf.mxu2  ;;  %vm2412_vm11 = vcmp.eq.f32.partialorder %v2411_v46, 8.507059e+37  ;;  %v3432_v46 = vld [vmem:[%s5431_s12 + $0x40] sm:$0xff] }
 0x957   : > { %v4942_v61 = vadd.f32 %v2228_v7, %v4907_v33  ;;  %v4947_v8 = vadd.f32 1.0, %v2355_v23  ;;  %v2358_v53 = vmul.f32 0.3275911, %v4939_v44  ;;  %3091 = vmatpush.bf16.msrb.mxu3 %v3432_v46 }
 0x959   : > { %v3700_v16 = vpop.eup %3699  ;;  %v4951_v13 = vmul.f32 0.70710677, %v4942_v61  ;;  %3701 = vrcp.f32 %v4947_v8  ;;  %v4957_v62 = vadd.f32 1.0, %v2358_v53  ;;  %v2398_v6 = vand.u32 2147483648, %v4947_v8 }
 0x95a   : > { %v2403_v32 = vmul.f32 %v3700_v16, %v2372_v50  ;;  %vm2408_vm8 = vweird.f32 %v3700_v16  ;;  %v2396_v20 = vand.u32 2147483647, %v4947_v8  ;;  %vm2392_vm13 = vweird.f32 %v4947_v8 }
 0x95b   : > { %v4960_v29 = vand.u32 2147483647, %v4951_v13  ;;  %3703 = vrcp.f32 %v4957_v62  ;;  %vm2409_vm10 = vmor %vm2407_vm9, %vm2408_vm8  ;;  %v2399_v14 = vor.u32 1.1754944e-38, %v2398_v6  ;;  %v2441_v23 = vand.u32 2147483647, %v4957_v62 }
 0x95c   : > { %v2404_v12 = vsub.f32 1.0, %v2403_v32  ;;  %v2443_v7 = vand.u32 2147483648, %v4957_v62  ;;  %vm2397_vm15 = vcmp.eq.f32.partialorder %v2396_v20, 8.507059e+37  ;;  %vm2437_vm2 = vweird.f32 %v4957_v62 }
 0x95d   : > { %v2357_v49 = vmul.f32 0.3275911, %v4960_v29  ;;  %vm2442_vm4 = vcmp.eq.f32.partialorder %v2441_v23, 8.507059e+37  ;;  %vm2308_vm9 = vcmp.ge.f32.partialorder %v4905_v25, 0.0 }
 0x95e   : > { %v2405_v28 = vmul.f32 %v3700_v16, %v2404_v12  ;;  %v2787_v12 = vmul.f32 %v2771_v35, %v4929_v19 }
 0x95f   : > { %v3702_v4 = vpop.eup %3701  ;;  %v4974_v57 = vadd.f32 1.0, %v2357_v49  ;;  %v2444_v49 = vor.u32 1.1754944e-38, %v2443_v7 }
 0x960   : > { %v2406_v26 = vadd.f32 %v3700_v16, %v2405_v28  ;;  %v2388_v43 = vmul.f32 %v3702_v4, %v4947_v8  ;;  %vm2393_vm12 = vweird.f32 %v3702_v4  ;;  %v3426_v8 = vld [vmem:[%s5431_s12 + $0x10] sm:$0xff]  ;;  %v2774_v28 = vsub.f32 0.0, %v4939_v44 }
 0x961   : > { %3705 = vrcp.f32 %v4974_v57  ;;  %v3704_v34 = vpop.eup %3703  ;;  %vm2394_vm14 = vmor %vm2392_vm13, %vm2393_vm12  ;;  %3060 = vmatpush.bf16.msrb.mxu1 %v3426_v8  ;;  %v2426_v2 = vand.u32 2147483647, %v4974_v57  ;;  %v2803_v5 = vmul.f32 1.442695, %v2787_v12  ;;  %vm2422_vm6 = vweird.f32 %v4974_v57 }
 0x962   : > { %v2410_v60 = vsel %vm2409_vm10, %v3700_v16, %v2406_v26  ;;  %v2389_v3 = vsub.f32 1.0, %v2388_v43  ;;  %v2433_v56 = vmul.f32 %v3704_v34, %v4957_v62  ;;  %vm2438_vm1 = vweird.f32 %v3704_v34 }
 0x963   : > { %v4979_v22 = vsel %vm2412_vm11, %v2414_v48, %v2410_v60  ;;  %vm2439_vm3 = vmor %vm2437_vm2, %vm2438_vm1  ;;  %v2428_v48 = vand.u32 2147483648, %v4974_v57  ;;  %3707 = vpow2.f32 %v2805_v21  ;;  %vm2427_vm8 = vcmp.eq.f32.partialorder %v2426_v2, 8.507059e+37 }
 0x964   : > { %v2628_v38 = vmul.f32 1.0614054, %v4979_v22  ;;  %v2390_v17 = vmul.f32 %v3702_v4, %v2389_v3  ;;  %v2434_v50 = vsub.f32 1.0, %v2433_v56  ;;  %3709 = vpow2.f32 %v2803_v5 }
 0x965   : > { %v2429_v20 = vor.u32 1.1754944e-38, %v2428_v48  ;;  %vm2307_vm10 = vcmp.ge.f32.partialorder %v4917_v18, 0.0  ;;  %vm2310_vm11 = vcmp.ge.f32.partialorder %v4932_v11, 0.0  ;;  %vm2309_vm12 = vcmp.ge.f32.partialorder %v4951_v13, 0.0 }
 0x966   : > { %v2644_v10 = vadd.f32 -1.4531521, %v2628_v38  ;;  %v2391_v47 = vadd.f32 %v3702_v4, %v2390_v17  ;;  %v2435_v53 = vmul.f32 %v3704_v34, %v2434_v50 }
 0x967   : > { %v3706_v42 = vpop.eup %3705 }
 0x968   : > { %v2660_v51 = vmul.f32 %v2644_v10, %v4979_v22  ;;  %v2395_v16 = vsel %vm2394_vm14, %v3702_v4, %v2391_v47  ;;  %v2418_v63 = vmul.f32 %v3706_v42, %v4974_v57  ;;  %v2436_v59 = vadd.f32 %v3704_v34, %v2435_v53 }
 0x969   : > { %v2400_v9 = vsel %vm2397_vm15, %v2399_v14, %v2395_v16  ;;  %vm2423_vm5 = vweird.f32 %v3706_v42  ;;  %v2790_v10 = vmul.f32 %v2774_v28, %v4939_v44  ;;  %v2773_v57 = vsub.f32 0.0, %v4960_v29  ;;  %v3708_v53 = vpop.eup %3707 }
 0x96a   : > { %v2676_v32 = vadd.f32 1.4214138, %v2660_v51  ;;  %v2627_v45 = vmul.f32 1.0614054, %v2400_v9  ;;  %v2419_v4 = vsub.f32 1.0, %v2418_v63  ;;  %v2440_v26 = vsel %vm2439_vm3, %v3704_v34, %v2436_v59  ;;  %v3425_v34 = vld [vmem:[%s5431_s12 + $0x8] sm:$0xff]  ;;  %vm2424_vm7 = vmor %vm2422_vm6, %vm2423_vm5 }
 0x96b   : > { %v2445_v43 = vsel %vm2442_vm4, %v2444_v49, %v2440_v26  ;;  %3061 = vmatpush.bf16.msrb.mxu1 %v3425_v34  ;;  %v2809_v7 = vmul.f32 1.442695, %v2790_v10  ;;  %v2789_v44 = vmul.f32 %v2773_v57, %v4960_v29  ;;  %v3424_v49 = vld [vmem:[%s5431_s12] sm:$0xff]  ;;  %v3710_v26 = vpop.eup %3709 }
 0x96c   : > { %v2692_v39 = vmul.f32 %v2676_v32, %v4979_v22  ;;  %v2643_v19 = vadd.f32 -1.4531521, %v2627_v45  ;;  %v2420_v37 = vmul.f32 %v3706_v42, %v2419_v4  ;;  %v2630_v27 = vmul.f32 1.0614054, %v2445_v43 }
 0x96d   : > { %3711 = vpow2.f32 %v2809_v7 }
 0x96e   : > { %v2708_v62 = vadd.f32 -0.28449672, %v2692_v39  ;;  %v2659_v60 = vmul.f32 %v2643_v19, %v2400_v9  ;;  %v2421_v38 = vadd.f32 %v3706_v42, %v2420_v37  ;;  %v2646_v17 = vadd.f32 -1.4531521, %v2630_v27 }
 0x96f   : > { %v2807_v39 = vmul.f32 1.442695, %v2789_v44  ;;  %3062 = vmatpush.bf16.msrb.mxu1 %v3424_v49  ;;  %v3787_v27 = vmov -1.0  }
 0x970   : > { %v2724_v3 = vmul.f32 %v2708_v62, %v4979_v22  ;;  %v2675_v6 = vadd.f32 1.4214138, %v2659_v60  ;;  %v2425_v35 = vsel %vm2424_vm7, %v3706_v42, %v2421_v38  ;;  %v2662_v50 = vmul.f32 %v2646_v17, %v2445_v43 }
 0x971   : > { %v2430_v41 = vsel %vm2427_vm8, %v2429_v20, %v2425_v35  ;;  %3713 = vpow2.f32 %v2807_v39  ;;  %v2325_v13 = vsel %vm2309_vm12, 1.0, %v3787_v27 }
 0x972   : > { %v2740_v56 = vadd.f32 0.2548296, %v2724_v3  ;;  %v2691_v47 = vmul.f32 %v2675_v6, %v2400_v9  ;;  %v2629_v51 = vmul.f32 1.0614054, %v2430_v41  ;;  %v2678_v21 = vadd.f32 1.4214138, %v2662_v50 }
 0x973   : > { %v3712_v60 = vpop.eup %3711  ;;  %v2324_v3 = vsel %vm2308_vm9, 1.0, %v3787_v27  ;;  %v2326_v50 = vsel %vm2310_vm11, 1.0, %v3787_v27 }
 0x974   : > { %v2756_v14 = vmul.f32 %v2740_v56, %v4979_v22  ;;  %v2707_v23 = vadd.f32 -0.28449672, %v2691_v47  ;;  %v2645_v16 = vadd.f32 -1.4531521, %v2629_v51  ;;  %v2694_v32 = vmul.f32 %v2678_v21, %v2445_v43 }
 0x975   : > { %v2323_v47 = vsel %vm2307_vm10, 1.0, %v3787_v27 }
 0x976   : > { %v2723_v8 = vmul.f32 %v2707_v23, %v2400_v9  ;;  %v2661_v42 = vmul.f32 %v2645_v16, %v2430_v41  ;;  %v2836_v12 = vmul.f32 %v3708_v53, %v2756_v14  ;;  %v2710_v45 = vadd.f32 -0.28449672, %v2694_v32 }
 0x977   : > { %v3714_v18 = vpop.eup %3713  ;;  %v2276_v53 = vmul.f32 0.5, %v4902_v55  ;;  %v2275_v55 = vmul.f32 0.5, %v4914_v24 }
 0x978   : > { %v2739_v63 = vadd.f32 0.2548296, %v2723_v8  ;;  %v2677_v59 = vadd.f32 1.4214138, %v2661_v42  ;;  %v2726_v46 = vmul.f32 %v2710_v45, %v2445_v43  ;;  %v2852_v29 = vsub.f32 1.0, %v2836_v12 }
 0x979   : > { %v2278_v8 = vmul.f32 0.5, %v4923_v40  ;;  %v2277_v40 = vmul.f32 0.5, %v4942_v61 }
 0x97a   : > { %v2755_v28 = vmul.f32 %v2739_v63, %v2400_v9  ;;  %v2693_v4 = vmul.f32 %v2677_v59, %v2430_v41  ;;  %v2742_v2 = vadd.f32 0.2548296, %v2726_v46  ;;  %v2868_v34 = vmul.f32 %v2852_v29, %v2324_v3 }
 0x97b   : > { %v2260_v22 = vpop.f32.mrf.mxu0 }
 0x97c   : > { %v5023_v19 = vadd.f32 %v2260_v22, %v4897_v36  ;;  %v2835_v48 = vmul.f32 %v3710_v26, %v2755_v28  ;;  %v2709_v62 = vadd.f32 -0.28449672, %v2693_v4  ;;  %v2758_v37 = vmul.f32 %v2742_v2, %v2445_v43 }
 0x97d   : > { %v2884_v14 = vadd.f32 1.0, %v2868_v34 }
 0x97e   : > { %v5027_v9 = vmul.f32 0.70710677, %v5023_v19  ;;  %v2725_v5 = vmul.f32 %v2709_v62, %v2430_v41  ;;  %v2838_v25 = vmul.f32 %v3712_v60, %v2758_v37  ;;  %v2851_v17 = vsub.f32 1.0, %v2835_v48 }
 0x97f   : > { %v2900_v42 = vmul.f32 %v2884_v14, %v2276_v53 }
 0x980   : > { %v5031_v38 = vand.u32 2147483647, %v5027_v9  ;;  %v2741_v20 = vadd.f32 0.2548296, %v2725_v5  ;;  %v2854_v10 = vsub.f32 1.0, %v2838_v25  ;;  %v2867_v21 = vmul.f32 %v2851_v17, %v2323_v47 }
 0x981   : > { %v2231_v6 = vpop.f32.mrf.mxu2 }
 0x982   : > { %v2360_v43 = vmul.f32 0.3275911, %v5031_v38  ;;  %v5037_v56 = vadd.f32 %v2231_v6, %v4907_v33  ;;  %v2757_v57 = vmul.f32 %v2741_v20, %v2430_v41  ;;  %v2870_v11 = vmul.f32 %v2854_v10, %v2326_v50 }
 0x983   : > { %v2262_v35 = vpop.f32.mrf.mxu0  ;;  %v2883_v63 = vadd.f32 1.0, %v2867_v21 }
 0x984   : > { %v2376_v51 = vadd.f32 1.0, %v2360_v43  ;;  %v5043_v23 = vmul.f32 0.70710677, %v5037_v56  ;;  %v2837_v7 = vmul.f32 %v3714_v18, %v2757_v57  ;;  %v5046_v16 = vadd.f32 %v2262_v35, %v4897_v36 }
 0x985   : > { %v2886_v41 = vadd.f32 1.0, %v2870_v11  ;;  %v2899_v2 = vmul.f32 %v2883_v63, %v2275_v55  ;;  %v2776_v18 = vsub.f32 0.0, %v5031_v38 }
 0x986   : > { %3715 = vrcp.f32 %v2376_v51  ;;  %v2853_v32 = vsub.f32 1.0, %v2837_v7  ;;  %v2343_v44 = vand.u32 2147483647, %v5043_v23  ;;  %v5053_v28 = vmul.f32 0.70710677, %v5046_v16 }
 0x987   : > { %v2902_v12 = vmul.f32 %v2886_v41, %v2278_v8  ;;  %v2473_v24 = vand.u32 2147483648, %v2376_v51  ;;  %v2471_v61 = vand.u32 2147483647, %v2376_v51  ;;  %vm2467_vm14 = vweird.f32 %v2376_v51 }
 0x988   : > { %v2869_v45 = vmul.f32 %v2853_v32, %v2325_v13  ;;  %v2359_v59 = vmul.f32 0.3275911, %v2343_v44  ;;  %v5058_v29 = vand.u32 2147483647, %v5053_v28  ;;  %v2775_v14 = vsub.f32 0.0, %v2343_v44 }
 0x989   : > { %v2916_v46 = vpack.c.bf16 %v2902_v12, %v2900_v42  ;;  %v2233_v39 = vpop.f32.mrf.mxu2  ;;  %v2474_v43 = vor.u32 1.1754944e-38, %v2473_v24  ;;  %vm2472_vm1 = vcmp.eq.f32.partialorder %v2471_v61, 8.507059e+37  ;;  %v5082_v7 = vmul.f32 0.5, %v5023_v19 }
 0x98a   : > { %v2885_v49 = vadd.f32 1.0, %v2869_v45  ;;  %v2375_v4 = vadd.f32 1.0, %v2359_v59  ;;  %v5061_v62 = vadd.f32 %v2233_v39, %v4907_v33  ;;  %v2362_v60 = vmul.f32 0.3275911, %v5058_v29 }
 0x98b   : > { %3092 = vmatmul.bf16.vlgmr.msrb.gmra.mxu3 %v2916_v46  ;;  %v2792_v63 = vmul.f32 %v2776_v18, %v5031_v38  ;;  %v2791_v45 = vmul.f32 %v2775_v14, %v2343_v44 }
 0x98c   : > { %v3716_v22 = vpop.eup %3715  ;;  %v2901_v48 = vmul.f32 %v2885_v49, %v2277_v40  ;;  %3717 = vrcp.f32 %v2375_v4  ;;  %v5064_v34 = vadd.f32 1.0, %v2362_v60  ;;  %v2265_v25 = vpop.f32.mrf.mxu0  ;;  %v5067_v6 = vmul.f32 0.70710677, %v5061_v62 }
 0x98d   : > { %v2463_v26 = vmul.f32 %v3716_v22, %v2376_v51  ;;  %vm2468_vm13 = vweird.f32 %v3716_v22  ;;  %v5074_v35 = vadd.f32 %v2265_v25, %v4897_v36  ;;  %v2456_v53 = vand.u32 2147483647, %v2375_v4 }
 0x98e   : > { %v2915_v3 = vpack.c.bf16 %v2901_v48, %v2899_v2  ;;  %3719 = vrcp.f32 %v5064_v34  ;;  %vm2469_vm15 = vmor %vm2467_vm14, %vm2468_vm13  ;;  %v5071_v10 = vand.u32 2147483647, %v5067_v6  ;;  %v2458_v8 = vand.u32 2147483648, %v2375_v4 }
 0x98f   : > { %v2464_v37 = vsub.f32 1.0, %v2463_v26  ;;  %v5085_v41 = vmul.f32 0.70710677, %v5074_v35  ;;  %vm2452_vm3 = vweird.f32 %v2375_v4  ;;  %vm2457_vm5 = vcmp.eq.f32.partialorder %v2456_v53, 8.507059e+37 }
 0x990   : > { %3063 = vmatmul.bf16.vlgmr.msrb.gmra.mxu1 %v2915_v3  ;;  %v2361_v21 = vmul.f32 0.3275911, %v5071_v10  ;;  %v2778_v40 = vsub.f32 0.0, %v5058_v29  ;;  %v2503_v26 = vand.u32 2147483648, %v5064_v34  ;;  %v2813_v61 = vmul.f32 1.442695, %v2792_v63 }
 0x991   : > { %v2465_v5 = vmul.f32 %v3716_v22, %v2464_v37  ;;  %v5092_v46 = vand.u32 2147483647, %v5085_v41  ;;  %v2811_v25 = vmul.f32 1.442695, %v2791_v45  ;;  %vm2497_vm7 = vweird.f32 %v5064_v34 }
 0x992   : > { %v3718_v20 = vpop.eup %3717  ;;  %v5087_v13 = vadd.f32 1.0, %v2361_v21  ;;  %v2236_v49 = vpop.f32.mrf.mxu2  ;;  %v2794_v14 = vmul.f32 %v2778_v40, %v5058_v29 }
 0x993   : > { %v2466_v17 = vadd.f32 %v3716_v22, %v2465_v5  ;;  %v2448_v50 = vmul.f32 %v3718_v20, %v2375_v4  ;;  %vm2453_vm2 = vweird.f32 %v3718_v20  ;;  %v2364_v2 = vmul.f32 0.3275911, %v5092_v46 }
 0x994   : > { %v3720_v32 = vpop.eup %3719  ;;  %3721 = vrcp.f32 %v5087_v13  ;;  %vm2454_vm4 = vmor %vm2452_vm3, %vm2453_vm2  ;;  %v2501_v4 = vand.u32 2147483647, %v5064_v34  ;;  %v5107_v5 = vadd.f32 %v2236_v49, %v4907_v33  ;;  %v2488_v29 = vand.u32 2147483648, %v5087_v13 }
 0x995   : > { %v2470_v47 = vsel %vm2469_vm15, %v3716_v22, %v2466_v17  ;;  %v2449_v11 = vsub.f32 1.0, %v2448_v50  ;;  %v2493_v59 = vmul.f32 %v3720_v32, %v5064_v34  ;;  %v2459_v22 = vor.u32 1.1754944e-38, %v2458_v8 }
 0x996   : > { %v5076_v57 = vsel %vm2472_vm1, %v2474_v43, %v2470_v47  ;;  %vm2498_vm6 = vweird.f32 %v3720_v32  ;;  %v5104_v24 = vadd.f32 1.0, %v2364_v2  ;;  %v2504_v50 = vor.u32 1.1754944e-38, %v2503_v26 }
 0x997   : > { %v2632_v51 = vmul.f32 1.0614054, %v5076_v57  ;;  %v2450_v12 = vmul.f32 %v3718_v20, %v2449_v11  ;;  %v2494_v55 = vsub.f32 1.0, %v2493_v59  ;;  %vm2499_vm8 = vmor %vm2497_vm7, %vm2498_vm6  ;;  %vm2502_vm9 = vcmp.eq.f32.partialorder %v2501_v4, 8.507059e+37 }
 0x998   : > { %3723 = vrcp.f32 %v5104_v24  ;;  %v5118_v34 = vmul.f32 0.70710677, %v5107_v5  ;;  %v2817_v59 = vmul.f32 1.442695, %v2794_v14  ;;  %vm2482_vm11 = vweird.f32 %v5087_v13 }
 0x999   : > { %v2648_v42 = vadd.f32 -1.4531521, %v2632_v51  ;;  %v2451_v39 = vadd.f32 %v3718_v20, %v2450_v12  ;;  %v2495_v37 = vmul.f32 %v3720_v32, %v2494_v55  ;;  %3725 = vpow2.f32 %v2813_v61 }
 0x99a   : > { %3727 = vpow2.f32 %v2811_v25  ;;  %v2777_v55 = vsub.f32 0.0, %v5071_v10  ;;  %v5127_v40 = vand.u32 2147483647, %v5118_v34  ;;  %v2531_v25 = vand.u32 2147483647, %v5104_v24 }
 0x99b   : > { %v2664_v19 = vmul.f32 %v2648_v42, %v5076_v57  ;;  %v2455_v44 = vsel %vm2454_vm4, %v3718_v20, %v2451_v39  ;;  %v2496_v17 = vadd.f32 %v3720_v32, %v2495_v37  ;;  %v3722_v20 = vpop.eup %3721  ;;  %v2489_v37 = vor.u32 1.1754944e-38, %v2488_v29 }
 0x99c   : > { %v5099_v48 = vsel %vm2457_vm5, %v2459_v22, %v2455_v44  ;;  %v2478_v51 = vmul.f32 %v3722_v20, %v5087_v13  ;;  %vm2483_vm10 = vweird.f32 %v3722_v20  ;;  %v2363_v4 = vmul.f32 0.3275911, %v5127_v40 }
 0x99d   : > { %v2680_v38 = vadd.f32 1.4214138, %v2664_v19  ;;  %v2631_v3 = vmul.f32 1.0614054, %v5099_v48  ;;  %v2500_v18 = vsel %vm2499_vm8, %v3720_v32, %v2496_v17  ;;  %v2486_v32 = vand.u32 2147483647, %v5087_v13  ;;  %vm2484_vm13 = vmor %vm2482_vm11, %vm2483_vm10 }
 0x99e   : > { %v5115_v53 = vsel %vm2502_vm9, %v2504_v50, %v2500_v18  ;;  %v2479_v42 = vsub.f32 1.0, %v2478_v51  ;;  %v3724_v39 = vpop.eup %3723  ;;  %v2533_v50 = vand.u32 2147483648, %v5104_v24  ;;  %v5138_v18 = vadd.f32 1.0, %v2363_v4 }
 0x99f   : > { %v2696_v60 = vmul.f32 %v2680_v38, %v5076_v57  ;;  %v2647_v47 = vadd.f32 -1.4531521, %v2631_v3  ;;  %v2634_v8 = vmul.f32 1.0614054, %v5115_v53  ;;  %vm2487_vm12 = vcmp.eq.f32.partialorder %v2486_v32, 8.507059e+37 }
 0x9a0   : > { %v2480_v19 = vmul.f32 %v3722_v20, %v2479_v42  ;;  %v2523_v44 = vmul.f32 %v3724_v39, %v5104_v24  ;;  %vm2528_vm14 = vweird.f32 %v3724_v39  ;;  %vm2312_vm15 = vcmp.ge.f32.partialorder %v5027_v9, 0.0 }
 0x9a1   : > { %v2712_v43 = vadd.f32 -0.28449672, %v2696_v60  ;;  %v2663_v21 = vmul.f32 %v2647_v47, %v5099_v48  ;;  %v2650_v45 = vadd.f32 -1.4531521, %v2634_v8  ;;  %v3726_v60 = vpop.eup %3725  ;;  %3729 = vrcp.f32 %v5138_v18 }
 0x9a2   : > { %v2481_v38 = vadd.f32 %v3722_v20, %v2480_v19  ;;  %v2524_v61 = vsub.f32 1.0, %v2523_v44  ;;  %v3728_v17 = vpop.eup %3727  ;;  %vm2527_vm1 = vweird.f32 %v5104_v24  ;;  %3731 = vpow2.f32 %v2817_v59 }
 0x9a3   : > { %v2728_v11 = vmul.f32 %v2712_v43, %v5076_v57  ;;  %v2679_v63 = vadd.f32 1.4214138, %v2663_v21  ;;  %v2666_v49 = vmul.f32 %v2650_v45, %v5115_v53  ;;  %v2793_v21 = vmul.f32 %v2777_v55, %v5071_v10  ;;  %vm2529_vm2 = vmor %vm2527_vm1, %vm2528_vm14 }
 0x9a4   : > { %v2485_v3 = vsel %vm2484_vm13, %v3722_v20, %v2481_v38  ;;  %v2525_v51 = vmul.f32 %v3724_v39, %v2524_v61  ;;  %vm2532_vm3 = vcmp.eq.f32.partialorder %v2531_v25, 8.507059e+37  ;;  %v2328_v10 = vsel %vm2312_vm15, 1.0, %v3787_v27 }
 0x9a5   : > { %v2744_v12 = vadd.f32 0.2548296, %v2728_v11  ;;  %v2695_v22 = vmul.f32 %v2679_v63, %v5099_v48  ;;  %v2682_v13 = vadd.f32 1.4214138, %v2666_v49  ;;  %v5135_v47 = vsel %vm2487_vm12, %v2489_v37, %v2485_v3  ;;  %v2267_v11 = vpop.f32.mrf.mxu0 }
 0x9a6   : > { %v2633_v14 = vmul.f32 1.0614054, %v5135_v47  ;;  %v2526_v32 = vadd.f32 %v3724_v39, %v2525_v51  ;;  %v2534_v63 = vor.u32 1.1754944e-38, %v2533_v50  ;;  %v5147_v29 = vadd.f32 %v2267_v11, %v4897_v36 }
 0x9a7   : > { %v2760_v26 = vmul.f32 %v2744_v12, %v5076_v57  ;;  %v2711_v2 = vadd.f32 -0.28449672, %v2695_v22  ;;  %v2698_v57 = vmul.f32 %v2682_v13, %v5115_v53  ;;  %v2815_v49 = vmul.f32 1.442695, %v2793_v21 }
 0x9a8   : > { %v2649_v42 = vadd.f32 -1.4531521, %v2633_v14  ;;  %v2530_v22 = vsel %vm2529_vm2, %v3724_v39, %v2526_v32  ;;  %vm2311_vm4 = vcmp.ge.f32.partialorder %v5043_v23, 0.0  ;;  %v2282_v39 = vmul.f32 0.5, %v5046_v16 }
 0x9a9   : > { %v2727_v43 = vmul.f32 %v2711_v2, %v5099_v48  ;;  %v2840_v20 = vmul.f32 %v3726_v60, %v2760_v26  ;;  %v2714_v8 = vadd.f32 -0.28449672, %v2698_v57  ;;  %v5154_v24 = vsel %vm2532_vm3, %v2534_v63, %v2530_v22  ;;  %v3730_v26 = vpop.eup %3729 }
 0x9aa   : > { %v2665_v19 = vmul.f32 %v2649_v42, %v5135_v47  ;;  %v2636_v44 = vmul.f32 1.0614054, %v5154_v24  ;;  %v5161_v37 = vmul.f32 0.70710677, %v5147_v29  ;;  %v2508_v13 = vmul.f32 %v3730_v26, %v5138_v18  ;;  %v3732_v3 = vpop.eup %3731 }
 0x9ab   : > { %v2743_v12 = vadd.f32 0.2548296, %v2727_v43  ;;  %v2730_v45 = vmul.f32 %v2714_v8, %v5115_v53  ;;  %v2856_v55 = vsub.f32 1.0, %v2840_v20  ;;  %vm2314_vm5 = vcmp.ge.f32.partialorder %v5053_v28, 0.0  ;;  %v2238_v8 = vpop.f32.mrf.mxu2 }
 0x9ac   : > { %v2681_v38 = vadd.f32 1.4214138, %v2665_v19  ;;  %v2652_v60 = vadd.f32 -1.4531521, %v2636_v44  ;;  %3733 = vpow2.f32 %v2815_v49  ;;  %v5168_v25 = vand.u32 2147483647, %v5161_v37 }
 0x9ad   : > { %v2746_v59 = vadd.f32 0.2548296, %v2730_v45  ;;  %v2759_v2 = vmul.f32 %v2743_v12, %v5099_v48  ;;  %v2872_v61 = vmul.f32 %v2856_v55, %v2328_v10  ;;  %v2509_v43 = vsub.f32 1.0, %v2508_v13 }
 0x9ae   : > { %v2697_v4 = vmul.f32 %v2681_v38, %v5135_v47  ;;  %v2518_v50 = vand.u32 2147483648, %v5138_v18  ;;  %v2516_v14 = vand.u32 2147483647, %v5138_v18  ;;  %v2366_v51 = vmul.f32 0.3275911, %v5168_v25 }
 0x9af   : > { %v2762_v9 = vmul.f32 %v2746_v59, %v5115_v53  ;;  %v2839_v57 = vmul.f32 %v3728_v17, %v2759_v2  ;;  %v2668_v53 = vmul.f32 %v2652_v60, %v5154_v24  ;;  %v2510_v21 = vmul.f32 %v3730_v26, %v2509_v43 }
 0x9b0   : > { %v2713_v16 = vadd.f32 -0.28449672, %v2697_v4  ;;  %vm2513_vm6 = vweird.f32 %v3730_v26  ;;  %v2888_v42 = vadd.f32 1.0, %v2872_v61  ;;  %v2330_v32 = vsel %vm2314_vm5, 1.0, %v3787_v27 }
 0x9b1   : > { %v2842_v48 = vmul.f32 %v3732_v3, %v2762_v9  ;;  %vm2512_vm7 = vweird.f32 %v5138_v18  ;;  %v5179_v17 = vadd.f32 1.0, %v2366_v51  ;;  %v2511_v45 = vadd.f32 %v3730_v26, %v2510_v21 }
 0x9b2   : > { %v2729_v20 = vmul.f32 %v2713_v16, %v5135_v47  ;;  %v2519_v19 = vor.u32 1.1754944e-38, %v2518_v50  ;;  %v3734_v22 = vpop.eup %3733  ;;  %v2855_v10 = vsub.f32 1.0, %v2839_v57  ;;  %v2684_v55 = vadd.f32 1.4214138, %v2668_v53  ;;  %vm2514_vm8 = vmor %vm2512_vm7, %vm2513_vm6 }
 0x9b3   : > { %v2858_v11 = vsub.f32 1.0, %v2842_v48  ;;  %3735 = vrcp.f32 %v5179_v17  ;;  %v5183_v49 = vadd.f32 %v2238_v8, %v4907_v33  ;;  %v2515_v38 = vsel %vm2514_vm8, %v3730_v26, %v2511_v45 }
 0x9b4   : > { %v2745_v63 = vadd.f32 0.2548296, %v2729_v20  ;;  %vm2517_vm9 = vcmp.eq.f32.partialorder %v2516_v14, 8.507059e+37  ;;  %v2327_v18 = vsel %vm2311_vm4, 1.0, %v3787_v27  ;;  %vm2313_vm10 = vcmp.ge.f32.partialorder %v5067_v6, 0.0 }
 0x9b5   : > { %v2874_v12 = vmul.f32 %v2858_v11, %v2330_v32  ;;  %v5190_v44 = vsel %vm2517_vm9, %v2519_v19, %v2515_v38  ;;  %v2904_v2 = vmul.f32 %v2888_v42, %v5082_v7  ;;  %v2871_v13 = vmul.f32 %v2855_v10, %v2327_v18 }
 0x9b6   : > { %v2761_v28 = vmul.f32 %v2745_v63, %v5135_v47  ;;  %v2635_v60 = vmul.f32 1.0614054, %v5190_v44  ;;  %v2700_v3 = vmul.f32 %v2684_v55, %v5154_v24  ;;  %v5196_v47 = vmul.f32 0.70710677, %v5183_v49 }
 0x9b7   : > { %v2890_v59 = vadd.f32 1.0, %v2874_v12  ;;  %v2780_v23 = vsub.f32 0.0, %v5092_v46  ;;  %v2329_v16 = vsel %vm2313_vm10, 1.0, %v3787_v27  ;;  %v2887_v50 = vadd.f32 1.0, %v2871_v13 }
 0x9b8   : > { %v2841_v4 = vmul.f32 %v3734_v22, %v2761_v28  ;;  %v2651_v61 = vadd.f32 -1.4531521, %v2635_v60  ;;  %v5201_v7 = vand.u32 2147483647, %v5196_v47  ;;  %v2716_v57 = vadd.f32 -0.28449672, %v2700_v3 }
 0x9b9   : > { %v2906_v9 = vmul.f32 %v2890_v59, %v2282_v39  ;;  %v3736_v6 = vpop.eup %3735  ;;  %v2281_v51 = vmul.f32 0.5, %v5061_v62  ;;  %v2796_v20 = vmul.f32 %v2780_v23, %v5092_v46  ;;  %v2279_v8 = vmul.f32 0.5, %v5037_v56 }
 0x9ba   : > { %v2857_v26 = vsub.f32 1.0, %v2841_v4  ;;  %v2553_v43 = vmul.f32 %v3736_v6, %v5179_v17  ;;  %v2667_v53 = vmul.f32 %v2651_v61, %v5190_v44  ;;  %v2365_v14 = vmul.f32 0.3275911, %v5201_v7 }
 0x9bb   : > { %v2918_v48 = vpack.c.bf16 %v2906_v9, %v2904_v2  ;;  %v2563_v42 = vand.u32 2147483648, %v5179_v17  ;;  %vm2558_vm11 = vweird.f32 %v3736_v6  ;;  %v2561_v45 = vand.u32 2147483647, %v5179_v17 }
 0x9bc   : > { %v2873_v39 = vmul.f32 %v2857_v26, %v2329_v16  ;;  %v2554_v21 = vsub.f32 1.0, %v2553_v43  ;;  %v5210_v32 = vadd.f32 1.0, %v2365_v14  ;;  %v2903_v22 = vmul.f32 %v2887_v50, %v2279_v8 }
 0x9bd   : > { %3097 = vmatmul.bf16.gmra.mxu3 %v2918_v48  ;;  %v2732_v10 = vmul.f32 %v2716_v57, %v5154_v24  ;;  %v2683_v62 = vadd.f32 1.4214138, %v2667_v53  ;;  %v2821_v46 = vmul.f32 1.442695, %v2796_v20  ;;  %vm2557_vm12 = vweird.f32 %v5179_v17 }
 0x9be   : > { %v2889_v11 = vadd.f32 1.0, %v2873_v39  ;;  %v2555_v63 = vmul.f32 %v3736_v6, %v2554_v21  ;;  %3737 = vrcp.f32 %v5210_v32  ;;  %v2782_v56 = vsub.f32 0.0, %v5168_v25  ;;  %vm2559_vm13 = vmor %vm2557_vm12, %vm2558_vm11 }
 0x9bf   : > { %v2564_v59 = vor.u32 1.1754944e-38, %v2563_v42  ;;  %vm2562_vm14 = vcmp.eq.f32.partialorder %v2561_v45, 8.507059e+37  ;;  %v2748_v2 = vadd.f32 0.2548296, %v2732_v10  ;;  %v2699_v9 = vmul.f32 %v2683_v62, %v5190_v44 }
 0x9c0   : > { %v2905_v12 = vmul.f32 %v2889_v11, %v2281_v51  ;;  %v2556_v55 = vadd.f32 %v3736_v6, %v2555_v63  ;;  %3739 = vpow2.f32 %v2821_v46  ;;  %v2779_v17 = vsub.f32 0.0, %v5127_v40 }
 0x9c1   : > { %v2798_v3 = vmul.f32 %v2782_v56, %v5168_v25  ;;  %vm2316_vm15 = vcmp.ge.f32.partialorder %v5085_v41, 0.0  ;;  %v2764_v39 = vmul.f32 %v2748_v2, %v5154_v24  ;;  %v2715_v43 = vadd.f32 -0.28449672, %v2699_v9 }
 0x9c2   : > { %v2917_v38 = vpack.c.bf16 %v2905_v12, %v2903_v22  ;;  %v2560_v18 = vsel %vm2559_vm13, %v3736_v6, %v2556_v55  ;;  %v2795_v25 = vmul.f32 %v2779_v17, %v5127_v40  ;;  %v2548_v51 = vand.u32 2147483648, %v5210_v32 }
 0x9c3   : > { %v2270_v19 = vpop.f32.mrf.mxu0  ;;  %v5221_v4 = vsel %vm2562_vm14, %v2564_v59, %v2560_v18  ;;  %v2825_v53 = vmul.f32 1.442695, %v2798_v3  ;;  %v2781_v11 = vsub.f32 0.0, %v5201_v7  ;;  %v2546_v12 = vand.u32 2147483647, %v5210_v32 }
 0x9c4   : > { %v5218_v28 = vadd.f32 %v2270_v19, %v4897_v36  ;;  %3068 = vmatmul.bf16.gmra.mxu1 %v2917_v38  ;;  %v2638_v13 = vmul.f32 1.0614054, %v5221_v4  ;;  %v3738_v23 = vpop.eup %3737  ;;  %vm2315_vm2 = vcmp.ge.f32.partialorder %v5118_v34, 0.0  ;;  %v2731_v45 = vmul.f32 %v2715_v43, %v5190_v44 }
 0x9c5   : > { %v2538_v16 = vmul.f32 %v3738_v23, %v5210_v32  ;;  %vm2543_vm1 = vweird.f32 %v3738_v23  ;;  %v2819_v19 = vmul.f32 1.442695, %v2795_v25  ;;  %vm2542_vm3 = vweird.f32 %v5210_v32 }
 0x9c6   : > { %v5224_v60 = vmul.f32 0.70710677, %v5218_v28  ;;  %v2654_v6 = vadd.f32 -1.4531521, %v2638_v13  ;;  %v3740_v8 = vpop.eup %3739  ;;  %vm2544_vm4 = vmor %vm2542_vm3, %vm2543_vm1  ;;  %v2549_v62 = vor.u32 1.1754944e-38, %v2548_v51  ;;  %vm2547_vm5 = vcmp.eq.f32.partialorder %v2546_v12, 8.507059e+37 }
 0x9c7   : > { %v2539_v14 = vsub.f32 1.0, %v2538_v16  ;;  %v2844_v63 = vmul.f32 %v3740_v8, %v2764_v39  ;;  %v2797_v38 = vmul.f32 %v2781_v11, %v5201_v7  ;;  %v2747_v2 = vadd.f32 0.2548296, %v2731_v45 }
 0x9c8   : > { %v5230_v61 = vand.u32 2147483647, %v5224_v60  ;;  %v2670_v57 = vmul.f32 %v2654_v6, %v5221_v4  ;;  %v2284_v17 = vmul.f32 0.5, %v5074_v35  ;;  %v2331_v7 = vsel %vm2315_vm2, 1.0, %v3787_v27 }
 0x9c9   : > { %v2241_v26 = vpop.f32.mrf.mxu2  ;;  %v2540_v42 = vmul.f32 %v3738_v23, %v2539_v14  ;;  %v2860_v18 = vsub.f32 1.0, %v2844_v63  ;;  %vm2318_vm6 = vcmp.ge.f32.partialorder %v5161_v37, 0.0  ;;  %v2763_v41 = vmul.f32 %v2747_v2, %v5190_v44 }
 0x9ca   : > { %v5233_v48 = vadd.f32 %v2241_v26, %v4907_v33  ;;  %v2368_v50 = vmul.f32 0.3275911, %v5230_v61  ;;  %v2686_v24 = vadd.f32 1.4214138, %v2670_v57  ;;  %v2332_v26 = vsel %vm2316_vm15, 1.0, %v3787_v27 }
 0x9cb   : > { %v2272_v40 = vpop.f32.mrf.mxu0  ;;  %v2541_v10 = vadd.f32 %v3738_v23, %v2540_v42  ;;  %v2823_v25 = vmul.f32 1.442695, %v2797_v38  ;;  %v2286_v34 = vmul.f32 0.5, %v5147_v29  ;;  %v2334_v37 = vsel %vm2318_vm6, 1.0, %v3787_v27 }
 0x9cc   : > { %v5243_v20 = vadd.f32 1.0, %v2368_v50  ;;  %v5246_v21 = vmul.f32 0.70710677, %v5233_v48  ;;  %v2702_v22 = vmul.f32 %v2686_v24, %v5221_v4  ;;  %v5258_v55 = vadd.f32 %v2272_v40, %v4897_v36 }
 0x9cd   : > { %v2545_v59 = vsel %vm2544_vm4, %v3738_v23, %v2541_v10  ;;  %v2876_v50 = vmul.f32 %v2860_v18, %v2332_v26  ;;  %vm2317_vm7 = vcmp.ge.f32.partialorder %v5196_v47, 0.0 }
 0x9ce   : > { %3741 = vrcp.f32 %v5243_v20  ;;  %v5255_v46 = vand.u32 2147483647, %v5246_v21  ;;  %v2718_v56 = vadd.f32 -0.28449672, %v2702_v22  ;;  %v5261_v9 = vsel %vm2547_vm5, %v2549_v62, %v2545_v59 }
 0x9cf   : > { %3743 = vpow2.f32 %v2825_v53  ;;  %v2637_v3 = vmul.f32 1.0614054, %v5261_v9  ;;  %v5276_v6 = vmul.f32 0.70710677, %v5258_v55  ;;  %v2591_v51 = vand.u32 2147483647, %v5243_v20 }
 0x9d0   : > { %v2367_v32 = vmul.f32 0.3275911, %v5255_v46  ;;  %3745 = vpow2.f32 %v2819_v19  ;;  %v2734_v13 = vmul.f32 %v2718_v56, %v5221_v4  ;;  %v2593_v11 = vand.u32 2147483648, %v5243_v20 }
 0x9d1   : > { %v2653_v16 = vadd.f32 -1.4531521, %v2637_v3  ;;  %v5289_v8 = vand.u32 2147483647, %v5276_v6  ;;  %v2892_v12 = vadd.f32 1.0, %v2876_v50  ;;  %vm2587_vm9 = vweird.f32 %v5243_v20 }
 0x9d2   : > { %v5273_v23 = vadd.f32 1.0, %v2367_v32  ;;  %v2750_v35 = vadd.f32 0.2548296, %v2734_v13  ;;  %vm2592_vm11 = vcmp.eq.f32.partialorder %v2591_v51, 8.507059e+37  ;;  %v2594_v62 = vor.u32 1.1754944e-38, %v2593_v11 }
 0x9d3   : > { %v2669_v53 = vmul.f32 %v2653_v16, %v5261_v9  ;;  %v2370_v63 = vmul.f32 0.3275911, %v5289_v8  ;;  %v2908_v13 = vmul.f32 %v2892_v12, %v2284_v17 }
 0x9d4   : > { %v3742_v36 = vpop.eup %3741  ;;  %3747 = vrcp.f32 %v5273_v23  ;;  %v2766_v57 = vmul.f32 %v2750_v35, %v5221_v4  ;;  %v2243_v4 = vpop.f32.mrf.mxu2  ;;  %vm2572_vm13 = vweird.f32 %v5273_v23 }
 0x9d5   : > { %v2583_v39 = vmul.f32 %v3742_v36, %v5243_v20  ;;  %v3744_v43 = vpop.eup %3743  ;;  %v2685_v42 = vadd.f32 1.4214138, %v2669_v53  ;;  %vm2588_vm8 = vweird.f32 %v3742_v36  ;;  %3749 = vpow2.f32 %v2823_v25 }
 0x9d6   : > { %v3746_v44 = vpop.eup %3745  ;;  %v2846_v24 = vmul.f32 %v3744_v43, %v2766_v57  ;;  %vm2589_vm10 = vmor %vm2587_vm9, %vm2588_vm8  ;;  %v5295_v56 = vadd.f32 1.0, %v2370_v63  ;;  %v5298_v59 = vadd.f32 %v2243_v4, %v4907_v33  ;;  %v2576_v33 = vand.u32 2147483647, %v5273_v23 }
 0x9d7   : > { %v2584_v14 = vsub.f32 1.0, %v2583_v39  ;;  %v2843_v40 = vmul.f32 %v3746_v44, %v2763_v41  ;;  %v2701_v19 = vmul.f32 %v2685_v42, %v5261_v9  ;;  %v2333_v42 = vsel %vm2317_vm7, 1.0, %v3787_v27 }
 0x9d8   : > { %v2862_v45 = vsub.f32 1.0, %v2846_v24  ;;  %3751 = vrcp.f32 %v5295_v56  ;;  %v5309_v50 = vmul.f32 0.70710677, %v5298_v59  ;;  %vm2577_vm15 = vcmp.eq.f32.partialorder %v2576_v33, 8.507059e+37 }
 0x9d9   : > { %v2585_v29 = vmul.f32 %v3742_v36, %v2584_v14  ;;  %v2717_v18 = vadd.f32 -0.28449672, %v2701_v19  ;;  %v2859_v3 = vsub.f32 1.0, %v2843_v40  ;;  %v2784_v14 = vsub.f32 0.0, %v5230_v61 }
 0x9da   : > { %v3748_v10 = vpop.eup %3747  ;;  %v2878_v38 = vmul.f32 %v2862_v45, %v2334_v37  ;;  %vm2617_vm2 = vweird.f32 %v5295_v56  ;;  %vm2320_vm9 = vcmp.ge.f32.partialorder %v5224_v60, 0.0 }
 0x9db   : > { %v2586_v22 = vadd.f32 %v3742_v36, %v2585_v29  ;;  %v2568_v32 = vmul.f32 %v3748_v10, %v5273_v23  ;;  %v2733_v35 = vmul.f32 %v2717_v18, %v5261_v9  ;;  %v3750_v43 = vpop.eup %3749  ;;  %vm2573_vm12 = vweird.f32 %v3748_v10 }
 0x9dc   : > { %v2894_v20 = vadd.f32 1.0, %v2878_v38  ;;  %v2875_v53 = vmul.f32 %v2859_v3, %v2331_v7  ;;  %vm2574_vm14 = vmor %vm2572_vm13, %vm2573_vm12  ;;  %v5320_v7 = vand.u32 2147483647, %v5309_v50  ;;  %v2800_v40 = vmul.f32 %v2784_v14, %v5230_v61 }
 0x9dd   : > { %v2590_v2 = vsel %vm2589_vm10, %v3742_v36, %v2586_v22  ;;  %v2569_v39 = vsub.f32 1.0, %v2568_v32  ;;  %v2578_v36 = vand.u32 2147483648, %v5273_v23  ;;  %v2749_v41 = vadd.f32 0.2548296, %v2733_v35 }
 0x9de   : > { %v5301_v26 = vsel %vm2592_vm11, %v2594_v62, %v2590_v2  ;;  %v2910_v17 = vmul.f32 %v2894_v20, %v2286_v34  ;;  %v3752_v24 = vpop.eup %3751  ;;  %v2891_v12 = vadd.f32 1.0, %v2875_v53  ;;  %v2369_v47 = vmul.f32 0.3275911, %v5320_v7 }
 0x9df   : > { %v2640_v16 = vmul.f32 1.0614054, %v5301_v26  ;;  %v2570_v57 = vmul.f32 %v3748_v10, %v2569_v39  ;;  %v2765_v37 = vmul.f32 %v2749_v41, %v5261_v9  ;;  %v2579_v34 = vor.u32 1.1754944e-38, %v2578_v36 }
 0x9e0   : > { %v2920_v44 = vpack.c.bf16 %v2910_v17, %v2908_v13  ;;  %v2613_v9 = vmul.f32 %v3752_v24, %v5295_v56  ;;  %vm2618_vm1 = vweird.f32 %v3752_v24  ;;  %v2621_v38 = vand.u32 2147483647, %v5295_v56 }
 0x9e1   : > { %v2656_v25 = vadd.f32 -1.4531521, %v2640_v16  ;;  %v2571_v11 = vadd.f32 %v3748_v10, %v2570_v57  ;;  %v2845_v29 = vmul.f32 %v3750_v43, %v2765_v37  ;;  %v2385_v18 = vadd.f32 1.0, %v2369_v47  ;;  %vm2619_vm3 = vmor %vm2617_vm2, %vm2618_vm1 }
 0x9e2   : > { %3102 = vmatmul.bf16.gmra.mxu3 %v2920_v44  ;;  %v2614_v62 = vsub.f32 1.0, %v2613_v9  ;;  %v2283_v3 = vmul.f32 0.5, %v5107_v5  ;;  %v2285_v20 = vmul.f32 0.5, %v5183_v49  ;;  %v2829_v36 = vmul.f32 1.442695, %v2800_v40 }
 0x9e3   : > { %v2672_v51 = vmul.f32 %v2656_v25, %v5301_v26  ;;  %v2575_v4 = vsel %vm2574_vm14, %v3748_v10, %v2571_v11  ;;  %v2861_v45 = vsub.f32 1.0, %v2845_v29  ;;  %v2623_v10 = vand.u32 2147483648, %v5295_v56 }
 0x9e4   : > { %v5324_v63 = vsel %vm2577_vm15, %v2579_v34, %v2575_v4  ;;  %v2615_v61 = vmul.f32 %v3752_v24, %v2614_v62  ;;  %3753 = vrcp.f32 %v2385_v18  ;;  %v2907_v43 = vmul.f32 %v2891_v12, %v2283_v3 }
 0x9e5   : > { %v2688_v23 = vadd.f32 1.4214138, %v2672_v51  ;;  %v2639_v22 = vmul.f32 1.0614054, %v5324_v63  ;;  %v2877_v2 = vmul.f32 %v2861_v45, %v2333_v42  ;;  %v2624_v17 = vor.u32 1.1754944e-38, %v2623_v10 }
 0x9e6   : > { %v2616_v39 = vadd.f32 %v3752_v24, %v2615_v61  ;;  %vm2622_vm4 = vcmp.eq.f32.partialorder %v2621_v38, 8.507059e+37  ;;  %v2786_v49 = vsub.f32 0.0, %v5289_v8  ;;  %3755 = vpow2.f32 %v2829_v36 }
 0x9e7   : > { %v2704_v19 = vmul.f32 %v2688_v23, %v5301_v26  ;;  %v2655_v13 = vadd.f32 -1.4531521, %v2639_v22  ;;  %v2893_v35 = vadd.f32 1.0, %v2877_v2  ;;  %v2783_v42 = vsub.f32 0.0, %v5255_v46 }
 0x9e8   : > { %v2620_v57 = vsel %vm2619_vm3, %v3752_v24, %v2616_v39  ;;  %v2802_v34 = vmul.f32 %v2786_v49, %v5289_v8  ;;  %v2606_v4 = vand.u32 2147483647, %v2385_v18  ;;  %v2608_v9 = vand.u32 2147483648, %v2385_v18 }
 0x9e9   : > { %v2720_v32 = vadd.f32 -0.28449672, %v2704_v19  ;;  %v2671_v16 = vmul.f32 %v2655_v13, %v5324_v63  ;;  %v2909_v41 = vmul.f32 %v2893_v35, %v2285_v20  ;;  %v2625_v5 = vsel %vm2622_vm4, %v2624_v17, %v2620_v57 }
 0x9ea   : > { %v2642_v53 = vmul.f32 1.0614054, %v2625_v5  ;;  %v3754_v37 = vpop.eup %3753  ;;  %v2799_v45 = vmul.f32 %v2783_v42, %v5255_v46  ;;  %v2833_v19 = vmul.f32 1.442695, %v2802_v34  ;;  %vm2602_vm6 = vweird.f32 %v2385_v18 }
 0x9eb   : > { %v2736_v33 = vmul.f32 %v2720_v32, %v5301_v26  ;;  %v2687_v25 = vadd.f32 1.4214138, %v2671_v16  ;;  %v2919_v14 = vpack.c.bf16 %v2909_v41, %v2907_v43  ;;  %v2598_v44 = vmul.f32 %v3754_v37, %v2385_v18 }
 0x9ec   : > { %v2658_v11 = vadd.f32 -1.4531521, %v2642_v53  ;;  %vm2603_vm5 = vweird.f32 %v3754_v37  ;;  %v3756_v22 = vpop.eup %3755  ;;  %v2609_v8 = vor.u32 1.1754944e-38, %v2608_v9  ;;  %vm2607_vm8 = vcmp.eq.f32.partialorder %v2606_v4, 8.507059e+37 }
 0x9ed   : > { %v2752_v51 = vadd.f32 0.2548296, %v2736_v33  ;;  %v2703_v56 = vmul.f32 %v2687_v25, %v5324_v63  ;;  %3073 = vmatmul.bf16.gmra.mxu1 %v2919_v14  ;;  %v2599_v24 = vsub.f32 1.0, %v2598_v44  ;;  %vm2604_vm7 = vmor %vm2602_vm6, %vm2603_vm5  ;;  %v2827_v13 = vmul.f32 1.442695, %v2799_v45 }
 0x9ee   : > { %v2674_v29 = vmul.f32 %v2658_v11, %v2625_v5  ;;  %3757 = vpow2.f32 %v2833_v19  ;;  %v2785_v3 = vsub.f32 0.0, %v5320_v7  ;;  %v2336_v41 = vsel %vm2320_vm9, 1.0, %v3787_v27  ;;  %v5363_v45 = vld [vmem:[%s5433_s14] ss:$0 sm:$0xff] }
 0x9ef   : > { %v2768_v23 = vmul.f32 %v2752_v51, %v5301_v26  ;;  %v2719_v12 = vadd.f32 -0.28449672, %v2703_v56  ;;  %v2600_v47 = vmul.f32 %v3754_v37, %v2599_v24  ;;  %3759 = vpow2.f32 %v2827_v13 }
 0x9f0   : > { %v2690_v40 = vadd.f32 1.4214138, %v2674_v29  ;;  %v2801_v43 = vmul.f32 %v2785_v3, %v5320_v7  ;;  %vm2322_vm10 = vcmp.ge.f32.partialorder %v5276_v6, 0.0  ;;  %v2288_v42 = vmul.f32 0.5, %v5218_v28 }
 0x9f1   : > { %v2601_v38 = vadd.f32 %v3754_v37, %v2600_v47  ;;  %v2848_v10 = vmul.f32 %v3756_v22, %v2768_v23  ;;  %v2735_v2 = vmul.f32 %v2719_v12, %v5324_v63  ;;  %v2338_v56 = vsel %vm2322_vm10, 1.0, %v3787_v27 }
 0x9f2   : > { %v2706_v62 = vmul.f32 %v2690_v40, %v2625_v5  ;;  %v2831_v60 = vmul.f32 1.442695, %v2801_v43  ;;  %v2290_v6 = vmul.f32 0.5, %v5258_v55  ;;  %vm2319_vm11 = vcmp.ge.f32.partialorder %v5246_v21, 0.0 }
 0x9f3   : > { %v2605_v26 = vsel %vm2604_vm7, %v3754_v37, %v2601_v38  ;;  %v2864_v35 = vsub.f32 1.0, %v2848_v10  ;;  %v2751_v16 = vadd.f32 0.2548296, %v2735_v2  ;;  %v2335_v22 = vsel %vm2319_vm11, 1.0, %v3787_v27 }
 0x9f4   : > { %v2722_v32 = vadd.f32 -0.28449672, %v2706_v62  ;;  %v2610_v61 = vsel %vm2607_vm8, %v2609_v8, %v2605_v26  ;;  %v3758_v17 = vpop.eup %3757  ;;  %3761 = vpow2.f32 %v2831_v60  ;;  %vm2321_vm12 = vcmp.ge.f32.partialorder %v5309_v50, 0.0 }
 0x9f5   : > { %v2641_v46 = vmul.f32 1.0614054, %v2610_v61  ;;  %v2880_v25 = vmul.f32 %v2864_v35, %v2336_v41  ;;  %v2767_v57 = vmul.f32 %v2751_v16, %v5324_v63  ;;  %v3760_v51 = vpop.eup %3759  ;;  %v5356_v63 = vld [vmem:[%s5432_s13] ss:$0 sm:$0xff]  ;;  %v2337_v2 = vsel %vm2321_vm12, 1.0, %v3787_v27 }
 0x9f6   : > { %v2738_v20 = vmul.f32 %v2722_v32, %v2625_v5  ;;  %v2289_v3 = vmul.f32 0.5, %v5298_v59 }
 0x9f7   : > { %v2657_v39 = vadd.f32 -1.4531521, %v2641_v46  ;;  %v2896_v11 = vadd.f32 1.0, %v2880_v25  ;;  %v2847_v7 = vmul.f32 %v3760_v51, %v2767_v57 }
 0x9f8   : > { %v2754_v18 = vadd.f32 0.2548296, %v2738_v20 }
 0x9f9   : > { %v2673_v36 = vmul.f32 %v2657_v39, %v2610_v61  ;;  %v2912_v24 = vmul.f32 %v2896_v11, %v2288_v42  ;;  %v2863_v23 = vsub.f32 1.0, %v2847_v7 }
 0x9fa   : > { %v2770_v33 = vmul.f32 %v2754_v18, %v2625_v5  ;;  %v3762_v19 = vpop.eup %3761 }
 0x9fb   : > { %v2689_v53 = vadd.f32 1.4214138, %v2673_v36  ;;  %v2879_v21 = vmul.f32 %v2863_v23, %v2335_v22 }
 0x9fc   : > { %v2850_v49 = vmul.f32 %v3758_v17, %v2770_v33 }
 0x9fd   : > { %v2705_v37 = vmul.f32 %v2689_v53, %v2610_v61  ;;  %v2895_v32 = vadd.f32 1.0, %v2879_v21 }
 0x9fe   : > { %v2866_v14 = vsub.f32 1.0, %v2850_v49 }
 0x9ff   : > { %v2721_v44 = vadd.f32 -0.28449672, %v2705_v37 }
 0xa00   : > { %v2882_v5 = vmul.f32 %v2866_v14, %v2338_v56 }
 0xa01   : > { %v2737_v29 = vmul.f32 %v2721_v44, %v2610_v61 }
 0xa02   : > { %v2898_v34 = vadd.f32 1.0, %v2882_v5 }
 0xa03   : > { %v2753_v9 = vadd.f32 0.2548296, %v2737_v29 }
 0xa04   : > { %v2914_v4 = vmul.f32 %v2898_v34, %v2290_v6 }
 0xa05   : > { %v2769_v40 = vmul.f32 %v2753_v9, %v2610_v61  ;;  %v2287_v61 = vmul.f32 0.5, %v5233_v48 }
 0xa06   : > { %v2922_v47 = vpack.c.bf16 %v2914_v4, %v2912_v24 }
 0xa07   : > { %v2849_v62 = vmul.f32 %v3762_v19, %v2769_v40  ;;  %v2911_v16 = vmul.f32 %v2895_v32, %v2287_v61 }
 0xa08   : > { %3107 = vmatmul.bf16.gmra.mxu3 %v2922_v47 }
 0xa09   : > { %v2865_v10 = vsub.f32 1.0, %v2849_v62 }
 0xa0b   : > { %v2881_v26 = vmul.f32 %v2865_v10, %v2337_v2 }
 0xa0d   : > { %v3064_v12 = vpop.f32.mrf.mxu1  ;;  %v2897_v20 = vadd.f32 1.0, %v2881_v26 }
 0xa0e   : > { %v3065_v28 = vadd.f32 %v5356_v63, %v3064_v12  ;;  %v3093_v55 = vpop.f32.mrf.mxu3 }
 0xa0f   : > { %v2913_v18 = vmul.f32 %v2897_v20, %v2289_v3 }
 0xa10   : > { %v3094_v38 = vadd.f32 %v3093_v55, %v3065_v28 }
 0xa11   : > { %v2921_v39 = vpack.c.bf16 %v2913_v18, %v2911_v16 }
 0xa12   : > { %v3117_v8 = vmul.f32 %v5363_v45, %v3094_v38 }
 0xa13   : > { %3078 = vmatmul.bf16.gmra.mxu1 %v2921_v39 }
 0xa14   : > { %v3125_v50 = vadd.f32 %v3117_v8, %v4703_v54 }
 0xa15   : > { %v3066_v13 = vpop.f32.mrf.mxu1 }
 0xa16   : > { %3133 = vst.msk [vmem:[%s5373_s30] sm:$0xff] %vm509_vm0, %v3125_v50  ;;  %v3067_v46 = vadd.f32 %v5356_v63, %v3066_v13  ;;  %v3095_v35 = vpop.f32.mrf.mxu3 }
 0xa18   : > { %v3096_v27 = vadd.f32 %v3095_v35, %v3067_v46 }
 0xa1a   : > { %v3118_v43 = vmul.f32 %v5363_v45, %v3096_v27 }
 0xa1c   : > { %v3126_v54 = vadd.f32 %v3118_v43, %v4708_v52 }
 0xa1e   : > { %3134 = vst.msk [vmem:[%s5373_s30 + $0x8] sm:$0xff] %vm509_vm0, %v3126_v54 }
 0xa40   : > { %v3098_v59 = vpop.f32.mrf.mxu3 }
 0xa41   : > { %v3069_v48 = vpop.f32.mrf.mxu1 }
 0xa42   : > { %v3070_v33 = vadd.f32 %v5356_v63, %v3069_v48 }
 0xa44   : > { %v3099_v36 = vadd.f32 %v3098_v59, %v3070_v33 }
 0xa46   : > { %v3119_v17 = vmul.f32 %v5363_v45, %v3099_v36 }
 0xa48   : > { %v3127_v41 = vadd.f32 %v3119_v17, %v4713_v31  ;;  %v3100_v49 = vpop.f32.mrf.mxu3 }
 0xa49   : > { %v3071_v25 = vpop.f32.mrf.mxu1 }
 0xa4a   : > { %3135 = vst.msk [vmem:[%s5373_s30 + $0x10] sm:$0xff] %vm509_vm0, %v3127_v41  ;;  %v3072_v57 = vadd.f32 %v5356_v63, %v3071_v25 }
 0xa4c   : > { %v3101_v53 = vadd.f32 %v3100_v49, %v3072_v57 }
 0xa4e   : > { %v3120_v52 = vmul.f32 %v5363_v45, %v3101_v53 }
 0xa50   : > { %v3128_v60 = vadd.f32 %v3120_v52, %v4718_v0 }
 0xa52   : > { %3136 = vst.msk [vmem:[%s5373_s30 + $0x18] sm:$0xff] %vm509_vm0, %v3128_v60 }
 0xa65   : > { %v3103_v37 = vpop.f32.mrf.mxu3 }
 0xa6a   : > { %v3074_v14 = vpop.f32.mrf.mxu1 }
 0xa6b   : > { %v3075_v51 = vadd.f32 %v5356_v63, %v3074_v14 }
 0xa6d   : > { %v3104_v31 = vadd.f32 %v3103_v37, %v3075_v51  ;;  %v3105_v44 = vpop.f32.mrf.mxu3 }
 0xa6f   : > { %v3121_v56 = vmul.f32 %v5363_v45, %v3104_v31 }
 0xa71   : > { %v3129_v11 = vadd.f32 %v3121_v56, %v4723_v30 }
 0xa72   : > { %v3076_v7 = vpop.f32.mrf.mxu1 }
 0xa73   : > { %3137 = vst.msk [vmem:[%s5373_s30 + $0x20] sm:$0xff] %vm509_vm0, %v3129_v11  ;;  %v3077_v5 = vadd.f32 %v5356_v63, %v3076_v7 }
 0xa75   : > { %v3106_v42 = vadd.f32 %v3105_v44, %v3077_v5 }
 0xa77   : > { %v3122_v0 = vmul.f32 %v5363_v45, %v3106_v42 }
 0xa79   : > { %v3130_v6 = vadd.f32 %v3122_v0, %v4728_v15 }
 0xa7b   : > { %3138 = vst.msk [vmem:[%s5373_s30 + $0x28] sm:$0xff] %vm509_vm0, %v3130_v6 }
 0xa8b   : > { %v3108_v29 = vpop.f32.mrf.mxu3 }
 0xa90   : > { %v3079_v34 = vpop.f32.mrf.mxu1 }
 0xa91   : > { %v3080_v24 = vadd.f32 %v5356_v63, %v3079_v34 }
 0xa93   : > { %v3109_v30 = vadd.f32 %v3108_v29, %v3080_v24  ;;  %v3110_v40 = vpop.f32.mrf.mxu3 }
 0xa95   : > { %v3123_v23 = vmul.f32 %v5363_v45, %v3109_v30 }
 0xa97   : > { %v3131_v4 = vadd.f32 %v3123_v23, %v4733_v58 }
 0xa98   : > { %v3081_v9 = vpop.f32.mrf.mxu1 }
 0xa99   : > { %3139 = vst.msk [vmem:[%s5373_s30 + $0x30] sm:$0xff] %vm509_vm0, %v3131_v4  ;;  %v3082_v12 = vadd.f32 %v5356_v63, %v3081_v9 }
 0xa9b   : > { %v3111_v47 = vadd.f32 %v3110_v40, %v3082_v12 }
 0xa9d   : > { %v3124_v15 = vmul.f32 %v5363_v45, %v3111_v47 }
 0xa9f   : > { %v3132_v28 = vadd.f32 %v3124_v15, %v4746_v1 }
 0xaa1   : > { %3140 = vst.msk [vmem:[%s5373_s30 + $0x38] sm:$0xff] %vm509_vm0, %v3132_v28 }
 0xaa2 PF: > { %s25_s18 = sadd.s32 1, %s3777_s18  }
 0xaa3   : > { %p22_p4 = scmp.ge.s32.totalorder %s25_s18, 4  }
 0xaa5   :  { %24 = sbr.rel (!%p22_p4) target bundleno = 1 (0x1), region = 110 }

</bundles_post_ra>
